<compile_context>
chip_gen: v6e
topology: v6e:2x2x1
jax: 0.10.0
libtpu: 0.0.40
codegen_flags: <defaults>
</compile_context>

<pallas_src>
import numpy as np
import jax
import jax.numpy as jnp
from jax.experimental import pallas as pl
from jax.experimental.pallas import tpu as pltpu


# ---------------------------------------------------------------------------
# Banded conv-weight packing (host side, init time)
# ---------------------------------------------------------------------------
def _banded_conv_weight(w, width, col_stride, n_in_cols):
    """Pack a 3x3 conv weight (3, 3, Cin, Cout) into 3 banded matrices (one per
    kernel row dy) of shape (n_in_cols, width*Cout) so that a stride-1 / pad-1
    3x3 conv over row-packed activations (rows, n_in_cols) becomes
        out = sum_dy  rows_shifted_by_dy @ band[dy].
    Input column x*col_stride + ci holds channel ci of spatial position x; the
    W-axis zero padding is encoded by omitting the out-of-range bands."""
    w = np.asarray(jax.device_get(w), dtype=np.float32)
    _, _, cin, cout = w.shape
    band = np.zeros((3, n_in_cols, width * cout), np.float32)
    for dy in range(3):
        for dx in range(3):
            for x in range(width):
                xin = x + dx - 1
                if 0 <= xin < width:
                    band[dy,
                         xin * col_stride: xin * col_stride + cin,
                         x * cout: (x + 1) * cout] = w[dy, dx]
    return jnp.asarray(band)


# ---------------------------------------------------------------------------
# Fused per-layer kernel:
#   neighbour mixing + (conv3x3 -> ReLU -> maxpool2 -> conv3x3) x 2 branches
#   + add + LayerNorm((C, Hh, Wh)) + ReLU             -- one graph per grid step
# ---------------------------------------------------------------------------
def make_layer_kernel(*, n, H, W, Cin, C):
    Hh, Wh = H // 2, W // 2
    Wf_in = W * Cin          # packed input row width
    Wf_out = W * C           # packed conv1 output row width
    Wf_pool = (W - 1) * C    # un-compacted pooled row width (compaction in weights)
    Wf_fin = Wh * C          # packed layer-output row width

    def conv_block(xp_scr, pp_scr, w1_ref, b1_ref, w2_ref, b2_ref):
        # ---- conv1 (3x3, pad 1) + bias + ReLU: 3 banded matmuls on the MXU ----
        acc = jnp.zeros((n * H, Wf_out), jnp.float32)
        for dy in range(3):
            slab = xp_scr[:, dy:dy + H, :].reshape(n * H, Wf_in)
            acc = acc + jnp.dot(slab, w1_ref[dy],
                                preferred_element_type=jnp.float32)
        acc = jnp.maximum(acc + b1_ref[...], 0.0)

        # ---- 2x2 max pool, all in registers ----
        # H direction: pairwise row max (row order is node-major so pairs never
        # cross node boundaries).
        v = acc.reshape(n * Hh, 2, Wf_out)
        rowmax = jnp.maximum(v[:, 0, :], v[:, 1, :])           # (n*Hh, W*C)
        # W direction: compare C-shifted lane groups; keep UNCOMPACTED -- the
        # even-group selection + W zero-pad are folded into the conv2 band.
        cmp = jnp.maximum(rowmax[:, :Wf_out - C], rowmax[:, C:])   # (n*Hh, (W-1)*C)
        pp_scr[:, 1:Hh + 1, :] = cmp.reshape(n, Hh, Wf_pool)

        # ---- conv2 (3x3, pad 1) + bias ----
        acc2 = jnp.zeros((n * Hh, Wf_fin), jnp.float32)
        for dy in range(3):
            slab = pp_scr[:, dy:dy + Hh, :].reshape(n * Hh, Wf_pool)
            acc2 = acc2 + jnp.dot(slab, w2_ref[dy],
                                  preferred_element_type=jnp.float32)
        return acc2 + b2_ref[...]                               # (n*Hh, Wh*C)

    def kernel(adj_ref,                                         # SMEM (b, n*n)
               x_ref,                                           # (1, n, H, W*Cin)
               w1a_ref, b1a_ref, w2a_ref, b2a_ref,              # LH1 banded weights
               w1b_ref, b1b_ref, w2b_ref, b2b_ref,              # LH3 banded weights
               g_ref, beta_ref,                                 # LayerNorm affine
               o_ref,                                           # (1, n, Hh, Wh*C)
               xp_scr, pp_scr):                                 # VMEM scratch
        g = pl.program_id(0)

        # Zero only the two H-border rows of each scratch (interiors are always
        # fully overwritten; scratches are per-core so this is megacore-safe).
        zx = jnp.zeros((n, 1, Wf_in), jnp.float32)
        xp_scr[:, 0:1, :] = zx
        xp_scr[:, H + 1:H + 2, :] = zx
        zp = jnp.zeros((n, 1, Wf_pool), jnp.float32)
        pp_scr[:, 0:1, :] = zp
        pp_scr[:, Hh + 1:Hh + 2, :] = zp

        # ---- LH3 branch: neigh[i] = sum_m adj[g,i,m] * x[m] (adj scalars in SMEM)
        for i in range(n):
            acc = adj_ref[g, i * n] * x_ref[0, 0]
            for m in range(1, n):
                acc = acc + adj_ref[g, i * n + m] * x_ref[0, m]
            xp_scr[i, 1:H + 1, :] = acc
        lh3 = conv_block(xp_scr, pp_scr, w1b_ref, b1b_ref, w2b_ref, b2b_ref)

        # ---- LH1 branch on the node's own image ----
        xp_scr[:, 1:H + 1, :] = x_ref[0]
        lh1 = conv_block(xp_scr, pp_scr, w1a_ref, b1a_ref, w2a_ref, b2a_ref)

        # ---- add + LayerNorm((C, Hh, Wh)) per node + ReLU, packed (Hh, Wh*C) ----
        y = lh1 + lh3                                           # (n*Hh, Wh*C)
        for i in range(n):
            yi = y[i * Hh:(i + 1) * Hh, :]
            mu = jnp.mean(yi, keepdims=True)
            var = jnp.mean((yi - mu) ** 2, keepdims=True)
            yi = (yi - mu) * jax.lax.rsqrt(var + 1e-5)
            o_ref[0, i] = jnp.maximum(yi * g_ref[...] + beta_ref[...], 0.0)

    return kernel


def layer_forward(xc, adj_flat, lp, *, n, H, W, Cin, C):
    # xc: (b, n, H, W*Cin) packed activations; adj_flat: (b, n*n)
    b = adj_flat.shape[0]
    Hh, Wh = H // 2, W // 2
    Wf_in, Wf_out = W * Cin, W * C
    Wf_pool, Wf_fin = (W - 1) * C, Wh * C

    kernel = make_layer_kernel(n=n, H=H, W=W, Cin=Cin, C=C)

    img4 = lambda i, *_: (i, 0, 0, 0)
    const3 = lambda i, *_: (0, 0, 0)
    const2 = lambda i, *_: (0, 0)

    grid_spec = pltpu.PrefetchScalarGridSpec(
        num_scalar_prefetch=1,                 # adj -> SMEM
        grid=(b,),
        in_specs=[
            pl.BlockSpec((1, n, H, Wf_in), img4),            # x (packed)
            pl.BlockSpec((3, Wf_in, Wf_out), const3),        # LH1 conv1 band
            pl.BlockSpec((1, Wf_out), const2),               # LH1 bias1 (tiled)
            pl.BlockSpec((3, Wf_pool, Wf_fin), const3),      # LH1 conv2 band
            pl.BlockSpec((1, Wf_fin), const2),               # LH1 bias2 (tiled)
            pl.BlockSpec((3, Wf_in, Wf_out), const3),        # LH3 conv1 band
            pl.BlockSpec((1, Wf_out), const2),
            pl.BlockSpec((3, Wf_pool, Wf_fin), const3),
            pl.BlockSpec((1, Wf_fin), const2),
            pl.BlockSpec((Hh, Wf_fin), const2),              # gamma (packed)
            pl.BlockSpec((Hh, Wf_fin), const2),              # beta  (packed)
        ],
        out_specs=pl.BlockSpec((1, n, Hh, Wf_fin), img4),
        scratch_shapes=[
            pltpu.VMEM((n, H + 2, Wf_in), jnp.float32),      # H-padded conv1 input
            pltpu.VMEM((n, Hh + 2, Wf_pool), jnp.float32),   # H-padded pooled map
        ],
    )
    return pl.pallas_call(
        kernel,
        out_shape=jax.ShapeDtypeStruct((b, n, Hh, Wf_fin), jnp.float32),
        grid_spec=grid_spec,
        compiler_params=pltpu.CompilerParams(
            dimension_semantics=("parallel",)),
    )(adj_flat, xc,
      lp["lh1_w1"], lp["lh1_b1"], lp["lh1_w2"], lp["lh1_b2"],
      lp["lh3_w1"], lp["lh3_b1"], lp["lh3_w2"], lp["lh3_b2"],
      lp["gamma"], lp["beta"])


# ---------------------------------------------------------------------------
# Final MLP: Linear -> ReLU -> Linear (single tiny kernel)
# ---------------------------------------------------------------------------
def _mlp_kernel(x_ref, w1_ref, b1_ref, w2_ref, b2_ref, o_ref):
    h = jnp.dot(x_ref[...], w1_ref[...], preferred_element_type=jnp.float32) + b1_ref[...]
    h = jnp.maximum(h, 0.0)
    o_ref[...] = jnp.dot(h, w2_ref[...], preferred_element_type=jnp.float32) + b2_ref[...]


def mlp(x, w1, b1, w2, b2):
    B, F = x.shape
    Hd, O = w1.shape[1], w2.shape[1]
    return pl.pallas_call(
        _mlp_kernel,
        out_shape=jax.ShapeDtypeStruct((B, O), jnp.float32),
        grid=(1,),
        in_specs=[pl.BlockSpec((B, F), lambda i: (0, 0)),
                  pl.BlockSpec((F, Hd), lambda i: (0, 0)),
                  pl.BlockSpec((1, Hd), lambda i: (0, 0)),
                  pl.BlockSpec((Hd, O), lambda i: (0, 0)),
                  pl.BlockSpec((1, O), lambda i: (0, 0))],
        out_specs=pl.BlockSpec((B, O), lambda i: (0, 0)),
    )(x, w1, b1, w2, b2)


# ---------------------------------------------------------------------------
# Parameter init (deterministic, synthetic) + full forward
# ---------------------------------------------------------------------------
def init_params(key, in_ch, hid, out_ch, num_layers, h, w):
    keys = iter(jax.random.split(key, 10 * num_layers + 8))

    def conv_raw(cin, cout):
        scale = 1.0 / ((cin * 9) ** 0.5)
        wgt = jax.random.normal(next(keys), (3, 3, cin, cout), jnp.float32) * scale
        bias = jax.random.normal(next(keys), (cout,), jnp.float32) * 0.05
        return wgt, bias

    layers = []
    cin = in_ch
    hh, ww = h, w
    for _ in range(num_layers):
        H, W = hh, ww
        Hh, Wh = H // 2, W // 2

        def branch(cin_):
            w1, b1 = conv_raw(cin_, hid)
            w2, b2 = conv_raw(hid, hid)
            return dict(
                # conv1 operates on packed (rows, W*cin_) activations.
                w1=_banded_conv_weight(w1, W, cin_, W * cin_),
                b1=jnp.tile(b1, W)[None, :],                        # (1, W*hid)
                # conv2 operates on the un-compacted pooled map: pooled position
                # x' lives at column 2*x'*hid (odd groups carry garbage and get
                # zero weights), hence col_stride=2*hid, n_in_cols=(W-1)*hid.
                w2=_banded_conv_weight(w2, Wh, 2 * hid, (W - 1) * hid),
                b2=jnp.tile(b2, Wh)[None, :],                       # (1, Wh*hid)
            )

        lh1 = branch(cin)
        lh3 = branch(cin)
        # LayerNorm((hid, Hh, Wh)) affine, stored channel-last row-packed (Hh, Wh*hid).
        gamma = 1.0 + 0.1 * jax.random.normal(next(keys), (Hh, Wh * hid), jnp.float32)
        beta = 0.1 * jax.random.normal(next(keys), (Hh, Wh * hid), jnp.float32)
        layers.append(dict(
            lh1_w1=lh1["w1"], lh1_b1=lh1["b1"], lh1_w2=lh1["w2"], lh1_b2=lh1["b2"],
            lh3_w1=lh3["w1"], lh3_b1=lh3["b1"], lh3_w2=lh3["w2"], lh3_b2=lh3["b2"],
            gamma=gamma, beta=beta))
        cin = hid
        hh, ww = Hh, Wh

    # Final MLP; lin_w1 rows are in channel-last (h, w, c) flatten order so the
    # packed activations flatten directly (no runtime transpose).
    F = hid * hh * ww
    lin_w1 = jax.random.normal(next(keys), (F, hid), jnp.float32) / (F ** 0.5)
    lin_b1 = (0.05 * jax.random.normal(next(keys), (hid,), jnp.float32))[None, :]
    lin_w2 = jax.random.normal(next(keys), (hid, out_ch), jnp.float32) / (hid ** 0.5)
    lin_b2 = (0.05 * jax.random.normal(next(keys), (out_ch,), jnp.float32))[None, :]
    return dict(layers=layers, lin_w1=lin_w1, lin_b1=lin_b1,
                lin_w2=lin_w2, lin_b2=lin_b2)


def dsimageg_forward(x, adj, params, hid, out_ch):
    # x: (b, n, d, h, w) float32 (PyTorch NCHW per node); adj: (b, n, n) dense
    b, n, d, h, w = x.shape
    # NCHW -> channel-last row-packed (b, n, h, w*d); stays packed between layers.
    xc = jnp.transpose(x, (0, 1, 3, 4, 2)).reshape(b, n, h, w * d)
    adj_flat = adj.astype(jnp.float32).reshape(b, n * n)

    cin = d
    for lp in params["layers"]:
        xc = layer_forward(xc, adj_flat, lp, n=n, H=h, W=w, Cin=cin, C=hid)
        h, w, cin = h // 2, w // 2, hid

    # Packed (b, n, h, w*hid) flattens directly in (h, w, c) order; lin_w1 rows
    # were generated in that order (free, contiguous reshape -- no transpose).
    xflat = xc.reshape(b * n, hid * h * w)
    out = mlp(xflat, params["lin_w1"], params["lin_b1"],
              params["lin_w2"], params["lin_b2"])
    return out.reshape(b, n, out_ch)  # node_level=True -> no graph aggregation


if __name__ == "__main__":
    b, n = 2, 4
    in_ch, hid, out_ch = 3, 8, 5
    num_layers = 2
    h = w = 32

    key = jax.random.PRNGKey(0)
    kx, kadj, kp = jax.random.split(key, 3)
    x = jax.random.normal(kx, (b, n, in_ch, h, w), jnp.float32)
    adj = (jax.random.uniform(kadj, (b, n, n)) > 0.5).astype(jnp.float32)
    params = init_params(kp, in_ch, hid, out_ch, num_layers, h, w)

    out = dsimageg_forward(x, adj, params, hid, out_ch)
    out = jax.block_until_ready(out)
    assert out.shape == (b, n, out_ch)
    assert bool(jnp.all(jnp.isfinite(out)))
    print("KERNEL_OK")
</pallas_src>

<mosaic_0001>
module attributes {stable_mosaic.version = 11 : i64} {
  func.func @kernel(%arg0: i32, %arg1: memref<2x16xf32, #tpu.memory_space<smem>>, %arg2: memref<1x4x32x96xf32, #tpu.memory_space<vmem>>, %arg3: memref<3x96x256xf32, #tpu.memory_space<vmem>>, %arg4: memref<1x256xf32, #tpu.memory_space<vmem>>, %arg5: memref<3x248x128xf32, #tpu.memory_space<vmem>>, %arg6: memref<1x128xf32, #tpu.memory_space<vmem>>, %arg7: memref<3x96x256xf32, #tpu.memory_space<vmem>>, %arg8: memref<1x256xf32, #tpu.memory_space<vmem>>, %arg9: memref<3x248x128xf32, #tpu.memory_space<vmem>>, %arg10: memref<1x128xf32, #tpu.memory_space<vmem>>, %arg11: memref<16x128xf32, #tpu.memory_space<vmem>>, %arg12: memref<16x128xf32, #tpu.memory_space<vmem>>, %arg13: memref<1x4x16x128xf32, #tpu.memory_space<vmem>>, %arg14: memref<4x34x96xf32, #tpu.memory_space<vmem>>, %arg15: memref<4x18x248xf32, #tpu.memory_space<vmem>>) attributes {dimension_semantics = [#tpu.dimension_semantics<parallel>], iteration_bounds = array<i64: 2>, scalar_prefetch = 1 : i64, scratch_operands = 2 : i64, tpu.core_type = #tpu.core_type<tc>, window_params = [{transform_indices = @transform_0, window_bounds = array<i64: 1, 4, 32, 96>}, {pipeline_mode = #tpu.pipeline_mode<synchronous>, transform_indices = @transform_1, window_bounds = array<i64: 3, 96, 256>}, {pipeline_mode = #tpu.pipeline_mode<synchronous>, transform_indices = @transform_2, window_bounds = array<i64: 1, 256>}, {pipeline_mode = #tpu.pipeline_mode<synchronous>, transform_indices = @transform_3, window_bounds = array<i64: 3, 248, 128>}, {pipeline_mode = #tpu.pipeline_mode<synchronous>, transform_indices = @transform_4, window_bounds = array<i64: 1, 128>}, {pipeline_mode = #tpu.pipeline_mode<synchronous>, transform_indices = @transform_5, window_bounds = array<i64: 3, 96, 256>}, {pipeline_mode = #tpu.pipeline_mode<synchronous>, transform_indices = @transform_6, window_bounds = array<i64: 1, 256>}, {pipeline_mode = #tpu.pipeline_mode<synchronous>, transform_indices = @transform_7, window_bounds = array<i64: 3, 248, 128>}, {pipeline_mode = #tpu.pipeline_mode<synchronous>, transform_indices = @transform_8, window_bounds = array<i64: 1, 128>}, {pipeline_mode = #tpu.pipeline_mode<synchronous>, transform_indices = @transform_9, window_bounds = array<i64: 16, 128>}, {pipeline_mode = #tpu.pipeline_mode<synchronous>, transform_indices = @transform_10, window_bounds = array<i64: 16, 128>}, {transform_indices = @transform_11, window_bounds = array<i64: 1, 4, 16, 128>}]} {
    %cst = arith.constant 0.000000e+00 : f32
    %0 = vector.broadcast %cst : f32 to vector<4x1x96xf32>
    %c0 = arith.constant 0 : index
    %c0_0 = arith.constant 0 : index
    %c0_1 = arith.constant 0 : index
    %1 = vector.load %arg14[%c0, %c0_0, %c0_1] : memref<4x34x96xf32, #tpu.memory_space<vmem>>, vector<4x1x96xf32>
    tpu.vector_store %arg14[%c0, %c0_0, %c0_1], %0 {strides = array<i32>} : memref<4x34x96xf32, #tpu.memory_space<vmem>>, vector<4x1x96xf32>,
    %c0_2 = arith.constant 0 : index
    %c33 = arith.constant 33 : index
    %c0_3 = arith.constant 0 : index
    %2 = vector.load %arg14[%c0_2, %c33, %c0_3] : memref<4x34x96xf32, #tpu.memory_space<vmem>>, vector<4x1x96xf32>
    tpu.vector_store %arg14[%c0_2, %c33, %c0_3], %0 {strides = array<i32>} : memref<4x34x96xf32, #tpu.memory_space<vmem>>, vector<4x1x96xf32>,
    %cst_4 = arith.constant 0.000000e+00 : f32
    %3 = vector.broadcast %cst_4 : f32 to vector<4x1x248xf32>
    %c0_5 = arith.constant 0 : index
    %c0_6 = arith.constant 0 : index
    %c0_7 = arith.constant 0 : index
    %4 = vector.load %arg15[%c0_5, %c0_6, %c0_7] : memref<4x18x248xf32, #tpu.memory_space<vmem>>, vector<4x1x248xf32>
    tpu.vector_store %arg15[%c0_5, %c0_6, %c0_7], %3 {strides = array<i32>} : memref<4x18x248xf32, #tpu.memory_space<vmem>>, vector<4x1x248xf32>,
    %c0_8 = arith.constant 0 : index
    %c17 = arith.constant 17 : index
    %c0_9 = arith.constant 0 : index
    %5 = vector.load %arg15[%c0_8, %c17, %c0_9] : memref<4x18x248xf32, #tpu.memory_space<vmem>>, vector<4x1x248xf32>
    tpu.vector_store %arg15[%c0_8, %c17, %c0_9], %3 {strides = array<i32>} : memref<4x18x248xf32, #tpu.memory_space<vmem>>, vector<4x1x248xf32>,
    %6 = arith.index_cast %arg0 : i32 to index
    %c0_10 = arith.constant 0 : index
    %7 = memref.load %arg1[%6, %c0_10] : memref<2x16xf32, #tpu.memory_space<smem>>
    %c0_11 = arith.constant 0 : index
    %c0_12 = arith.constant 0 : index
    %c0_13 = arith.constant 0 : index
    %c0_14 = arith.constant 0 : index
    %8 = vector.load %arg2[%c0_11, %c0_12, %c0_13, %c0_14] : memref<1x4x32x96xf32, #tpu.memory_space<vmem>>, vector<1x1x32x96xf32>
    %9 = vector.shape_cast %8 : vector<1x1x32x96xf32> to vector<32x96xf32>
    %10 = vector.broadcast %7 : f32 to vector<32x96xf32>
    %11 = arith.mulf %10, %9 : vector<32x96xf32>
    %12 = arith.index_cast %arg0 : i32 to index
    %c1 = arith.constant 1 : index
    %13 = memref.load %arg1[%12, %c1] : memref<2x16xf32, #tpu.memory_space<smem>>
    %c0_15 = arith.constant 0 : index
    %c1_16 = arith.constant 1 : index
    %c0_17 = arith.constant 0 : index
    %c0_18 = arith.constant 0 : index
    %14 = vector.load %arg2[%c0_15, %c1_16, %c0_17, %c0_18] : memref<1x4x32x96xf32, #tpu.memory_space<vmem>>, vector<1x1x32x96xf32>
    %15 = vector.shape_cast %14 : vector<1x1x32x96xf32> to vector<32x96xf32>
    %16 = vector.broadcast %13 : f32 to vector<32x96xf32>
    %17 = arith.mulf %16, %15 : vector<32x96xf32>
    %18 = arith.addf %11, %17 : vector<32x96xf32>
    %19 = arith.index_cast %arg0 : i32 to index
    %c2 = arith.constant 2 : index
    %20 = memref.load %arg1[%19, %c2] : memref<2x16xf32, #tpu.memory_space<smem>>
    %c0_19 = arith.constant 0 : index
    %c2_20 = arith.constant 2 : index
    %c0_21 = arith.constant 0 : index
    %c0_22 = arith.constant 0 : index
    %21 = vector.load %arg2[%c0_19, %c2_20, %c0_21, %c0_22] : memref<1x4x32x96xf32, #tpu.memory_space<vmem>>, vector<1x1x32x96xf32>
    %22 = vector.shape_cast %21 : vector<1x1x32x96xf32> to vector<32x96xf32>
    %23 = vector.broadcast %20 : f32 to vector<32x96xf32>
    %24 = arith.mulf %23, %22 : vector<32x96xf32>
    %25 = arith.addf %18, %24 : vector<32x96xf32>
    %26 = arith.index_cast %arg0 : i32 to index
    %c3 = arith.constant 3 : index
    %27 = memref.load %arg1[%26, %c3] : memref<2x16xf32, #tpu.memory_space<smem>>
    %c0_23 = arith.constant 0 : index
    %c3_24 = arith.constant 3 : index
    %c0_25 = arith.constant 0 : index
    %c0_26 = arith.constant 0 : index
    %28 = vector.load %arg2[%c0_23, %c3_24, %c0_25, %c0_26] : memref<1x4x32x96xf32, #tpu.memory_space<vmem>>, vector<1x1x32x96xf32>
    %29 = vector.shape_cast %28 : vector<1x1x32x96xf32> to vector<32x96xf32>
    %30 = vector.broadcast %27 : f32 to vector<32x96xf32>
    %31 = arith.mulf %30, %29 : vector<32x96xf32>
    %32 = arith.addf %25, %31 : vector<32x96xf32>
    %c0_27 = arith.constant 0 : index
    %c1_28 = arith.constant 1 : index
    %c0_29 = arith.constant 0 : index
    %33 = vector.load %arg14[%c0_27, %c1_28, %c0_29] : memref<4x34x96xf32, #tpu.memory_space<vmem>>, vector<1x32x96xf32>
    %34 = vector.shape_cast %33 : vector<1x32x96xf32> to vector<32x96xf32>
    %35 = vector.shape_cast %32 : vector<32x96xf32> to vector<1x32x96xf32>
    tpu.vector_store %arg14[%c0_27, %c1_28, %c0_29], %35 {strides = array<i32>} : memref<4x34x96xf32, #tpu.memory_space<vmem>>, vector<1x32x96xf32>,
    %36 = arith.index_cast %arg0 : i32 to index
    %c4 = arith.constant 4 : index
    %37 = memref.load %arg1[%36, %c4] : memref<2x16xf32, #tpu.memory_space<smem>>
    %c0_30 = arith.constant 0 : index
    %c0_31 = arith.constant 0 : index
    %c0_32 = arith.constant 0 : index
    %c0_33 = arith.constant 0 : index
    %38 = vector.load %arg2[%c0_30, %c0_31, %c0_32, %c0_33] : memref<1x4x32x96xf32, #tpu.memory_space<vmem>>, vector<1x1x32x96xf32>
    %39 = vector.shape_cast %38 : vector<1x1x32x96xf32> to vector<32x96xf32>
    %40 = vector.broadcast %37 : f32 to vector<32x96xf32>
    %41 = arith.mulf %40, %39 : vector<32x96xf32>
    %42 = arith.index_cast %arg0 : i32 to index
    %c5 = arith.constant 5 : index
    %43 = memref.load %arg1[%42, %c5] : memref<2x16xf32, #tpu.memory_space<smem>>
    %c0_34 = arith.constant 0 : index
    %c1_35 = arith.constant 1 : index
    %c0_36 = arith.constant 0 : index
    %c0_37 = arith.constant 0 : index
    %44 = vector.load %arg2[%c0_34, %c1_35, %c0_36, %c0_37] : memref<1x4x32x96xf32, #tpu.memory_space<vmem>>, vector<1x1x32x96xf32>
    %45 = vector.shape_cast %44 : vector<1x1x32x96xf32> to vector<32x96xf32>
    %46 = vector.broadcast %43 : f32 to vector<32x96xf32>
    %47 = arith.mulf %46, %45 : vector<32x96xf32>
    %48 = arith.addf %41, %47 : vector<32x96xf32>
    %49 = arith.index_cast %arg0 : i32 to index
    %c6 = arith.constant 6 : index
    %50 = memref.load %arg1[%49, %c6] : memref<2x16xf32, #tpu.memory_space<smem>>
    %c0_38 = arith.constant 0 : index
    %c2_39 = arith.constant 2 : index
    %c0_40 = arith.constant 0 : index
    %c0_41 = arith.constant 0 : index
    %51 = vector.load %arg2[%c0_38, %c2_39, %c0_40, %c0_41] : memref<1x4x32x96xf32, #tpu.memory_space<vmem>>, vector<1x1x32x96xf32>
    %52 = vector.shape_cast %51 : vector<1x1x32x96xf32> to vector<32x96xf32>
    %53 = vector.broadcast %50 : f32 to vector<32x96xf32>
    %54 = arith.mulf %53, %52 : vector<32x96xf32>
    %55 = arith.addf %48, %54 : vector<32x96xf32>
    %56 = arith.index_cast %arg0 : i32 to index
    %c7 = arith.constant 7 : index
    %57 = memref.load %arg1[%56, %c7] : memref<2x16xf32, #tpu.memory_space<smem>>
    %c0_42 = arith.constant 0 : index
    %c3_43 = arith.constant 3 : index
    %c0_44 = arith.constant 0 : index
    %c0_45 = arith.constant 0 : index
    %58 = vector.load %arg2[%c0_42, %c3_43, %c0_44, %c0_45] : memref<1x4x32x96xf32, #tpu.memory_space<vmem>>, vector<1x1x32x96xf32>
    %59 = vector.shape_cast %58 : vector<1x1x32x96xf32> to vector<32x96xf32>
    %60 = vector.broadcast %57 : f32 to vector<32x96xf32>
    %61 = arith.mulf %60, %59 : vector<32x96xf32>
    %62 = arith.addf %55, %61 : vector<32x96xf32>
    %c1_46 = arith.constant 1 : index
    %c1_47 = arith.constant 1 : index
    %c0_48 = arith.constant 0 : index
    %63 = vector.load %arg14[%c1_46, %c1_47, %c0_48] : memref<4x34x96xf32, #tpu.memory_space<vmem>>, vector<1x32x96xf32>
    %64 = vector.shape_cast %63 : vector<1x32x96xf32> to vector<32x96xf32>
    %65 = vector.shape_cast %62 : vector<32x96xf32> to vector<1x32x96xf32>
    tpu.vector_store %arg14[%c1_46, %c1_47, %c0_48], %65 {strides = array<i32>} : memref<4x34x96xf32, #tpu.memory_space<vmem>>, vector<1x32x96xf32>,
    %66 = arith.index_cast %arg0 : i32 to index
    %c8 = arith.constant 8 : index
    %67 = memref.load %arg1[%66, %c8] : memref<2x16xf32, #tpu.memory_space<smem>>
    %c0_49 = arith.constant 0 : index
    %c0_50 = arith.constant 0 : index
    %c0_51 = arith.constant 0 : index
    %c0_52 = arith.constant 0 : index
    %68 = vector.load %arg2[%c0_49, %c0_50, %c0_51, %c0_52] : memref<1x4x32x96xf32, #tpu.memory_space<vmem>>, vector<1x1x32x96xf32>
    %69 = vector.shape_cast %68 : vector<1x1x32x96xf32> to vector<32x96xf32>
    %70 = vector.broadcast %67 : f32 to vector<32x96xf32>
    %71 = arith.mulf %70, %69 : vector<32x96xf32>
    %72 = arith.index_cast %arg0 : i32 to index
    %c9 = arith.constant 9 : index
    %73 = memref.load %arg1[%72, %c9] : memref<2x16xf32, #tpu.memory_space<smem>>
    %c0_53 = arith.constant 0 : index
    %c1_54 = arith.constant 1 : index
    %c0_55 = arith.constant 0 : index
    %c0_56 = arith.constant 0 : index
    %74 = vector.load %arg2[%c0_53, %c1_54, %c0_55, %c0_56] : memref<1x4x32x96xf32, #tpu.memory_space<vmem>>, vector<1x1x32x96xf32>
    %75 = vector.shape_cast %74 : vector<1x1x32x96xf32> to vector<32x96xf32>
    %76 = vector.broadcast %73 : f32 to vector<32x96xf32>
    %77 = arith.mulf %76, %75 : vector<32x96xf32>
    %78 = arith.addf %71, %77 : vector<32x96xf32>
    %79 = arith.index_cast %arg0 : i32 to index
    %c10 = arith.constant 10 : index
    %80 = memref.load %arg1[%79, %c10] : memref<2x16xf32, #tpu.memory_space<smem>>
    %c0_57 = arith.constant 0 : index
    %c2_58 = arith.constant 2 : index
    %c0_59 = arith.constant 0 : index
    %c0_60 = arith.constant 0 : index
    %81 = vector.load %arg2[%c0_57, %c2_58, %c0_59, %c0_60] : memref<1x4x32x96xf32, #tpu.memory_space<vmem>>, vector<1x1x32x96xf32>
    %82 = vector.shape_cast %81 : vector<1x1x32x96xf32> to vector<32x96xf32>
    %83 = vector.broadcast %80 : f32 to vector<32x96xf32>
    %84 = arith.mulf %83, %82 : vector<32x96xf32>
    %85 = arith.addf %78, %84 : vector<32x96xf32>
    %86 = arith.index_cast %arg0 : i32 to index
    %c11 = arith.constant 11 : index
    %87 = memref.load %arg1[%86, %c11] : memref<2x16xf32, #tpu.memory_space<smem>>
    %c0_61 = arith.constant 0 : index
    %c3_62 = arith.constant 3 : index
    %c0_63 = arith.constant 0 : index
    %c0_64 = arith.constant 0 : index
    %88 = vector.load %arg2[%c0_61, %c3_62, %c0_63, %c0_64] : memref<1x4x32x96xf32, #tpu.memory_space<vmem>>, vector<1x1x32x96xf32>
    %89 = vector.shape_cast %88 : vector<1x1x32x96xf32> to vector<32x96xf32>
    %90 = vector.broadcast %87 : f32 to vector<32x96xf32>
    %91 = arith.mulf %90, %89 : vector<32x96xf32>
    %92 = arith.addf %85, %91 : vector<32x96xf32>
    %c2_65 = arith.constant 2 : index
    %c1_66 = arith.constant 1 : index
    %c0_67 = arith.constant 0 : index
    %93 = vector.load %arg14[%c2_65, %c1_66, %c0_67] : memref<4x34x96xf32, #tpu.memory_space<vmem>>, vector<1x32x96xf32>
    %94 = vector.shape_cast %93 : vector<1x32x96xf32> to vector<32x96xf32>
    %95 = vector.shape_cast %92 : vector<32x96xf32> to vector<1x32x96xf32>
    tpu.vector_store %arg14[%c2_65, %c1_66, %c0_67], %95 {strides = array<i32>} : memref<4x34x96xf32, #tpu.memory_space<vmem>>, vector<1x32x96xf32>,
    %96 = arith.index_cast %arg0 : i32 to index
    %c12 = arith.constant 12 : index
    %97 = memref.load %arg1[%96, %c12] : memref<2x16xf32, #tpu.memory_space<smem>>
    %c0_68 = arith.constant 0 : index
    %c0_69 = arith.constant 0 : index
    %c0_70 = arith.constant 0 : index
    %c0_71 = arith.constant 0 : index
    %98 = vector.load %arg2[%c0_68, %c0_69, %c0_70, %c0_71] : memref<1x4x32x96xf32, #tpu.memory_space<vmem>>, vector<1x1x32x96xf32>
    %99 = vector.shape_cast %98 : vector<1x1x32x96xf32> to vector<32x96xf32>
    %100 = vector.broadcast %97 : f32 to vector<32x96xf32>
    %101 = arith.mulf %100, %99 : vector<32x96xf32>
    %102 = arith.index_cast %arg0 : i32 to index
    %c13 = arith.constant 13 : index
    %103 = memref.load %arg1[%102, %c13] : memref<2x16xf32, #tpu.memory_space<smem>>
    %c0_72 = arith.constant 0 : index
    %c1_73 = arith.constant 1 : index
    %c0_74 = arith.constant 0 : index
    %c0_75 = arith.constant 0 : index
    %104 = vector.load %arg2[%c0_72, %c1_73, %c0_74, %c0_75] : memref<1x4x32x96xf32, #tpu.memory_space<vmem>>, vector<1x1x32x96xf32>
    %105 = vector.shape_cast %104 : vector<1x1x32x96xf32> to vector<32x96xf32>
    %106 = vector.broadcast %103 : f32 to vector<32x96xf32>
    %107 = arith.mulf %106, %105 : vector<32x96xf32>
    %108 = arith.addf %101, %107 : vector<32x96xf32>
    %109 = arith.index_cast %arg0 : i32 to index
    %c14 = arith.constant 14 : index
    %110 = memref.load %arg1[%109, %c14] : memref<2x16xf32, #tpu.memory_space<smem>>
    %c0_76 = arith.constant 0 : index
    %c2_77 = arith.constant 2 : index
    %c0_78 = arith.constant 0 : index
    %c0_79 = arith.constant 0 : index
    %111 = vector.load %arg2[%c0_76, %c2_77, %c0_78, %c0_79] : memref<1x4x32x96xf32, #tpu.memory_space<vmem>>, vector<1x1x32x96xf32>
    %112 = vector.shape_cast %111 : vector<1x1x32x96xf32> to vector<32x96xf32>
    %113 = vector.broadcast %110 : f32 to vector<32x96xf32>
    %114 = arith.mulf %113, %112 : vector<32x96xf32>
    %115 = arith.addf %108, %114 : vector<32x96xf32>
    %116 = arith.index_cast %arg0 : i32 to index
    %c15 = arith.constant 15 : index
    %117 = memref.load %arg1[%116, %c15] : memref<2x16xf32, #tpu.memory_space<smem>>
    %c0_80 = arith.constant 0 : index
    %c3_81 = arith.constant 3 : index
    %c0_82 = arith.constant 0 : index
    %c0_83 = arith.constant 0 : index
    %118 = vector.load %arg2[%c0_80, %c3_81, %c0_82, %c0_83] : memref<1x4x32x96xf32, #tpu.memory_space<vmem>>, vector<1x1x32x96xf32>
    %119 = vector.shape_cast %118 : vector<1x1x32x96xf32> to vector<32x96xf32>
    %120 = vector.broadcast %117 : f32 to vector<32x96xf32>
    %121 = arith.mulf %120, %119 : vector<32x96xf32>
    %122 = arith.addf %115, %121 : vector<32x96xf32>
    %c3_84 = arith.constant 3 : index
    %c1_85 = arith.constant 1 : index
    %c0_86 = arith.constant 0 : index
    %123 = vector.load %arg14[%c3_84, %c1_85, %c0_86] : memref<4x34x96xf32, #tpu.memory_space<vmem>>, vector<1x32x96xf32>
    %124 = vector.shape_cast %123 : vector<1x32x96xf32> to vector<32x96xf32>
    %125 = vector.shape_cast %122 : vector<32x96xf32> to vector<1x32x96xf32>
    tpu.vector_store %arg14[%c3_84, %c1_85, %c0_86], %125 {strides = array<i32>} : memref<4x34x96xf32, #tpu.memory_space<vmem>>, vector<1x32x96xf32>,
    %cst_87 = arith.constant 0.000000e+00 : f32
    %126 = vector.broadcast %cst_87 : f32 to vector<128x256xf32>
    %c0_88 = arith.constant 0 : index
    %c0_89 = arith.constant 0 : index
    %c0_90 = arith.constant 0 : index
    %127 = vector.load %arg14[%c0_88, %c0_89, %c0_90] : memref<4x34x96xf32, #tpu.memory_space<vmem>>, vector<4x32x96xf32>
    %128 = vector.shape_cast %127 : vector<4x32x96xf32> to vector<128x96xf32>
    %c0_91 = arith.constant 0 : index
    %c0_92 = arith.constant 0 : index
    %c0_93 = arith.constant 0 : index
    %129 = vector.load %arg7[%c0_91, %c0_92, %c0_93] : memref<3x96x256xf32, #tpu.memory_space<vmem>>, vector<1x96x256xf32>
    %130 = vector.shape_cast %129 : vector<1x96x256xf32> to vector<96x256xf32>
    %cst_94 = arith.constant dense<0.000000e+00> : vector<128x256xf32>
    %131 = tpu.matmul %128, %130, %cst_94 {dimension_numbers = #tpu.dot_dimension_numbers<[1], [0], [0], [1], [0, 0, 1, 1], [], []>} : vector<128x96xf32>, vector<96x256xf32>, vector<128x256xf32> -> vector<128x256xf32>
    %132 = arith.addf %126, %131 : vector<128x256xf32>
    %c0_95 = arith.constant 0 : index
    %c1_96 = arith.constant 1 : index
    %c0_97 = arith.constant 0 : index
    %133 = vector.load %arg14[%c0_95, %c1_96, %c0_97] : memref<4x34x96xf32, #tpu.memory_space<vmem>>, vector<4x32x96xf32>
    %134 = vector.shape_cast %133 : vector<4x32x96xf32> to vector<128x96xf32>
    %c1_98 = arith.constant 1 : index
    %c0_99 = arith.constant 0 : index
    %c0_100 = arith.constant 0 : index
    %135 = vector.load %arg7[%c1_98, %c0_99, %c0_100] : memref<3x96x256xf32, #tpu.memory_space<vmem>>, vector<1x96x256xf32>
    %136 = vector.shape_cast %135 : vector<1x96x256xf32> to vector<96x256xf32>
    %cst_101 = arith.constant dense<0.000000e+00> : vector<128x256xf32>
    %137 = tpu.matmul %134, %136, %cst_101 {dimension_numbers = #tpu.dot_dimension_numbers<[1], [0], [0], [1], [0, 0, 1, 1], [], []>} : vector<128x96xf32>, vector<96x256xf32>, vector<128x256xf32> -> vector<128x256xf32>
    %138 = arith.addf %132, %137 : vector<128x256xf32>
    %c0_102 = arith.constant 0 : index
    %c2_103 = arith.constant 2 : index
    %c0_104 = arith.constant 0 : index
    %139 = vector.load %arg14[%c0_102, %c2_103, %c0_104] : memref<4x34x96xf32, #tpu.memory_space<vmem>>, vector<4x32x96xf32>
    %140 = vector.shape_cast %139 : vector<4x32x96xf32> to vector<128x96xf32>
    %c2_105 = arith.constant 2 : index
    %c0_106 = arith.constant 0 : index
    %c0_107 = arith.constant 0 : index
    %141 = vector.load %arg7[%c2_105, %c0_106, %c0_107] : memref<3x96x256xf32, #tpu.memory_space<vmem>>, vector<1x96x256xf32>
    %142 = vector.shape_cast %141 : vector<1x96x256xf32> to vector<96x256xf32>
    %cst_108 = arith.constant dense<0.000000e+00> : vector<128x256xf32>
    %143 = tpu.matmul %140, %142, %cst_108 {dimension_numbers = #tpu.dot_dimension_numbers<[1], [0], [0], [1], [0, 0, 1, 1], [], []>} : vector<128x96xf32>, vector<96x256xf32>, vector<128x256xf32> -> vector<128x256xf32>
    %144 = arith.addf %138, %143 : vector<128x256xf32>
    %c0_109 = arith.constant 0 : index
    %c0_110 = arith.constant 0 : index
    %145 = vector.load %arg8[%c0_109, %c0_110] : memref<1x256xf32, #tpu.memory_space<vmem>>, vector<1x256xf32>
    %146 = vector.broadcast %145 : vector<1x256xf32> to vector<128x256xf32>
    %147 = arith.addf %144, %146 : vector<128x256xf32>
    %cst_111 = arith.constant 0.000000e+00 : f32
    %148 = vector.broadcast %cst_111 : f32 to vector<128x256xf32>
    %149 = arith.maximumf %147, %148 : vector<128x256xf32>
    %150 = vector.shape_cast %149 : vector<128x256xf32> to vector<64x2x256xf32>
    %151 = vector.extract_strided_slice %150 {offsets = [0, 0, 0], sizes = [64, 1, 256], strides = [1, 1, 1]} : vector<64x2x256xf32> to vector<64x1x256xf32>
    %152 = vector.shape_cast %151 : vector<64x1x256xf32> to vector<64x256xf32>
    %153 = vector.extract_strided_slice %150 {offsets = [0, 1, 0], sizes = [64, 1, 256], strides = [1, 1, 1]} : vector<64x2x256xf32> to vector<64x1x256xf32>
    %154 = vector.shape_cast %153 : vector<64x1x256xf32> to vector<64x256xf32>
    %155 = arith.maximumf %152, %154 : vector<64x256xf32>
    %156 = vector.extract_strided_slice %155 {offsets = [0, 0], sizes = [64, 248], strides = [1, 1]} : vector<64x256xf32> to vector<64x248xf32>
    %157 = vector.extract_strided_slice %155 {offsets = [0, 8], sizes = [64, 248], strides = [1, 1]} : vector<64x256xf32> to vector<64x248xf32>
    %158 = arith.maximumf %156, %157 : vector<64x248xf32>
    %159 = vector.shape_cast %158 : vector<64x248xf32> to vector<4x16x248xf32>
    %c0_112 = arith.constant 0 : index
    %c1_113 = arith.constant 1 : index
    %c0_114 = arith.constant 0 : index
    %160 = vector.load %arg15[%c0_112, %c1_113, %c0_114] : memref<4x18x248xf32, #tpu.memory_space<vmem>>, vector<4x16x248xf32>
    tpu.vector_store %arg15[%c0_112, %c1_113, %c0_114], %159 {strides = array<i32>} : memref<4x18x248xf32, #tpu.memory_space<vmem>>, vector<4x16x248xf32>,
    %cst_115 = arith.constant 0.000000e+00 : f32
    %161 = vector.broadcast %cst_115 : f32 to vector<64x128xf32>
    %c0_116 = arith.constant 0 : index
    %c0_117 = arith.constant 0 : index
    %c0_118 = arith.constant 0 : index
    %162 = vector.load %arg15[%c0_116, %c0_117, %c0_118] : memref<4x18x248xf32, #tpu.memory_space<vmem>>, vector<4x16x248xf32>
    %163 = vector.shape_cast %162 : vector<4x16x248xf32> to vector<64x248xf32>
    %c0_119 = arith.constant 0 : index
    %c0_120 = arith.constant 0 : index
    %c0_121 = arith.constant 0 : index
    %164 = vector.load %arg9[%c0_119, %c0_120, %c0_121] : memref<3x248x128xf32, #tpu.memory_space<vmem>>, vector<1x248x128xf32>
    %165 = vector.shape_cast %164 : vector<1x248x128xf32> to vector<248x128xf32>
    %cst_122 = arith.constant dense<0.000000e+00> : vector<64x128xf32>
    %166 = tpu.matmul %163, %165, %cst_122 {dimension_numbers = #tpu.dot_dimension_numbers<[1], [0], [0], [1], [0, 0, 1, 1], [], []>} : vector<64x248xf32>, vector<248x128xf32>, vector<64x128xf32> -> vector<64x128xf32>
    %167 = arith.addf %161, %166 : vector<64x128xf32>
    %c0_123 = arith.constant 0 : index
    %c1_124 = arith.constant 1 : index
    %c0_125 = arith.constant 0 : index
    %168 = vector.load %arg15[%c0_123, %c1_124, %c0_125] : memref<4x18x248xf32, #tpu.memory_space<vmem>>, vector<4x16x248xf32>
    %169 = vector.shape_cast %168 : vector<4x16x248xf32> to vector<64x248xf32>
    %c1_126 = arith.constant 1 : index
    %c0_127 = arith.constant 0 : index
    %c0_128 = arith.constant 0 : index
    %170 = vector.load %arg9[%c1_126, %c0_127, %c0_128] : memref<3x248x128xf32, #tpu.memory_space<vmem>>, vector<1x248x128xf32>
    %171 = vector.shape_cast %170 : vector<1x248x128xf32> to vector<248x128xf32>
    %cst_129 = arith.constant dense<0.000000e+00> : vector<64x128xf32>
    %172 = tpu.matmul %169, %171, %cst_129 {dimension_numbers = #tpu.dot_dimension_numbers<[1], [0], [0], [1], [0, 0, 1, 1], [], []>} : vector<64x248xf32>, vector<248x128xf32>, vector<64x128xf32> -> vector<64x128xf32>
    %173 = arith.addf %167, %172 : vector<64x128xf32>
    %c0_130 = arith.constant 0 : index
    %c2_131 = arith.constant 2 : index
    %c0_132 = arith.constant 0 : index
    %174 = vector.load %arg15[%c0_130, %c2_131, %c0_132] : memref<4x18x248xf32, #tpu.memory_space<vmem>>, vector<4x16x248xf32>
    %175 = vector.shape_cast %174 : vector<4x16x248xf32> to vector<64x248xf32>
    %c2_133 = arith.constant 2 : index
    %c0_134 = arith.constant 0 : index
    %c0_135 = arith.constant 0 : index
    %176 = vector.load %arg9[%c2_133, %c0_134, %c0_135] : memref<3x248x128xf32, #tpu.memory_space<vmem>>, vector<1x248x128xf32>
    %177 = vector.shape_cast %176 : vector<1x248x128xf32> to vector<248x128xf32>
    %cst_136 = arith.constant dense<0.000000e+00> : vector<64x128xf32>
    %178 = tpu.matmul %175, %177, %cst_136 {dimension_numbers = #tpu.dot_dimension_numbers<[1], [0], [0], [1], [0, 0, 1, 1], [], []>} : vector<64x248xf32>, vector<248x128xf32>, vector<64x128xf32> -> vector<64x128xf32>
    %179 = arith.addf %173, %178 : vector<64x128xf32>
    %c0_137 = arith.constant 0 : index
    %c0_138 = arith.constant 0 : index
    %180 = vector.load %arg10[%c0_137, %c0_138] : memref<1x128xf32, #tpu.memory_space<vmem>>, vector<1x128xf32>
    %181 = vector.broadcast %180 : vector<1x128xf32> to vector<64x128xf32>
    %182 = arith.addf %179, %181 : vector<64x128xf32>
    %c0_139 = arith.constant 0 : index
    %c0_140 = arith.constant 0 : index
    %c0_141 = arith.constant 0 : index
    %c0_142 = arith.constant 0 : index
    %183 = vector.load %arg2[%c0_139, %c0_140, %c0_141, %c0_142] : memref<1x4x32x96xf32, #tpu.memory_space<vmem>>, vector<1x4x32x96xf32>
    %184 = vector.shape_cast %183 : vector<1x4x32x96xf32> to vector<4x32x96xf32>
    %c0_143 = arith.constant 0 : index
    %c1_144 = arith.constant 1 : index
    %c0_145 = arith.constant 0 : index
    %185 = vector.load %arg14[%c0_143, %c1_144, %c0_145] : memref<4x34x96xf32, #tpu.memory_space<vmem>>, vector<4x32x96xf32>
    tpu.vector_store %arg14[%c0_143, %c1_144, %c0_145], %184 {strides = array<i32>} : memref<4x34x96xf32, #tpu.memory_space<vmem>>, vector<4x32x96xf32>,
    %cst_146 = arith.constant 0.000000e+00 : f32
    %186 = vector.broadcast %cst_146 : f32 to vector<128x256xf32>
    %c0_147 = arith.constant 0 : index
    %c0_148 = arith.constant 0 : index
    %c0_149 = arith.constant 0 : index
    %187 = vector.load %arg14[%c0_147, %c0_148, %c0_149] : memref<4x34x96xf32, #tpu.memory_space<vmem>>, vector<4x32x96xf32>
    %188 = vector.shape_cast %187 : vector<4x32x96xf32> to vector<128x96xf32>
    %c0_150 = arith.constant 0 : index
    %c0_151 = arith.constant 0 : index
    %c0_152 = arith.constant 0 : index
    %189 = vector.load %arg3[%c0_150, %c0_151, %c0_152] : memref<3x96x256xf32, #tpu.memory_space<vmem>>, vector<1x96x256xf32>
    %190 = vector.shape_cast %189 : vector<1x96x256xf32> to vector<96x256xf32>
    %cst_153 = arith.constant dense<0.000000e+00> : vector<128x256xf32>
    %191 = tpu.matmul %188, %190, %cst_153 {dimension_numbers = #tpu.dot_dimension_numbers<[1], [0], [0], [1], [0, 0, 1, 1], [], []>} : vector<128x96xf32>, vector<96x256xf32>, vector<128x256xf32> -> vector<128x256xf32>
    %192 = arith.addf %186, %191 : vector<128x256xf32>
    %c0_154 = arith.constant 0 : index
    %c1_155 = arith.constant 1 : index
    %c0_156 = arith.constant 0 : index
    %193 = vector.load %arg14[%c0_154, %c1_155, %c0_156] : memref<4x34x96xf32, #tpu.memory_space<vmem>>, vector<4x32x96xf32>
    %194 = vector.shape_cast %193 : vector<4x32x96xf32> to vector<128x96xf32>
    %c1_157 = arith.constant 1 : index
    %c0_158 = arith.constant 0 : index
    %c0_159 = arith.constant 0 : index
    %195 = vector.load %arg3[%c1_157, %c0_158, %c0_159] : memref<3x96x256xf32, #tpu.memory_space<vmem>>, vector<1x96x256xf32>
    %196 = vector.shape_cast %195 : vector<1x96x256xf32> to vector<96x256xf32>
    %cst_160 = arith.constant dense<0.000000e+00> : vector<128x256xf32>
    %197 = tpu.matmul %194, %196, %cst_160 {dimension_numbers = #tpu.dot_dimension_numbers<[1], [0], [0], [1], [0, 0, 1, 1], [], []>} : vector<128x96xf32>, vector<96x256xf32>, vector<128x256xf32> -> vector<128x256xf32>
    %198 = arith.addf %192, %197 : vector<128x256xf32>
    %c0_161 = arith.constant 0 : index
    %c2_162 = arith.constant 2 : index
    %c0_163 = arith.constant 0 : index
    %199 = vector.load %arg14[%c0_161, %c2_162, %c0_163] : memref<4x34x96xf32, #tpu.memory_space<vmem>>, vector<4x32x96xf32>
    %200 = vector.shape_cast %199 : vector<4x32x96xf32> to vector<128x96xf32>
    %c2_164 = arith.constant 2 : index
    %c0_165 = arith.constant 0 : index
    %c0_166 = arith.constant 0 : index
    %201 = vector.load %arg3[%c2_164, %c0_165, %c0_166] : memref<3x96x256xf32, #tpu.memory_space<vmem>>, vector<1x96x256xf32>
    %202 = vector.shape_cast %201 : vector<1x96x256xf32> to vector<96x256xf32>
    %cst_167 = arith.constant dense<0.000000e+00> : vector<128x256xf32>
    %203 = tpu.matmul %200, %202, %cst_167 {dimension_numbers = #tpu.dot_dimension_numbers<[1], [0], [0], [1], [0, 0, 1, 1], [], []>} : vector<128x96xf32>, vector<96x256xf32>, vector<128x256xf32> -> vector<128x256xf32>
    %204 = arith.addf %198, %203 : vector<128x256xf32>
    %c0_168 = arith.constant 0 : index
    %c0_169 = arith.constant 0 : index
    %205 = vector.load %arg4[%c0_168, %c0_169] : memref<1x256xf32, #tpu.memory_space<vmem>>, vector<1x256xf32>
    %206 = vector.broadcast %205 : vector<1x256xf32> to vector<128x256xf32>
    %207 = arith.addf %204, %206 : vector<128x256xf32>
    %cst_170 = arith.constant 0.000000e+00 : f32
    %208 = vector.broadcast %cst_170 : f32 to vector<128x256xf32>
    %209 = arith.maximumf %207, %208 : vector<128x256xf32>
    %210 = vector.shape_cast %209 : vector<128x256xf32> to vector<64x2x256xf32>
    %211 = vector.extract_strided_slice %210 {offsets = [0, 0, 0], sizes = [64, 1, 256], strides = [1, 1, 1]} : vector<64x2x256xf32> to vector<64x1x256xf32>
    %212 = vector.shape_cast %211 : vector<64x1x256xf32> to vector<64x256xf32>
    %213 = vector.extract_strided_slice %210 {offsets = [0, 1, 0], sizes = [64, 1, 256], strides = [1, 1, 1]} : vector<64x2x256xf32> to vector<64x1x256xf32>
    %214 = vector.shape_cast %213 : vector<64x1x256xf32> to vector<64x256xf32>
    %215 = arith.maximumf %212, %214 : vector<64x256xf32>
    %216 = vector.extract_strided_slice %215 {offsets = [0, 0], sizes = [64, 248], strides = [1, 1]} : vector<64x256xf32> to vector<64x248xf32>
    %217 = vector.extract_strided_slice %215 {offsets = [0, 8], sizes = [64, 248], strides = [1, 1]} : vector<64x256xf32> to vector<64x248xf32>
    %218 = arith.maximumf %216, %217 : vector<64x248xf32>
    %219 = vector.shape_cast %218 : vector<64x248xf32> to vector<4x16x248xf32>
    %c0_171 = arith.constant 0 : index
    %c1_172 = arith.constant 1 : index
    %c0_173 = arith.constant 0 : index
    %220 = vector.load %arg15[%c0_171, %c1_172, %c0_173] : memref<4x18x248xf32, #tpu.memory_space<vmem>>, vector<4x16x248xf32>
    tpu.vector_store %arg15[%c0_171, %c1_172, %c0_173], %219 {strides = array<i32>} : memref<4x18x248xf32, #tpu.memory_space<vmem>>, vector<4x16x248xf32>,
    %cst_174 = arith.constant 0.000000e+00 : f32
    %221 = vector.broadcast %cst_174 : f32 to vector<64x128xf32>
    %c0_175 = arith.constant 0 : index
    %c0_176 = arith.constant 0 : index
    %c0_177 = arith.constant 0 : index
    %222 = vector.load %arg15[%c0_175, %c0_176, %c0_177] : memref<4x18x248xf32, #tpu.memory_space<vmem>>, vector<4x16x248xf32>
    %223 = vector.shape_cast %222 : vector<4x16x248xf32> to vector<64x248xf32>
    %c0_178 = arith.constant 0 : index
    %c0_179 = arith.constant 0 : index
    %c0_180 = arith.constant 0 : index
    %224 = vector.load %arg5[%c0_178, %c0_179, %c0_180] : memref<3x248x128xf32, #tpu.memory_space<vmem>>, vector<1x248x128xf32>
    %225 = vector.shape_cast %224 : vector<1x248x128xf32> to vector<248x128xf32>
    %cst_181 = arith.constant dense<0.000000e+00> : vector<64x128xf32>
    %226 = tpu.matmul %223, %225, %cst_181 {dimension_numbers = #tpu.dot_dimension_numbers<[1], [0], [0], [1], [0, 0, 1, 1], [], []>} : vector<64x248xf32>, vector<248x128xf32>, vector<64x128xf32> -> vector<64x128xf32>
    %227 = arith.addf %221, %226 : vector<64x128xf32>
    %c0_182 = arith.constant 0 : index
    %c1_183 = arith.constant 1 : index
    %c0_184 = arith.constant 0 : index
    %228 = vector.load %arg15[%c0_182, %c1_183, %c0_184] : memref<4x18x248xf32, #tpu.memory_space<vmem>>, vector<4x16x248xf32>
    %229 = vector.shape_cast %228 : vector<4x16x248xf32> to vector<64x248xf32>
    %c1_185 = arith.constant 1 : index
    %c0_186 = arith.constant 0 : index
    %c0_187 = arith.constant 0 : index
    %230 = vector.load %arg5[%c1_185, %c0_186, %c0_187] : memref<3x248x128xf32, #tpu.memory_space<vmem>>, vector<1x248x128xf32>
    %231 = vector.shape_cast %230 : vector<1x248x128xf32> to vector<248x128xf32>
    %cst_188 = arith.constant dense<0.000000e+00> : vector<64x128xf32>
    %232 = tpu.matmul %229, %231, %cst_188 {dimension_numbers = #tpu.dot_dimension_numbers<[1], [0], [0], [1], [0, 0, 1, 1], [], []>} : vector<64x248xf32>, vector<248x128xf32>, vector<64x128xf32> -> vector<64x128xf32>
    %233 = arith.addf %227, %232 : vector<64x128xf32>
    %c0_189 = arith.constant 0 : index
    %c2_190 = arith.constant 2 : index
    %c0_191 = arith.constant 0 : index
    %234 = vector.load %arg15[%c0_189, %c2_190, %c0_191] : memref<4x18x248xf32, #tpu.memory_space<vmem>>, vector<4x16x248xf32>
    %235 = vector.shape_cast %234 : vector<4x16x248xf32> to vector<64x248xf32>
    %c2_192 = arith.constant 2 : index
    %c0_193 = arith.constant 0 : index
    %c0_194 = arith.constant 0 : index
    %236 = vector.load %arg5[%c2_192, %c0_193, %c0_194] : memref<3x248x128xf32, #tpu.memory_space<vmem>>, vector<1x248x128xf32>
    %237 = vector.shape_cast %236 : vector<1x248x128xf32> to vector<248x128xf32>
    %cst_195 = arith.constant dense<0.000000e+00> : vector<64x128xf32>
    %238 = tpu.matmul %235, %237, %cst_195 {dimension_numbers = #tpu.dot_dimension_numbers<[1], [0], [0], [1], [0, 0, 1, 1], [], []>} : vector<64x248xf32>, vector<248x128xf32>, vector<64x128xf32> -> vector<64x128xf32>
    %239 = arith.addf %233, %238 : vector<64x128xf32>
    %c0_196 = arith.constant 0 : index
    %c0_197 = arith.constant 0 : index
    %240 = vector.load %arg6[%c0_196, %c0_197] : memref<1x128xf32, #tpu.memory_space<vmem>>, vector<1x128xf32>
    %241 = vector.broadcast %240 : vector<1x128xf32> to vector<64x128xf32>
    %242 = arith.addf %239, %241 : vector<64x128xf32>
    %243 = arith.addf %242, %182 : vector<64x128xf32>
    %244 = vector.extract_strided_slice %243 {offsets = [0, 0], sizes = [16, 128], strides = [1, 1]} : vector<64x128xf32> to vector<16x128xf32>
    %245 = vector.shape_cast %244 : vector<16x128xf32> to vector<1x16x128xf32>
    %cst_198 = arith.constant dense<0.000000e+00> : vector<1xf32>
    %246 = vector.multi_reduction <add>, %245, %cst_198 [1, 2] : vector<1x16x128xf32> to vector<1xf32>
    %247 = vector.shape_cast %246 : vector<1xf32> to vector<1x1x1xf32>
    %248 = vector.extract %247[0, 0, 0] : f32 from vector<1x1x1xf32>
    %249 = vector.broadcast %248 : f32 to vector<1x1xf32>
    %cst_199 = arith.constant 2.048000e+03 : f32
    %250 = vector.broadcast %cst_199 : f32 to vector<1x1xf32>
    %251 = arith.divf %249, %250 : vector<1x1xf32>
    %252 = vector.broadcast %251 : vector<1x1xf32> to vector<16x128xf32>
    %253 = arith.subf %244, %252 : vector<16x128xf32>
    %254 = arith.mulf %253, %253 : vector<16x128xf32>
    %255 = vector.shape_cast %254 : vector<16x128xf32> to vector<1x16x128xf32>
    %cst_200 = arith.constant dense<0.000000e+00> : vector<1xf32>
    %256 = vector.multi_reduction <add>, %255, %cst_200 [1, 2] : vector<1x16x128xf32> to vector<1xf32>
    %257 = vector.shape_cast %256 : vector<1xf32> to vector<1x1x1xf32>
    %258 = vector.extract %257[0, 0, 0] : f32 from vector<1x1x1xf32>
    %259 = vector.broadcast %258 : f32 to vector<1x1xf32>
    %cst_201 = arith.constant 2.048000e+03 : f32
    %260 = vector.broadcast %cst_201 : f32 to vector<1x1xf32>
    %261 = arith.divf %259, %260 : vector<1x1xf32>
    %262 = vector.broadcast %251 : vector<1x1xf32> to vector<16x128xf32>
    %263 = arith.subf %244, %262 : vector<16x128xf32>
    %cst_202 = arith.constant 9.99999974E-6 : f32
    %264 = vector.broadcast %cst_202 : f32 to vector<1x1xf32>
    %265 = arith.addf %261, %264 : vector<1x1xf32>
    %266 = math.rsqrt %265 : vector<1x1xf32>
    %267 = vector.broadcast %266 : vector<1x1xf32> to vector<16x128xf32>
    %268 = arith.mulf %263, %267 : vector<16x128xf32>
    %c0_203 = arith.constant 0 : index
    %c0_204 = arith.constant 0 : index
    %269 = vector.load %arg11[%c0_203, %c0_204] : memref<16x128xf32, #tpu.memory_space<vmem>>, vector<16x128xf32>
    %270 = arith.mulf %268, %269 : vector<16x128xf32>
    %c0_205 = arith.constant 0 : index
    %c0_206 = arith.constant 0 : index
    %271 = vector.load %arg12[%c0_205, %c0_206] : memref<16x128xf32, #tpu.memory_space<vmem>>, vector<16x128xf32>
    %272 = arith.addf %270, %271 : vector<16x128xf32>
    %cst_207 = arith.constant 0.000000e+00 : f32
    %273 = vector.broadcast %cst_207 : f32 to vector<16x128xf32>
    %274 = arith.maximumf %272, %273 : vector<16x128xf32>
    %c0_208 = arith.constant 0 : index
    %c0_209 = arith.constant 0 : index
    %c0_210 = arith.constant 0 : index
    %c0_211 = arith.constant 0 : index
    %275 = vector.load %arg13[%c0_208, %c0_209, %c0_210, %c0_211] : memref<1x4x16x128xf32, #tpu.memory_space<vmem>>, vector<1x1x16x128xf32>
    %276 = vector.shape_cast %275 : vector<1x1x16x128xf32> to vector<16x128xf32>
    %277 = vector.shape_cast %274 : vector<16x128xf32> to vector<1x1x16x128xf32>
    tpu.vector_store %arg13[%c0_208, %c0_209, %c0_210, %c0_211], %277 {strides = array<i32>} : memref<1x4x16x128xf32, #tpu.memory_space<vmem>>, vector<1x1x16x128xf32>,
    %278 = vector.extract_strided_slice %243 {offsets = [16, 0], sizes = [16, 128], strides = [1, 1]} : vector<64x128xf32> to vector<16x128xf32>
    %279 = vector.shape_cast %278 : vector<16x128xf32> to vector<1x16x128xf32>
    %cst_212 = arith.constant dense<0.000000e+00> : vector<1xf32>
    %280 = vector.multi_reduction <add>, %279, %cst_212 [1, 2] : vector<1x16x128xf32> to vector<1xf32>
    %281 = vector.shape_cast %280 : vector<1xf32> to vector<1x1x1xf32>
    %282 = vector.extract %281[0, 0, 0] : f32 from vector<1x1x1xf32>
    %283 = vector.broadcast %282 : f32 to vector<1x1xf32>
    %cst_213 = arith.constant 2.048000e+03 : f32
    %284 = vector.broadcast %cst_213 : f32 to vector<1x1xf32>
    %285 = arith.divf %283, %284 : vector<1x1xf32>
    %286 = vector.broadcast %285 : vector<1x1xf32> to vector<16x128xf32>
    %287 = arith.subf %278, %286 : vector<16x128xf32>
    %288 = arith.mulf %287, %287 : vector<16x128xf32>
    %289 = vector.shape_cast %288 : vector<16x128xf32> to vector<1x16x128xf32>
    %cst_214 = arith.constant dense<0.000000e+00> : vector<1xf32>
    %290 = vector.multi_reduction <add>, %289, %cst_214 [1, 2] : vector<1x16x128xf32> to vector<1xf32>
    %291 = vector.shape_cast %290 : vector<1xf32> to vector<1x1x1xf32>
    %292 = vector.extract %291[0, 0, 0] : f32 from vector<1x1x1xf32>
    %293 = vector.broadcast %292 : f32 to vector<1x1xf32>
    %cst_215 = arith.constant 2.048000e+03 : f32
    %294 = vector.broadcast %cst_215 : f32 to vector<1x1xf32>
    %295 = arith.divf %293, %294 : vector<1x1xf32>
    %296 = vector.broadcast %285 : vector<1x1xf32> to vector<16x128xf32>
    %297 = arith.subf %278, %296 : vector<16x128xf32>
    %cst_216 = arith.constant 9.99999974E-6 : f32
    %298 = vector.broadcast %cst_216 : f32 to vector<1x1xf32>
    %299 = arith.addf %295, %298 : vector<1x1xf32>
    %300 = math.rsqrt %299 : vector<1x1xf32>
    %301 = vector.broadcast %300 : vector<1x1xf32> to vector<16x128xf32>
    %302 = arith.mulf %297, %301 : vector<16x128xf32>
    %c0_217 = arith.constant 0 : index
    %c0_218 = arith.constant 0 : index
    %303 = vector.load %arg11[%c0_217, %c0_218] : memref<16x128xf32, #tpu.memory_space<vmem>>, vector<16x128xf32>
    %304 = arith.mulf %302, %303 : vector<16x128xf32>
    %c0_219 = arith.constant 0 : index
    %c0_220 = arith.constant 0 : index
    %305 = vector.load %arg12[%c0_219, %c0_220] : memref<16x128xf32, #tpu.memory_space<vmem>>, vector<16x128xf32>
    %306 = arith.addf %304, %305 : vector<16x128xf32>
    %cst_221 = arith.constant 0.000000e+00 : f32
    %307 = vector.broadcast %cst_221 : f32 to vector<16x128xf32>
    %308 = arith.maximumf %306, %307 : vector<16x128xf32>
    %c0_222 = arith.constant 0 : index
    %c1_223 = arith.constant 1 : index
    %c0_224 = arith.constant 0 : index
    %c0_225 = arith.constant 0 : index
    %309 = vector.load %arg13[%c0_222, %c1_223, %c0_224, %c0_225] : memref<1x4x16x128xf32, #tpu.memory_space<vmem>>, vector<1x1x16x128xf32>
    %310 = vector.shape_cast %309 : vector<1x1x16x128xf32> to vector<16x128xf32>
    %311 = vector.shape_cast %308 : vector<16x128xf32> to vector<1x1x16x128xf32>
    tpu.vector_store %arg13[%c0_222, %c1_223, %c0_224, %c0_225], %311 {strides = array<i32>} : memref<1x4x16x128xf32, #tpu.memory_space<vmem>>, vector<1x1x16x128xf32>,
    %312 = vector.extract_strided_slice %243 {offsets = [32, 0], sizes = [16, 128], strides = [1, 1]} : vector<64x128xf32> to vector<16x128xf32>
    %313 = vector.shape_cast %312 : vector<16x128xf32> to vector<1x16x128xf32>
    %cst_226 = arith.constant dense<0.000000e+00> : vector<1xf32>
    %314 = vector.multi_reduction <add>, %313, %cst_226 [1, 2] : vector<1x16x128xf32> to vector<1xf32>
    %315 = vector.shape_cast %314 : vector<1xf32> to vector<1x1x1xf32>
    %316 = vector.extract %315[0, 0, 0] : f32 from vector<1x1x1xf32>
    %317 = vector.broadcast %316 : f32 to vector<1x1xf32>
    %cst_227 = arith.constant 2.048000e+03 : f32
    %318 = vector.broadcast %cst_227 : f32 to vector<1x1xf32>
    %319 = arith.divf %317, %318 : vector<1x1xf32>
    %320 = vector.broadcast %319 : vector<1x1xf32> to vector<16x128xf32>
    %321 = arith.subf %312, %320 : vector<16x128xf32>
    %322 = arith.mulf %321, %321 : vector<16x128xf32>
    %323 = vector.shape_cast %322 : vector<16x128xf32> to vector<1x16x128xf32>
    %cst_228 = arith.constant dense<0.000000e+00> : vector<1xf32>
    %324 = vector.multi_reduction <add>, %323, %cst_228 [1, 2] : vector<1x16x128xf32> to vector<1xf32>
    %325 = vector.shape_cast %324 : vector<1xf32> to vector<1x1x1xf32>
    %326 = vector.extract %325[0, 0, 0] : f32 from vector<1x1x1xf32>
    %327 = vector.broadcast %326 : f32 to vector<1x1xf32>
    %cst_229 = arith.constant 2.048000e+03 : f32
    %328 = vector.broadcast %cst_229 : f32 to vector<1x1xf32>
    %329 = arith.divf %327, %328 : vector<1x1xf32>
    %330 = vector.broadcast %319 : vector<1x1xf32> to vector<16x128xf32>
    %331 = arith.subf %312, %330 : vector<16x128xf32>
    %cst_230 = arith.constant 9.99999974E-6 : f32
    %332 = vector.broadcast %cst_230 : f32 to vector<1x1xf32>
    %333 = arith.addf %329, %332 : vector<1x1xf32>
    %334 = math.rsqrt %333 : vector<1x1xf32>
    %335 = vector.broadcast %334 : vector<1x1xf32> to vector<16x128xf32>
    %336 = arith.mulf %331, %335 : vector<16x128xf32>
    %c0_231 = arith.constant 0 : index
    %c0_232 = arith.constant 0 : index
    %337 = vector.load %arg11[%c0_231, %c0_232] : memref<16x128xf32, #tpu.memory_space<vmem>>, vector<16x128xf32>
    %338 = arith.mulf %336, %337 : vector<16x128xf32>
    %c0_233 = arith.constant 0 : index
    %c0_234 = arith.constant 0 : index
    %339 = vector.load %arg12[%c0_233, %c0_234] : memref<16x128xf32, #tpu.memory_space<vmem>>, vector<16x128xf32>
    %340 = arith.addf %338, %339 : vector<16x128xf32>
    %cst_235 = arith.constant 0.000000e+00 : f32
    %341 = vector.broadcast %cst_235 : f32 to vector<16x128xf32>
    %342 = arith.maximumf %340, %341 : vector<16x128xf32>
    %c0_236 = arith.constant 0 : index
    %c2_237 = arith.constant 2 : index
    %c0_238 = arith.constant 0 : index
    %c0_239 = arith.constant 0 : index
    %343 = vector.load %arg13[%c0_236, %c2_237, %c0_238, %c0_239] : memref<1x4x16x128xf32, #tpu.memory_space<vmem>>, vector<1x1x16x128xf32>
    %344 = vector.shape_cast %343 : vector<1x1x16x128xf32> to vector<16x128xf32>
    %345 = vector.shape_cast %342 : vector<16x128xf32> to vector<1x1x16x128xf32>
    tpu.vector_store %arg13[%c0_236, %c2_237, %c0_238, %c0_239], %345 {strides = array<i32>} : memref<1x4x16x128xf32, #tpu.memory_space<vmem>>, vector<1x1x16x128xf32>,
    %346 = vector.extract_strided_slice %243 {offsets = [48, 0], sizes = [16, 128], strides = [1, 1]} : vector<64x128xf32> to vector<16x128xf32>
    %347 = vector.shape_cast %346 : vector<16x128xf32> to vector<1x16x128xf32>
    %cst_240 = arith.constant dense<0.000000e+00> : vector<1xf32>
    %348 = vector.multi_reduction <add>, %347, %cst_240 [1, 2] : vector<1x16x128xf32> to vector<1xf32>
    %349 = vector.shape_cast %348 : vector<1xf32> to vector<1x1x1xf32>
    %350 = vector.extract %349[0, 0, 0] : f32 from vector<1x1x1xf32>
    %351 = vector.broadcast %350 : f32 to vector<1x1xf32>
    %cst_241 = arith.constant 2.048000e+03 : f32
    %352 = vector.broadcast %cst_241 : f32 to vector<1x1xf32>
    %353 = arith.divf %351, %352 : vector<1x1xf32>
    %354 = vector.broadcast %353 : vector<1x1xf32> to vector<16x128xf32>
    %355 = arith.subf %346, %354 : vector<16x128xf32>
    %356 = arith.mulf %355, %355 : vector<16x128xf32>
    %357 = vector.shape_cast %356 : vector<16x128xf32> to vector<1x16x128xf32>
    %cst_242 = arith.constant dense<0.000000e+00> : vector<1xf32>
    %358 = vector.multi_reduction <add>, %357, %cst_242 [1, 2] : vector<1x16x128xf32> to vector<1xf32>
    %359 = vector.shape_cast %358 : vector<1xf32> to vector<1x1x1xf32>
    %360 = vector.extract %359[0, 0, 0] : f32 from vector<1x1x1xf32>
    %361 = vector.broadcast %360 : f32 to vector<1x1xf32>
    %cst_243 = arith.constant 2.048000e+03 : f32
    %362 = vector.broadcast %cst_243 : f32 to vector<1x1xf32>
    %363 = arith.divf %361, %362 : vector<1x1xf32>
    %364 = vector.broadcast %353 : vector<1x1xf32> to vector<16x128xf32>
    %365 = arith.subf %346, %364 : vector<16x128xf32>
    %cst_244 = arith.constant 9.99999974E-6 : f32
    %366 = vector.broadcast %cst_244 : f32 to vector<1x1xf32>
    %367 = arith.addf %363, %366 : vector<1x1xf32>
    %368 = math.rsqrt %367 : vector<1x1xf32>
    %369 = vector.broadcast %368 : vector<1x1xf32> to vector<16x128xf32>
    %370 = arith.mulf %365, %369 : vector<16x128xf32>
    %c0_245 = arith.constant 0 : index
    %c0_246 = arith.constant 0 : index
    %371 = vector.load %arg11[%c0_245, %c0_246] : memref<16x128xf32, #tpu.memory_space<vmem>>, vector<16x128xf32>
    %372 = arith.mulf %370, %371 : vector<16x128xf32>
    %c0_247 = arith.constant 0 : index
    %c0_248 = arith.constant 0 : index
    %373 = vector.load %arg12[%c0_247, %c0_248] : memref<16x128xf32, #tpu.memory_space<vmem>>, vector<16x128xf32>
    %374 = arith.addf %372, %373 : vector<16x128xf32>
    %cst_249 = arith.constant 0.000000e+00 : f32
    %375 = vector.broadcast %cst_249 : f32 to vector<16x128xf32>
    %376 = arith.maximumf %374, %375 : vector<16x128xf32>
    %c0_250 = arith.constant 0 : index
    %c3_251 = arith.constant 3 : index
    %c0_252 = arith.constant 0 : index
    %c0_253 = arith.constant 0 : index
    %377 = vector.load %arg13[%c0_250, %c3_251, %c0_252, %c0_253] : memref<1x4x16x128xf32, #tpu.memory_space<vmem>>, vector<1x1x16x128xf32>
    %378 = vector.shape_cast %377 : vector<1x1x16x128xf32> to vector<16x128xf32>
    %379 = vector.shape_cast %376 : vector<16x128xf32> to vector<1x1x16x128xf32>
    tpu.vector_store %arg13[%c0_250, %c3_251, %c0_252, %c0_253], %379 {strides = array<i32>} : memref<1x4x16x128xf32, #tpu.memory_space<vmem>>, vector<1x1x16x128xf32>,
    return
  }
  func.func @transform_0(%arg0: i32, %arg1: memref<2x16xf32, #tpu.memory_space<smem>>) -> (i32, i32, i32, i32) {
    %c0_i32 = arith.constant 0 : i32
    %c0_i32_0 = arith.constant 0 : i32
    %c0_i32_1 = arith.constant 0 : i32
    %c0_i32_2 = arith.constant 0 : i32
    return %arg0, %c0_i32, %c0_i32_0, %c0_i32_1 : i32, i32, i32, i32
  }
  func.func @transform_1(%arg0: i32, %arg1: memref<2x16xf32, #tpu.memory_space<smem>>) -> (i32, i32, i32) {
    %c0_i32 = arith.constant 0 : i32
    %c0_i32_0 = arith.constant 0 : i32
    %c0_i32_1 = arith.constant 0 : i32
    %c0_i32_2 = arith.constant 0 : i32
    return %c0_i32, %c0_i32_0, %c0_i32_1 : i32, i32, i32
  }
  func.func @transform_2(%arg0: i32, %arg1: memref<2x16xf32, #tpu.memory_space<smem>>) -> (i32, i32) {
    %c0_i32 = arith.constant 0 : i32
    %c0_i32_0 = arith.constant 0 : i32
    %c0_i32_1 = arith.constant 0 : i32
    return %c0_i32, %c0_i32_0 : i32, i32
  }
  func.func @transform_3(%arg0: i32, %arg1: memref<2x16xf32, #tpu.memory_space<smem>>) -> (i32, i32, i32) {
    %c0_i32 = arith.constant 0 : i32
    %c0_i32_0 = arith.constant 0 : i32
    %c0_i32_1 = arith.constant 0 : i32
    %c0_i32_2 = arith.constant 0 : i32
    return %c0_i32, %c0_i32_0, %c0_i32_1 : i32, i32, i32
  }
  func.func @transform_4(%arg0: i32, %arg1: memref<2x16xf32, #tpu.memory_space<smem>>) -> (i32, i32) {
    %c0_i32 = arith.constant 0 : i32
    %c0_i32_0 = arith.constant 0 : i32
    %c0_i32_1 = arith.constant 0 : i32
    return %c0_i32, %c0_i32_0 : i32, i32
  }
  func.func @transform_5(%arg0: i32, %arg1: memref<2x16xf32, #tpu.memory_space<smem>>) -> (i32, i32, i32) {
    %c0_i32 = arith.constant 0 : i32
    %c0_i32_0 = arith.constant 0 : i32
    %c0_i32_1 = arith.constant 0 : i32
    %c0_i32_2 = arith.constant 0 : i32
    return %c0_i32, %c0_i32_0, %c0_i32_1 : i32, i32, i32
  }
  func.func @transform_6(%arg0: i32, %arg1: memref<2x16xf32, #tpu.memory_space<smem>>) -> (i32, i32) {
    %c0_i32 = arith.constant 0 : i32
    %c0_i32_0 = arith.constant 0 : i32
    %c0_i32_1 = arith.constant 0 : i32
    return %c0_i32, %c0_i32_0 : i32, i32
  }
  func.func @transform_7(%arg0: i32, %arg1: memref<2x16xf32, #tpu.memory_space<smem>>) -> (i32, i32, i32) {
    %c0_i32 = arith.constant 0 : i32
    %c0_i32_0 = arith.constant 0 : i32
    %c0_i32_1 = arith.constant 0 : i32
    %c0_i32_2 = arith.constant 0 : i32
    return %c0_i32, %c0_i32_0, %c0_i32_1 : i32, i32, i32
  }
  func.func @transform_8(%arg0: i32, %arg1: memref<2x16xf32, #tpu.memory_space<smem>>) -> (i32, i32) {
    %c0_i32 = arith.constant 0 : i32
    %c0_i32_0 = arith.constant 0 : i32
    %c0_i32_1 = arith.constant 0 : i32
    return %c0_i32, %c0_i32_0 : i32, i32
  }
  func.func @transform_9(%arg0: i32, %arg1: memref<2x16xf32, #tpu.memory_space<smem>>) -> (i32, i32) {
    %c0_i32 = arith.constant 0 : i32
    %c0_i32_0 = arith.constant 0 : i32
    %c0_i32_1 = arith.constant 0 : i32
    return %c0_i32, %c0_i32_0 : i32, i32
  }
  func.func @transform_10(%arg0: i32, %arg1: memref<2x16xf32, #tpu.memory_space<smem>>) -> (i32, i32) {
    %c0_i32 = arith.constant 0 : i32
    %c0_i32_0 = arith.constant 0 : i32
    %c0_i32_1 = arith.constant 0 : i32
    return %c0_i32, %c0_i32_0 : i32, i32
  }
  func.func @transform_11(%arg0: i32, %arg1: memref<2x16xf32, #tpu.memory_space<smem>>) -> (i32, i32, i32, i32) {
    %c0_i32 = arith.constant 0 : i32
    %c0_i32_0 = arith.constant 0 : i32
    %c0_i32_1 = arith.constant 0 : i32
    %c0_i32_2 = arith.constant 0 : i32
    return %arg0, %c0_i32, %c0_i32_0, %c0_i32_1 : i32, i32, i32, i32
  }
}

</mosaic_0001>

<bundles_post_ra>
// kernel: tpu_custom_call.1
= control target key start
LH: loop header
LB: loop body
LE: loop exit
PB: predicated region body
PF: predicated region fallthrough
CT: control target
= control target key end

     0   :  { %s8736_s21 = smov [#allocation5]   ;;  %s12749_s0 = inlined_call_operand.hbm [shape: f32[2,16], index: 0, kind: input, shape index: {}]   ;;  %s12750_s1 = inlined_call_operand.hbm [shape: f32[2,4,32,96], index: 1, kind: input, shape index: {}]   ;;  %s12751_s2 = inlined_call_operand.hbm [shape: f32[3,96,256], index: 2, kind: input, shape index: {}]   ;;  %s12752_s3 = inlined_call_operand.vmem [shape: f32[1,256], index: 3, kind: input, shape index: {}]   ;;  %s12753_s4 = inlined_call_operand.hbm [shape: f32[3,248,128], index: 4, kind: input, shape index: {}]   ;;  %s12754_s5 = inlined_call_operand.hbm [shape: f32[1,128], index: 5, kind: input, shape index: {}]   ;;  %s12755_s6 = inlined_call_operand.hbm [shape: f32[3,96,256], index: 6, kind: input, shape index: {}]   ;;  %s12756_s7 = inlined_call_operand.hbm [shape: f32[1,256], index: 7, kind: input, shape index: {}]   ;;  %s12757_s8 = inlined_call_operand.hbm [shape: f32[3,248,128], index: 8, kind: input, shape index: {}]   ;;  %s12758_s9 = inlined_call_operand.hbm [shape: f32[1,128], index: 9, kind: input, shape index: {}]   ;;  %s12759_s10 = inlined_call_operand.vmem [shape: f32[16,128], index: 10, kind: input, shape index: {}]   ;;  %s12760_s11 = inlined_call_operand.hbm [shape: f32[16,128], index: 11, kind: input, shape index: {}]   ;;  %s12761_s12 = inlined_call_operand.hbm [shape: f32[2,4,16,128], index: 12, kind: output, shape index: {}]  }
   0x1   :  { %12831 = sst [smem:[#allocation72_spill]] %s12750_s1 }
   0x2   :  { %12832 = sst [smem:[#allocation73_spill]] %s12751_s2 }
   0x3   :  { %12833 = sst [smem:[#allocation74_spill]] %s12753_s4 }
   0x4   :  { %12834 = sst [smem:[#allocation75_spill]] %s12754_s5 }
   0x5   :  { %12835 = sst [smem:[#allocation76_spill]] %s12755_s6 }
   0x6   :  { %12836 = sst [smem:[#allocation77_spill]] %s12756_s7 }
   0x7   :  { %12837 = sst [smem:[#allocation78_spill]] %s12757_s8 }
   0x8   :  { %18 = dma.hbm_to_smem %s12749_s0, 32, %s8736_s21, [#allocation4] }
   0x9   :  { %8694 = dma.done.wait [#allocation4], 32 }
   0xa   :  { %8695 = vsyncadd [#allocation4], 4294967264 }
   0xb   :  { %20 = sfence }
   0xc   :  { %21 = vsyncpa [#allocation7], 0 }
   0xd   :  { %23 = vsyncpa [#allocation7 + $0x1], 0 }
   0xe   :  { %24 = vsyncpa [#allocation10], 0 }
   0xf   :  { %25 = vsyncpa [#allocation13], 0 }
  0x10   :  { %26 = vsyncpa [#allocation16], 0 }
  0x11   :  { %27 = vsyncpa [#allocation19], 0 }
  0x12   :  { %28 = vsyncpa [#allocation8], 0 }
  0x13   :  { %30 = vsyncpa [#allocation8 + $0x1], 0  ;;  %s8824_s24 = smov 0   ;;  %s8826_s25 = smov 0  }
  0x14   :  { %s8828_s26 = smov 0   ;;  %s8830_s27 = smov 0  }
  0x15 LB: > { %s8737_s0 = smov [#allocation9]   ;;  %s8845_s29 = sadd.s32 4294967295, %s8734_s27   ;;  %s8734_s27 = sphi %s8830_s27, %s13036_s27   ;;  %s8730_s26 = sphi %s8828_s26, %s13035_s26   ;;  %s8726_s25 = sphi %s8826_s25, %s13034_s25   ;;  %s8722_s24 = sphi %s8824_s24, %s13033_s24  }
  0x16   : > { %s315_s28 = sshll.u32 %s8737_s0, 4  ;;  %p7883_p0 = scmp.ge.s32.totalorder %s8734_s27, 1  ;;  %s316_s28 = int_to_ptr.vmem [resolvable:$true] %s315_s28 }
  0x17   : > { %p12762_p1 = scmp.eq.s32.totalorder %s8845_s29, 0  ;;  %p303_p2 = scmp.lt.s32.totalorder %s8734_s27, 3 }
  0x18   : > { %s8738_s13 = smov [#allocation12]   ;;  %s8739_s16 = smov [#allocation15]  }
  0x19   : > { %p8850_p3 = pnand %p7883_p0, %p303_p2  ;;  %s345_s14 = sshll.u32 %s8738_s13, 4  ;;  %s346_s14 = int_to_ptr.vmem [resolvable:$true] %s345_s14 }
  0x1a   : > { %s369_s17 = sshll.u32 %s8739_s16, 4  ;;  %s8427_s19 = scalar_lea.vmem %s316_s28, 9216  ;;  %s8863_s17 = int_to_ptr.vmem [resolvable:$true] %s369_s17 }
  0x1b   : > { %s12838_s30 = scalar_select %p8850_p3, 1, 0 }
  0x1c   : > { %p8295_p5 = pneg %p8850_p3  ;;  %p8428_p8 = scmp.ne.s32.totalorder %s316_s28, %s8427_s19 }
  0x1d   : > { %p8435_p11 = scmp.lt.s32.totalorder %s316_s28, %s316_s28  ;;  %p8436_p12 = scmp.lt.s32.totalorder %s8427_s19, %s8427_s19 }
  0x1e   : > { %p8859_p6 = pnand %p8295_p5, %p12762_p1 }
  0x1f   : > { %p8437_p13 = por %p8436_p12, %p8435_p11 }
  0x20   : > { %p8867_p7 = pneg %p8859_p6 }
  0x22   : > { %p8430_p9 = pnand %p8428_p8, %p8867_p7 }
  0x24   : > { %p8431_p10 = pneg %p8430_p9 }
  0x26   : > { %p8438_p0 = pnand %p8437_p13, %p8431_p10 }
  0x28   : > { %8441 = shalt.err (!%p8438_p0)
}
  0x29   : > { %s12764_s20 = smov 256   ;;  %s8741_s21 = smov 16  }
  0x2a   : > { %s12841_s2 = sld [smem:[#allocation73_spill]]  ;;  %s8453_s0 = scalar_lea.vmem %s346_s14, 16 }
  0x2b   : > { %p8454_p2 = scmp.ne.s32.totalorder %s346_s14, %s8453_s0  ;;  %s8460_s13 = scalar_lea.vmem %s346_s14, 32 }
  0x2c   : > { %p8461_p9 = scmp.lt.s32.totalorder %s346_s14, %s346_s14  ;;  %p8462_p10 = scmp.lt.s32.totalorder %s8460_s13, %s8453_s0 }
  0x2d   : > { %p8456_p5 = pnand %p8454_p2, %p8867_p7 }
  0x2e   : > { %p8463_p11 = por %p8462_p10, %p8461_p9 }
  0x2f   : > { %p8457_p8 = pneg %p8456_p5 }
  0x30   : > { %8298 = dma.hbm_to_vmem [thread:$0]  (!%p8859_p6), %s12841_s2, 9216, %s316_s28, [#allocation10], %s12764_s20, %s12764_s20, %s8741_s21  }
  0x31   : > { %p8464_p12 = pnand %p8463_p11, %p8457_p8 }
  0x33   : > { %8467 = shalt.err (!%p8464_p12)
}
  0x34   : > { %s12842_s5 = sld [smem:[#allocation75_spill]]  ;;  %s8479_s28 = scalar_lea.vmem %s8863_s17, 32 }
  0x35   : > { %p8480_p13 = scmp.ne.s32.totalorder %s8863_s17, %s8479_s28  ;;  %p8487_p5 = scmp.lt.s32.totalorder %s8863_s17, %s8863_s17 }
  0x36   : > { %p8488_p9 = scmp.lt.s32.totalorder %s8479_s28, %s8479_s28 }
  0x37   : > { %p8482_p0 = pnand %p8480_p13, %p8867_p7 }
  0x38   : > { %p8489_p8 = por %p8488_p9, %p8487_p5 }
  0x39   : > { %p8483_p2 = pneg %p8482_p0 }
  0x3a   : > { %8304 = dma.hbm_to_vmem [thread:$0]  (!%p8859_p6), %s12842_s5, 16, %s346_s14, [#allocation13]  }
  0x3b   : > { %p8490_p10 = pnand %p8489_p8, %p8483_p2 }
  0x3d   : > { %8493 = shalt.err (!%p8490_p10)
}
  0x3e   : > { %s12843_s7 = sld [smem:[#allocation77_spill]]  ;;  %s8742_s14 = smov [#allocation18]  }
  0x3f   : > { %s393_s0 = sshll.u32 %s8742_s14, 4  ;;  %s8743_s13 = smov [#allocation11]   ;;  %s394_s0 = int_to_ptr.vmem [resolvable:$true] %s393_s0 }
  0x40   : > { %s331_s16 = sshll.u32 %s8743_s13, 4  ;;  %s8505_s19 = scalar_lea.vmem %s394_s0, 16  ;;  %s332_s16 = int_to_ptr.vmem [resolvable:$true] %s331_s16 }
  0x41   : > { %p8506_p11 = scmp.ne.s32.totalorder %s394_s0, %s8505_s19  ;;  %s8512_s28 = scalar_lea.vmem %s394_s0, 32 }
  0x42   : > { %p8513_p0 = scmp.lt.s32.totalorder %s394_s0, %s394_s0  ;;  %p8514_p2 = scmp.lt.s32.totalorder %s8512_s28, %s8505_s19 }
  0x43   : > { %p8508_p12 = pnand %p8506_p11, %p8867_p7 }
  0x44   : > { %8310 = dma.hbm_to_vmem [thread:$0]  (!%p8859_p6), %s12843_s7, 32, %s8863_s17, [#allocation16]  }
  0x45   : > { %p8509_p13 = pneg %p8508_p12  ;;  %p8515_p5 = por %p8514_p2, %p8513_p0 }
  0x47   : > { %p8516_p9 = pnand %p8515_p5, %p8509_p13 }
  0x49   : > { %8519 = shalt.err (!%p8516_p9)
}
  0x4a   : > { %8316 = dma.hbm_to_vmem [thread:$0]  (!%p8859_p6), %s12758_s9, 16, %s394_s0, [#allocation19]  }
  0x4b   : > { %s8531_s23 = scalar_lea.vmem %s332_s16, 11904  ;;  %p8539_p12 = scmp.lt.s32.totalorder %s332_s16, %s332_s16 }
  0x4c   : > { %p8532_p8 = scmp.ne.s32.totalorder %s332_s16, %s8531_s23  ;;  %p8540_p4 = scmp.lt.s32.totalorder %s8531_s23, %s8531_s23 }
  0x4e   : > { %p8534_p10 = pnand %p8532_p8, %p8867_p7  ;;  %p8541_p1 = por %p8540_p4, %p8539_p12 }
  0x50   : > { %p8535_p11 = pneg %p8534_p10 }
  0x52   : > { %p8542_p3 = pnand %p8541_p1, %p8535_p11 }
  0x54   : > { %8545 = shalt.err (!%p8542_p3)
}
  0x55   : > { %s12765_s14 = smov 128   ;;  %s12766_s13 = smov 8  }
  0x56   : > { %s12844_s4 = sld [smem:[#allocation74_spill]]  ;;  %s8746_s28 = smov [#allocation14]  }
  0x57   : > { %s355_s22 = sshll.u32 %s8746_s28, 4  ;;  %s8747_s17 = smov [#allocation17]   ;;  %s356_s22 = int_to_ptr.vmem [resolvable:$true] %s355_s22 }
  0x58   : > { %s379_s23 = sshll.u32 %s8747_s17, 4  ;;  %s8557_s20 = scalar_lea.vmem %s356_s22, 9216  ;;  %s380_s23 = int_to_ptr.vmem [resolvable:$true] %s379_s23 }
  0x59   : > { %p8558_p1 = scmp.ne.s32.totalorder %s356_s22, %s8557_s20  ;;  %p8565_p13 = scmp.lt.s32.totalorder %s356_s22, %s356_s22 }
  0x5a   : > { %p8566_p0 = scmp.lt.s32.totalorder %s8557_s20, %s8557_s20 }
  0x5b   : > { %p8560_p3 = pnand %p8558_p1, %p8867_p7 }
  0x5c   : > { %8301 = dma.hbm_to_vmem [thread:$0]  (!%p8859_p6), %s12844_s4, 11904, %s332_s16, [#allocation10], %s12765_s14, %s12765_s14, %s12766_s13  }
  0x5d   : > { %p8561_p4 = pneg %p8560_p3  ;;  %p8567_p2 = por %p8566_p0, %p8565_p13 }
  0x5f   : > { %p8568_p5 = pnand %p8567_p2, %p8561_p4 }
  0x61   : > { %8571 = shalt.err (!%p8568_p5)
}
  0x62   : > { %s12845_s0 = smov 256   ;;  %s12846_s6 = sld [smem:[#allocation76_spill]] }
  0x63   : > { %s8583_s28 = scalar_lea.vmem %s380_s23, 11904  ;;  %p8591_p11 = scmp.lt.s32.totalorder %s380_s23, %s380_s23 }
  0x64   : > { %p8584_p9 = scmp.ne.s32.totalorder %s380_s23, %s8583_s28  ;;  %p8592_p12 = scmp.lt.s32.totalorder %s8583_s28, %s8583_s28 }
  0x66   : > { %p8586_p8 = pnand %p8584_p9, %p8867_p7  ;;  %p8593_p1 = por %p8592_p12, %p8591_p11 }
  0x68   : > { %8307 = dma.hbm_to_vmem [thread:$0]  (!%p8859_p6), %s12846_s6, 9216, %s356_s22, [#allocation13], %s12845_s0, %s12845_s0, %s8741_s21  }
  0x69   : > { %p8587_p10 = pneg %p8586_p8 }
  0x6b   : > { %p8594_p3 = pnand %p8593_p1, %p8587_p10 }
  0x6d   : > { %8597 = shalt.err (!%p8594_p3)
}
  0x6e   : > { %s12847_s8 = sld [smem:[#allocation78_spill]]  ;;  %s8748_s21 = smov [#allocation20]  }
  0x6f   : > { %s406_s22 = sshll.u32 %s8748_s21, 4  ;;  %s407_s22 = int_to_ptr.vmem [resolvable:$true] %s406_s22 }
  0x70   : > { %s8609_s0 = scalar_lea.vmem %s407_s22, 256  ;;  %p8617_p2 = scmp.lt.s32.totalorder %s407_s22, %s407_s22 }
  0x71   : > { %p8610_p4 = scmp.ne.s32.totalorder %s407_s22, %s8609_s0  ;;  %p8618_p5 = scmp.lt.s32.totalorder %s8609_s0, %s8609_s0 }
  0x73   : > { %p8612_p13 = pnand %p8610_p4, %p8867_p7  ;;  %p8619_p9 = por %p8618_p5, %p8617_p2 }
  0x74   : > { %8313 = dma.hbm_to_vmem [thread:$0]  (!%p8859_p6), %s12847_s8, 11904, %s380_s23, [#allocation16], %s12765_s14, %s12765_s14, %s12766_s13  }
  0x75   : > { %p8613_p0 = pneg %p8612_p13 }
  0x77   : > { %p8620_p8 = pnand %p8619_p9, %p8613_p0 }
  0x79   : > { %8623 = shalt.err (!%p8620_p8)
}
  0x7a   : > { %8319 = dma.hbm_to_vmem [thread:$0]  (!%p8859_p6), %s12760_s11, 256, %s407_s22, [#allocation19], %s12765_s14, %s12765_s14, %s12766_s13  }
  0x7b   : > { %s7882_s15 = sadd.s32 4294967294, %s8734_s27   ;;  %s8949_s18 = sadd.s32 1, %s8734_s27  }
  0x7c   : > { %s40_s19 = ssub.s32 %s8734_s27, %s8949_s18  ;;  %s43_s28 = sadd.s32 1, %s8730_s26 }
  0x7d   : > { %p41_p7 = scmp.eq.s32.totalorder %s40_s19, 0  ;;  %p50_p10 = scmp.ne.s32.totalorder %s8730_s26, %s8726_s25 }
  0x7e   : > { %p51_p11 = scmp.eq.s32.totalorder %s8734_s27, 0  ;;  %p56_p12 = scmp.ne.s32.totalorder %s8726_s25, %s8722_s24 }
  0x7f   : > { %s8960_s20 = scalar_select %p41_p7, %s8730_s26, %s43_s28  }
  0x80   : > { %p8962_p1 = por %p51_p11, %p50_p10  ;;  %p12849_p3 = scmp.eq.s32.totalorder %s8845_s29, 0 }
  0x81   : > { %p290_p4 = scmp.eq.s32.totalorder %s8845_s29, 1  ;;  %p296_p13 = scmp.eq.s32.totalorder %s7882_s15, 1 }
  0x82   : > { %p8968_p6 = por %p12849_p3, %p56_p12  ;;  %p8336_p0 = scmp.lt.s32.totalorder %s8734_s27, 2 }
  0x83   : > { %s420_s22 = sand.u32 1, %s8730_s26   ;;  %p8975_p2 = por %p290_p4, %p50_p10 }
  0x84   : > { %s12850_s21 = scalar_select %p8968_p6, 1, 0 }
  0x85   : > { %s12851_s0 = scalar_select %p8975_p2, 1, 0 }
  0x86   : > { %p8979_p5 = por %p296_p13, %p56_p12  ;;  %s7893_s23 = sshll.u32 %s420_s22, 7 }
  0x87   : > { %s8241_s19 = sshll.u32 %s8734_s27, 11  ;;  %s12853_s1 = sld [smem:[#allocation72_spill]] }
  0x88   : > { %s12852_s16 = scalar_select %p8979_p5, 1, 0 }
  0x89   : > { %s424_s15 = scalar_lea.vmem [#allocation6], %s7893_s23  ;;  %p8993_p9 = pnand %p8336_p0, %p8962_p1 }
  0x8a   : > { %s431_s2 = sshll.u32 %s424_s15, 4  ;;  %s8997_s5 = scalar_lea.sflag [#allocation7], %s420_s22  ;;  %s8989_s2 = int_to_ptr.vmem [resolvable:$true] %s431_s2 }
  0x8b   : > { %p8626_p7 = pneg %p8993_p9 }
  0x8d   : > { %s8987_s13 = scalar_lea.hbm %s12853_s1, %s8241_s19  ;;  %s8629_s23 = scalar_lea.hbm %s12853_s1, 4096 }
  0x8e   : > { %s8624_s6 = scalar_lea.hbm %s8987_s13, 2048  ;;  %p8630_p12 = scmp.lt.s32.totalorder %s8987_s13, %s12853_s1 }
  0x8f   : > { %p8625_p8 = scmp.ne.s32.totalorder %s8987_s13, %s8624_s6  ;;  %p8631_p1 = scmp.lt.s32.totalorder %s8629_s23, %s8624_s6 }
  0x91   : > { %p8627_p10 = pnand %p8626_p7, %p8625_p8  ;;  %p8632_p3 = por %p8631_p1, %p8630_p12 }
  0x93   : > { %p8628_p11 = pneg %p8627_p10 }
  0x95   : > { %p8633_p4 = pnand %p8632_p3, %p8628_p11 }
  0x97   : > { %8636 = shalt.err (!%p8633_p4)
}
  0x98   : > { %s8637_s17 = scalar_lea.vmem %s8989_s2, 2048  ;;  %s8749_s22 = smov [#allocation6]  }
  0x99   : > { %p8638_p13 = scmp.ne.s32.totalorder %s8989_s2, %s8637_s17  ;;  %s8642_s7 = sshll.u32 %s8749_s22, 4  ;;  %s8643_s7 = int_to_ptr.vmem [resolvable:$false] %s8642_s7 }
  0x9a   : > { %s8644_s14 = scalar_lea.vmem %s8643_s7, 4096  ;;  %p8645_p10 = scmp.lt.s32.totalorder %s8989_s2, %s8643_s7 }
  0x9b   : > { %p8640_p0 = pnand %p8638_p13, %p8626_p7  ;;  %p8646_p5 = scmp.lt.s32.totalorder %s8644_s14, %s8637_s17 }
  0x9d   : > { %p8641_p8 = pneg %p8640_p0  ;;  %p8647_p2 = por %p8646_p5, %p8645_p10 }
  0x9f   : > { %p8648_p6 = pnand %p8647_p2, %p8641_p8 }
  0xa1   : > { %8651 = shalt.err (!%p8648_p6)
}
  0xa2   : > { %s12855_s6 = smov 8   ;;  %s12856_s19 = smov 128  }
  0xa3   : > { %8323 = dma.hbm_to_vmem [thread:$0]  (!%p8993_p9), %s8987_s13, 2048, %s8989_s2, %s8997_s5, %s12856_s19, %s12856_s19, %s12855_s6  }
  0xa4   : > { %p12857_p7 = scmp.ne.s32.totalorder %s12838_s30, 0 }
  0xa6   : > { %443 = sbr.rel (%p12857_p7) target bundleno = 2635 (0xa4b), region = 64 }
  0xab   : > { %s9024_s23 = sand.u32 1, %s8726_s25   ;;  %p12858_p6 = scmp.ne.s32.totalorder %s12850_s21, 0 }
  0xac   : > { %s7897_s7 = sshll.u32 %s9024_s23, 7  ;;  %s446_s28 = scalar_lea.sflag [#allocation7], %s9024_s23 }
  0xad   : > { %s9028_s15 = scalar_lea.vmem [#allocation6], %s7897_s7 }
  0xae   : > { %8697 = dma.done.wait (%p12858_p6), %s446_s28, 2048  }
  0xaf   : > { %8699 = vsyncadd (%p12858_p6), %s446_s28, 4294965248  ;;  %p12859_p2 = scmp.eq.s32.totalorder %s8845_s29, 0 }
  0xb1   : > { %8701 = dma.done.wait (%p12859_p2), [#allocation10], 21120   ;;  %p12860_p5 = pmov %p12859_p2 }
  0xb2   : > { %p12861_p9 = pmov %p12859_p2 }
  0xb3   : > { %8703 = vsyncadd (%p12860_p5), [#allocation10], 4294946176 }
  0xb4   : > { %8705 = dma.done.wait (%p12861_p9), [#allocation13], 9232   ;;  %p12862_p11 = pmov %p12859_p2 }
  0xb5   : > { %p12863_p12 = pmov %p12859_p2 }
  0xb6   : > { %8707 = vsyncadd (%p12862_p11), [#allocation13], 4294958064 }
  0xb7   : > { %8709 = dma.done.wait (%p12863_p12), [#allocation16], 11936   ;;  %p12864_p1 = pmov %p12859_p2 }
  0xb9   : > { %8711 = vsyncadd (%p12864_p1), [#allocation16], 4294955360  ;;  %p12865_p3 = pmov %p12864_p1 }
  0xba   : > { %p12866_p4 = pmov %p12864_p1 }
  0xbb   : > { %8713 = dma.done.wait (%p12865_p3), [#allocation19], 272  }
  0xbc   : > { %8715 = vsyncadd (%p12866_p4), [#allocation19], 4294967024  ;;  %vm520_vm0 = vcmask 778240   ;;  %v12770_v0 = vmov 0.0   ;;  %s9061_s2 = sshll.u32 %s8845_s29, 7  ;;  %v883_v1 = vld [vmem:[#allocation14 + $0x178] sm:$0xff] }
  0xbd   : > { %996 = vmatprep.mubr.f32.mxu0 %v12770_v0  ;;  %1205 = vmatprep.mubr.f32.mxu1 %v12770_v0  ;;  %521 = vst.msk [vmem:[#allocation2] sm:$0x1] %vm520_vm0, %v12770_v0  ;;  %522 = vst.msk [vmem:[#allocation2 + $0x28] sm:$0x1] %vm520_vm0, %v12770_v0  ;;  %v842_v2 = vld [vmem:[#allocation14 + $0xb8] sm:$0xff]  ;;  %v882_v3 = vld [vmem:[#allocation14 + $0x170] sm:$0xff] }
  0xbe   : > { %523 = vst.msk [vmem:[#allocation2 + $0x50] sm:$0x1] %vm520_vm0, %v12770_v0  ;;  %524 = vst.msk [vmem:[#allocation2 + $0x78] sm:$0x1] %vm520_vm0, %v12770_v0  ;;  %s567_s4 = sadd.s32 1, %s9061_s2  ;;  %940 = vmatprep.subr.mxu0 %v883_v1  ;;  %1149 = vmatprep.subr.mxu1 %v842_v2  ;;  %v841_v4 = vld [vmem:[#allocation14 + $0xb0] sm:$0xff] }
  0xbf   : > { %525 = vst.msk [vmem:[#allocation2 + $0x21] sm:$0x1] %vm520_vm0, %v12770_v0  ;;  %526 = vst.msk [vmem:[#allocation2 + $0x49] sm:$0x1] %vm520_vm0, %v12770_v0  ;;  %v881_v5 = vld [vmem:[#allocation14 + $0x168] sm:$0xff]  ;;  %s583_s5 = sadd.s32 2, %s9061_s2  ;;  %941 = vmatpush1.msra.mxu0 %v882_v3  ;;  %1150 = vmatpush1.msra.mxu1 %v841_v4 }
  0xc0   : > { %527 = vst.msk [vmem:[#allocation2 + $0x71] sm:$0x1] %vm520_vm0, %v12770_v0  ;;  %528 = vst.msk [vmem:[#allocation2 + $0x99] sm:$0x1] %vm520_vm0, %v12770_v0  ;;  %v840_v6 = vld [vmem:[#allocation14 + $0xa8] sm:$0xff]  ;;  %v880_v7 = vld [vmem:[#allocation14 + $0x160] sm:$0xff]  ;;  %942 = vmatprep.subr.mxu0 %v881_v5 }
  0xc1   : > { %v839_v8 = vld [vmem:[#allocation14 + $0xa0] sm:$0xff]  ;;  %v879_v9 = vld [vmem:[#allocation14 + $0x158] sm:$0xff]  ;;  %s9066_s30 = sld [smem:[#allocation5 + %s9061_s2]]  ;;  %s599_s13 = sadd.s32 3, %s9061_s2  ;;  %1151 = vmatprep.subr.mxu1 %v840_v6  ;;  %v878_v11 = vld [vmem:[#allocation14 + $0x150] sm:$0xff]  ;;  %943 = vmatpush1.msra.mxu0 %v880_v7  ;;  %vm615_vm1 = vcmask 785408  }
  0xc2   : > { %v838_v10 = vld [vmem:[#allocation14 + $0x98] sm:$0xff]  ;;  %v837_v12 = vld [vmem:[#allocation14 + $0x90] sm:$0xff]  ;;  %s9069_s21 = sld [smem:[#allocation5 + %s567_s4]]  ;;  %s620_s17 = sadd.s32 4, %s9061_s2  ;;  %1152 = vmatpush1.msra.mxu1 %v839_v8  ;;  %v877_v13 = vld [vmem:[#allocation14 + $0x148] sm:$0xff]  ;;  %944 = vmatprep.subr.mxu0 %v879_v9  ;;  %vm2556_vm3 = vcmask 982016  }
  0xc3   : > { %v836_v14 = vld [vmem:[#allocation14 + $0x88] sm:$0xff]  ;;  %s9072_s22 = sld [smem:[#allocation5 + %s583_s5]]  ;;  %s631_s14 = sadd.s32 5, %s9061_s2  ;;  %1153 = vmatprep.subr.mxu1 %v838_v10  ;;  %v876_v15 = vld [vmem:[#allocation14 + $0x140] sm:$0xff]  ;;  %945 = vmatpush1.msra.mxu0 %v878_v11  ;;  %v875_v17 = vld [vmem:[#allocation14 + $0x138] sm:$0xff]  ;;  %vm3325_vm4 = vcmask 1042434  }
  0xc4   : > { %v835_v16 = vld [vmem:[#allocation14 + $0x80] sm:$0xff]  ;;  %s9075_s6 = sld [smem:[#allocation5 + %s599_s13]]  ;;  %1154 = vmatpush1.msra.mxu1 %v837_v12  ;;  %v834_v18 = vld [vmem:[#allocation14 + $0x78] sm:$0xff]  ;;  %946 = vmatprep.subr.mxu0 %v877_v13  ;;  %v874_v19 = vld [vmem:[#allocation14 + $0x130] sm:$0xff]  ;;  %s646_s28 = sadd.s32 6, %s9061_s2  ;;  %vm3343_vm5 = vcmask 1041409  }
  0xc5   : > { %s9077_s19 = sld [smem:[#allocation5 + %s620_s17]]  ;;  %1155 = vmatprep.subr.mxu1 %v836_v14  ;;  %v833_v20 = vld [vmem:[#allocation14 + $0x70] sm:$0xff]  ;;  %947 = vmatpush1.msra.mxu0 %v876_v15  ;;  %v873_v21 = vld [vmem:[#allocation14 + $0x128] sm:$0xff]  ;;  %v872_v23 = vld [vmem:[#allocation14 + $0x120] sm:$0xff]  ;;  %s661_s4 = sadd.s32 7, %s9061_s2  ;;  %vm3327_vm6 = vcmask 1043459  }
  0xc6   : > { %s9079_s7 = sld [smem:[#allocation5 + %s631_s14]]  ;;  %1156 = vmatpush1.msra.mxu1 %v835_v16  ;;  %v832_v22 = vld [vmem:[#allocation14 + $0x68] sm:$0xff]  ;;  %948 = vmatprep.subr.mxu0 %v875_v17  ;;  %v831_v24 = vld [vmem:[#allocation14 + $0x60] sm:$0xff]  ;;  %v871_v25 = vld [vmem:[#allocation14 + $0x118] sm:$0xff]  ;;  %s681_s5 = sadd.s32 8, %s9061_s2  ;;  %vm3329_vm7 = vcmask 1044484  }
  0xc7   : > { %1157 = vmatprep.subr.mxu1 %v834_v18  ;;  %949 = vmatpush1.msra.mxu0 %v874_v19  ;;  %v830_v26 = vld [vmem:[#allocation14 + $0x58] sm:$0xff]  ;;  %v870_v27 = vld [vmem:[#allocation14 + $0x110] sm:$0xff]  ;;  %s9084_s13 = sld [smem:[#allocation5 + %s646_s28]]  ;;  %s692_s17 = sadd.s32 9, %s9061_s2  ;;  %v869_v29 = vld [vmem:[#allocation14 + $0x108] sm:$0xff]  ;;  %v9094_v38 = vstv %s9066_s30  ;;  %vm3331_vm8 = vcmask 1045509  }
  0xc8   : > { %1158 = vmatpush1.msra.mxu1 %v833_v20  ;;  %950 = vmatprep.subr.mxu0 %v873_v21  ;;  %v829_v28 = vld [vmem:[#allocation14 + $0x50] sm:$0xff]  ;;  %v828_v30 = vld [vmem:[#allocation14 + $0x48] sm:$0xff]  ;;  %v868_v31 = vld [vmem:[#allocation14 + $0x100] sm:$0xff]  ;;  %s9087_s14 = sld [smem:[#allocation5 + %s661_s4]]  ;;  %s707_s1 = sadd.s32 10, %s9061_s2  ;;  %v9097_v39 = vstv %s9069_s21  ;;  %vm3333_vm9 = vcmask 1046534  }
  0xc9   : > { %1159 = vmatprep.subr.mxu1 %v832_v22  ;;  %951 = vmatpush1.msra.mxu0 %v872_v23  ;;  %v827_v32 = vld [vmem:[#allocation14 + $0x40] sm:$0xff]  ;;  %v867_v33 = vld [vmem:[#allocation14 + $0xf8] sm:$0xff]  ;;  %s9090_s8 = sld [smem:[#allocation5 + %s681_s5]]  ;;  %s722_s28 = sadd.s32 11, %s9061_s2  ;;  %v866_v35 = vld [vmem:[#allocation14 + $0xf0] sm:$0xff]  ;;  %v9100_v40 = vstv %s9072_s22  ;;  %vm3335_vm10 = vcmask 1047559  }
  0xca   : > { %1160 = vmatpush1.msra.mxu1 %v831_v24  ;;  %952 = vmatprep.subr.mxu0 %v871_v25  ;;  %v826_v34 = vld [vmem:[#allocation14 + $0x38] sm:$0xff]  ;;  %v825_v36 = vld [vmem:[#allocation14 + $0x30] sm:$0xff]  ;;  %v865_v37 = vld [vmem:[#allocation14 + $0xe8] sm:$0xff]  ;;  %s9102_s4 = sld [smem:[#allocation5 + %s692_s17]]  ;;  %v9105_v44 = vstv %s9075_s6  ;;  %s768_s22 = sadd.s32 14, %s9061_s2  ;;  %vm3461_vm11 = vcmask 982017  }
  0xcb   : > { %1161 = vmatprep.subr.mxu1 %v830_v26  ;;  %953 = vmatpush1.msra.mxu0 %v870_v27  ;;  %v824_v41 = vld [vmem:[#allocation14 + $0x28] sm:$0xff]  ;;  %v864_v42 = vld [vmem:[#allocation14 + $0xe0] sm:$0xff]  ;;  %v9108_v45 = vstv %s9077_s19  ;;  %s9113_s30 = sld [smem:[#allocation5 + %s707_s1]]  ;;  %v863_v47 = vld [vmem:[#allocation14 + $0xd8] sm:$0xff]  ;;  %s742_s1 = sadd.s32 12, %s9061_s2  ;;  %vm3466_vm12 = vcmask 974848  }
  0xcc   : > { %1162 = vmatpush1.msra.mxu1 %v829_v28  ;;  %954 = vmatprep.subr.mxu0 %v869_v29  ;;  %v823_v43 = vld [vmem:[#allocation14 + $0x20] sm:$0xff]  ;;  %v9111_v46 = vstv %s9079_s7  ;;  %v822_v48 = vld [vmem:[#allocation14 + $0x18] sm:$0xff]  ;;  %s9124_s21 = sld [smem:[#allocation5 + %s722_s28]]  ;;  %v862_v52 = vld [vmem:[#allocation14 + $0xd0] sm:$0xff]  ;;  %s783_s19 = sadd.s32 15, %s9061_s2  ;;  %vm3573_vm13 = vcmask 1046528  }
  0xcd   : > { %1163 = vmatprep.subr.mxu1 %v828_v30  ;;  %955 = vmatpush1.msra.mxu0 %v868_v31  ;;  %v9116_v49 = vld [vmem:[%s9028_s15] sm:$0xff]  ;;  %v861_v58 = vld [vmem:[#allocation14 + $0xc8] sm:$0xff]  ;;  %v9138_v61 = vld [vmem:[%s9028_s15 + $0x8] sm:$0xff]  ;;  %v9158_v9 = vstv %s9084_s13  ;;  %s9252_s7 = sld [smem:[#allocation5 + %s768_s22]]  ;;  %s8752_s5 = smov 120   ;;  %vm3932_vm14 = vcmask 1045504  }
  0xce   : > { %1164 = vmatpush1.msra.mxu1 %v827_v32  ;;  %v9119_v50 = vld [vmem:[%s9028_s15 + $0x20] sm:$0xff]  ;;  %956 = vmatprep.subr.mxu0 %v867_v33  ;;  %v563_v54 = vmul.f32 %v9094_v38, %v9116_v49  ;;  %v820_v59 = vld [vmem:[#allocation14 + $0x8] sm:$0xff]  ;;  %v9141_v62 = vld [vmem:[%s9028_s15 + $0x28] sm:$0xff]  ;;  %v627_v1 = vmul.f32 %v9108_v45, %v9116_v49  ;;  %v564_v6 = vmul.f32 %v9094_v38, %v9138_v61  ;;  %v9174_v16 = vstv %s9087_s14  ;;  %s8242_s13 = sshll.u32 %s8845_s29, 10  ;;  %s7720_s29 = scalar_lea.sflag [#allocation8], %s9024_s23 }
  0xcf   : > { %v9122_v51 = vld [vmem:[%s9028_s15 + $0x40] sm:$0xff]  ;;  %1165 = vmatprep.subr.mxu1 %v826_v34  ;;  %v575_v55 = vmul.f32 %v9119_v50, %v9097_v39  ;;  %957 = vmatpush1.msra.mxu0 %v866_v35  ;;  %v9144_v63 = vld [vmem:[%s9028_s15 + $0x48] sm:$0xff]  ;;  %v638_v2 = vmul.f32 %v9119_v50, %v9111_v46  ;;  %v576_v7 = vmul.f32 %v9141_v62, %v9097_v39  ;;  %v9165_v12 = vld [vmem:[%s9028_s15 + $0x10] sm:$0xff]  ;;  %v9185_v23 = vstv %s9090_s8  ;;  %s753_s8 = sadd.s32 13, %s9061_s2  ;;  %s9257_s2 = sld [smem:[#allocation5 + %s783_s19]] }
  0xd0   : > { %v821_v53 = vld [vmem:[#allocation14 + $0x10] sm:$0xff]  ;;  %v591_v56 = vmul.f32 %v9122_v51, %v9100_v40  ;;  %1166 = vmatpush1.msra.mxu1 %v825_v36  ;;  %958 = vmatprep.subr.mxu0 %v865_v37  ;;  %v860_v3 = vld [vmem:[#allocation14 + $0xc0] sm:$0xff]  ;;  %v592_v10 = vmul.f32 %v9144_v63, %v9100_v40  ;;  %v1342_v18 = vld [vmem:[#allocation14 + $0x238] sm:$0xff]  ;;  %v565_v20 = vmul.f32 %v9094_v38, %v9165_v12  ;;  %v9203_v30 = vstv %s9102_s4  ;;  %s9241_s6 = sld [smem:[#allocation5 + %s753_s8]]  ;;  %p13030_p0 = scmp.ne.s32.totalorder %s12851_s0, 0 }
  0xd1   : > { %v9133_v57 = vld [vmem:[%s9028_s15 + $0x60] sm:$0xff]  ;;  %1167 = vmatprep.subr.mxu1 %v824_v41  ;;  %v819_v4 = vld [vmem:[#allocation14] sm:$0xff]  ;;  %v579_v5 = vadd.f32 %v575_v55, %v563_v54  ;;  %959 = vmatpush1.msra.mxu0 %v864_v42  ;;  %v642_v15 = vadd.f32 %v638_v2, %v627_v1  ;;  %v580_v19 = vadd.f32 %v576_v7, %v564_v6  ;;  %v9182_v22 = vld [vmem:[%s9028_s15 + $0x18] sm:$0xff]  ;;  %v9208_v34 = vstv %s9113_s30 }
  0xd2   : > { %v607_v60 = vmul.f32 %v9133_v57, %v9105_v44  ;;  %v9155_v8 = vld [vmem:[%s9028_s15 + $0x68] sm:$0xff]  ;;  %1168 = vmatpush1.msra.mxu1 %v823_v43  ;;  %v9168_v13 = vld [vmem:[%s9028_s15 + $0x30] sm:$0xff]  ;;  %960 = vmatprep.subr.mxu0 %v863_v47  ;;  %v9194_v27 = vld [vmem:[%s9028_s15 + $0x38] sm:$0xff]  ;;  %v566_v33 = vmul.f32 %v9094_v38, %v9182_v22  ;;  %v9216_v41 = vstv %s9124_s21  ;;  %v653_v43 = vmul.f32 %v9122_v51, %v9158_v9  ;;  %s8753_s21 = smov [#allocation21]  }
  0xd3   : > { %v608_v11 = vmul.f32 %v9155_v8, %v9105_v44  ;;  %v9171_v14 = vld [vmem:[%s9028_s15 + $0x50] sm:$0xff]  ;;  %1169 = vmatprep.subr.mxu1 %v822_v48  ;;  %v595_v17 = vadd.f32 %v591_v56, %v579_v5  ;;  %961 = vmatpush1.msra.mxu0 %v862_v52  ;;  %v577_v24 = vmul.f32 %v9168_v13, %v9097_v39  ;;  %v9197_v28 = vld [vmem:[%s9028_s15 + $0x58] sm:$0xff] }
  0xd4   : > { %v9179_v21 = vld [vmem:[%s9028_s15 + $0x70] sm:$0xff]  ;;  %1170 = vmatpush1.msra.mxu1 %v821_v53  ;;  %v593_v25 = vmul.f32 %v9171_v14, %v9100_v40  ;;  %v9200_v29 = vld [vmem:[%s9028_s15 + $0x78] sm:$0xff]  ;;  %962 = vmatprep.subr.mxu0 %v861_v58  ;;  %v596_v32 = vadd.f32 %v592_v10, %v580_v19  ;;  %v578_v36 = vmul.f32 %v9194_v27, %v9097_v39  ;;  %s9230_s15 = sld [smem:[#allocation5 + %s742_s1]]  ;;  %s8656_s1 = sshll.u32 %s8753_s21, 4  ;;  %s8657_s1 = int_to_ptr.vmem [resolvable:$false] %s8656_s1 }
  0xd5   : > { %v609_v26 = vmul.f32 %v9179_v21, %v9105_v44  ;;  %1171 = vmatprep.subr.mxu1 %v820_v59  ;;  %v611_v31 = vadd.f32 %v607_v60, %v595_v17  ;;  %963 = vmatpush1.msra.mxu0 %v860_v3  ;;  %v581_v35 = vadd.f32 %v577_v24, %v565_v20  ;;  %s8658_s8 = scalar_lea.vmem %s8657_s1, 2048 }
  0xd6   : > { %1172 = vmatpush1.msra.mxu1 %v819_v4  ;;  %v594_v37 = vmul.f32 %v9197_v28, %v9100_v40  ;;  %1399 = vmatprep.subr.mxu0 %v1342_v18  ;;  %v612_v38 = vadd.f32 %v608_v11, %v596_v32  ;;  %v610_v42 = vmul.f32 %v9200_v29, %v9105_v44  ;;  %v1341_v11 = vld [vmem:[#allocation14 + $0x230] sm:$0xff] }
  0xd7   : > { %616 = vst.msk [vmem:[#allocation2 + $0x1] sm:$0xff] %vm615_vm1, %v611_v31  ;;  %v668_v39 = vmul.f32 %v9133_v57, %v9174_v16  ;;  %v597_v47 = vadd.f32 %v593_v25, %v581_v35  ;;  %v582_v48 = vadd.f32 %v578_v36, %v566_v33  ;;  %v628_v40 = vmul.f32 %v9108_v45, %v9138_v61 }
  0xd8   : > { %v639_v52 = vmul.f32 %v9141_v62, %v9111_v46  ;;  %3670 = vmatprep.subr.mxu1 %v12770_v0  ;;  %617 = vst.msk [vmem:[#allocation2 + $0x9] sm:$0xff] %vm615_vm1, %v612_v38  ;;  %v657_v44 = vadd.f32 %v653_v43, %v642_v15  ;;  %v654_v53 = vmul.f32 %v9144_v63, %v9158_v9 }
  0xd9   : > { %v669_v54 = vmul.f32 %v9155_v8, %v9174_v16  ;;  %v629_v55 = vmul.f32 %v9108_v45, %v9165_v12  ;;  %v613_v56 = vadd.f32 %v609_v26, %v597_v47  ;;  %v598_v58 = vadd.f32 %v594_v37, %v582_v48 }
  0xda   : > { %v643_v59 = vadd.f32 %v639_v52, %v628_v40  ;;  %v640_v60 = vmul.f32 %v9168_v13, %v9111_v46  ;;  %v672_v1 = vadd.f32 %v668_v39, %v657_v44  ;;  %v655_v2 = vmul.f32 %v9171_v14, %v9158_v9  ;;  %v1338_v44 = vld [vmem:[#allocation14 + $0x218] sm:$0xff] }
  0xdb   : > { %v670_v3 = vmul.f32 %v9179_v21, %v9174_v16  ;;  %v630_v4 = vmul.f32 %v9108_v45, %v9182_v22  ;;  %618 = vst.msk [vmem:[#allocation2 + $0x11] sm:$0xff] %vm615_vm1, %v613_v56  ;;  %v614_v5 = vadd.f32 %v610_v42, %v598_v58  ;;  %v641_v10 = vmul.f32 %v9194_v27, %v9111_v46  ;;  %v1340_v46 = vld [vmem:[#allocation14 + $0x228] sm:$0xff] }
  0xdc   : > { %v658_v6 = vadd.f32 %v654_v53, %v643_v59  ;;  %v644_v7 = vadd.f32 %v640_v60, %v629_v55  ;;  %677 = vst.msk [vmem:[#allocation2 + $0x29] sm:$0xff] %vm615_vm1, %v672_v1  ;;  %v656_v15 = vmul.f32 %v9197_v28, %v9158_v9  ;;  %v671_v45 = vmul.f32 %v9200_v29, %v9174_v16  ;;  %v1339_v16 = vld [vmem:[#allocation14 + $0x220] sm:$0xff]  ;;  %v1337_v59 = vld [vmem:[#allocation14 + $0x210] sm:$0xff] }
  0xdd   : > { %v688_v17 = vmul.f32 %v9185_v23, %v9116_v49  ;;  %v699_v18 = vmul.f32 %v9119_v50, %v9203_v30  ;;  %619 = vst.msk [vmem:[#allocation2 + $0x19] sm:$0xff] %vm615_vm1, %v614_v5  ;;  %v645_v26 = vadd.f32 %v641_v10, %v630_v4  ;;  %v714_v9 = vmul.f32 %v9122_v51, %v9208_v34 }
  0xde   : > { %v843_v19 = vld [vmem:[#allocation2 + $0x1] sm:$0xff]  ;;  %v673_v24 = vadd.f32 %v669_v54, %v658_v6  ;;  %v659_v25 = vadd.f32 %v655_v2, %v644_v7  ;;  %v729_v32 = vmul.f32 %v9133_v57, %v9216_v41  ;;  %v689_v33 = vmul.f32 %v9185_v23, %v9138_v61  ;;  %v1336_v6 = vld [vmem:[#allocation14 + $0x208] sm:$0xff] }
  0xdf   : > { %v803_v20 = vld [vmem:[#allocation2] sm:$0xff]  ;;  %7956 = vmatmul.mubr.msk.f32.vlgmr.msra.gmra.mxu0 %vm615_vm1, %v843_v19  ;;  %v703_v31 = vadd.f32 %v699_v18, %v688_v17  ;;  %v844_v35 = vld [vmem:[#allocation2 + $0x9] sm:$0xff]  ;;  %v660_v38 = vadd.f32 %v656_v15, %v645_v26  ;;  %v700_v42 = vmul.f32 %v9141_v62, %v9203_v30  ;;  %v9282_v43 = vstv %s9230_s15  ;;  %s7906_s15 = sshll.u32 %s9024_s23, 6 }
  0xe0   : > { %7972 = vmatmul.mubr.msk.f32.vlgmr.msra.gmra.mxu1 %vm615_vm1, %v803_v20  ;;  %1400 = vmatpush1.msra.mxu0 %v1341_v11  ;;  %v804_v36 = vld [vmem:[#allocation2 + $0x8] sm:$0xff]  ;;  %678 = vst.msk [vmem:[#allocation2 + $0x31] sm:$0xff] %vm615_vm1, %v673_v24  ;;  %v674_v37 = vadd.f32 %v670_v3, %v659_v25  ;;  %v715_v48 = vmul.f32 %v9144_v63, %v9208_v34  ;;  %v9292_v52 = vstv %s9241_s6  ;;  %v9308_v3 = vstv %s9252_s7  ;;  %s12673_s22 = scalar_lea.vmem [#allocation21], %s7906_s15 }
  0xe1   : > { %1002 = vmatprep.mubr.f32.mxu0 %v12770_v0  ;;  %v9284_v39 = vld [vmem:[#allocation2 + $0x2] sm:$0xff]  ;;  %1211 = vmatprep.mubr.f32.mxu1 %v12770_v0  ;;  %v718_v47 = vadd.f32 %v714_v9, %v703_v31  ;;  %v730_v40 = vmul.f32 %v9155_v8, %v9216_v41  ;;  %v675_v53 = vadd.f32 %v671_v45, %v660_v38  ;;  %v9318_v15 = vstv %s9257_s2  ;;  %v1335_v17 = vld [vmem:[#allocation14 + $0x200] sm:$0xff]  ;;  %s7733_s17 = sshll.u32 %s12673_s22, 4  ;;  %s12704_s17 = int_to_ptr.vmem [resolvable:$true] %s7733_s17 }
  0xe2   : > { %1401 = vmatprep.subr.mxu0 %v1340_v46  ;;  %4173 = vst.msk [vmem:[#allocation2 + $0x1] sm:$0xff] %vm615_vm1, %v9116_v49  ;;  %679 = vst.msk [vmem:[#allocation2 + $0x39] sm:$0xff] %vm615_vm1, %v674_v37  ;;  %v704_v54 = vadd.f32 %v700_v42, %v689_v33  ;;  %v690_v55 = vmul.f32 %v9185_v23, %v9165_v12  ;;  %v701_v56 = vmul.f32 %v9168_v13, %v9203_v30  ;;  %v805_v58 = vld [vmem:[#allocation2 + $0x10] sm:$0xff]  ;;  %s8652_s30 = scalar_lea.vmem %s12704_s17, 1024  ;;  %p8659_p7 = scmp.lt.s32.totalorder %s12704_s17, %s8657_s1 }
  0xe3   : > { %1402 = vmatpush1.msra.mxu0 %v1339_v16  ;;  %v733_v60 = vadd.f32 %v729_v32, %v718_v47  ;;  %v716_v1 = vmul.f32 %v9171_v14, %v9208_v34  ;;  %v731_v2 = vmul.f32 %v9179_v21, %v9216_v41  ;;  %v9310_v4 = vld [vmem:[#allocation2 + $0xa] sm:$0xff]  ;;  %680 = vst.msk [vmem:[#allocation2 + $0x41] sm:$0xff] %vm615_vm1, %v675_v53  ;;  %p8653_p13 = scmp.ne.s32.totalorder %s12704_s17, %s8652_s30  ;;  %p8660_p6 = scmp.lt.s32.totalorder %s8658_s8, %s8652_s30 }
  0xe4   : > { %7957 = vmatmul.mubr.msk.f32.gmra.mxu0 %vm615_vm1, %v844_v35  ;;  %7973 = vmatmul.mubr.msk.f32.gmra.mxu1 %vm615_vm1, %v804_v36  ;;  %v845_v5 = vld [vmem:[#allocation2 + $0x11] sm:$0xff]  ;;  %v719_v7 = vadd.f32 %v715_v48, %v704_v54  ;;  %v705_v10 = vadd.f32 %v701_v56, %v690_v55  ;;  %v691_v11 = vmul.f32 %v9185_v23, %v9182_v22  ;;  %v846_v24 = vld [vmem:[#allocation2 + $0x19] sm:$0xff]  ;;  %v9333_v25 = vld [vmem:[#allocation2 + $0x29] sm:$0xff] }
  0xe5   : > { %1008 = vmatprep.mubr.f32.mxu0 %v12770_v0  ;;  %1217 = vmatprep.mubr.f32.mxu1 %v12770_v0  ;;  %4174 = vst.msk [vmem:[#allocation2 + $0x9] sm:$0xff] %vm615_vm1, %v9138_v61  ;;  %v806_v45 = vld [vmem:[#allocation2 + $0x18] sm:$0xff]  ;;  %738 = vst.msk [vmem:[#allocation2 + $0x51] sm:$0xff] %vm615_vm1, %v733_v60  ;;  %v702_v18 = vmul.f32 %v9194_v27, %v9203_v30  ;;  %v717_v19 = vmul.f32 %v9197_v28, %v9208_v34  ;;  %v1334_v54 = vld [vmem:[#allocation14 + $0x1f8] sm:$0xff]  ;;  %p8654_p8 = pnand %p8653_p13, %p13030_p0  ;;  %p8661_p2 = por %p8660_p6, %p8659_p7 }
  0xe6   : > { %1403 = vmatprep.subr.mxu0 %v1338_v44  ;;  %v732_v20 = vmul.f32 %v9200_v29, %v9216_v41  ;;  %v749_v23 = vmul.f32 %v9282_v43, %v9116_v49  ;;  %v9331_v46 = vld [vmem:[#allocation2 + $0x12] sm:$0xff]  ;;  %v734_v26 = vadd.f32 %v730_v40, %v719_v7  ;;  %v720_v9 = vadd.f32 %v716_v1, %v705_v10  ;;  %v9341_v41 = vld [vmem:[#allocation2 + $0x1a] sm:$0xff]  ;;  %v807_v49 = vld [vmem:[#allocation2 + $0x28] sm:$0xff] }
  0xe7   : > { %1404 = vmatpush1.msra.mxu0 %v1337_v59  ;;  %v760_v30 = vmul.f32 %v9119_v50, %v9292_v52  ;;  %v775_v34 = vmul.f32 %v9122_v51, %v9308_v3  ;;  %4175 = vst.msk [vmem:[#allocation2 + $0x11] sm:$0xff] %vm615_vm1, %v9165_v12  ;;  %v9345_v16 = vld [vmem:[#allocation2 + $0x30] sm:$0xff]  ;;  %v706_v31 = vadd.f32 %v702_v18, %v691_v11  ;;  %4176 = vst.msk [vmem:[#allocation2 + $0x19] sm:$0xff] %vm615_vm1, %v9182_v22  ;;  %p8655_p10 = pneg %p8654_p8 }
  0xe8   : > { %7958 = vmatmul.mubr.msk.f32.gmra.mxu0 %vm615_vm1, %v845_v5  ;;  %7974 = vmatmul.mubr.msk.f32.gmra.mxu1 %vm615_vm1, %v805_v58  ;;  %v790_v32 = vmul.f32 %v9133_v57, %v9318_v15  ;;  %v750_v33 = vmul.f32 %v9282_v43, %v9138_v61  ;;  %v9353_v35 = vld [vmem:[#allocation2 + $0x2a] sm:$0xff]  ;;  %739 = vst.msk [vmem:[#allocation2 + $0x59] sm:$0xff] %vm615_vm1, %v734_v26 }
  0xe9   : > { %1014 = vmatprep.mubr.f32.mxu0 %v12770_v0  ;;  %1223 = vmatprep.mubr.f32.mxu1 %v12770_v0  ;;  %v735_v36 = vadd.f32 %v731_v2, %v720_v9  ;;  %v764_v37 = vadd.f32 %v760_v30, %v749_v23  ;;  %v761_v38 = vmul.f32 %v9141_v62, %v9292_v52  ;;  %v9362_v61 = vld [vmem:[#allocation2 + $0x31] sm:$0xff]  ;;  %p8662_p5 = pnand %p8661_p2, %p8655_p10 }
  0xea   : > { %4177 = vst.msk [vmem:[#allocation2 + $0x29] sm:$0xff] %vm615_vm1, %v9119_v50  ;;  %1405 = vmatprep.subr.mxu0 %v1336_v6  ;;  %v9364_v42 = vld [vmem:[#allocation2 + $0x38] sm:$0xff]  ;;  %v721_v47 = vadd.f32 %v717_v19, %v706_v31  ;;  %v776_v48 = vmul.f32 %v9144_v63, %v9308_v3  ;;  %v791_v40 = vmul.f32 %v9155_v8, %v9318_v15  ;;  %v9385_v60 = vld [vmem:[#allocation2 + $0x40] sm:$0xff]  ;;  %v1331_v18 = vld [vmem:[#allocation14 + $0x1e0] sm:$0xff] }
  0xeb   : > { %v751_v44 = vmul.f32 %v9282_v43, %v9165_v12  ;;  %v9372_v53 = vld [vmem:[#allocation2 + $0x32] sm:$0xff]  ;;  %1406 = vmatpush1.msra.mxu0 %v1335_v17  ;;  %v1333_v50 = vld [vmem:[#allocation14 + $0x1f0] sm:$0xff]  ;;  %740 = vst.msk [vmem:[#allocation2 + $0x61] sm:$0xff] %vm615_vm1, %v735_v36  ;;  %v779_v55 = vadd.f32 %v775_v34, %v764_v37  ;;  %v765_v56 = vadd.f32 %v761_v38, %v750_v33  ;;  %v1327_v37 = vld [vmem:[#allocation14 + $0x1c0] sm:$0xff] }
  0xec   : > { %v762_v58 = vmul.f32 %v9168_v13, %v9292_v52  ;;  %v777_v59 = vmul.f32 %v9171_v14, %v9308_v3  ;;  %4178 = vst.msk [vmem:[#allocation2 + $0x31] sm:$0xff] %vm615_vm1, %v9141_v62  ;;  %7959 = vmatmul.mubr.msk.f32.gmra.mxu0 %vm615_vm1, %v846_v24  ;;  %7975 = vmatmul.mubr.msk.f32.gmra.mxu1 %vm615_vm1, %v806_v45  ;;  %v9383_v12 = vld [vmem:[#allocation2 + $0x39] sm:$0xff]  ;;  %v9395_v62 = vld [vmem:[#allocation2 + $0x41] sm:$0xff]  ;;  %v9408_v19 = vld [vmem:[#allocation2 + $0x51] sm:$0xff] }
  0xed   : > { %v736_v1 = vadd.f32 %v732_v20, %v721_v47  ;;  %v792_v2 = vmul.f32 %v9179_v21, %v9318_v15  ;;  %v752_v5 = vmul.f32 %v9282_v43, %v9182_v22  ;;  %v9391_v6 = vld [vmem:[#allocation2 + $0x3a] sm:$0xff]  ;;  %1020 = vmatprep.mubr.f32.mxu0 %v12770_v0  ;;  %1229 = vmatprep.mubr.f32.mxu1 %v12770_v0  ;;  %v9399_v45 = vld [vmem:[#allocation2 + $0x42] sm:$0xff]  ;;  %v1332_v17 = vld [vmem:[#allocation14 + $0x1e8] sm:$0xff] }
  0xee   : > { %v794_v7 = vadd.f32 %v790_v32, %v779_v55  ;;  %v780_v10 = vadd.f32 %v776_v48, %v765_v56  ;;  %v766_v11 = vadd.f32 %v762_v58, %v751_v44  ;;  %4179 = vst.msk [vmem:[#allocation2 + $0x39] sm:$0xff] %vm615_vm1, %v9168_v13  ;;  %1407 = vmatprep.subr.mxu0 %v1334_v54  ;;  %4180 = vst.msk [vmem:[#allocation2 + $0x41] sm:$0xff] %vm615_vm1, %v9194_v27  ;;  %v1326_v44 = vld [vmem:[#allocation14 + $0x1b8] sm:$0xff]  ;;  %v1324_v56 = vld [vmem:[#allocation14 + $0x1a8] sm:$0xff] }
  0xef   : > { %741 = vst.msk [vmem:[#allocation2 + $0x69] sm:$0xff] %vm615_vm1, %v736_v1  ;;  %v763_v22 = vmul.f32 %v9194_v27, %v9292_v52  ;;  %v778_v43 = vmul.f32 %v9197_v28, %v9308_v3  ;;  %1408 = vmatpush1.msra.mxu0 %v1333_v50  ;;  %v9414_v52 = vld [vmem:[#allocation2 + $0x50] sm:$0xff]  ;;  %v9416_v3 = vld [vmem:[#allocation2 + $0x58] sm:$0xff]  ;;  %v793_v27 = vmul.f32 %v9200_v29, %v9318_v15  ;;  %v1330_v15 = vld [vmem:[#allocation14 + $0x1d8] sm:$0xff] }
  0xf0   : > { %799 = vst.msk [vmem:[#allocation2 + $0x79] sm:$0xff] %vm615_vm1, %v794_v7  ;;  %v795_v13 = vadd.f32 %v791_v40, %v780_v10  ;;  %v781_v20 = vadd.f32 %v777_v59, %v766_v11  ;;  %7960 = vmatmul.mubr.msk.f32.gmra.mxu0 %vm615_vm1, %v9333_v25  ;;  %7976 = vmatmul.mubr.msk.f32.gmra.mxu1 %vm615_vm1, %v807_v49  ;;  %v9420_v24 = vld [vmem:[#allocation2 + $0x52] sm:$0xff]  ;;  %v1323_v58 = vld [vmem:[#allocation14 + $0x1a0] sm:$0xff] }
  0xf1   : > { %v767_v23 = vadd.f32 %v763_v22, %v752_v5  ;;  %1026 = vmatprep.mubr.f32.mxu0 %v12770_v0  ;;  %1235 = vmatprep.mubr.f32.mxu1 %v12770_v0  ;;  %4181 = vst.msk [vmem:[#allocation2 + $0x51] sm:$0xff] %vm615_vm1, %v9122_v51  ;;  %v9427_v25 = vld [vmem:[#allocation2 + $0x59] sm:$0xff] }
  0xf2   : > { %800 = vst.msk [vmem:[#allocation2 + $0x81] sm:$0xff] %vm615_vm1, %v795_v13  ;;  %v796_v26 = vadd.f32 %v792_v2, %v781_v20  ;;  %1409 = vmatprep.subr.mxu0 %v1332_v17  ;;  %v9429_v9 = vld [vmem:[#allocation2 + $0x60] sm:$0xff]  ;;  %v1320_v59 = vld [vmem:[#allocation14 + $0x188] sm:$0xff] }
  0xf3   : > { %v782_v30 = vadd.f32 %v778_v43, %v767_v23  ;;  %v9431_v34 = vld [vmem:[#allocation2 + $0x5a] sm:$0xff]  ;;  %1410 = vmatpush1.msra.mxu0 %v1331_v18 }
  0xf4   : > { %801 = vst.msk [vmem:[#allocation2 + $0x89] sm:$0xff] %vm615_vm1, %v796_v26  ;;  %4182 = vst.msk [vmem:[#allocation2 + $0x59] sm:$0xff] %vm615_vm1, %v9144_v63  ;;  %7961 = vmatmul.mubr.msk.f32.gmra.mxu0 %vm615_vm1, %v9362_v61  ;;  %7977 = vmatmul.mubr.msk.f32.gmra.mxu1 %vm615_vm1, %v9345_v16  ;;  %v1329_v51 = vld [vmem:[#allocation14 + $0x1d0] sm:$0xff]  ;;  %v1328_v16 = vld [vmem:[#allocation14 + $0x1c8] sm:$0xff] }
  0xf5   : > { %v797_v49 = vadd.f32 %v793_v27, %v782_v30  ;;  %1032 = vmatprep.mubr.f32.mxu0 %v12770_v0  ;;  %1241 = vmatprep.mubr.f32.mxu1 %v12770_v0  ;;  %v853_v31 = vld [vmem:[#allocation2 + $0x61] sm:$0xff] }
  0xf6   : > { %v9442_v32 = vld [vmem:[#allocation2 + $0x68] sm:$0xff]  ;;  %1411 = vmatprep.subr.mxu0 %v1330_v15 }
  0xf7   : > { %v9444_v33 = vld [vmem:[#allocation2 + $0x62] sm:$0xff]  ;;  %802 = vst.msk [vmem:[#allocation2 + $0x91] sm:$0xff] %vm615_vm1, %v797_v49  ;;  %v9449_v63 = vld [vmem:[#allocation2 + $0x6a] sm:$0xff]  ;;  %1412 = vmatpush1.msra.mxu0 %v1329_v51  ;;  %v855_v38 = vld [vmem:[#allocation2 + $0x79] sm:$0xff] }
  0xf8   : > { %v854_v36 = vld [vmem:[#allocation2 + $0x69] sm:$0xff]  ;;  %4183 = vst.msk [vmem:[#allocation2 + $0x61] sm:$0xff] %vm615_vm1, %v9171_v14  ;;  %7962 = vmatmul.mubr.msk.f32.gmra.mxu0 %vm615_vm1, %v9383_v12  ;;  %7978 = vmatmul.mubr.msk.f32.gmra.mxu1 %vm615_vm1, %v9364_v42  ;;  %v815_v61 = vld [vmem:[#allocation2 + $0x78] sm:$0xff] }
  0xf9   : > { %4184 = vst.msk [vmem:[#allocation2 + $0x69] sm:$0xff] %vm615_vm1, %v9197_v28  ;;  %v816_v47 = vld [vmem:[#allocation2 + $0x80] sm:$0xff]  ;;  %1038 = vmatprep.mubr.f32.mxu0 %v12770_v0  ;;  %1247 = vmatprep.mubr.f32.mxu1 %v12770_v0  ;;  %v1319_v12 = vld [vmem:[#allocation14 + $0x180] sm:$0xff] }
  0xfa   : > { %v9457_v48 = vld [vmem:[#allocation2 + $0x7a] sm:$0xff]  ;;  %1413 = vmatprep.subr.mxu0 %v1328_v16 }
  0xfb   : > { %4185 = vst.msk [vmem:[#allocation2 + $0x79] sm:$0xff] %vm615_vm1, %v9133_v57  ;;  %v856_v14 = vld [vmem:[#allocation2 + $0x81] sm:$0xff]  ;;  %1414 = vmatpush1.msra.mxu0 %v1327_v37  ;;  %v857_v57 = vld [vmem:[#allocation2 + $0x89] sm:$0xff] }
  0xfc   : > { %v817_v28 = vld [vmem:[#allocation2 + $0x88] sm:$0xff]  ;;  %7963 = vmatmul.mubr.msk.f32.gmra.mxu0 %vm615_vm1, %v9395_v62  ;;  %7979 = vmatmul.mubr.msk.f32.gmra.mxu1 %vm615_vm1, %v9385_v60  ;;  %v1325_v42 = vld [vmem:[#allocation14 + $0x1b0] sm:$0xff] }
  0xfd   : > { %v9463_v40 = vld [vmem:[#allocation2 + $0x82] sm:$0xff]  ;;  %1044 = vmatprep.mubr.f32.mxu0 %v12770_v0  ;;  %1253 = vmatprep.mubr.f32.mxu1 %v12770_v0 }
  0xfe   : > { %4186 = vst.msk [vmem:[#allocation2 + $0x81] sm:$0xff] %vm615_vm1, %v9155_v8  ;;  %v818_v54 = vld [vmem:[#allocation2 + $0x90] sm:$0xff]  ;;  %1415 = vmatprep.subr.mxu0 %v1326_v44 }
  0xff   : > { %v9473_v50 = vld [vmem:[#allocation2 + $0x8a] sm:$0xff]  ;;  %v9477_v8 = vld [vmem:[#allocation2 + $0x92] sm:$0xff]  ;;  %1416 = vmatpush1.msra.mxu0 %v1325_v42 }
 0x100   : > { %v858_v55 = vld [vmem:[#allocation2 + $0x91] sm:$0xff]  ;;  %4187 = vst.msk [vmem:[#allocation2 + $0x89] sm:$0xff] %vm615_vm1, %v9179_v21  ;;  %7964 = vmatmul.mubr.msk.f32.gmra.mxu0 %vm615_vm1, %v9408_v19  ;;  %7980 = vmatmul.mubr.msk.f32.gmra.mxu1 %vm615_vm1, %v9414_v52  ;;  %v1322_v21 = vld [vmem:[#allocation14 + $0x198] sm:$0xff] }
 0x101   : > { %4188 = vst.msk [vmem:[#allocation2 + $0x91] sm:$0xff] %vm615_vm1, %v9200_v29  ;;  %1050 = vmatprep.mubr.f32.mxu0 %v12770_v0  ;;  %1259 = vmatprep.mubr.f32.mxu1 %v12770_v0  ;;  %v1321_v29 = vld [vmem:[#allocation14 + $0x190] sm:$0xff] }
 0x102   : > { %1417 = vmatprep.subr.mxu0 %v1324_v56  ;;  %v3637_v56 = vld [vmem:[#allocation17 + $0x168] sm:$0xff] }
 0x103   : > { %1418 = vmatpush1.msra.mxu0 %v1323_v58 }
 0x104   : > { %7965 = vmatmul.mubr.msk.f32.gmra.mxu0 %vm615_vm1, %v9427_v25  ;;  %7981 = vmatmul.mubr.msk.f32.gmra.mxu1 %vm615_vm1, %v9416_v3 }
 0x105   : > { %1056 = vmatprep.mubr.f32.mxu0 %v12770_v0  ;;  %1265 = vmatprep.mubr.f32.mxu1 %v12770_v0 }
 0x106   : > { %1419 = vmatprep.subr.mxu0 %v1322_v21 }
 0x107   : > { %1420 = vmatpush1.msra.mxu0 %v1321_v29  ;;  %v8751_v29 = vmov 1983009808  }
 0x108   : > { %7966 = vmatmul.mubr.msk.f32.gmra.mxu0 %vm615_vm1, %v853_v31  ;;  %7982 = vmatmul.mubr.msk.f32.gmra.mxu1 %vm615_vm1, %v9429_v9 }
 0x109   : > { %1062 = vmatprep.mubr.f32.mxu0 %v12770_v0  ;;  %1271 = vmatprep.mubr.f32.mxu1 %v12770_v0 }
 0x10a   : > { %1421 = vmatprep.subr.mxu0 %v1320_v59  ;;  %v1695_v59 = vunpack.c.l.s4 %v8751_v29 }
 0x10b   : > { %1422 = vmatpush1.msra.mxu0 %v1319_v12  ;;  %v3638_v12 = vld [vmem:[#allocation17 + $0x170] sm:$0xff] }
 0x10c   : > { %7967 = vmatmul.mubr.msk.f32.gmra.mxu0 %vm615_vm1, %v854_v36  ;;  %7983 = vmatmul.mubr.msk.f32.gmra.mxu1 %vm615_vm1, %v9442_v32 }
 0x10d   : > { %1068 = vmatprep.mubr.f32.mxu0 %v12770_v0  ;;  %1277 = vmatprep.mubr.f32.mxu1 %v12770_v0 }
 0x10e   : > { %4029 = vmatprep.subr.mxu0 %v12770_v0  ;;  %3671 = vmatpush1.msra.mxu1 %v3638_v12  ;;  %v3636_v12 = vld [vmem:[#allocation17 + $0x160] sm:$0xff] }
 0x110   : > { %7968 = vmatmul.mubr.msk.f32.gmra.mxu0 %vm615_vm1, %v855_v38  ;;  %7984 = vmatmul.mubr.msk.f32.gmra.mxu1 %vm615_vm1, %v815_v61 }
 0x111   : > { %1074 = vmatprep.mubr.f32.mxu0 %v12770_v0  ;;  %1283 = vmatprep.mubr.f32.mxu1 %v12770_v0 }
 0x114   : > { %7969 = vmatmul.mubr.msk.f32.gmra.mxu0 %vm615_vm1, %v856_v14  ;;  %7985 = vmatmul.mubr.msk.f32.gmra.mxu1 %vm615_vm1, %v816_v47 }
 0x115   : > { %1080 = vmatprep.mubr.f32.mxu0 %v12770_v0  ;;  %1289 = vmatprep.mubr.f32.mxu1 %v12770_v0 }
 0x118   : > { %7970 = vmatmul.mubr.msk.f32.gmra.mxu0 %vm615_vm1, %v857_v57  ;;  %7986 = vmatmul.mubr.msk.f32.gmra.mxu1 %vm615_vm1, %v817_v28 }
 0x119   : > { %1086 = vmatprep.mubr.f32.mxu0 %v12770_v0  ;;  %1295 = vmatprep.mubr.f32.mxu1 %v12770_v0 }
 0x11c   : > { %7971 = vmatmul.mubr.msk.f32.gmra.mxu0 %vm615_vm1, %v858_v55  ;;  %7987 = vmatmul.mubr.msk.f32.gmra.mxu1 %vm615_vm1, %v818_v54 }
 0x11d   : > { %1455 = vmatprep.mubr.f32.mxu0 %v12770_v0 }
 0x120   : > { %7988 = vmatmul.mubr.msk.f32.vlgmr.msra.gmra.mxu0 %vm615_vm1, %v9284_v39 }
 0x121   : > { %1461 = vmatprep.mubr.f32.mxu0 %v12770_v0 }
 0x124   : > { %7989 = vmatmul.mubr.msk.f32.gmra.mxu0 %vm615_vm1, %v9310_v4 }
 0x125   : > { %1467 = vmatprep.mubr.f32.mxu0 %v12770_v0 }
 0x128   : > { %7990 = vmatmul.mubr.msk.f32.gmra.mxu0 %vm615_vm1, %v9331_v46 }
 0x129   : > { %1473 = vmatprep.mubr.f32.mxu0 %v12770_v0 }
 0x12c   : > { %7991 = vmatmul.mubr.msk.f32.gmra.mxu0 %vm615_vm1, %v9341_v41 }
 0x12d   : > { %1479 = vmatprep.mubr.f32.mxu0 %v12770_v0 }
 0x130   : > { %7992 = vmatmul.mubr.msk.f32.gmra.mxu0 %vm615_vm1, %v9353_v35 }
 0x131   : > { %1485 = vmatprep.mubr.f32.mxu0 %v12770_v0 }
 0x134   : > { %7993 = vmatmul.mubr.msk.f32.gmra.mxu0 %vm615_vm1, %v9372_v53 }
 0x135   : > { %1491 = vmatprep.mubr.f32.mxu0 %v12770_v0 }
 0x138   : > { %7994 = vmatmul.mubr.msk.f32.gmra.mxu0 %vm615_vm1, %v9391_v6 }
 0x139   : > { %1497 = vmatprep.mubr.f32.mxu0 %v12770_v0 }
 0x13c   : > { %7995 = vmatmul.mubr.msk.f32.gmra.mxu0 %vm615_vm1, %v9399_v45 }
 0x13d   : > { %1503 = vmatprep.mubr.f32.mxu0 %v12770_v0 }
 0x140   : > { %7996 = vmatmul.mubr.msk.f32.gmra.mxu0 %vm615_vm1, %v9420_v24 }
 0x141   : > { %1509 = vmatprep.mubr.f32.mxu0 %v12770_v0 }
 0x144   : > { %7997 = vmatmul.mubr.msk.f32.gmra.mxu0 %vm615_vm1, %v9431_v34 }
 0x145   : > { %1515 = vmatprep.mubr.f32.mxu0 %v12770_v0 }
 0x148   : > { %7998 = vmatmul.mubr.msk.f32.gmra.mxu0 %vm615_vm1, %v9444_v33 }
 0x149   : > { %1521 = vmatprep.mubr.f32.mxu0 %v12770_v0 }
 0x14c   : > { %7999 = vmatmul.mubr.msk.f32.gmra.mxu0 %vm615_vm1, %v9449_v63 }
 0x14d   : > { %1527 = vmatprep.mubr.f32.mxu0 %v12770_v0 }
 0x150   : > { %8000 = vmatmul.mubr.msk.f32.gmra.mxu0 %vm615_vm1, %v9457_v48  ;;  %v12769_v48 = vlaneseq }
 0x151   : > { %1533 = vmatprep.mubr.f32.mxu0 %v12770_v0 }
 0x152   : > { %v9665_v44 = vshrl.u32 %v12769_v48, 7  ;;  %v3997_v48 = vld [vmem:[#allocation17 + $0x268] sm:$0xff] }
 0x153   : > { %4030 = vmatpush1.msra.mxu0 %v3997_v48  ;;  %v1696_v48 = vunpack.c.0.s8 %v1695_v59 }
 0x154   : > { %8001 = vmatmul.mubr.msk.f32.gmra.mxu0 %vm615_vm1, %v9463_v40  ;;  %12870 = vst [vmem:[#allocation32_spill] sm:$0xff] %v9665_v44 }
 0x155   : > { %1539 = vmatprep.mubr.f32.mxu0 %v12770_v0 }
 0x158   : > { %8002 = vmatmul.mubr.msk.f32.gmra.mxu0 %vm615_vm1, %v9473_v50  ;;  %v9674_v50 = vsub.s32 0, %v9665_v44 }
 0x159   : > { %1545 = vmatprep.mubr.f32.mxu0 %v12770_v0 }
 0x15a   : > { %12873 = vst [vmem:[#allocation35_spill] sm:$0xff] %v9674_v50 }
 0x15c   : > { %8003 = vmatmul.mubr.msk.f32.gmra.mxu0 %vm615_vm1, %v9477_v8  ;;  %v1584_v8 = vld [vmem:[#allocation15] sm:$0x3] }
 0x19f   : > { %v9566_v39 = vpop.f32.mrf.mxu0 }
 0x1a0   : > { %v9568_v4 = vpop.f32.mrf.mxu1 }
 0x1a1   : > { %v9570_v46 = vpop.f32.mrf.mxu0  ;;  %v1208_v0 = vadd.f32 %v9568_v4, %v9566_v39 }
 0x1a2   : > { %v9572_v41 = vpop.f32.mrf.mxu1 }
 0x1a3   : > { %v1210_v29 = vadd.f32 %v9572_v41, %v9570_v46 }
 0x1a4   : > { %v9574_v35 = vpop.f32.mrf.mxu0  ;;  %v9576_v53 = vpop.f32.mrf.mxu1 }
 0x1a5   : > { %v1214_v46 = vadd.f32 %v9576_v53, %v9574_v35  ;;  %v9711_v35 = vsub.s32 %v1696_v48, %v9665_v44 }
 0x1a6   : > { %v9578_v60 = vpop.f32.mrf.mxu0  ;;  %v9580_v1 = vpop.f32.mrf.mxu1 }
 0x1a7   : > { %12878 = vst [vmem:[#allocation38_spill] sm:$0xff] %v9711_v35 }
 0x1a8   : > { %v9582_v2 = vpop.f32.mrf.mxu0  ;;  %v9584_v5 = vpop.f32.mrf.mxu1 }
 0x1aa   : > { %v9586_v6 = vpop.f32.mrf.mxu0  ;;  %v9588_v62 = vpop.f32.mrf.mxu1 }
 0x1ac   : > { %v9590_v7 = vpop.f32.mrf.mxu0  ;;  %v9592_v10 = vpop.f32.mrf.mxu1 }
 0x1ae   : > { %v9594_v11 = vpop.f32.mrf.mxu0  ;;  %v9596_v45 = vpop.f32.mrf.mxu1 }
 0x1af   : > { %v1228_v48 = vadd.f32 %v9596_v45, %v9594_v11  ;;  %v3994_v11 = vld [vmem:[#allocation17 + $0x250] sm:$0xff] }
 0x1b0   : > { %v9598_v22 = vpop.f32.mrf.mxu0  ;;  %v9600_v43 = vpop.f32.mrf.mxu1  ;;  %v3634_v45 = vld [vmem:[#allocation17 + $0x150] sm:$0xff] }
 0x1b2   : > { %v9602_v17 = vpop.f32.mrf.mxu0  ;;  %v9604_v18 = vpop.f32.mrf.mxu1 }
 0x1b4   : > { %v9606_v19 = vpop.f32.mrf.mxu0  ;;  %v9608_v13 = vpop.f32.mrf.mxu1 }
 0x1b6   : > { %v9610_v20 = vpop.f32.mrf.mxu0  ;;  %v9612_v52 = vpop.f32.mrf.mxu1 }
 0x1b8   : > { %v9614_v3 = vpop.f32.mrf.mxu0  ;;  %v9616_v23 = vpop.f32.mrf.mxu1 }
 0x1ba   : > { %v9618_v27 = vpop.f32.mrf.mxu0  ;;  %v9620_v24 = vpop.f32.mrf.mxu1 }
 0x1bc   : > { %v9622_v26 = vpop.f32.mrf.mxu0  ;;  %v9624_v25 = vpop.f32.mrf.mxu1 }
 0x1be   : > { %v9626_v9 = vpop.f32.mrf.mxu0  ;;  %v9630_v34 = vpop.f32.mrf.mxu1 }
 0x1c0   : > { %v9628_v30 = vpop.f32.mrf.mxu0  ;;  %v9636_v49 = vpop.f32.mrf.mxu1 }
 0x1c2   : > { %v9632_v15 = vpop.f32.mrf.mxu0  ;;  %v9642_v33 = vpop.f32.mrf.mxu1 }
 0x1c4   : > { %v9634_v51 = vpop.f32.mrf.mxu0  ;;  %v9648_v16 = vpop.f32.mrf.mxu1 }
 0x1c6   : > { %v9638_v31 = vpop.f32.mrf.mxu0  ;;  %v9654_v61 = vpop.f32.mrf.mxu1 }
 0x1c8   : > { %v9640_v32 = vpop.f32.mrf.mxu0  ;;  %v9660_v28 = vpop.f32.mrf.mxu1 }
 0x1ca   : > { %v9644_v36 = vpop.f32.mrf.mxu0  ;;  %v9669_v57 = vpop.f32.mrf.mxu1 }
 0x1cc   : > { %v9646_v63 = vpop.f32.mrf.mxu0  ;;  %v9679_v58 = vpop.f32.mrf.mxu1 }
 0x1ce   : > { %v9650_v37 = vpop.f32.mrf.mxu0  ;;  %v9696_v39 = vpop.f32.mrf.mxu1 }
 0x1d0   : > { %v9652_v38 = vpop.f32.mrf.mxu0 }
 0x1d2   : > { %v9656_v47 = vpop.f32.mrf.mxu0 }
 0x1d3   : > { %12867 = vst [vmem:[#allocation29_spill] sm:$0xff] %v9656_v47 }
 0x1d4   : > { %v9658_v14 = vpop.f32.mrf.mxu0 }
 0x1d5   : > { %12868 = vst [vmem:[#allocation30_spill] sm:$0xff] %v9658_v14  ;;  %v12877_v14 = vsub.s32 1, %v9665_v44 }
 0x1d6   : > { %v9662_v40 = vpop.f32.mrf.mxu0 }
 0x1d7   : > { %12869 = vst [vmem:[#allocation31_spill] sm:$0xff] %v9662_v40  ;;  %v3996_v40 = vld [vmem:[#allocation17 + $0x260] sm:$0xff]  ;;  %v9694_v47 = vrot.slane %v1584_v8, %v12877_v14 }
 0x1d8   : > { %v9667_v42 = vpop.f32.mrf.mxu0 }
 0x1d9   : > { %12871 = vst [vmem:[#allocation33_spill] sm:$0xff] %v9667_v42  ;;  %v12876_v42 = vmov 0.0  }
 0x1da   : > { %v9671_v54 = vpop.f32.mrf.mxu0  ;;  %3672 = vmatprep.subr.mxu1 %v12876_v42  ;;  %4031 = vmatprep.subr.mxu0 %v12876_v42 }
 0x1db   : > { %12872 = vst [vmem:[#allocation34_spill] sm:$0xff] %v9671_v54  ;;  %v9686_v54 = vrot.slane %v1584_v8, %v9674_v50  ;;  %3673 = vmatpush1.msra.mxu1 %v3637_v56  ;;  %4032 = vmatpush1.msra.mxu0 %v3996_v40  ;;  %v3995_v50 = vld [vmem:[#allocation17 + $0x258] sm:$0xff]  ;;  %v1216_v40 = vadd.f32 %v9580_v1, %v9578_v60  ;;  %v9708_v56 = vpop.f32.mrf.mxu1 }
 0x1dc   : > { %v9676_v55 = vpop.f32.mrf.mxu0  ;;  %3674 = vmatprep.subr.mxu1 %v12876_v42  ;;  %4033 = vmatprep.subr.mxu0 %v12876_v42  ;;  %v1222_v60 = vadd.f32 %v9588_v62, %v9586_v6  ;;  %v9722_v1 = vadd.f32 %v9592_v10, %v9590_v7  ;;  %v3635_v10 = vld [vmem:[#allocation17 + $0x158] sm:$0xff] }
 0x1dd   : > { %12874 = vst [vmem:[#allocation36_spill] sm:$0xff] %v9676_v55  ;;  %3675 = vmatpush1.msra.mxu1 %v3636_v12  ;;  %4034 = vmatpush1.msra.mxu0 %v3995_v50  ;;  %v9739_v6 = vpop.f32.mrf.mxu1 }
 0x1de   : > { %v9681_v21 = vpop.f32.mrf.mxu0  ;;  %3676 = vmatprep.subr.mxu1 %v12876_v42  ;;  %4035 = vmatprep.subr.mxu0 %v12876_v42 }
 0x1df   : > { %12875 = vst [vmem:[#allocation37_spill] sm:$0xff] %v9681_v21  ;;  %3677 = vmatpush1.msra.mxu1 %v3635_v10  ;;  %4036 = vmatpush1.msra.mxu0 %v3994_v11 }
 0x1e0   : > { %v1457_v55 = vpop.f32.mrf.mxu0  ;;  %3678 = vmatprep.subr.mxu1 %v12876_v42  ;;  %4037 = vmatprep.subr.mxu0 %v12876_v42 }
 0x1e1   : > { %v1552_v21 = vadd.f32 %v1457_v55, %v1208_v0  ;;  %3679 = vmatpush1.msra.mxu1 %v3634_v45 }
 0x1e2   : > { %v1459_v4 = vpop.f32.mrf.mxu0  ;;  %3680 = vmatprep.subr.mxu1 %v12876_v42 }
 0x1e3   : > { %v1596_v0 = vadd.f32 %v9686_v54, %v1552_v21  ;;  %v1553_v41 = vadd.f32 %v1459_v4, %v1210_v29  ;;  %v1220_v4 = vadd.f32 %v9584_v5, %v9582_v2  ;;  %v9733_v2 = vadd.f32 %v9604_v18, %v9602_v17  ;;  %v3993_v17 = vld [vmem:[#allocation17 + $0x248] sm:$0xff] }
 0x1e4   : > { %v1463_v14 = vpop.f32.mrf.mxu0  ;;  %v9737_v5 = vadd.f32 %v9608_v13, %v9606_v19  ;;  %v9745_v18 = vadd.f32 %v9612_v52, %v9610_v20  ;;  %v9762_v52 = vadd.f32 %v9624_v25, %v9622_v26  ;;  %4038 = vmatpush1.msra.mxu0 %v3993_v17  ;;  %v9777_v26 = vadd.f32 %v9642_v33, %v9632_v15  ;;  %v3632_v15 = vld [vmem:[#allocation17 + $0x140] sm:$0xff]  ;;  %v3991_v33 = vld [vmem:[#allocation17 + $0x238] sm:$0xff] }
 0x1e5   : > { %v1597_v55 = vadd.f32 %v9694_v47, %v1553_v41  ;;  %v1554_v8 = vadd.f32 %v1463_v14, %v1214_v46  ;;  %v1628_v21 = vmax.f32 %v1596_v0, 0.0  ;;  %v9729_v14 = vadd.f32 %v9600_v43, %v9598_v22  ;;  %4039 = vmatprep.subr.mxu0 %v12876_v42  ;;  %v3631_v17 = vld [vmem:[#allocation17 + $0x138] sm:$0xff] }
 0x1e6   : > { %v1465_v53 = vpop.f32.mrf.mxu0 }
 0x1e7   : > { %v1629_v59 = vmax.f32 %v1597_v55, 0.0  ;;  %v9714_v50 = vadd.f32 %v9686_v54, %v1554_v8  ;;  %v1555_v29 = vadd.f32 %v1465_v53, %v1216_v40  ;;  %v9753_v53 = vadd.f32 %v9616_v23, %v9614_v3  ;;  %v9772_v23 = vpop.f32.mrf.mxu1 }
 0x1e8   : > { %v1469_v12 = vpop.f32.mrf.mxu0  ;;  %v9770_v3 = vadd.f32 %v9636_v49, %v9628_v30  ;;  %v9785_v30 = vadd.f32 %v9648_v16, %v9634_v51  ;;  %v9797_v51 = vadd.f32 %v9660_v28, %v9640_v32 }
 0x1e9   : > { %v1692_v46 = vcombine.low %v1628_v21, %v1629_v59  ;;  %v1693_v0 = vcombine.high %v1628_v21, %v1629_v59  ;;  %v1599_v41 = vadd.f32 %v9694_v47, %v1555_v29  ;;  %v1556_v62 = vadd.f32 %v1469_v12, %v1220_v4  ;;  %v3633_v29 = vld [vmem:[#allocation17 + $0x148] sm:$0xff]  ;;  %v3992_v4 = vld [vmem:[#allocation17 + $0x240] sm:$0xff]  ;;  %v9799_v16 = vpop.f32.mrf.mxu1 }
 0x1ea   : > { %v1471_v7 = vpop.f32.mrf.mxu0  ;;  %v1630_v40 = vmax.f32 %v9714_v50, 0.0  ;;  %v9757_v21 = vadd.f32 %v9620_v24, %v9618_v27  ;;  %v9766_v50 = vadd.f32 %v9630_v34, %v9626_v9  ;;  %3681 = vmatpush1.msra.mxu1 %v3633_v29  ;;  %4040 = vmatpush1.msra.mxu0 %v3992_v4  ;;  %v9841_v4 = vadd.f32 %v9696_v39, %v9650_v37 }
 0x1eb   : > { %v1631_v55 = vmax.f32 %v1599_v41, 0.0  ;;  %v1557_v22 = vadd.f32 %v1471_v7, %v1222_v60  ;;  %v1700_v43 = vrot.slane %v1692_v46, %v9711_v35  ;;  %v1707_v19 = vrot.slane %v1693_v0, %v9711_v35  ;;  %3682 = vmatprep.subr.mxu1 %v12876_v42  ;;  %4041 = vmatprep.subr.mxu0 %v12876_v42 }
 0x1ec   : > { %v1600_v13 = vadd.f32 %v9686_v54, %v1556_v62  ;;  %v1475_v8 = vpop.f32.mrf.mxu0  ;;  %v9792_v0 = vadd.f32 %v9654_v61, %v9638_v31  ;;  %3683 = vmatpush1.msra.mxu1 %v3632_v15  ;;  %v9807_v61 = vadd.f32 %v9669_v57, %v9644_v36  ;;  %4042 = vmatpush1.msra.mxu0 %v3991_v33  ;;  %v3990_v36 = vld [vmem:[#allocation17 + $0x230] sm:$0xff]  ;;  %v12879_v15 = vld [vmem:[#allocation29_spill] sm:$0xff] }
 0x1ed   : > { %v1711_v59 = vcombine.high %v1630_v40, %v1631_v55  ;;  %v1601_v20 = vadd.f32 %v9694_v47, %v1557_v22  ;;  %v8004_v24 = vrot.slane %v1700_v43, 9  ;;  %v8006_v12 = vrot.slane %v1707_v19, 9  ;;  %3684 = vmatprep.subr.mxu1 %v12876_v42  ;;  %4043 = vmatprep.subr.mxu0 %v12876_v42 }
 0x1ee   : > { %v1477_v27 = vpop.f32.mrf.mxu0  ;;  %v1632_v9 = vmax.f32 %v1600_v13, 0.0  ;;  %v1708_v46 = vcombine.high %v1700_v43, %v1700_v43  ;;  %v1710_v7 = vcombine.low %v1630_v40, %v1631_v55  ;;  %v1558_v32 = vadd.f32 %v1475_v8, %v9722_v1  ;;  %3685 = vmatpush1.msra.mxu1 %v3631_v17  ;;  %4044 = vmatpush1.msra.mxu0 %v3990_v36  ;;  %v1291_v13 = vpop.f32.mrf.mxu1  ;;  %v3987_v36 = vld [vmem:[#allocation17 + $0x218] sm:$0xff] }
 0x1ef   : > { %v9780_v25 = vrot.slane %v1711_v59, %v9711_v35  ;;  %v1633_v34 = vmax.f32 %v1601_v20, 0.0  ;;  %v9787_v60 = vmax.f32 %v1700_v43, %v8004_v24  ;;  %v1559_v62 = vadd.f32 %v1477_v27, %v1228_v48  ;;  %v3989_v27 = vld [vmem:[#allocation17 + $0x228] sm:$0xff]  ;;  %3686 = vmatprep.subr.mxu1 %v12876_v42  ;;  %4045 = vmatprep.subr.mxu0 %v12876_v42 }
 0x1f0   : > { %v1481_v49 = vpop.f32.mrf.mxu0  ;;  %v9812_v40 = vmax.f32 %v1707_v19, %v8006_v12  ;;  %v8005_v22 = vrot.slane %v1708_v46, 9  ;;  %v1709_v43 = vcombine.high %v1707_v19, %v1707_v19  ;;  %v9818_v57 = vadd.f32 %v9679_v58, %v9646_v63  ;;  %v3630_v58 = vld [vmem:[#allocation17 + $0x130] sm:$0xff]  ;;  %4046 = vmatpush1.msra.mxu0 %v3989_v27 }
 0x1f1   : > { %v1728_v41 = vcombine.low %v1632_v9, %v1633_v34  ;;  %v1729_v10 = vcombine.high %v1632_v9, %v1633_v34  ;;  %2364 = vrot.lane.b32.xlu1 %v9787_v60, %s8752_s5  ;;  %v1727_v31 = vcombine.high %v9780_v25, %v9780_v25  ;;  %v9821_v1 = vadd.f32 %v9694_v47, %v1559_v62 }
 0x1f2   : > { %v1483_v11 = vpop.f32.mrf.mxu0  ;;  %v9825_v19 = vrot.slane %v1710_v7, %v9711_v35  ;;  %v9833_v24 = vadd.f32 %v9686_v54, %v1558_v32  ;;  %v8007_v12 = vrot.slane %v1709_v43, 9  ;;  %3687 = vmatpush1.msra.mxu1 %v3630_v58  ;;  %v9854_v33 = vadd.f32 %v9739_v6, %v12879_v15  ;;  %4047 = vmatprep.subr.mxu0 %v12876_v42 }
 0x1f3   : > { %v1736_v48 = vrot.slane %v1728_v41, %v9711_v35  ;;  %v1561_v28 = vadd.f32 %v1483_v11, %v9733_v2  ;;  %v8011_v55 = vrot.slane %v1727_v31, 9  ;;  %v1560_v2 = vadd.f32 %v1481_v49, %v9729_v14  ;;  %3688 = vmatprep.subr.mxu1 %v12876_v42  ;;  %v9859_v41 = vpop.f32.mrf.mxu1 }
 0x1f4   : > { %v1487_v45 = vpop.f32.mrf.mxu0  ;;  %v1743_v8 = vrot.slane %v1729_v10, %v9711_v35  ;;  %v9846_v49 = vmax.f32 %v1708_v46, %v8005_v22  ;;  %v1635_v37 = vmax.f32 %v9821_v1, 0.0  ;;  %v3988_v46 = vld [vmem:[#allocation17 + $0x220] sm:$0xff] }
 0x1f5   : > { %2368 = vrot.lane.b32.xlu1 %v9812_v40, %s8752_s5  ;;  %v9830_v20 = vmax.f32 %v1727_v31, %v8011_v55  ;;  %v8012_v63 = vrot.slane %v1736_v48, 9  ;;  %v1605_v14 = vadd.f32 %v9694_v47, %v1561_v28  ;;  %v1562_v9 = vadd.f32 %v1487_v45, %v9737_v5  ;;  %v3629_v5 = vld [vmem:[#allocation17 + $0x128] sm:$0xff]  ;;  %4048 = vmatpush1.msra.mxu0 %v3988_v46  ;;  %v3628_v45 = vld [vmem:[#allocation17 + $0x120] sm:$0xff] }
 0x1f6   : > { %v1489_v59 = vpop.f32.mrf.mxu0  ;;  %v1604_v39 = vadd.f32 %v9686_v54, %v1560_v2  ;;  %v8014_v6 = vrot.slane %v1743_v8, 9  ;;  %v1744_v7 = vcombine.high %v1736_v48, %v1736_v48  ;;  %v12880_v10 = vld [vmem:[#allocation30_spill] sm:$0xff]  ;;  %v1634_v31 = vmax.f32 %v9833_v24, 0.0  ;;  %3689 = vmatpush1.msra.mxu1 %v3629_v5  ;;  %v12881_v55 = vld [vmem:[#allocation31_spill] sm:$0xff]  ;;  %v12882_v1 = vld [vmem:[#allocation33_spill] sm:$0xff]  ;;  %4049 = vmatprep.subr.mxu0 %v12876_v42 }
 0x1f7   : > { %v1563_v29 = vadd.f32 %v1489_v59, %v9745_v18  ;;  %2378 = vrot.lane.b32.xlu0 %v9830_v20, %s8752_s5  ;;  %v9850_v18 = vadd.f32 %v9708_v56, %v9652_v38  ;;  %v9864_v56 = vmax.f32 %v1736_v48, %v8012_v63  ;;  %v9869_v11 = vadd.f32 %v9772_v23, %v12880_v10 }
 0x1f8   : > { %v1493_v34 = vpop.f32.mrf.mxu0  ;;  %v1637_v32 = vmax.f32 %v1605_v14, 0.0  ;;  %v8008_v28 = vrot.slane %v9825_v19, 9  ;;  %v9875_v22 = vadd.f32 %v9799_v16, %v12881_v55  ;;  %v1606_v48 = vadd.f32 %v9686_v54, %v1562_v9  ;;  %3690 = vmatprep.subr.mxu1 %v12876_v42  ;;  %v1297_v16 = vpop.f32.mrf.mxu1  ;;  %v3986_v9 = vld [vmem:[#allocation17 + $0x210] sm:$0xff]  ;;  %4050 = vmatpush1.msra.mxu0 %v3987_v36 }
 0x1f9   : > { %v1607_v62 = vadd.f32 %v9694_v47, %v1563_v29  ;;  %2366 = vrot.lane.b32.xlu1 %v9846_v49, %s8752_s5  ;;  %v9880_v23 = vmax.f32 %v1709_v43, %v8007_v12  ;;  %v9884_v2 = vadd.f32 %v1291_v13, %v12882_v1  ;;  %v1746_v59 = vcombine.low %v1634_v31, %v1635_v37  ;;  %v3627_v13 = vld [vmem:[#allocation17 + $0x118] sm:$0xff] }
 0x1fa   : > { %v1495_v38 = vpop.f32.mrf.mxu0  ;;  %v1636_v63 = vmax.f32 %v1604_v39, 0.0  ;;  %v9892_v43 = vmax.f32 %v1743_v8, %v8014_v6  ;;  %v8013_v14 = vrot.slane %v1744_v7, 9  ;;  %v1745_v29 = vcombine.high %v1743_v8, %v1743_v8  ;;  %3691 = vmatpush1.msra.mxu1 %v3628_v45  ;;  %4051 = vmatprep.subr.mxu0 %v12876_v42  ;;  %v3626_v6 = vld [vmem:[#allocation17 + $0x110] sm:$0xff]  ;;  %v1299_v10 = vpop.f32.mrf.mxu1 }
 0x1fb   : > { %2380 = vrot.lane.b32.xlu0 %v9864_v56, %s8752_s5  ;;  %v1565_v58 = vadd.f32 %v1495_v38, %v9757_v21  ;;  %v1639_v27 = vmax.f32 %v1607_v62, 0.0  ;;  %v1564_v15 = vadd.f32 %v1493_v34, %v9753_v53  ;;  %v9896_v21 = vmax.f32 %v9825_v19, %v8008_v28  ;;  %3692 = vmatprep.subr.mxu1 %v12876_v42  ;;  %v12884_v36 = vld [vmem:[#allocation36_spill] sm:$0xff] }
 0x1fc   : > { %v1499_v17 = vpop.f32.mrf.mxu0  ;;  %v1764_v12 = vcombine.low %v1636_v63, %v1637_v32  ;;  %v1765_v39 = vcombine.high %v1636_v63, %v1637_v32  ;;  %v1638_v5 = vmax.f32 %v1606_v48, 0.0  ;;  %v8010_v8 = vrot.slane %v9780_v25, 9  ;;  %3693 = vmatpush1.msra.mxu1 %v3627_v13  ;;  %4052 = vmatpush1.msra.mxu0 %v3986_v9  ;;  %v3984_v13 = vld [vmem:[#allocation17 + $0x200] sm:$0xff] }
 0x1fd   : > { %2370 = vrot.lane.b32.xlu1 %v9880_v23, %s8752_s5  ;;  %v1726_v62 = vcombine.high %v9825_v19, %v9825_v19  ;;  %v1747_v53 = vcombine.high %v1634_v31, %v1635_v37  ;;  %v9908_v34 = vrot.slane %v1746_v59, %v9711_v35  ;;  %v1609_v38 = vadd.f32 %v9694_v47, %v1565_v58  ;;  %v3985_v37 = vld [vmem:[#allocation17 + $0x208] sm:$0xff] }
 0x1fe   : > { %v9890_v24 = vpop.f32.mrf.mxu0  ;;  %v1782_v32 = vcombine.low %v1638_v5, %v1639_v27  ;;  %v1783_v28 = vcombine.high %v1638_v5, %v1639_v27  ;;  %v9915_v19 = vmax.f32 %v1744_v7, %v8013_v14  ;;  %v8015_v55 = vrot.slane %v1745_v29, 9  ;;  %3694 = vmatprep.subr.mxu1 %v12876_v42  ;;  %v12883_v31 = vld [vmem:[#allocation34_spill] sm:$0xff]  ;;  %4053 = vmatprep.subr.mxu0 %v12876_v42 }
 0x1ff   : > { %2384 = vrot.lane.b32.xlu0 %v9892_v43, %s8752_s5  ;;  %v9920_v48 = vadd.f32 %v9859_v41, %v12883_v31  ;;  %v9923_v1 = vadd.f32 %v1297_v16, %v12884_v36  ;;  %v1608_v59 = vadd.f32 %v9686_v54, %v1564_v15  ;;  %v1566_v63 = vadd.f32 %v1499_v17, %v9762_v52  ;;  %v3625_v14 = vld [vmem:[#allocation17 + $0x108] sm:$0xff]  ;;  %v12885_v52 = vld [vmem:[#allocation37_spill] sm:$0xff] }
 0x200   : > { %v9901_v46 = vpop.f32.mrf.mxu0  ;;  %v9929_v7 = vrot.slane %v1764_v12, %v9711_v35  ;;  %v9932_v58 = vrot.slane %v1765_v39, %v9711_v35  ;;  %v9937_v27 = vmax.f32 %v9780_v25, %v8010_v8  ;;  %v8009_v16 = vrot.slane %v1726_v62, 9  ;;  %3695 = vmatpush1.msra.mxu1 %v3626_v6  ;;  %4054 = vmatpush1.msra.mxu0 %v3985_v37  ;;  %v3983_v36 = vld [vmem:[#allocation17 + $0x1f8] sm:$0xff] }
 0x201   : > { %2372 = vrot.lane.b32.xlu1 %v9896_v21, %s8752_s5  ;;  %v9940_v17 = vadd.f32 %v1299_v10, %v12885_v52  ;;  %v1761_v9 = vrot.slane %v1747_v53, %v9711_v35  ;;  %v1641_v12 = vmax.f32 %v1609_v38, 0.0  ;;  %3696 = vmatprep.subr.mxu1 %v12876_v42  ;;  %v9946_v39 = vrot.slane %v1782_v32, %v9711_v35 }
 0x202   : > { %v9913_v45 = vpop.f32.mrf.mxu0  ;;  %v9949_v25 = vrot.slane %v1783_v28, %v9711_v35  ;;  %v9953_v8 = vmax.f32 %v1745_v29, %v8015_v55  ;;  %v8016_v53 = vrot.slane %v9908_v34, 9  ;;  %4055 = vmatprep.subr.mxu0 %v12876_v42  ;;  %v1640_v38 = vmax.f32 %v1608_v59, 0.0  ;;  %3697 = vmatpush1.msra.mxu1 %v3625_v14  ;;  %v3623_v14 = vld [vmem:[#allocation17 + $0xf8] sm:$0xff] }
 0x203   : > { %2382 = vrot.lane.b32.xlu0 %v9915_v19, %s8752_s5  ;;  %v9958_v6 = vadd.f32 %v9686_v54, %v1566_v63  ;;  %4056 = vmatpush1.msra.mxu0 %v3984_v13  ;;  %v1567_v28 = vadd.f32 %v9890_v24, %v9766_v50  ;;  %v9966_v55 = vmax.f32 %v1726_v62, %v8009_v16  ;;  %v8020_v37 = vrot.slane %v9929_v7, 9 }
 0x204   : > { %v1511_v41 = vpop.f32.mrf.mxu0  ;;  %v1781_v31 = vcombine.high %v9932_v58, %v9932_v58  ;;  %3698 = vmatprep.subr.mxu1 %v12876_v42  ;;  %v1801_v59 = vcombine.high %v1640_v38, %v1641_v12  ;;  %4057 = vmatprep.subr.mxu0 %v12876_v42  ;;  %v9978_v62 = vmax.f32 %v9908_v34, %v8016_v53 }
 0x205   : > { %v1570_v15 = vadd.f32 %v1511_v41, %v9785_v30  ;;  %2376 = vrot.lane.b32.xlu1 %v9937_v27, %s8752_s5  ;;  %v3624_v30 = vld [vmem:[#allocation17 + $0x100] sm:$0xff]  ;;  %v8018_v41 = vrot.slane %v1761_v9, 9  ;;  %v1762_v16 = vcombine.high %v9908_v34, %v9908_v34  ;;  %v1568_v13 = vadd.f32 %v9901_v46, %v9770_v3  ;;  %4058 = vmatpush1.msra.mxu0 %v3983_v36 }
 0x206   : > { %v1513_v5 = vpop.f32.mrf.mxu0  ;;  %3699 = vmatpush1.msra.mxu1 %v3624_v30  ;;  %v9990_v34 = vmax.f32 %v9929_v7, %v8020_v37  ;;  %v8023_v30 = vrot.slane %v1781_v31, 9  ;;  %4059 = vmatprep.subr.mxu0 %v12876_v42 }
 0x207   : > { %v1614_v10 = vadd.f32 %v9686_v54, %v1570_v15  ;;  %v1571_v32 = vadd.f32 %v1513_v5, %v9792_v0  ;;  %2386 = vrot.lane.b32.xlu0 %v9953_v8, %s8752_s5  ;;  %v1800_v0 = vcombine.low %v1640_v38, %v1641_v12  ;;  %3700 = vmatprep.subr.mxu1 %v12876_v42 }
 0x208   : > { %v1517_v29 = vpop.f32.mrf.mxu0  ;;  %v1763_v38 = vcombine.high %v1761_v9, %v1761_v9  ;;  %3701 = vmatpush1.msra.mxu1 %v3623_v14  ;;  %v10006_v36 = vmax.f32 %v1761_v9, %v8018_v41  ;;  %v10021_v14 = vmax.f32 %v1781_v31, %v8023_v30 }
 0x209   : > { %v1615_v63 = vadd.f32 %v9694_v47, %v1571_v32  ;;  %v1572_v50 = vadd.f32 %v1517_v29, %v9797_v51  ;;  %2374 = vrot.lane.b32.xlu1 %v9966_v55, %s8752_s5  ;;  %v1646_v52 = vmax.f32 %v1614_v10, 0.0  ;;  %v3982_v51 = vld [vmem:[#allocation17 + $0x1f0] sm:$0xff]  ;;  %v10000_v32 = vadd.f32 %v9694_v47, %v1567_v28  ;;  %3704 = vmatprep.subr.mxu1 %v12876_v42 }
 0x20a   : > { %v1519_v24 = vpop.f32.mrf.mxu0  ;;  %v1569_v29 = vadd.f32 %v9913_v45, %v9777_v26  ;;  %4060 = vmatpush1.msra.mxu0 %v3982_v51  ;;  %v8024_v28 = vrot.slane %v9946_v39, 9  ;;  %v10013_v26 = vrot.slane %v1800_v0, %v9711_v35  ;;  %v10016_v45 = vrot.slane %v1801_v59, %v9711_v35  ;;  %v3652_v0 = vld [vmem:[#allocation17 + $0x1e0] sm:$0xff] }
 0x20b   : > { %v1647_v12 = vmax.f32 %v1615_v63, 0.0  ;;  %v1573_v15 = vadd.f32 %v1519_v24, %v9807_v61  ;;  %v1616_v5 = vadd.f32 %v9686_v54, %v1572_v50  ;;  %2388 = vrot.lane.b32.xlu0 %v9978_v62, %s8752_s5  ;;  %v8017_v63 = vrot.slane %v1762_v16, 9  ;;  %v3653_v50 = vld [vmem:[#allocation17 + $0x1e8] sm:$0xff]  ;;  %v4012_v24 = vld [vmem:[#allocation17 + $0x2e0] sm:$0xff]  ;;  %4063 = vmatprep.subr.mxu0 %v12876_v42 }
 0x20c   : > { %v1523_v53 = vpop.f32.mrf.mxu0  ;;  %3705 = vmatpush2.msra.mxu1 %v3653_v50  ;;  %4064 = vmatpush2.msra.mxu0 %v4012_v24  ;;  %v10029_v59 = vadd.f32 %v9686_v54, %v1568_v13  ;;  %v10043_v13 = vmax.f32 %v9946_v39, %v8024_v28 }
 0x20d   : > { %v9993_v3 = vcombine.low %v1646_v52, %v1647_v12  ;;  %v9995_v61 = vcombine.high %v1646_v52, %v1647_v12  ;;  %v1617_v46 = vadd.f32 %v9694_v47, %v1573_v15  ;;  %v1574_v10 = vadd.f32 %v1523_v53, %v9818_v57  ;;  %2396 = vrot.lane.b32.xlu1 %v9990_v34, %s8752_s5 }
 0x20e   : > { %v1525_v37 = vpop.f32.mrf.mxu0  ;;  %v1648_v52 = vmax.f32 %v1616_v5, 0.0  ;;  %v8019_v53 = vrot.slane %v1763_v38, 9  ;;  %v10034_v30 = vmax.f32 %v1762_v16, %v8017_v63  ;;  %3706 = vmatprep.subr.mxu1 %v12876_v42  ;;  %4065 = vmatprep.subr.mxu0 %v12876_v42  ;;  %v8026_v63 = vrot.slane %v9949_v25, 9 }
 0x20f   : > { %v1649_v12 = vmax.f32 %v1617_v46, 0.0  ;;  %v1618_v57 = vadd.f32 %v9686_v54, %v1574_v10  ;;  %v1575_v9 = vadd.f32 %v1525_v37, %v9841_v4  ;;  %2392 = vrot.lane.b32.xlu0 %v10006_v36, %s8752_s5  ;;  %v4011_v46 = vld [vmem:[#allocation17 + $0x2d8] sm:$0xff]  ;;  %3707 = vmatpush2.msra.mxu1 %v3652_v0  ;;  %v8022_v0 = vrot.slane %v9932_v58, 9 }
 0x210   : > { %v1529_v41 = vpop.f32.mrf.mxu0  ;;  %4066 = vmatpush2.msra.mxu0 %v4011_v46  ;;  %3708 = vmatprep.subr.mxu1 %v12876_v42 }
 0x211   : > { %v10023_v15 = vcombine.low %v1648_v52, %v1649_v12  ;;  %v10025_v51 = vcombine.high %v1648_v52, %v1649_v12  ;;  %v1576_v5 = vadd.f32 %v1529_v41, %v9850_v18  ;;  %v1619_v4 = vadd.f32 %v9694_v47, %v1575_v9  ;;  %2402 = vrot.lane.b32.xlu1 %v10021_v14, %s8752_s5  ;;  %v3651_v52 = vld [vmem:[#allocation17 + $0x1d8] sm:$0xff]  ;;  %v4010_v12 = vld [vmem:[#allocation17 + $0x2d0] sm:$0xff] }
 0x212   : > { %v1531_v31 = vpop.f32.mrf.mxu0  ;;  %v10038_v18 = vadd.f32 %v9694_v47, %v1569_v29  ;;  %v1650_v50 = vmax.f32 %v1618_v57, 0.0  ;;  %v1799_v29 = vcombine.high %v9949_v25, %v9949_v25  ;;  %v10053_v9 = vmax.f32 %v1763_v38, %v8019_v53  ;;  %4067 = vmatprep.subr.mxu0 %v12876_v42  ;;  %3709 = vmatpush2.msra.mxu1 %v3651_v52 }
 0x213   : > { %v1620_v10 = vadd.f32 %v9686_v54, %v1576_v5  ;;  %v1577_v37 = vadd.f32 %v1531_v31, %v9854_v33  ;;  %v1651_v24 = vmax.f32 %v1619_v4, 0.0  ;;  %2390 = vrot.lane.b32.xlu0 %v10034_v30, %s8752_s5  ;;  %v1780_v4 = vcombine.high %v9929_v7, %v9929_v7  ;;  %4068 = vmatpush2.msra.mxu0 %v4010_v12 }
 0x214   : > { %v1535_v16 = vpop.f32.mrf.mxu0  ;;  %v10072_v7 = vmax.f32 %v9949_v25, %v8026_v63  ;;  %3710 = vmatprep.subr.mxu1 %v12876_v42  ;;  %4069 = vmatprep.subr.mxu0 %v12876_v42  ;;  %v1645_v25 = vmax.f32 %v10038_v18, 0.0 }
 0x215   : > { %v1621_v33 = vadd.f32 %v9694_v47, %v1577_v37  ;;  %v1578_v28 = vadd.f32 %v1535_v16, %v9869_v11  ;;  %v10056_v57 = vcombine.low %v1650_v50, %v1651_v24  ;;  %v10058_v41 = vcombine.high %v1650_v50, %v1651_v24  ;;  %2404 = vrot.lane.b32.xlu1 %v10043_v13, %s8752_s5  ;;  %v3650_v11 = vld [vmem:[#allocation17 + $0x1d0] sm:$0xff]  ;;  %v4009_v37 = vld [vmem:[#allocation17 + $0x2c8] sm:$0xff] }
 0x216   : > { %v1537_v5 = vpop.f32.mrf.mxu0  ;;  %v1652_v38 = vmax.f32 %v1620_v10, 0.0  ;;  %v1643_v50 = vmax.f32 %v10000_v32, 0.0  ;;  %v8027_v16 = vrot.slane %v1799_v29, 9  ;;  %v1798_v10 = vcombine.high %v9946_v39, %v9946_v39  ;;  %3711 = vmatpush2.msra.mxu1 %v3650_v11  ;;  %4070 = vmatpush2.msra.mxu0 %v4009_v37 }
 0x217   : > { %v1653_v53 = vmax.f32 %v1621_v33, 0.0  ;;  %v1622_v31 = vadd.f32 %v9686_v54, %v1578_v28  ;;  %v1579_v46 = vadd.f32 %v1537_v5, %v9875_v22  ;;  %2394 = vrot.lane.b32.xlu0 %v10053_v9, %s8752_s5  ;;  %v1642_v22 = vmax.f32 %v9958_v6, 0.0  ;;  %v3649_v33 = vld [vmem:[#allocation17 + $0x1c8] sm:$0xff]  ;;  %v4008_v5 = vld [vmem:[#allocation17 + $0x2c0] sm:$0xff]  ;;  %3712 = vmatprep.subr.mxu1 %v12876_v42 }
 0x218   : > { %v1541_v24 = vpop.f32.mrf.mxu0  ;;  %v10089_v6 = vmax.f32 %v9932_v58, %v8022_v0  ;;  %v8021_v28 = vrot.slane %v1780_v4, 9  ;;  %4071 = vmatprep.subr.mxu0 %v12876_v42  ;;  %v10098_v0 = vmax.f32 %v1799_v29, %v8027_v16  ;;  %v8025_v37 = vrot.slane %v1798_v10, 9  ;;  %3713 = vmatpush2.msra.mxu1 %v3649_v33  ;;  %v4007_v33 = vld [vmem:[#allocation17 + $0x2b8] sm:$0xff] }
 0x219   : > { %v10078_v52 = vcombine.low %v1652_v38, %v1653_v53  ;;  %v10080_v12 = vcombine.high %v1652_v38, %v1653_v53  ;;  %v1623_v32 = vadd.f32 %v9694_v47, %v1579_v46  ;;  %v1580_v63 = vadd.f32 %v1541_v24, %v9884_v2  ;;  %2408 = vrot.lane.b32.xlu1 %v10072_v7, %s8752_s5 }
 0x21a   : > { %v1543_v39 = vpop.f32.mrf.mxu0  ;;  %12886 = vst [vmem:[#allocation29_spill] sm:$0xff] %v10089_v6  ;;  %v1644_v38 = vmax.f32 %v10029_v59, 0.0  ;;  %v1654_v53 = vmax.f32 %v1622_v31, 0.0  ;;  %v1818_v2 = vcombine.low %v1642_v22, %v1643_v50  ;;  %v3648_v59 = vld [vmem:[#allocation17 + $0x1c0] sm:$0xff]  ;;  %4072 = vmatpush2.msra.mxu0 %v4008_v5  ;;  %v8028_v29 = vrot.slane %v10013_v26, 9  ;;  %3714 = vmatprep.subr.mxu1 %v12876_v42 }
 0x21b   : > { %v1655_v46 = vmax.f32 %v1623_v32, 0.0  ;;  %v1581_v11 = vadd.f32 %v1543_v39, %v9920_v48  ;;  %v1624_v18 = vadd.f32 %v9686_v54, %v1580_v63  ;;  %2400 = vrot.lane.b32.xlu0 %v10089_v6, %s8752_s5  ;;  %v10108_v6 = vmax.f32 %v1780_v4, %v8021_v28  ;;  %4073 = vmatprep.subr.mxu0 %v12876_v42 }
 0x21c   : > { %v1547_v58 = vpop.f32.mrf.mxu0  ;;  %v1836_v39 = vcombine.low %v1644_v38, %v1645_v25  ;;  %v1817_v16 = vcombine.high %v10016_v45, %v10016_v45  ;;  %3715 = vmatpush2.msra.mxu1 %v3648_v59  ;;  %v10119_v4 = vmax.f32 %v1798_v10, %v8025_v37  ;;  %v8030_v28 = vrot.slane %v10016_v45, 9  ;;  %4074 = vmatpush2.msra.mxu0 %v4007_v33 }
 0x21d   : > { %v10100_v31 = vcombine.low %v1654_v53, %v1655_v46  ;;  %v10102_v24 = vcombine.high %v1654_v53, %v1655_v46  ;;  %v1625_v48 = vadd.f32 %v9694_v47, %v1581_v11  ;;  %v1582_v32 = vadd.f32 %v1547_v58, %v9923_v1  ;;  %2410 = vrot.lane.b32.xlu1 %v10098_v0, %s8752_s5 }
 0x21e   : > { %v1549_v63 = vpop.f32.mrf.mxu0  ;;  %v1837_v53 = vcombine.high %v1644_v38, %v1645_v25  ;;  %v1656_v46 = vmax.f32 %v1624_v18, 0.0  ;;  %v1816_v58 = vcombine.high %v10013_v26, %v10013_v26  ;;  %v3647_v25 = vld [vmem:[#allocation17 + $0x1b8] sm:$0xff]  ;;  %v4006_v38 = vld [vmem:[#allocation17 + $0x2b0] sm:$0xff]  ;;  %v1819_v18 = vcombine.high %v1642_v22, %v1643_v50  ;;  %3716 = vmatprep.subr.mxu1 %v12876_v42  ;;  %4075 = vmatprep.subr.mxu0 %v12876_v42 }
 0x21f   : > { %v1657_v11 = vmax.f32 %v1625_v48, 0.0  ;;  %v1626_v1 = vadd.f32 %v9686_v54, %v1582_v32  ;;  %v1583_v5 = vadd.f32 %v1549_v63, %v9940_v17  ;;  %2398 = vrot.lane.b32.xlu0 %v10108_v6, %s8752_s5  ;;  %v1826_v17 = vrot.slane %v1818_v2, %v9711_v35  ;;  %v3646_v50 = vld [vmem:[#allocation17 + $0x1b0] sm:$0xff]  ;;  %3717 = vmatpush2.msra.mxu1 %v3647_v25 }
 0x220   : > { %v10134_v37 = vmax.f32 %v10013_v26, %v8028_v29  ;;  %v8031_v59 = vrot.slane %v1817_v16, 9  ;;  %v10138_v22 = vrot.slane %v1836_v39, %v9711_v35  ;;  %v10141_v32 = vrot.slane %v1837_v53, %v9711_v35  ;;  %4076 = vmatpush2.msra.mxu0 %v4006_v38  ;;  %3718 = vmatprep.subr.mxu1 %v12876_v42  ;;  %v4005_v29 = vld [vmem:[#allocation17 + $0x2a8] sm:$0xff] }
 0x221   : > { %v10124_v48 = vcombine.low %v1656_v46, %v1657_v11  ;;  %v10126_v54 = vcombine.high %v1656_v46, %v1657_v11  ;;  %v1627_v10 = vadd.f32 %v9694_v47, %v1583_v5  ;;  %2406 = vrot.lane.b32.xlu1 %v10119_v4, %s8752_s5  ;;  %v1658_v2 = vmax.f32 %v1626_v1, 0.0  ;;  %4077 = vmatprep.subr.mxu0 %v12876_v42  ;;  %v3645_v11 = vld [vmem:[#allocation17 + $0x1a8] sm:$0xff]  ;;  %v4004_v1 = vld [vmem:[#allocation17 + $0x2a0] sm:$0xff] }
 0x222   : > { %v10146_v26 = vmax.f32 %v10016_v45, %v8030_v28  ;;  %v8029_v63 = vrot.slane %v1816_v58, 9  ;;  %v1833_v39 = vrot.slane %v1819_v18, %v9711_v35  ;;  %3719 = vmatpush2.msra.mxu1 %v3646_v50  ;;  %v10157_v46 = vmax.f32 %v1817_v16, %v8031_v59  ;;  %4078 = vmatpush2.msra.mxu0 %v4005_v29  ;;  %v3644_v16 = vld [vmem:[#allocation17 + $0x1a0] sm:$0xff]  ;;  %v4003_v59 = vld [vmem:[#allocation17 + $0x298] sm:$0xff] }
 0x223   : > { %v1659_v47 = vmax.f32 %v1627_v10, 0.0  ;;  %2412 = vrot.lane.b32.xlu0 %v10134_v37, %s8752_s5  ;;  %v8032_v45 = vrot.slane %v1826_v17, 9  ;;  %3720 = vmatprep.subr.mxu1 %v12876_v42  ;;  %v8036_v28 = vrot.slane %v10138_v22, 9  ;;  %v1853_v25 = vcombine.high %v10141_v32, %v10141_v32 }
 0x224   : > { %v10162_v5 = vmax.f32 %v1816_v58, %v8029_v63  ;;  %4079 = vmatprep.subr.mxu0 %v12876_v42  ;;  %3721 = vmatpush2.msra.mxu1 %v3645_v11  ;;  %v8034_v18 = vrot.slane %v1833_v39, 9  ;;  %v1834_v10 = vcombine.high %v1826_v17, %v1826_v17  ;;  %v1862_v58 = vrot.slane %v9993_v3, %v9711_v35  ;;  %v4002_v63 = vld [vmem:[#allocation17 + $0x290] sm:$0xff]  ;;  %v4001_v11 = vld [vmem:[#allocation17 + $0x288] sm:$0xff] }
 0x225   : > { %v10151_v33 = vcombine.low %v1658_v2, %v1659_v47  ;;  %v10153_v53 = vcombine.high %v1658_v2, %v1659_v47  ;;  %2416 = vrot.lane.b32.xlu1 %v10146_v26, %s8752_s5  ;;  %v10170_v38 = vmax.f32 %v1826_v17, %v8032_v45  ;;  %4080 = vmatpush2.msra.mxu0 %v4004_v1  ;;  %v8039_v2 = vrot.slane %v1853_v25, 9  ;;  %v3643_v47 = vld [vmem:[#allocation17 + $0x198] sm:$0xff]  ;;  %v3642_v45 = vld [vmem:[#allocation17 + $0x190] sm:$0xff] }
 0x226   : > { %3722 = vmatprep.subr.mxu1 %v12876_v42  ;;  %4081 = vmatprep.subr.mxu0 %v12876_v42  ;;  %v10179_v50 = vmax.f32 %v10138_v22, %v8036_v28  ;;  %v10184_v17 = vmax.f32 %v1833_v39, %v8034_v18  ;;  %v8033_v29 = vrot.slane %v1834_v10, 9  ;;  %v1835_v3 = vcombine.high %v1833_v39, %v1833_v39  ;;  %v3641_v39 = vld [vmem:[#allocation17 + $0x188] sm:$0xff] }
 0x227   : > { %2418 = vrot.lane.b32.xlu0 %v10157_v46, %s8752_s5  ;;  %3723 = vmatpush2.msra.mxu1 %v3644_v16  ;;  %v1869_v1 = vrot.slane %v9995_v61, %v9711_v35  ;;  %v10191_v28 = vmax.f32 %v1853_v25, %v8039_v2  ;;  %v8040_v16 = vrot.slane %v1862_v58, 9  ;;  %v4000_v61 = vld [vmem:[#allocation17 + $0x280] sm:$0xff] }
 0x228   : > { %4082 = vmatpush2.msra.mxu0 %v4003_v59  ;;  %3724 = vmatprep.subr.mxu1 %v12876_v42  ;;  %v10197_v18 = vmax.f32 %v1834_v10, %v8033_v29  ;;  %v8035_v59 = vrot.slane %v1835_v3, 9  ;;  %v3999_v10 = vld [vmem:[#allocation17 + $0x278] sm:$0xff] }
 0x229   : > { %2414 = vrot.lane.b32.xlu1 %v10162_v5, %s8752_s5  ;;  %4083 = vmatprep.subr.mxu0 %v12876_v42  ;;  %12887 = vst [vmem:[#allocation30_spill] sm:$0xff] %v10191_v28  ;;  %v10203_v25 = vmax.f32 %v1862_v58, %v8040_v16  ;;  %v8042_v2 = vrot.slane %v1869_v1, 9  ;;  %v3639_v16 = vld [vmem:[#allocation17 + $0x178] sm:$0xff] }
 0x22a   : > { %3725 = vmatpush2.msra.mxu1 %v3643_v47  ;;  %4084 = vmatpush2.msra.mxu0 %v4002_v63  ;;  %v1871_v47 = vcombine.high %v1869_v1, %v1869_v1  ;;  %v3640_v63 = vld [vmem:[#allocation17 + $0x180] sm:$0xff]  ;;  %v10208_v29 = vmax.f32 %v1835_v3, %v8035_v59  ;;  %v1887_v3 = vrot.slane %v10025_v51, %v9711_v35 }
 0x22b   : > { %2420 = vrot.lane.b32.xlu0 %v10170_v38, %s8752_s5  ;;  %3726 = vmatprep.subr.mxu1 %v12876_v42  ;;  %12888 = vst [vmem:[#allocation31_spill] sm:$0xff] %v10203_v25 }
 0x22c   : > { %4085 = vmatprep.subr.mxu0 %v12876_v42  ;;  %3727 = vmatpush2.msra.mxu1 %v3642_v45  ;;  %v8038_v45 = vrot.slane %v10141_v32, 9 }
 0x22d   : > { %2428 = vrot.lane.b32.xlu1 %v10179_v50, %s8752_s5  ;;  %4086 = vmatpush2.msra.mxu0 %v4001_v11  ;;  %v1852_v11 = vcombine.high %v10138_v22, %v10138_v22  ;;  %v1880_v22 = vrot.slane %v10023_v15, %v9711_v35 }
 0x22e   : > { %3728 = vmatprep.subr.mxu1 %v12876_v42  ;;  %4087 = vmatprep.subr.mxu0 %v12876_v42 }
 0x22f   : > { %2424 = vrot.lane.b32.xlu0 %v10184_v17, %s8752_s5  ;;  %3729 = vmatpush2.msra.mxu1 %v3641_v39  ;;  %v10216_v39 = vmax.f32 %v1869_v1, %v8042_v2  ;;  %v10227_v1 = vmax.f32 %v10141_v32, %v8038_v45  ;;  %v8037_v59 = vrot.slane %v1852_v11, 9  ;;  %v8044_v32 = vrot.slane %v1880_v22, 9 }
 0x230   : > { %4088 = vmatpush2.msra.mxu0 %v4000_v61  ;;  %3730 = vmatprep.subr.mxu1 %v12876_v42  ;;  %v8043_v61 = vrot.slane %v1871_v47, 9  ;;  %v1898_v45 = vrot.slane %v10056_v57, %v9711_v35  ;;  %v1905_v57 = vrot.slane %v10058_v41, %v9711_v35 }
 0x231   : > { %2434 = vrot.lane.b32.xlu1 %v10191_v28, %s8752_s5  ;;  %4089 = vmatprep.subr.mxu0 %v12876_v42  ;;  %v1870_v28 = vcombine.high %v1862_v58, %v1862_v58  ;;  %v12889_v58 = vlaneseq  ;;  %v10245_v51 = vmax.f32 %v1852_v11, %v8037_v59  ;;  %v1916_v11 = vrot.slane %v10078_v52, %v9711_v35 }
 0x232   : > { %3731 = vmatpush2.msra.mxu1 %v3640_v63  ;;  %4090 = vmatpush2.msra.mxu0 %v3999_v10  ;;  %v10233_v15 = vmax.f32 %v1871_v47, %v8043_v61  ;;  %v8046_v63 = vrot.slane %v1887_v3, 9  ;;  %v1888_v10 = vcombine.high %v1880_v22, %v1880_v22  ;;  %v1923_v59 = vrot.slane %v10080_v12, %v9711_v35 }
 0x233   : > { %2422 = vrot.lane.b32.xlu0 %v10197_v18, %s8752_s5  ;;  %3732 = vmatprep.subr.mxu1 %v12876_v42  ;;  %vm531_vm2 = vcmp.lt.s32.totalorder %v12889_v58, 248  ;;  %v8041_v2 = vrot.slane %v1870_v28, 9  ;;  %v8052_v12 = vrot.slane %v1916_v11, 9  ;;  %v1906_v41 = vcombine.high %v1898_v45, %v1898_v45 }
 0x234   : > { %4091 = vmatprep.subr.mxu0 %v12876_v42  ;;  %3733 = vmatpush2.msra.mxu1 %v3639_v16  ;;  %545 = vst.msk [vmem:[#allocation3 + $0x21] ss:$8 sm:$0x3] %vm531_vm2, %v12876_v42  ;;  %533 = vst.msk [vmem:[#allocation3] ss:$8 sm:$0x3] %vm531_vm2, %v12876_v42  ;;  %v10255_v16 = vmax.f32 %v1880_v22, %v8044_v32  ;;  %v1925_v32 = vcombine.high %v1923_v59, %v1923_v59 }
 0x235   : > { %2436 = vrot.lane.b32.xlu1 %v10203_v25, %s8752_s5  ;;  %v3998_v25 = vld [vmem:[#allocation17 + $0x270] sm:$0xff]  ;;  %3795 = vmatprep.subr.mxu1 %v12876_v42  ;;  %536 = vst.msk [vmem:[#allocation3 + $0x30] ss:$8 sm:$0x3] %vm531_vm2, %v12876_v42  ;;  %v10249_v47 = vmax.f32 %v1870_v28, %v8041_v2  ;;  %v10263_v28 = vmax.f32 %v1887_v3, %v8046_v63  ;;  %v8045_v58 = vrot.slane %v1888_v10, 9  ;;  %v8048_v2 = vrot.slane %v1898_v45, 9 }
 0x236   : > { %4092 = vmatpush2.msra.mxu0 %v3998_v25  ;;  %539 = vst.msk [vmem:[#allocation3 + $0x60] ss:$8 sm:$0x3] %vm531_vm2, %v12876_v42  ;;  %542 = vst.msk [vmem:[#allocation3 + $0x90] ss:$8 sm:$0x3] %vm531_vm2, %v12876_v42  ;;  %v1889_v25 = vcombine.high %v1887_v3, %v1887_v3 }
 0x237   : > { %2426 = vrot.lane.b32.xlu0 %v10208_v29, %s8752_s5  ;;  %548 = vst.msk [vmem:[#allocation3 + $0x51] ss:$8 sm:$0x3] %vm531_vm2, %v12876_v42  ;;  %551 = vst.msk [vmem:[#allocation3 + $0x81] ss:$8 sm:$0x3] %vm531_vm2, %v12876_v42  ;;  %v10273_v52 = vmax.f32 %v1888_v10, %v8045_v58  ;;  %v10277_v3 = vmax.f32 %v1898_v45, %v8048_v2  ;;  %v10285_v10 = vmax.f32 %v1916_v11, %v8052_v12 }
 0x238   : > { %554 = vst.msk [vmem:[#allocation3 + $0xb1] ss:$8 sm:$0x3] %vm531_vm2, %v12876_v42  ;;  %v8047_v61 = vrot.slane %v1889_v25, 9  ;;  %12890 = vst [vmem:[#allocation33_spill] sm:$0xff] %v10263_v28  ;;  %v8050_v63 = vrot.slane %v1905_v57, 9 }
 0x239   : > { %2440 = vrot.lane.b32.xlu1 %v10216_v39, %s8752_s5  ;;  %12892 = vst [vmem:[#allocation36_spill] sm:$0xff] %v10273_v52  ;;  %12893 = vst [vmem:[#allocation37_spill] sm:$0xff] %v10277_v3  ;;  %v8049_v2 = vrot.slane %v1906_v41, 9 }
 0x23a   : > { %v10269_v22 = vmax.f32 %v1889_v25, %v8047_v61  ;;  %v1941_v25 = vrot.slane %v10102_v24, %v9711_v35  ;;  %12894 = vst [vmem:[#allocation39_spill] sm:$0xff] %v10285_v10  ;;  %v8055_v61 = vrot.slane %v1925_v32, 9  ;;  %v10289_v58 = vmax.f32 %v1905_v57, %v8050_v63 }
 0x23b   : > { %2432 = vrot.lane.b32.xlu0 %v10227_v1, %s8752_s5  ;;  %v10297_v12 = vmax.f32 %v1906_v41, %v8049_v2  ;;  %v1959_v63 = vrot.slane %v10126_v54, %v9711_v35  ;;  %v8054_v41 = vrot.slane %v1923_v59, 9  ;;  %v1924_v2 = vcombine.high %v1916_v11, %v1916_v11 }
 0x23c   : > { %12891 = vst [vmem:[#allocation34_spill] sm:$0xff] %v10269_v22  ;;  %12895 = vst [vmem:[#allocation40_spill] sm:$0xff] %v10289_v58  ;;  %v1943_v24 = vcombine.high %v1941_v25, %v1941_v25 }
 0x23d   : > { %2442 = vrot.lane.b32.xlu1 %v10233_v15, %s8752_s5  ;;  %12897 = vst [vmem:[#allocation42_spill] sm:$0xff] %v10297_v12 }
 0x23f   : > { %2430 = vrot.lane.b32.xlu0 %v10245_v51, %s8752_s5 }
 0x241   : > { %2438 = vrot.lane.b32.xlu1 %v10249_v47, %s8752_s5 }
 0x243   : > { %2444 = vrot.lane.b32.xlu0 %v10255_v16, %s8752_s5 }
 0x245   : > { %2448 = vrot.lane.b32.xlu1 %v10263_v28, %s8752_s5  ;;  %v1934_v28 = vrot.slane %v10100_v31, %v9711_v35  ;;  %v10293_v31 = vmax.f32 %v1925_v32, %v8055_v61  ;;  %v8059_v32 = vrot.slane %v1943_v24, 9 }
 0x247   : > { %2450 = vrot.lane.b32.xlu0 %v10269_v22, %s8752_s5  ;;  %12896 = vst [vmem:[#allocation41_spill] sm:$0xff] %v10293_v31  ;;  %v8056_v45 = vrot.slane %v1934_v28, 9  ;;  %v1942_v11 = vcombine.high %v1934_v28, %v1934_v28 }
 0x249   : > { %2446 = vrot.lane.b32.xlu1 %v10273_v52, %s8752_s5  ;;  %v1907_v52 = vcombine.high %v1905_v57, %v1905_v57  ;;  %v10305_v57 = vmax.f32 %v1934_v28, %v8056_v45  ;;  %v10317_v45 = vmax.f32 %v1923_v59, %v8054_v41  ;;  %v8057_v41 = vrot.slane %v1942_v11, 9 }
 0x24b   : > { %2452 = vrot.lane.b32.xlu0 %v10277_v3, %s8752_s5  ;;  %v8051_v3 = vrot.slane %v1907_v52, 9  ;;  %12898 = vst [vmem:[#allocation43_spill] sm:$0xff] %v10305_v57  ;;  %12901 = vst [vmem:[#allocation46_spill] sm:$0xff] %v10317_v45 }
 0x24d   : > { %2460 = vrot.lane.b32.xlu1 %v10285_v10, %s8752_s5  ;;  %v1952_v10 = vrot.slane %v10124_v48, %v9711_v35  ;;  %v10309_v61 = vmax.f32 %v1907_v52, %v8051_v3  ;;  %v10313_v48 = vmax.f32 %v1943_v24, %v8059_v32 }
 0x24f   : > { %2456 = vrot.lane.b32.xlu0 %v10289_v58, %s8752_s5  ;;  %12899 = vst [vmem:[#allocation44_spill] sm:$0xff] %v10309_v61  ;;  %12900 = vst [vmem:[#allocation45_spill] sm:$0xff] %v10313_v48  ;;  %v1960_v54 = vcombine.high %v1952_v10, %v1952_v10  ;;  %v8060_v32 = vrot.slane %v1952_v10, 9 }
 0x251   : > { %2466 = vrot.lane.b32.xlu1 %v10293_v31, %s8752_s5  ;;  %v8062_v31 = vrot.slane %v1959_v63, 9  ;;  %v8061_v3 = vrot.slane %v1960_v54, 9  ;;  %v10337_v28 = vmax.f32 %v1952_v10, %v8060_v32 }
 0x253   : > { %2454 = vrot.lane.b32.xlu0 %v10297_v12, %s8752_s5  ;;  %v8053_v12 = vrot.slane %v1924_v2, 9  ;;  %v10321_v52 = vmax.f32 %v1959_v63, %v8062_v31  ;;  %v10331_v59 = vmax.f32 %v1960_v54, %v8061_v3  ;;  %v1970_v31 = vrot.slane %v10151_v33, %v9711_v35  ;;  %12905 = vst [vmem:[#allocation50_spill] sm:$0xff] %v10337_v28 }
 0x255   : > { %2468 = vrot.lane.b32.xlu1 %v10305_v57, %s8752_s5  ;;  %12902 = vst [vmem:[#allocation47_spill] sm:$0xff] %v10321_v52  ;;  %v10325_v24 = vmax.f32 %v1924_v2, %v8053_v12  ;;  %v1961_v57 = vcombine.high %v1959_v63, %v1959_v63  ;;  %12904 = vst [vmem:[#allocation49_spill] sm:$0xff] %v10331_v59  ;;  %v8058_v2 = vrot.slane %v1941_v25, 9  ;;  %v8064_v33 = vrot.slane %v1970_v31, 9 }
 0x256   : > { %v1978_v3 = vcombine.high %v1970_v31, %v1970_v31 }
 0x257   : > { %2458 = vrot.lane.b32.xlu0 %v10309_v61, %s8752_s5  ;;  %12903 = vst [vmem:[#allocation48_spill] sm:$0xff] %v10325_v24  ;;  %v8063_v12 = vrot.slane %v1961_v57, 9  ;;  %v10349_v32 = vmax.f32 %v1941_v25, %v8058_v2 }
 0x259   : > { %2474 = vrot.lane.b32.xlu1 %v10313_v48, %s8752_s5  ;;  %v1977_v48 = vrot.slane %v10153_v53, %v9711_v35  ;;  %v10341_v53 = vmax.f32 %v1942_v11, %v8057_v41  ;;  %v10345_v54 = vmax.f32 %v1961_v57, %v8063_v12  ;;  %12908 = vst [vmem:[#allocation53_spill] sm:$0xff] %v10349_v32  ;;  %v8065_v41 = vrot.slane %v1978_v3, 9 }
 0x25a   : > { %v10353_v11 = vmax.f32 %v1970_v31, %v8064_v33 }
 0x25b   : > { %2464 = vrot.lane.b32.xlu0 %v10317_v45, %s8752_s5  ;;  %12906 = vst [vmem:[#allocation51_spill] sm:$0xff] %v10341_v53  ;;  %12907 = vst [vmem:[#allocation52_spill] sm:$0xff] %v10345_v54  ;;  %v10361_v25 = vmax.f32 %v1978_v3, %v8065_v41  ;;  %v8066_v2 = vrot.slane %v1977_v48, 9 }
 0x25c   : > { %12909 = vst [vmem:[#allocation54_spill] sm:$0xff] %v10353_v11 }
 0x25d   : > { %2480 = vrot.lane.b32.xlu1 %v10321_v52, %s8752_s5  ;;  %v1979_v52 = vcombine.high %v1977_v48, %v1977_v48  ;;  %12911 = vst [vmem:[#allocation56_spill] sm:$0xff] %v10361_v25  ;;  %v10367_v61 = vmax.f32 %v1977_v48, %v8066_v2 }
 0x25f   : > { %2462 = vrot.lane.b32.xlu0 %v10325_v24, %s8752_s5  ;;  %v8067_v35 = vrot.slane %v1979_v52, 9  ;;  %12912 = vst [vmem:[#allocation57_spill] sm:$0xff] %v10367_v61 }
 0x261   : > { %2478 = vrot.lane.b32.xlu1 %v10331_v59, %s8752_s5  ;;  %v10357_v12 = vmax.f32 %v1979_v52, %v8067_v35 }
 0x263   : > { %2476 = vrot.lane.b32.xlu0 %v10337_v28, %s8752_s5  ;;  %v2365_v63 = vpop.permute.xlu1 %2364  ;;  %12910 = vst [vmem:[#allocation55_spill] sm:$0xff] %v10357_v12 }
 0x264   : > { %v2492_v59 = vrot.slane %v2365_v63, 2 }
 0x265   : > { %2470 = vrot.lane.b32.xlu1 %v10341_v53, %s8752_s5 }
 0x266   : > { %v2557_v52 = vsel %vm2556_vm3, %v2365_v63, %v2492_v59 }
 0x267   : > { %2482 = vrot.lane.b32.xlu0 %v10345_v54, %s8752_s5  ;;  %v2369_v10 = vpop.permute.xlu1 %2368  ;;  %v2685_v59 = vmax.f32 %v9787_v60, %v2557_v52 }
 0x269   : > { %v2379_v28 = vpop.permute.xlu0 %2378  ;;  %2472 = vrot.lane.b32.xlu1 %v10349_v32, %s8752_s5  ;;  %v2494_v32 = vrot.slane %v2369_v10, 2 }
 0x26a   : > { %v2499_v31 = vrot.slane %v2379_v28, 2 }
 0x26b   : > { %2484 = vrot.lane.b32.xlu0 %v10353_v11, %s8752_s5  ;;  %v2367_v57 = vpop.permute.xlu1 %2366  ;;  %v2559_v3 = vsel %vm2556_vm3, %v2369_v10, %v2494_v32 }
 0x26c   : > { %v2493_v53 = vrot.slane %v2367_v57, 2  ;;  %v2564_v41 = vsel %vm2556_vm3, %v2379_v28, %v2499_v31  ;;  %v2687_v48 = vmax.f32 %v9812_v40, %v2559_v3 }
 0x26d   : > { %v2381_v54 = vpop.permute.xlu0 %2380  ;;  %2490 = vrot.lane.b32.xlu1 %v10357_v12, %s8752_s5 }
 0x26e   : > { %v2500_v33 = vrot.slane %v2381_v54, 2  ;;  %v2558_v35 = vsel %vm2556_vm3, %v2367_v57, %v2493_v53  ;;  %v10376_v53 = vsub.s32 2, %v9665_v44  ;;  %v12914_v57 = vld [vmem:[#allocation35_spill] sm:$0xff] }
 0x26f   : > { %2486 = vrot.lane.b32.xlu0 %v10361_v25, %s8752_s5  ;;  %v2371_v11 = vpop.permute.xlu1 %2370  ;;  %v2686_v12 = vmax.f32 %v9846_v49, %v2558_v35  ;;  %v10382_v49 = vmax.f32 %v9830_v20, %v2564_v41 }
 0x270   : > { %v2495_v24 = vrot.slane %v2371_v11, 2  ;;  %v2565_v58 = vsel %vm2556_vm3, %v2381_v54, %v2500_v33  ;;  %12913 = vst [vmem:[#allocation58_spill] sm:$0xff] %v10376_v53 }
 0x271   : > { %v2385_v45 = vpop.permute.xlu0 %2384  ;;  %v10385_v54 = vmax.f32 %v9864_v56, %v2565_v58  ;;  %v2824_v2 = vrot.slane %v2686_v12, %v12914_v57  ;;  %v2828_v60 = vrot.slane %v2686_v12, %v10376_v53  ;;  %v2832_v56 = vrot.slane %v2687_v48, %v12914_v57 }
 0x272   : > { %v2560_v63 = vsel %vm2556_vm3, %v2371_v11, %v2495_v24  ;;  %v2816_v24 = vrot.slane %v2685_v59, %v12914_v57  ;;  %v2820_v11 = vrot.slane %v2685_v59, %v10376_v53  ;;  %v2502_v58 = vrot.slane %v2385_v45, 2 }
 0x273   : > { %2488 = vrot.lane.b32.xlu0 %v10367_v61, %s8752_s5  ;;  %v2373_v25 = vpop.permute.xlu1 %2372  ;;  %v2688_v20 = vmax.f32 %v9880_v23, %v2560_v63  ;;  %v2836_v12 = vrot.slane %v2687_v48, %v10376_v53  ;;  %v2880_v3 = vrot.slane %v10385_v54, %v12914_v57  ;;  %v2876_v23 = vrot.slane %v10382_v49, %v10376_v53 }
 0x274   : > { %v2496_v28 = vrot.slane %v2373_v25, 2  ;;  %v3326_v59 = vsel %vm3325_vm4, %v2824_v2, %v2816_v24  ;;  %v2884_v48 = vrot.slane %v10385_v54, %v10376_v53 }
 0x275   : > { %v2383_v10 = vpop.permute.xlu0 %2382  ;;  %v2844_v44 = vrot.slane %v2688_v20, %v10376_v53  ;;  %v3328_v61 = vsel %vm3327_vm6, %v2832_v56, %v3326_v59 }
 0x276   : > { %v2501_v32 = vrot.slane %v2383_v10, 2  ;;  %v2561_v40 = vsel %vm2556_vm3, %v2373_v25, %v2496_v28  ;;  %v2872_v25 = vrot.slane %v10382_v49, %v12914_v57 }
 0x277   : > { %v2377_v31 = vpop.permute.xlu1 %2376  ;;  %v2689_v33 = vmax.f32 %v9896_v21, %v2561_v40  ;;  %v3337_v21 = vsel %vm3325_vm4, %v2828_v60, %v2820_v11  ;;  %v2840_v40 = vrot.slane %v2688_v20, %v12914_v57 }
 0x278   : > { %v2498_v35 = vrot.slane %v2377_v31, 2  ;;  %v2566_v41 = vsel %vm2556_vm3, %v2383_v10, %v2501_v32  ;;  %v2567_v32 = vsel %vm2556_vm3, %v2385_v45, %v2502_v58  ;;  %v3344_v11 = vsel %vm3343_vm5, %v2880_v3, %v2872_v25 }
 0x279   : > { %v2387_v52 = vpop.permute.xlu0 %2386  ;;  %v2848_v49 = vrot.slane %v2689_v33, %v12914_v57  ;;  %v2694_v2 = vmax.f32 %v9915_v19, %v2566_v41  ;;  %v3338_v54 = vsel %vm3327_vm6, %v2836_v12, %v3337_v21  ;;  %v2852_v22 = vrot.slane %v2689_v33, %v10376_v53 }
 0x27a   : > { %v2503_v63 = vrot.slane %v2387_v52, 2  ;;  %v2563_v10 = vsel %vm2556_vm3, %v2377_v31, %v2498_v35  ;;  %v3330_v19 = vsel %vm3329_vm7, %v2840_v40, %v3328_v61  ;;  %v3339_v41 = vsel %vm3329_vm7, %v2844_v44, %v3338_v54 }
 0x27b   : > { %v2375_v28 = vpop.permute.xlu1 %2374  ;;  %v2691_v20 = vmax.f32 %v9937_v27, %v2563_v10  ;;  %v2695_v25 = vmax.f32 %v9892_v43, %v2567_v32  ;;  %v3332_v12 = vsel %vm3331_vm8, %v2848_v49, %v3330_v19  ;;  %v2888_v33 = vrot.slane %v2694_v2, %v12914_v57 }
 0x27c   : > { %v2497_v24 = vrot.slane %v2375_v28, 2  ;;  %v2568_v31 = vsel %vm2556_vm3, %v2387_v52, %v2503_v63  ;;  %v2892_v27 = vrot.slane %v2694_v2, %v10376_v53  ;;  %v3340_v59 = vsel %vm3331_vm8, %v2852_v22, %v3339_v41 }
 0x27d   : > { %v2389_v60 = vpop.permute.xlu0 %2388  ;;  %v2696_v21 = vmax.f32 %v9953_v8, %v2568_v31  ;;  %v2864_v43 = vrot.slane %v2691_v20, %v12914_v57  ;;  %v3351_v10 = vsel %vm3343_vm5, %v2884_v48, %v2876_v23  ;;  %v2896_v8 = vrot.slane %v2695_v25, %v12914_v57 }
 0x27e   : > { %v2562_v45 = vsel %vm2556_vm3, %v2375_v28, %v2497_v24  ;;  %v2504_v58 = vrot.slane %v2389_v60, 2  ;;  %v3345_v2 = vsel %vm3325_vm4, %v2888_v33, %v3344_v11  ;;  %v2900_v31 = vrot.slane %v2695_v25, %v10376_v53 }
 0x27f   : > { %v2397_v35 = vpop.permute.xlu1 %2396  ;;  %v2690_v56 = vmax.f32 %v9966_v55, %v2562_v45  ;;  %v2868_v55 = vrot.slane %v2691_v20, %v10376_v53  ;;  %v2904_v20 = vrot.slane %v2696_v21, %v12914_v57  ;;  %v2908_v45 = vrot.slane %v2696_v21, %v10376_v53 }
 0x280   : > { %v2569_v52 = vsel %vm2556_vm3, %v2389_v60, %v2504_v58  ;;  %v2508_v49 = vrot.slane %v2397_v35, 2  ;;  %v3346_v41 = vsel %vm3327_vm6, %v2896_v8, %v3345_v2 }
 0x281   : > { %v2393_v3 = vpop.permute.xlu0 %2392  ;;  %v2856_v61 = vrot.slane %v2690_v56, %v12914_v57  ;;  %v2860_v44 = vrot.slane %v2690_v56, %v10376_v53  ;;  %v2697_v63 = vmax.f32 %v9978_v62, %v2569_v52  ;;  %v3352_v62 = vsel %vm3325_vm4, %v2892_v27, %v3351_v10 }
 0x282   : > { %v2506_v28 = vrot.slane %v2393_v3, 2  ;;  %v2573_v56 = vsel %vm2556_vm3, %v2397_v35, %v2508_v49  ;;  %v3353_v33 = vsel %vm3327_vm6, %v2900_v31, %v3352_v62 }
 0x283   : > { %v2403_v40 = vpop.permute.xlu1 %2402  ;;  %v3334_v32 = vsel %vm3333_vm9, %v2856_v61, %v3332_v12  ;;  %v3341_v22 = vsel %vm3333_vm9, %v2860_v44, %v3340_v59  ;;  %v2912_v11 = vrot.slane %v2697_v63, %v12914_v57  ;;  %v2916_v27 = vrot.slane %v2697_v63, %v10376_v53 }
 0x284   : > { %v3336_v24 = vsel %vm3335_vm10, %v2864_v43, %v3334_v32  ;;  %v3342_v60 = vsel %vm3335_vm10, %v2868_v55, %v3341_v22  ;;  %v2571_v23 = vsel %vm2556_vm3, %v2393_v3, %v2506_v28  ;;  %v2511_v48 = vrot.slane %v2403_v40, 2  ;;  %v4228_v22 = vld [vmem:[#allocation9 + $0xb8] sm:$0xff] }
 0x285   : > { %v2391_v54 = vpop.permute.xlu0 %2390  ;;  %3460 = vst [vmem:[#allocation3] sm:$0xfe] %v3336_v24  ;;  %3462 = vst.msk [vmem:[#allocation3 + $0x8] sm:$0xfe] %vm3461_vm11, %v3342_v60  ;;  %v2699_v52 = vmax.f32 %v10006_v36, %v2571_v23  ;;  %v3347_v59 = vsel %vm3329_vm7, %v2904_v20, %v3346_v41  ;;  %v3354_v35 = vsel %vm3329_vm7, %v2908_v45, %v3353_v33  ;;  %4535 = vmatprep.subr.mxu0 %v4228_v22 }
 0x286   : > { %v2505_v58 = vrot.slane %v2391_v54, 2  ;;  %v2576_v21 = vsel %vm2556_vm3, %v2403_v40, %v2511_v48  ;;  %v3348_v43 = vsel %vm3331_vm8, %v2912_v11, %v3347_v59  ;;  %v10461_v55 = vmax.f32 %v9990_v34, %v2573_v56 }
 0x287   : > { %v2405_v19 = vpop.permute.xlu1 %2404  ;;  %v2932_v49 = vrot.slane %v2699_v52, %v10376_v53  ;;  %v10470_v8 = vmax.f32 %v10021_v14, %v2576_v21 }
 0x288   : > { %v2512_v12 = vrot.slane %v2405_v19, 2  ;;  %v2570_v25 = vsel %vm2556_vm3, %v2391_v54, %v2505_v58  ;;  %v2948_v41 = vrot.slane %v10461_v55, %v10376_v53 }
 0x289   : > { %v2395_v3 = vpop.permute.xlu0 %2394  ;;  %v2698_v61 = vmax.f32 %v10034_v30, %v2570_v25  ;;  %v3355_v30 = vsel %vm3331_vm8, %v2916_v27, %v3354_v35  ;;  %v2968_v56 = vrot.slane %v10470_v8, %v12914_v57 }
 0x28a   : > { %v2507_v44 = vrot.slane %v2395_v3, 2  ;;  %v2577_v63 = vsel %vm2556_vm3, %v2405_v19, %v2512_v12  ;;  %v2944_v19 = vrot.slane %v10461_v55, %v12914_v57 }
 0x28b   : > { %v2409_v36 = vpop.permute.xlu1 %2408  ;;  %v2920_v28 = vrot.slane %v2698_v61, %v12914_v57  ;;  %v2924_v10 = vrot.slane %v2698_v61, %v10376_v53  ;;  %v10475_v60 = vmax.f32 %v10043_v13, %v2577_v63 }
 0x28c   : > { %v2572_v32 = vsel %vm2556_vm3, %v2395_v3, %v2507_v44  ;;  %v2514_v40 = vrot.slane %v2409_v36, 2  ;;  %v10485_v11 = vld [vmem:[#allocation3 + $0x8] sm:$0xfe]  ;;  %v3533_v27 = vld [vmem:[#allocation3] sm:$0xfe] }
 0x28d   : > { %v2700_v34 = vmax.f32 %v10053_v9, %v2572_v32  ;;  %v2401_v2 = vpop.permute.xlu0 %2400  ;;  %v3356_v24 = vsel %vm3333_vm9, %v2924_v10, %v3355_v30  ;;  %v3349_v20 = vsel %vm3333_vm9, %v2920_v28, %v3348_v43  ;;  %v2928_v9 = vrot.slane %v2699_v52, %v12914_v57  ;;  %v10487_v58 = vld [vmem:[#allocation3 + $0x8] sm:$0xfc] }
 0x28e   : > { %v2579_v54 = vsel %vm2556_vm3, %v2409_v36, %v2514_v40  ;;  %v2510_v62 = vrot.slane %v2401_v2, 2  ;;  %v3357_v23 = vsel %vm3335_vm10, %v2932_v49, %v3356_v24  ;;  %v2972_v52 = vrot.slane %v10470_v8, %v10376_v53  ;;  %v12915_v3 = vld [vmem:[#allocation29_spill] sm:$0xff] }
 0x28f   : > { %v2936_v48 = vrot.slane %v2700_v34, %v12914_v57  ;;  %v2940_v14 = vrot.slane %v2700_v34, %v10376_v53  ;;  %v2411_v31 = vpop.permute.xlu1 %2410  ;;  %3464 = vst.msk [vmem:[#allocation3 + $0x18] sm:$0xff] %vm2556_vm3, %v3357_v23  ;;  %v10497_v12 = vmax.f32 %v10072_v7, %v2579_v54  ;;  %v10502_v25 = vsel %vm3335_vm10, %v2928_v9, %v3349_v20  ;;  %v3900_v49 = vld [vmem:[#allocation3] sm:$0xfc] }
 0x290   : > { %v2575_v45 = vsel %vm2556_vm3, %v2401_v2, %v2510_v62  ;;  %v2515_v13 = vrot.slane %v2411_v31, 2  ;;  %v2976_v61 = vrot.slane %v10475_v60, %v12914_v57  ;;  %v2980_v7 = vrot.slane %v10475_v60, %v10376_v53 }
 0x291   : > { %3465 = vst [vmem:[#allocation3 + $0x20] sm:$0x1] %v2936_v48  ;;  %3467 = vst.msk [vmem:[#allocation3 + $0x28] sm:$0x1] %vm3466_vm12, %v2940_v14  ;;  %v2399_v33 = vpop.permute.xlu0 %2398  ;;  %v2703_v59 = vmax.f32 %v12915_v3, %v2575_v45  ;;  %v3577_v35 = vrot.slane %v10485_v11, 1  ;;  %v3936_v43 = vrot.slane %v10487_v58, 2  ;;  %v2992_v10 = vrot.slane %v10497_v12, %v12914_v57 }
 0x292   : > { %v2509_v21 = vrot.slane %v2399_v33, 2  ;;  %v2580_v55 = vsel %vm2556_vm3, %v2411_v31, %v2515_v13  ;;  %v3574_v28 = vrot.slane %v3533_v27, 1  ;;  %v2996_v32 = vrot.slane %v10497_v12, %v10376_v53 }
 0x293   : > { %v2407_v44 = vpop.permute.xlu1 %2406  ;;  %v3575_v30 = vrot.slane %v10502_v25, 1  ;;  %v2960_v8 = vrot.slane %v2703_v59, %v12914_v57  ;;  %v2964_v34 = vrot.slane %v2703_v59, %v10376_v53  ;;  %v10523_v60 = vmax.f32 %v10098_v0, %v2580_v55 }
 0x294   : > { %v2574_v63 = vsel %vm2556_vm3, %v2399_v33, %v2509_v21  ;;  %v2513_v36 = vrot.slane %v2407_v44, 2  ;;  %v3933_v31 = vrot.slane %v3900_v49, 2  ;;  %v3934_v9 = vrot.slane %v10502_v25, 2 }
 0x295   : > { %v2702_v40 = vmax.f32 %v10108_v6, %v2574_v63  ;;  %v2413_v22 = vpop.permute.xlu0 %2412 }
 0x296   : > { %v2578_v2 = vsel %vm2556_vm3, %v2407_v44, %v2513_v36  ;;  %v2516_v24 = vrot.slane %v2413_v22, 2  ;;  %v10528_v23 = vld [vmem:[#allocation3 + $0x18] sm:$0xff]  ;;  %v3000_v44 = vrot.slane %v10523_v60, %v12914_v57  ;;  %v3576_v36 = vsel %vm3573_vm13, %v3574_v28, %v3575_v30 }
 0x297   : > { %v2952_v54 = vrot.slane %v2702_v40, %v12914_v57  ;;  %v2956_v62 = vrot.slane %v2702_v40, %v10376_v53  ;;  %v2706_v6 = vmax.f32 %v10119_v4, %v2578_v2  ;;  %v2417_v20 = vpop.permute.xlu1 %2416  ;;  %v3578_v11 = vrot.slane %v10528_v23, 1 }
 0x298   : > { %v2581_v48 = vsel %vm2556_vm3, %v2413_v22, %v2516_v24  ;;  %v2518_v14 = vrot.slane %v2417_v20, 2  ;;  %v3937_v58 = vrot.slane %v10528_v23, 2  ;;  %v3935_v40 = vsel %vm3932_vm14, %v3933_v31, %v3934_v9  ;;  %v3536_v22 = vld [vmem:[#allocation3 + $0x28] sm:$0x1]  ;;  %v3535_v2 = vld [vmem:[#allocation3 + $0x20] sm:$0x1] }
 0x299   : > { %v3358_v45 = vsel %vm3325_vm4, %v2952_v54, %v2944_v19  ;;  %v3364_v0 = vsel %vm3325_vm4, %v2956_v62, %v2948_v41  ;;  %v2419_v13 = vpop.permute.xlu0 %2418  ;;  %v2984_v33 = vrot.slane %v2706_v6, %v12914_v57  ;;  %v2988_v27 = vrot.slane %v2706_v6, %v10376_v53  ;;  %v3903_v49 = vld [vmem:[#allocation3 + $0x28] sm:$0x3]  ;;  %v3902_v24 = vld [vmem:[#allocation3 + $0x20] sm:$0x3] }
 0x29a   : > { %v3359_v4 = vsel %vm3327_vm6, %v2960_v8, %v3358_v45  ;;  %v3365_v12 = vsel %vm3327_vm6, %v2964_v34, %v3364_v0  ;;  %v2709_v19 = vmax.f32 %v10134_v37, %v2581_v48  ;;  %v2583_v41 = vsel %vm2556_vm3, %v2417_v20, %v2518_v14  ;;  %v3517_v23 = vld [vmem:[#allocation17 + $0x78] sm:$0xff] }
 0x29b   : > { %v3360_v3 = vsel %vm3329_vm7, %v2968_v56, %v3359_v4  ;;  %v3366_v59 = vsel %vm3329_vm7, %v2972_v52, %v3365_v12  ;;  %v2415_v21 = vpop.permute.xlu1 %2414  ;;  %v3004_v56 = vrot.slane %v10523_v60, %v10376_v53  ;;  %v2711_v28 = vmax.f32 %v10146_v26, %v2583_v41 }
 0x29c   : > { %v3361_v55 = vsel %vm3331_vm8, %v2976_v61, %v3360_v3  ;;  %v3367_v63 = vsel %vm3331_vm8, %v2980_v7, %v3366_v59  ;;  %v2519_v34 = vrot.slane %v2419_v13, 2  ;;  %v3008_v60 = vrot.slane %v2709_v19, %v12914_v57 }
 0x29d   : > { %v3362_v52 = vsel %vm3333_vm9, %v2984_v33, %v3361_v55  ;;  %v3368_v37 = vsel %vm3333_vm9, %v2988_v27, %v3367_v63  ;;  %v2421_v61 = vpop.permute.xlu0 %2420  ;;  %v3579_v54 = vsel %vm3573_vm13, %v3577_v35, %v3578_v11  ;;  %v3938_v62 = vsel %vm3932_vm14, %v3936_v43, %v3937_v58 }
 0x29e   : > { %v3363_v7 = vsel %vm3335_vm10, %v2992_v10, %v3362_v52  ;;  %v3369_v8 = vsel %vm3335_vm10, %v2996_v32, %v3368_v37  ;;  %v2517_v6 = vrot.slane %v2415_v21, 2  ;;  %v3012_v10 = vrot.slane %v2709_v19, %v10376_v53  ;;  %8068 = vmatprep.mubr.msk.f32.mxu1 %vm2556_vm3, %v3579_v54  ;;  %8084 = vmatprep.mubr.msk.f32.mxu0 %vm2556_vm3, %v3938_v62 }
 0x29f   : > { %3468 = vst [vmem:[#allocation3 + $0x30] sm:$0xfe] %v3363_v7  ;;  %3469 = vst.msk [vmem:[#allocation3 + $0x38] sm:$0xfe] %vm3461_vm11, %v3369_v8  ;;  %v2429_v20 = vpop.permute.xlu1 %2428  ;;  %v3582_v26 = vrot.slane %v3536_v22, 1  ;;  %v3941_v32 = vrot.slane %v3903_v49, 2  ;;  %3735 = vmatmul.mubr.f32.vlgmr.msra.gmra.mxu1 %v3576_v36  ;;  %4094 = vmatmul.mubr.f32.vlgmr.msra.gmra.mxu0 %v3935_v40  ;;  %v3024_v0 = vrot.slane %v2711_v28, %v12914_v57 }
 0x2a0   : > { %v2520_v48 = vrot.slane %v2421_v61, 2  ;;  %v2582_v14 = vsel %vm2556_vm3, %v2415_v21, %v2517_v6  ;;  %v3580_v31 = vrot.slane %v3535_v2, 1  ;;  %v3939_v35 = vrot.slane %v3902_v24, 2  ;;  %3796 = vmatpush1.msra.mxu1 %v3517_v23  ;;  %v3514_v8 = vld [vmem:[#allocation17 + $0x60] sm:$0xff]  ;;  %v3513_v23 = vld [vmem:[#allocation17 + $0x58] sm:$0xff] }
 0x2a1   : > { %v2524_v45 = vrot.slane %v2429_v20, 2  ;;  %v2425_v43 = vpop.permute.xlu0 %2424  ;;  %v2584_v4 = vsel %vm2556_vm3, %v2419_v13, %v2519_v34  ;;  %v2710_v12 = vmax.f32 %v10162_v5, %v2582_v14  ;;  %v3583_v33 = vsel %vm3573_vm13, %v3578_v11, %v3582_v26  ;;  %3797 = vmatprep.subr.mxu1 %v12876_v42 }
 0x2a2   : > { %v3370_v27 = vsel %vm3343_vm5, %v3008_v60, %v3000_v44  ;;  %8069 = vmatprep.mubr.msk.f32.mxu1 %vm2556_vm3, %v3583_v33  ;;  %v3942_v3 = vsel %vm3932_vm14, %v3937_v58, %v3941_v32  ;;  %v2585_v59 = vsel %vm2556_vm3, %v2421_v61, %v2520_v48  ;;  %v3581_v19 = vsel %vm3573_vm13, %v3575_v30, %v3580_v31  ;;  %v3516_v58 = vld [vmem:[#allocation17 + $0x70] sm:$0xff]  ;;  %v4226_v60 = vld [vmem:[#allocation9 + $0xa8] sm:$0xff] }
 0x2a3   : > { %v2435_v41 = vpop.permute.xlu1 %2434  ;;  %v3016_v13 = vrot.slane %v2710_v12, %v12914_v57  ;;  %v3020_v5 = vrot.slane %v2710_v12, %v10376_v53  ;;  %8085 = vmatprep.mubr.msk.f32.mxu0 %vm2556_vm3, %v3942_v3  ;;  %v3940_v11 = vsel %vm3932_vm14, %v3934_v9, %v3939_v35  ;;  %v2589_v21 = vsel %vm2556_vm3, %v2429_v20, %v2524_v45  ;;  %v4224_v35 = vld [vmem:[#allocation9 + $0x98] sm:$0xff] }
 0x2a4   : > { %v3377_v44 = vsel %vm3343_vm5, %v3012_v10, %v3004_v56  ;;  %v2712_v55 = vmax.f32 %v10157_v46, %v2584_v4  ;;  %v2713_v30 = vmax.f32 %v10170_v38, %v2585_v59  ;;  %3740 = vmatmul.mubr.f32.gmra.mxu1 %v3581_v19  ;;  %4099 = vmatmul.mubr.f32.gmra.mxu0 %v3940_v11  ;;  %v2522_v63 = vrot.slane %v2425_v43, 2  ;;  %v3515_v56 = vld [vmem:[#allocation17 + $0x68] sm:$0xff]  ;;  %v4225_v10 = vld [vmem:[#allocation9 + $0xa0] sm:$0xff] }
 0x2a5   : > { %v2423_v36 = vpop.permute.xlu0 %2422  ;;  %v3028_v52 = vrot.slane %v2711_v28, %v10376_v53  ;;  %v3371_v37 = vsel %vm3325_vm4, %v3016_v13, %v3370_v27  ;;  %v3378_v40 = vsel %vm3325_vm4, %v3020_v5, %v3377_v44  ;;  %v10594_v9 = vmax.f32 %v10179_v50, %v2589_v21  ;;  %3798 = vmatpush1.msra.mxu1 %v3516_v58  ;;  %v4227_v38 = vld [vmem:[#allocation9 + $0xb0] sm:$0xff]  ;;  %v3512_v12 = vld [vmem:[#allocation17 + $0x50] sm:$0xff] }
 0x2a6   : > { %v2527_v22 = vrot.slane %v2435_v41, 2  ;;  %v3372_v49 = vsel %vm3327_vm6, %v3024_v0, %v3371_v37  ;;  %v2587_v7 = vsel %vm2556_vm3, %v2425_v43, %v2522_v63  ;;  %3799 = vmatprep.subr.mxu1 %v12876_v42  ;;  %v3032_v28 = vrot.slane %v2712_v55, %v12914_v57  ;;  %4536 = vmatpush1.msra.mxu0 %v4227_v38  ;;  %v10627_v11 = vld [vmem:[#allocation3 + $0x38] sm:$0xfe]  ;;  %v4223_v21 = vld [vmem:[#allocation9 + $0x90] sm:$0xff] }
 0x2a7   : > { %v2437_v46 = vpop.permute.xlu1 %2436  ;;  %v3379_v61 = vsel %vm3327_vm6, %v3028_v52, %v3378_v40  ;;  %v3036_v50 = vrot.slane %v2712_v55, %v10376_v53  ;;  %v3040_v34 = vrot.slane %v2713_v30, %v12914_v57  ;;  %v3044_v2 = vrot.slane %v2713_v30, %v10376_v53  ;;  %3800 = vmatpush1.msra.mxu1 %v3515_v56  ;;  %v12917_v63 = vld [vmem:[#allocation31_spill] sm:$0xff]  ;;  %v3510_v56 = vld [vmem:[#allocation17 + $0x40] sm:$0xff] }
 0x2a8   : > { %v3072_v54 = vrot.slane %v10594_v9, %v12914_v57  ;;  %v2521_v62 = vrot.slane %v2423_v36, 2  ;;  %v2528_v6 = vrot.slane %v2437_v46, 2  ;;  %3801 = vmatprep.subr.mxu1 %v12876_v42  ;;  %v3373_v26 = vsel %vm3329_vm7, %v3032_v28, %v3372_v49  ;;  %4537 = vmatprep.subr.mxu0 %v4226_v60  ;;  %v10646_v28 = vld [vmem:[#allocation3 + $0x38] sm:$0xfc] }
 0x2a9   : > { %v2427_v24 = vpop.permute.xlu0 %2426  ;;  %v3380_v32 = vsel %vm3329_vm7, %v3036_v50, %v3379_v61  ;;  %v10611_v48 = vmax.f32 %v10184_v17, %v2587_v7  ;;  %v2592_v14 = vsel %vm2556_vm3, %v2435_v41, %v2527_v22  ;;  %3802 = vmatpush1.msra.mxu1 %v3514_v8  ;;  %v3076_v45 = vrot.slane %v10594_v9, %v10376_v53  ;;  %v12916_v41 = vld [vmem:[#allocation30_spill] sm:$0xff] }
 0x2aa   : > { %v2523_v20 = vrot.slane %v2427_v24, 2  ;;  %v2586_v43 = vsel %vm2556_vm3, %v2423_v36, %v2521_v62  ;;  %3803 = vmatprep.subr.mxu1 %v12876_v42  ;;  %v2593_v33 = vsel %vm2556_vm3, %v2437_v46, %v2528_v6  ;;  %4538 = vmatpush1.msra.mxu0 %v4225_v10  ;;  %v3374_v59 = vsel %vm3331_vm8, %v3040_v34, %v3373_v26  ;;  %v4222_v22 = vld [vmem:[#allocation9 + $0x88] sm:$0xff]  ;;  %v4221_v46 = vld [vmem:[#allocation9 + $0x80] sm:$0xff]  ;;  %v10648_v50 = vld [vmem:[#allocation3 + $0x30] sm:$0xfe] }
 0x2ab   : > { %v2441_v31 = vpop.permute.xlu1 %2440  ;;  %v2714_v17 = vmax.f32 %v10197_v18, %v2586_v43  ;;  %3804 = vmatpush1.msra.mxu1 %v3513_v23  ;;  %v3381_v19 = vsel %vm3331_vm8, %v3044_v2, %v3380_v32  ;;  %v10625_v13 = vmax.f32 %v12916_v41, %v2592_v14  ;;  %v3511_v18 = vld [vmem:[#allocation17 + $0x48] sm:$0xff]  ;;  %4539 = vmatprep.subr.mxu0 %v4224_v35  ;;  %v3587_v8 = vrot.slane %v10627_v11, 1  ;;  %v3509_v6 = vld [vmem:[#allocation17 + $0x38] sm:$0xff]  ;;  %v3508_v43 = vld [vmem:[#allocation17 + $0x30] sm:$0xff] }
 0x2ac   : > { %v2588_v0 = vsel %vm2556_vm3, %v2427_v24, %v2523_v20  ;;  %v2530_v4 = vrot.slane %v2441_v31, 2  ;;  %3805 = vmatprep.subr.mxu1 %v12876_v42  ;;  %v10636_v36 = vmax.f32 %v12917_v63, %v2593_v33  ;;  %v3056_v38 = vrot.slane %v10611_v48, %v12914_v57  ;;  %4540 = vmatpush1.msra.mxu0 %v4223_v21  ;;  %v10659_v62 = vld [vmem:[#allocation3 + $0x30] sm:$0xfc]  ;;  %v4220_v20 = vld [vmem:[#allocation9 + $0x78] sm:$0xff] }
 0x2ad   : > { %v2716_v27 = vmax.f32 %v10208_v29, %v2588_v0  ;;  %v2433_v3 = vpop.permute.xlu0 %2432  ;;  %v3060_v29 = vrot.slane %v10611_v48, %v10376_v53  ;;  %v3048_v58 = vrot.slane %v2714_v17, %v12914_v57  ;;  %v3052_v44 = vrot.slane %v2714_v17, %v10376_v53  ;;  %3806 = vmatpush1.msra.mxu1 %v3512_v12  ;;  %v4219_v0 = vld [vmem:[#allocation9 + $0x70] sm:$0xff]  ;;  %v12920_v11 = vld [vmem:[#allocation36_spill] sm:$0xff] }
 0x2ae   : > { %v2526_v5 = vrot.slane %v2433_v3, 2  ;;  %v2595_v55 = vsel %vm2556_vm3, %v2441_v31, %v2530_v4  ;;  %3807 = vmatprep.subr.mxu1 %v12876_v42  ;;  %v3096_v34 = vrot.slane %v10625_v13, %v12914_v57  ;;  %v3100_v2 = vrot.slane %v10625_v13, %v10376_v53  ;;  %4541 = vmatprep.subr.mxu0 %v4222_v22  ;;  %v12918_v13 = vld [vmem:[#allocation33_spill] sm:$0xff] }
 0x2af   : > { %v2443_v30 = vpop.permute.xlu1 %2442  ;;  %v3064_v52 = vrot.slane %v2716_v27, %v12914_v57  ;;  %v3068_v37 = vrot.slane %v2716_v27, %v10376_v53  ;;  %v3382_v49 = vsel %vm3333_vm9, %v3052_v44, %v3381_v19  ;;  %3808 = vmatpush1.msra.mxu1 %v3511_v18  ;;  %v10657_v60 = vmax.f32 %v10216_v39, %v2595_v55  ;;  %v4218_v27 = vld [vmem:[#allocation9 + $0x68] sm:$0xff] }
 0x2b0   : > { %v2591_v40 = vsel %vm2556_vm3, %v2433_v3, %v2526_v5  ;;  %v2531_v61 = vrot.slane %v2443_v30, 2  ;;  %v3383_v24 = vsel %vm3335_vm10, %v3060_v29, %v3382_v49  ;;  %3809 = vmatprep.subr.mxu1 %v12876_v42  ;;  %v3375_v23 = vsel %vm3333_vm9, %v3048_v58, %v3374_v59  ;;  %4542 = vmatpush1.msra.mxu0 %v4221_v46  ;;  %v4217_v5 = vld [vmem:[#allocation9 + $0x60] sm:$0xff] }
 0x2b1   : > { %v2431_v7 = vpop.permute.xlu0 %2430  ;;  %3472 = vst [vmem:[#allocation3 + $0x50] sm:$0x1] %v3064_v52  ;;  %3473 = vst.msk [vmem:[#allocation3 + $0x58] sm:$0x1] %vm3466_vm12, %v3068_v37  ;;  %v2719_v10 = vmax.f32 %v10227_v1, %v2591_v40  ;;  %3810 = vmatpush1.msra.mxu1 %v3510_v56  ;;  %v3104_v39 = vrot.slane %v10636_v36, %v12914_v57  ;;  %v3946_v31 = vrot.slane %v10646_v28, 2  ;;  %v3584_v35 = vrot.slane %v10648_v50, 1 }
 0x2b2   : > { %3471 = vst.msk [vmem:[#allocation3 + $0x48] sm:$0xff] %vm2556_vm3, %v3383_v24  ;;  %v2596_v26 = vsel %vm2556_vm3, %v2443_v30, %v2531_v61  ;;  %v2525_v32 = vrot.slane %v2431_v7, 2  ;;  %3811 = vmatprep.subr.mxu1 %v12876_v42  ;;  %v3108_v1 = vrot.slane %v10636_v36, %v10376_v53  ;;  %v3943_v33 = vrot.slane %v10659_v62, 2  ;;  %4543 = vmatprep.subr.mxu0 %v4220_v20  ;;  %v3506_v52 = vld [vmem:[#allocation17 + $0x20] sm:$0xff]  ;;  %v4216_v37 = vld [vmem:[#allocation9 + $0x58] sm:$0xff]  ;;  %v3505_v24 = vld [vmem:[#allocation17 + $0x18] sm:$0xff] }
 0x2b3   : > { %v2439_v48 = vpop.permute.xlu1 %2438  ;;  %v10674_v4 = vmax.f32 %v10233_v15, %v2596_v26  ;;  %3812 = vmatpush1.msra.mxu1 %v3509_v6  ;;  %v10679_v3 = vsel %vm3335_vm10, %v3056_v38, %v3375_v23  ;;  %v3120_v59 = vrot.slane %v10657_v60, %v12914_v57  ;;  %v3507_v15 = vld [vmem:[#allocation17 + $0x28] sm:$0xff]  ;;  %v3124_v18 = vrot.slane %v10657_v60, %v10376_v53 }
 0x2b4   : > { %v2529_v14 = vrot.slane %v2439_v48, 2  ;;  %v2590_v12 = vsel %vm2556_vm3, %v2431_v7, %v2525_v32  ;;  %3813 = vmatprep.subr.mxu1 %v12876_v42  ;;  %v3088_v21 = vrot.slane %v2719_v10, %v12914_v57  ;;  %v3092_v29 = vrot.slane %v2719_v10, %v10376_v53  ;;  %4544 = vmatpush1.msra.mxu0 %v4219_v0 }
 0x2b5   : > { %v2445_v17 = vpop.permute.xlu0 %2444  ;;  %v2718_v19 = vmax.f32 %v10245_v51, %v2590_v12  ;;  %3814 = vmatpush1.msra.mxu1 %v3508_v43  ;;  %4545 = vmatprep.subr.mxu0 %v4218_v27  ;;  %v3128_v40 = vrot.slane %v10674_v4, %v12914_v57  ;;  %v3585_v46 = vrot.slane %v10679_v3, 1  ;;  %v3944_v38 = vrot.slane %v10679_v3, 2  ;;  %v4214_v27 = vld [vmem:[#allocation9 + $0x48] sm:$0xff] }
 0x2b6   : > { %v2594_v41 = vsel %vm2556_vm3, %v2439_v48, %v2529_v14  ;;  %v2532_v58 = vrot.slane %v2445_v17, 2  ;;  %3815 = vmatprep.subr.mxu1 %v12876_v42  ;;  %4546 = vmatpush1.msra.mxu0 %v4217_v5  ;;  %v3132_v6 = vrot.slane %v10674_v4, %v10376_v53  ;;  %v3504_v48 = vld [vmem:[#allocation17 + $0x10] sm:$0xff]  ;;  %v4215_v14 = vld [vmem:[#allocation9 + $0x50] sm:$0xff] }
 0x2b7   : > { %v2449_v44 = vpop.permute.xlu1 %2448  ;;  %v3080_v55 = vrot.slane %v2718_v19, %v12914_v57  ;;  %v3084_v51 = vrot.slane %v2718_v19, %v10376_v53  ;;  %v2722_v30 = vmax.f32 %v10249_v47, %v2594_v41  ;;  %3816 = vmatpush1.msra.mxu1 %v3507_v15  ;;  %4547 = vmatprep.subr.mxu0 %v4216_v37  ;;  %v4213_v41 = vld [vmem:[#allocation9 + $0x40] sm:$0xff]  ;;  %v12919_v37 = vld [vmem:[#allocation34_spill] sm:$0xff] }
 0x2b8   : > { %v2534_v63 = vrot.slane %v2449_v44, 2  ;;  %v2597_v56 = vsel %vm2556_vm3, %v2445_v17, %v2532_v58  ;;  %3817 = vmatprep.subr.mxu1 %v12876_v42  ;;  %v3540_v12 = vld [vmem:[#allocation3 + $0x58] sm:$0x1]  ;;  %v3539_v58 = vld [vmem:[#allocation3 + $0x50] sm:$0x1]  ;;  %4548 = vmatpush1.msra.mxu0 %v4215_v14 }
 0x2b9   : > { %v2451_v22 = vpop.permute.xlu0 %2450  ;;  %v3384_v47 = vsel %vm3325_vm4, %v3080_v55, %v3072_v54  ;;  %v3390_v49 = vsel %vm3325_vm4, %v3084_v51, %v3076_v45  ;;  %v10708_v61 = vmax.f32 %v10255_v16, %v2597_v56  ;;  %3818 = vmatpush1.msra.mxu1 %v3506_v52  ;;  %v3112_v45 = vrot.slane %v2722_v30, %v12914_v57  ;;  %v10726_v32 = vld [vmem:[#allocation3 + $0x48] sm:$0xff]  ;;  %v3907_v50 = vld [vmem:[#allocation3 + $0x58] sm:$0x3]  ;;  %v3906_v55 = vld [vmem:[#allocation3 + $0x50] sm:$0x3] }
 0x2ba   : > { %v2599_v7 = vsel %vm2556_vm3, %v2449_v44, %v2534_v63  ;;  %v3385_v20 = vsel %vm3327_vm6, %v3088_v21, %v3384_v47  ;;  %v3391_v54 = vsel %vm3327_vm6, %v3092_v29, %v3390_v49  ;;  %v2535_v23 = vrot.slane %v2451_v22, 2  ;;  %3819 = vmatprep.subr.mxu1 %v12876_v42  ;;  %4549 = vmatprep.subr.mxu0 %v4214_v27 }
 0x2bb   : > { %v2447_v10 = vpop.permute.xlu1 %2446  ;;  %v3386_v16 = vsel %vm3329_vm7, %v3096_v34, %v3385_v20  ;;  %v3392_v9 = vsel %vm3329_vm7, %v3100_v2, %v3391_v54  ;;  %v3116_v26 = vrot.slane %v2722_v30, %v10376_v53  ;;  %v10735_v0 = vmax.f32 %v12918_v13, %v2599_v7  ;;  %3820 = vmatpush1.msra.mxu1 %v3505_v24  ;;  %v4212_v54 = vld [vmem:[#allocation9 + $0x38] sm:$0xff] }
 0x2bc   : > { %v3387_v34 = vsel %vm3331_vm8, %v3104_v39, %v3386_v16  ;;  %v3393_v43 = vsel %vm3331_vm8, %v3108_v1, %v3392_v9  ;;  %v3586_v2 = vsel %vm3573_vm13, %v3584_v35, %v3585_v46  ;;  %v3136_v39 = vrot.slane %v10708_v61, %v12914_v57  ;;  %3821 = vmatprep.subr.mxu1 %v12876_v42  ;;  %v3503_v35 = vld [vmem:[#allocation17 + $0x8] sm:$0xff] }
 0x2bd   : > { %v2453_v17 = vpop.permute.xlu0 %2452  ;;  %v3388_v19 = vsel %vm3333_vm9, %v3112_v45, %v3387_v34  ;;  %v3394_v36 = vsel %vm3333_vm9, %v3116_v26, %v3393_v43  ;;  %v3945_v1 = vsel %vm3932_vm14, %v3943_v33, %v3944_v38  ;;  %v2600_v21 = vsel %vm2556_vm3, %v2451_v22, %v2535_v23  ;;  %3822 = vmatpush1.msra.mxu1 %v3504_v48  ;;  %v12921_v26 = vld [vmem:[#allocation37_spill] sm:$0xff] }
 0x2be   : > { %v3389_v15 = vsel %vm3335_vm10, %v3120_v59, %v3388_v19  ;;  %v3395_v5 = vsel %vm3335_vm10, %v3124_v18, %v3394_v36  ;;  %v3588_v29 = vrot.slane %v10726_v32, 1  ;;  %v3140_v33 = vrot.slane %v10708_v61, %v10376_v53  ;;  %3823 = vmatprep.subr.mxu1 %v12876_v42  ;;  %4550 = vmatpush1.msra.mxu0 %v4213_v41 }
 0x2bf   : > { %v2461_v62 = vpop.permute.xlu1 %2460  ;;  %3474 = vst [vmem:[#allocation3 + $0x60] sm:$0xfe] %v3389_v15  ;;  %3475 = vst.msk [vmem:[#allocation3 + $0x68] sm:$0xfe] %vm3461_vm11, %v3395_v5  ;;  %v3947_v60 = vrot.slane %v10726_v32, 2  ;;  %v2533_v44 = vrot.slane %v2447_v10, 2  ;;  %v3152_v18 = vrot.slane %v10735_v0, %v12914_v57  ;;  %3824 = vmatpush1.msra.mxu1 %v3503_v35  ;;  %v2728_v56 = vmax.f32 %v12919_v37, %v2600_v21 }
 0x2c0   : > { %v3592_v59 = vrot.slane %v3540_v12, 1  ;;  %v3589_v51 = vsel %vm3573_vm13, %v3587_v8, %v3588_v29  ;;  %v3951_v30 = vrot.slane %v3907_v50, 2  ;;  %v2536_v63 = vrot.slane %v2453_v17, 2  ;;  %3825 = vmatprep.subr.mxu1 %v12876_v42  ;;  %4551 = vmatprep.subr.mxu0 %v4212_v54  ;;  %v12922_v35 = vld [vmem:[#allocation40_spill] sm:$0xff]  ;;  %v4211_v5 = vld [vmem:[#allocation9 + $0x30] sm:$0xff]  ;;  %v12925_v54 = vld [vmem:[#allocation41_spill] sm:$0xff] }
 0x2c1   : > { %v2457_v52 = vpop.permute.xlu0 %2456  ;;  %8070 = vmatprep.mubr.msk.f32.mxu1 %vm2556_vm3, %v3589_v51  ;;  %v3948_v22 = vsel %vm3932_vm14, %v3946_v31, %v3947_v60  ;;  %v2598_v47 = vsel %vm2556_vm3, %v2447_v10, %v2533_v44  ;;  %v3590_v49 = vrot.slane %v3539_v58, 1  ;;  %v3949_v24 = vrot.slane %v3906_v55, 2  ;;  %v12924_v44 = vld [vmem:[#allocation42_spill] sm:$0xff]  ;;  %4552 = vmatpush1.msra.mxu0 %v4211_v5 }
 0x2c2   : > { %8086 = vmatprep.mubr.msk.f32.mxu0 %vm2556_vm3, %v3948_v22  ;;  %3745 = vmatmul.mubr.f32.gmra.mxu1 %v3586_v2  ;;  %v2726_v8 = vmax.f32 %v12920_v11, %v2598_v47  ;;  %v3593_v61 = vsel %vm3573_vm13, %v3588_v29, %v3592_v59  ;;  %v3952_v7 = vsel %vm3932_vm14, %v3947_v60, %v3951_v30  ;;  %v2540_v23 = vrot.slane %v2461_v62, 2  ;;  %v3531_v29 = vld [vmem:[#allocation17 + $0xe8] sm:$0xff]  ;;  %v3530_v37 = vld [vmem:[#allocation17 + $0xe0] sm:$0xff] }
 0x2c3   : > { %v2467_v20 = vpop.permute.xlu1 %2466  ;;  %v3156_v28 = vrot.slane %v10735_v0, %v10376_v53  ;;  %4104 = vmatmul.mubr.f32.gmra.mxu0 %v3945_v1  ;;  %8071 = vmatprep.mubr.msk.f32.mxu1 %vm2556_vm3, %v3593_v61  ;;  %v2601_v31 = vsel %vm2556_vm3, %v2453_v17, %v2536_v63  ;;  %v2538_v10 = vrot.slane %v2457_v52, 2  ;;  %v3396_v16 = vsel %vm3343_vm5, %v3136_v39, %v3128_v40  ;;  %v3502_v0 = vld [vmem:[#allocation17] sm:$0xff]  ;;  %v3532_v39 = vld [vmem:[#allocation17 + $0xf0] sm:$0xff] }
 0x2c4   : > { %v3144_v9 = vrot.slane %v2726_v8, %v12914_v57  ;;  %v3148_v45 = vrot.slane %v2726_v8, %v10376_v53  ;;  %8087 = vmatprep.mubr.msk.f32.mxu0 %vm2556_vm3, %v3952_v7  ;;  %v10791_v48 = vmax.f32 %v12921_v26, %v2601_v31  ;;  %v3403_v34 = vsel %vm3343_vm5, %v3140_v33, %v3132_v6  ;;  %v12923_v33 = vld [vmem:[#allocation39_spill] sm:$0xff] }
 0x2c5   : > { %v2455_v14 = vpop.permute.xlu0 %2454  ;;  %v3591_v43 = vsel %vm3573_vm13, %v3585_v46, %v3590_v49  ;;  %v2603_v40 = vsel %vm2556_vm3, %v2457_v52, %v2538_v10  ;;  %v3164_v2 = vrot.slane %v2728_v56, %v10376_v53  ;;  %v3950_v4 = vsel %vm3932_vm14, %v3944_v38, %v3949_v24  ;;  %3826 = vmatpush1.msra.mxu1 %v3502_v0 }
 0x2c6   : > { %v2537_v13 = vrot.slane %v2455_v14, 2  ;;  %v3397_v12 = vsel %vm3325_vm4, %v3144_v9, %v3396_v16  ;;  %v3404_v17 = vsel %vm3325_vm4, %v3148_v45, %v3403_v34  ;;  %3750 = vmatmul.mubr.f32.gmra.mxu1 %v3591_v43  ;;  %v2605_v19 = vsel %vm2556_vm3, %v2461_v62, %v2540_v23  ;;  %3829 = vmatprep.subr.mxu1 %v12876_v42  ;;  %v12926_v23 = vld [vmem:[#allocation44_spill] sm:$0xff] }
 0x2c7   : > { %v2469_v6 = vpop.permute.xlu1 %2468  ;;  %v3398_v46 = vsel %vm3327_vm6, %v3152_v18, %v3397_v12  ;;  %v3405_v27 = vsel %vm3327_vm6, %v3156_v28, %v3404_v17  ;;  %4109 = vmatmul.mubr.f32.gmra.mxu0 %v3950_v4  ;;  %v2543_v36 = vrot.slane %v2467_v20, 2  ;;  %v3160_v1 = vrot.slane %v2728_v56, %v12914_v57  ;;  %3830 = vmatpush2.msra.mxu1 %v3532_v39  ;;  %v4210_v18 = vld [vmem:[#allocation9 + $0x28] sm:$0xff]  ;;  %v4209_v9 = vld [vmem:[#allocation9 + $0x20] sm:$0xff]  ;;  %v3527_v39 = vld [vmem:[#allocation17 + $0xc8] sm:$0xff] }
 0x2c8   : > { %v3172_v50 = vrot.slane %v10791_v48, %v10376_v53  ;;  %v10815_v41 = vmax.f32 %v12922_v35, %v2603_v40  ;;  %v2602_v38 = vsel %vm2556_vm3, %v2455_v14, %v2537_v13  ;;  %v3406_v21 = vsel %vm3329_vm7, %v3164_v2, %v3405_v27  ;;  %3831 = vmatprep.subr.mxu1 %v12876_v42  ;;  %v3528_v43 = vld [vmem:[#allocation17 + $0xd0] sm:$0xff]  ;;  %v12928_v12 = vld [vmem:[#allocation45_spill] sm:$0xff] }
 0x2c9   : > { %v2459_v15 = vpop.permute.xlu0 %2458  ;;  %v3168_v58 = vrot.slane %v10791_v48, %v12914_v57  ;;  %v3399_v62 = vsel %vm3329_vm7, %v3160_v1, %v3398_v46  ;;  %v10824_v60 = vmax.f32 %v12923_v33, %v2605_v19  ;;  %v2730_v59 = vmax.f32 %v12924_v44, %v2602_v38  ;;  %3832 = vmatpush2.msra.mxu1 %v3531_v29  ;;  %v12927_v48 = vld [vmem:[#allocation43_spill] sm:$0xff]  ;;  %v4206_v1 = vld [vmem:[#allocation9 + $0x8] sm:$0xff] }
 0x2ca   : > { %v2608_v51 = vsel %vm2556_vm3, %v2467_v20, %v2543_v36  ;;  %v2544_v30 = vrot.slane %v2469_v6, 2  ;;  %v2539_v63 = vrot.slane %v2459_v15, 2  ;;  %v3407_v56 = vsel %vm3331_vm8, %v3172_v50, %v3406_v21  ;;  %3833 = vmatprep.subr.mxu1 %v12876_v42  ;;  %v3529_v20 = vld [vmem:[#allocation17 + $0xd8] sm:$0xff]  ;;  %4553 = vmatprep.subr.mxu0 %v4210_v18  ;;  %v4208_v40 = vld [vmem:[#allocation9 + $0x18] sm:$0xff]  ;;  %v12929_v38 = vld [vmem:[#allocation46_spill] sm:$0xff] }
 0x2cb   : > { %v2475_v55 = vpop.permute.xlu1 %2474  ;;  %v3188_v22 = vrot.slane %v10815_v41, %v10376_v53  ;;  %v3176_v47 = vrot.slane %v2730_v59, %v12914_v57  ;;  %v3180_v49 = vrot.slane %v2730_v59, %v10376_v53  ;;  %v10839_v28 = vmax.f32 %v12925_v54, %v2608_v51  ;;  %3834 = vmatpush2.msra.mxu1 %v3530_v37  ;;  %v10861_v36 = vld [vmem:[#allocation3 + $0x68] sm:$0xfe]  ;;  %v4205_v21 = vld [vmem:[#allocation9] sm:$0xff] }
 0x2cc   : > { %v2547_v52 = vrot.slane %v2475_v55, 2  ;;  %v2609_v8 = vsel %vm2556_vm3, %v2469_v6, %v2544_v30  ;;  %v2604_v61 = vsel %vm2556_vm3, %v2459_v15, %v2539_v63  ;;  %v3400_v45 = vsel %vm3331_vm8, %v3168_v58, %v3399_v62  ;;  %3835 = vmatprep.subr.mxu1 %v12876_v42  ;;  %v4207_v6 = vld [vmem:[#allocation9 + $0x10] sm:$0xff]  ;;  %4554 = vmatpush1.msra.mxu0 %v4209_v9 }
 0x2cd   : > { %v2465_v11 = vpop.permute.xlu0 %2464  ;;  %v3408_v31 = vsel %vm3333_vm9, %v3180_v49, %v3407_v56  ;;  %v2732_v10 = vmax.f32 %v12926_v23, %v2604_v61  ;;  %v10846_v14 = vmax.f32 %v12927_v48, %v2609_v8  ;;  %v3401_v13 = vsel %vm3333_vm9, %v3176_v47, %v3400_v45  ;;  %3836 = vmatpush2.msra.mxu1 %v3529_v20  ;;  %v3526_v44 = vld [vmem:[#allocation17 + $0xc0] sm:$0xff]  ;;  %v3525_v47 = vld [vmem:[#allocation17 + $0xb8] sm:$0xff] }
 0x2ce   : > { %v2612_v7 = vsel %vm2556_vm3, %v2475_v55, %v2547_v52  ;;  %v2542_v24 = vrot.slane %v2465_v11, 2  ;;  %v3409_v26 = vsel %vm3335_vm10, %v3188_v22, %v3408_v31  ;;  %v3200_v46 = vrot.slane %v10824_v60, %v12914_v57  ;;  %3837 = vmatprep.subr.mxu1 %v12876_v42  ;;  %4555 = vmatprep.subr.mxu0 %v4208_v40  ;;  %v12930_v52 = vld [vmem:[#allocation48_spill] sm:$0xff]  ;;  %v12932_v45 = vld [vmem:[#allocation49_spill] sm:$0xff]  ;;  %v12933_v48 = vld [vmem:[#allocation50_spill] sm:$0xff] }
 0x2cf   : > { %v2481_v16 = vpop.permute.xlu1 %2480  ;;  %3477 = vst.msk [vmem:[#allocation3 + $0x78] sm:$0xff] %vm2556_vm3, %v3409_v26  ;;  %v3192_v0 = vrot.slane %v2732_v10, %v12914_v57  ;;  %v3196_v2 = vrot.slane %v2732_v10, %v10376_v53  ;;  %v10855_v17 = vmax.f32 %v12928_v12, %v2612_v7  ;;  %v3184_v27 = vrot.slane %v10815_v41, %v12914_v57  ;;  %v3524_v10 = vld [vmem:[#allocation17 + $0xb0] sm:$0xff] }
 0x2d0   : > { %v2607_v34 = vsel %vm2556_vm3, %v2465_v11, %v2542_v24  ;;  %v2550_v19 = vrot.slane %v2481_v16, 2  ;;  %v3204_v50 = vrot.slane %v10824_v60, %v10376_v53  ;;  %v3224_v35 = vrot.slane %v10839_v28, %v12914_v57  ;;  %3838 = vmatpush2.msra.mxu1 %v3528_v43  ;;  %v3541_v60 = vld [vmem:[#allocation3 + $0x60] sm:$0xfe]  ;;  %4556 = vmatpush1.msra.mxu0 %v4207_v6 }
 0x2d1   : > { %v2463_v4 = vpop.permute.xlu0 %2462  ;;  %3478 = vst [vmem:[#allocation3 + $0x80] sm:$0x1] %v3192_v0  ;;  %3479 = vst.msk [vmem:[#allocation3 + $0x88] sm:$0x1] %vm3466_vm12, %v3196_v2  ;;  %v2735_v15 = vmax.f32 %v12929_v38, %v2607_v34  ;;  %v3228_v29 = vrot.slane %v10839_v28, %v10376_v53  ;;  %v10873_v58 = vsel %vm3335_vm10, %v3184_v27, %v3401_v13  ;;  %3839 = vmatprep.subr.mxu1 %v12876_v42  ;;  %v3909_v13 = vld [vmem:[#allocation3 + $0x68] sm:$0xfc] }
 0x2d2   : > { %v2541_v41 = vrot.slane %v2463_v4, 2  ;;  %v3232_v62 = vrot.slane %v10846_v14, %v12914_v57  ;;  %v3236_v59 = vrot.slane %v10846_v14, %v10376_v53  ;;  %v3260_v55 = vrot.slane %v10855_v17, %v10376_v53  ;;  %3840 = vmatpush2.msra.mxu1 %v3527_v39  ;;  %4557 = vmatprep.subr.mxu0 %v4206_v1  ;;  %v3908_v6 = vld [vmem:[#allocation3 + $0x60] sm:$0xfc]  ;;  %v3523_v27 = vld [vmem:[#allocation17 + $0xa8] sm:$0xff] }
 0x2d3   : > { %v2479_v5 = vpop.permute.xlu1 %2478  ;;  %v3597_v30 = vrot.slane %v10861_v36, 1  ;;  %v2615_v63 = vsel %vm2556_vm3, %v2481_v16, %v2550_v19  ;;  %3841 = vmatprep.subr.mxu1 %v12876_v42  ;;  %4558 = vmatpush1.msra.mxu0 %v4205_v21  ;;  %v3216_v49 = vrot.slane %v2735_v15, %v12914_v57  ;;  %v3220_v11 = vrot.slane %v2735_v15, %v10376_v53  ;;  %v12931_v16 = vld [vmem:[#allocation47_spill] sm:$0xff] }
 0x2d4   : > { %v2549_v33 = vrot.slane %v2479_v5, 2  ;;  %v2606_v18 = vsel %vm2556_vm3, %v2463_v4, %v2541_v41  ;;  %v3594_v61 = vrot.slane %v3541_v60, 1  ;;  %v3595_v7 = vrot.slane %v10873_v58, 1  ;;  %3842 = vmatpush2.msra.mxu1 %v3526_v44  ;;  %7045 = vmatprep.subr.mxu0 %v12876_v42 }
 0x2d5   : > { %v2477_v51 = vpop.permute.xlu0 %2476  ;;  %v2734_v37 = vmax.f32 %v12930_v52, %v2606_v18  ;;  %3843 = vmatprep.subr.mxu1 %v12876_v42  ;;  %v10899_v9 = vmax.f32 %v12931_v16, %v2615_v63  ;;  %v3956_v41 = vrot.slane %v3909_v13, 2  ;;  %v3953_v18 = vrot.slane %v3908_v6, 2 }
 0x2d6   : > { %v2614_v56 = vsel %vm2556_vm3, %v2479_v5, %v2549_v33  ;;  %v2548_v22 = vrot.slane %v2477_v51, 2  ;;  %v10895_v23 = vld [vmem:[#allocation3 + $0x78] sm:$0xff]  ;;  %3844 = vmatpush2.msra.mxu1 %v3525_v47  ;;  %v3596_v5 = vsel %vm3573_vm13, %v3594_v61, %v3595_v7  ;;  %v3522_v33 = vld [vmem:[#allocation17 + $0xa0] sm:$0xff] }
 0x2d7   : > { %v2471_v8 = vpop.permute.xlu1 %2470  ;;  %v3208_v24 = vrot.slane %v2734_v37, %v12914_v57  ;;  %v3212_v20 = vrot.slane %v2734_v37, %v10376_v53  ;;  %v10902_v26 = vmax.f32 %v12932_v45, %v2614_v56  ;;  %v3598_v40 = vrot.slane %v10895_v23, 1  ;;  %3845 = vmatprep.subr.mxu1 %v12876_v42 }
 0x2d8   : > { %v2613_v54 = vsel %vm2556_vm3, %v2477_v51, %v2548_v22  ;;  %v2545_v31 = vrot.slane %v2471_v8, 2  ;;  %3846 = vmatpush2.msra.mxu1 %v3524_v10  ;;  %v3284_v63 = vrot.slane %v10899_v9, %v10376_v53  ;;  %v3954_v37 = vrot.slane %v10873_v58, 2  ;;  %v3544_v56 = vld [vmem:[#allocation3 + $0x88] sm:$0x1]  ;;  %v3910_v10 = vld [vmem:[#allocation3 + $0x80] sm:$0x3] }
 0x2d9   : > { %v2741_v34 = vmax.f32 %v12933_v48, %v2613_v54  ;;  %v2483_v43 = vpop.permute.xlu0 %2482  ;;  %v3410_v0 = vsel %vm3325_vm4, %v3208_v24, %v3200_v46  ;;  %v3416_v2 = vsel %vm3325_vm4, %v3212_v20, %v3204_v50  ;;  %v3256_v46 = vrot.slane %v10855_v17, %v12914_v57  ;;  %v12934_v50 = vld [vmem:[#allocation51_spill] sm:$0xff]  ;;  %3847 = vmatprep.subr.mxu1 %v12876_v42  ;;  %v3911_v47 = vld [vmem:[#allocation3 + $0x88] sm:$0x3]  ;;  %v12935_v20 = vld [vmem:[#allocation52_spill] sm:$0xff] }
 0x2da   : > { %v2610_v12 = vsel %vm2556_vm3, %v2471_v8, %v2545_v31  ;;  %v2551_v4 = vrot.slane %v2483_v43, 2  ;;  %v3411_v19 = vsel %vm3327_vm6, %v3216_v49, %v3410_v0  ;;  %v3417_v39 = vsel %vm3327_vm6, %v3220_v11, %v3416_v2  ;;  %3848 = vmatpush2.msra.mxu1 %v3523_v27  ;;  %v3543_v49 = vld [vmem:[#allocation3 + $0x80] sm:$0x1]  ;;  %v3521_v11 = vld [vmem:[#allocation17 + $0x98] sm:$0xff] }
 0x2db   : > { %v3264_v1 = vrot.slane %v2741_v34, %v12914_v57  ;;  %v3268_v38 = vrot.slane %v2741_v34, %v10376_v53  ;;  %v10917_v15 = vmax.f32 %v12934_v50, %v2610_v12  ;;  %v2473_v21 = vpop.permute.xlu1 %2472  ;;  %v3412_v44 = vsel %vm3329_vm7, %v3224_v35, %v3411_v19  ;;  %3849 = vmatprep.subr.mxu1 %v12876_v42  ;;  %v12936_v12 = vld [vmem:[#allocation53_spill] sm:$0xff] }
 0x2dc   : > { %v3418_v17 = vsel %vm3329_vm7, %v3228_v29, %v3417_v39  ;;  %v3276_v52 = vrot.slane %v10902_v26, %v10376_v53  ;;  %v3272_v28 = vrot.slane %v10902_v26, %v12914_v57  ;;  %v3599_v22 = vsel %vm3573_vm13, %v3597_v30, %v3598_v40  ;;  %3850 = vmatpush2.msra.mxu1 %v3522_v33  ;;  %v3520_v39 = vld [vmem:[#allocation17 + $0x90] sm:$0xff] }
 0x2dd   : > { %v3429_v60 = vsel %vm3343_vm5, %v3268_v38, %v3260_v55  ;;  %v2485_v51 = vpop.permute.xlu0 %2484  ;;  %v2616_v55 = vsel %vm2556_vm3, %v2483_v43, %v2551_v4  ;;  %v10942_v35 = vsel %vm3343_vm5, %v3264_v1, %v3256_v46  ;;  %v3240_v29 = vrot.slane %v10917_v15, %v12914_v57  ;;  %8072 = vmatprep.mubr.msk.f32.mxu1 %vm2556_vm3, %v3599_v22  ;;  %v12937_v1 = vld [vmem:[#allocation54_spill] sm:$0xff] }
 0x2de   : > { %v3430_v8 = vsel %vm3325_vm4, %v3276_v52, %v3429_v60  ;;  %v3413_v61 = vsel %vm3331_vm8, %v3232_v62, %v3412_v44  ;;  %v3419_v24 = vsel %vm3331_vm8, %v3236_v59, %v3418_v17  ;;  %v3957_v36 = vrot.slane %v10895_v23, 2  ;;  %3851 = vmatprep.subr.mxu1 %v12876_v42  ;;  %3755 = vmatmul.mubr.f32.gmra.mxu1 %v3596_v5 }
 0x2df   : > { %v3244_v30 = vrot.slane %v10917_v15, %v10376_v53  ;;  %v10966_v54 = vmax.f32 %v12935_v20, %v2616_v55  ;;  %v2546_v31 = vrot.slane %v2473_v21, 2  ;;  %v3602_v62 = vrot.slane %v3544_v56, 1  ;;  %v2491_v34 = vpop.permute.xlu1 %2490  ;;  %3852 = vmatpush2.msra.mxu1 %v3521_v11  ;;  %v12938_v55 = vld [vmem:[#allocation55_spill] sm:$0xff]  ;;  %v3518_v11 = vld [vmem:[#allocation17 + $0x80] sm:$0xff] }
 0x2e0   : > { %v3958_v14 = vsel %vm3932_vm14, %v3956_v41, %v3957_v36  ;;  %v3961_v59 = vrot.slane %v3911_v47, 2  ;;  %v2552_v45 = vrot.slane %v2485_v51, 2  ;;  %v3600_v48 = vrot.slane %v3543_v49, 1  ;;  %3853 = vmatprep.subr.mxu1 %v12876_v42  ;;  %v12940_v20 = vld [vmem:[#allocation57_spill] sm:$0xff] }
 0x2e1   : > { %v2487_v16 = vpop.permute.xlu0 %2486  ;;  %v3414_v43 = vsel %vm3333_vm9, %v3240_v29, %v3413_v61  ;;  %8088 = vmatprep.mubr.msk.f32.mxu0 %vm2556_vm3, %v3958_v14  ;;  %v3955_v13 = vsel %vm3932_vm14, %v3953_v18, %v3954_v37  ;;  %v2611_v0 = vsel %vm2556_vm3, %v2473_v21, %v2546_v31  ;;  %v3603_v2 = vsel %vm3573_vm13, %v3598_v40, %v3602_v62  ;;  %v3519_v18 = vld [vmem:[#allocation17 + $0x88] sm:$0xff]  ;;  %v12939_v29 = vld [vmem:[#allocation56_spill] sm:$0xff] }
 0x2e2   : > { %4114 = vmatmul.mubr.f32.gmra.mxu0 %v3955_v13  ;;  %v2739_v4 = vmax.f32 %v12936_v12, %v2611_v0  ;;  %8073 = vmatprep.mubr.msk.f32.mxu1 %vm2556_vm3, %v3603_v2  ;;  %v3962_v6 = vsel %vm3932_vm14, %v3957_v36, %v3961_v59  ;;  %v2617_v27 = vsel %vm2556_vm3, %v2485_v51, %v2552_v45  ;;  %v3959_v19 = vrot.slane %v3910_v10, 2  ;;  %v4269_v36 = vld [vmem:[#allocation9 + $0x178] sm:$0xff] }
 0x2e3   : > { %8089 = vmatprep.mubr.msk.f32.mxu0 %vm2556_vm3, %v3962_v6  ;;  %v2745_v38 = vmax.f32 %v12937_v1, %v2617_v27  ;;  %v3601_v46 = vsel %vm3573_vm13, %v3595_v7, %v3600_v48  ;;  %v2555_v40 = vrot.slane %v2491_v34, 2  ;;  %v2553_v50 = vrot.slane %v2487_v16, 2  ;;  %3854 = vmatpush2.msra.mxu1 %v3520_v39 }
 0x2e4   : > { %v3420_v41 = vsel %vm3333_vm9, %v3244_v30, %v3419_v24  ;;  %v3248_v5 = vrot.slane %v2739_v4, %v12914_v57  ;;  %v3252_v21 = vrot.slane %v2739_v4, %v10376_v53  ;;  %3760 = vmatmul.mubr.f32.gmra.mxu1 %v3601_v46  ;;  %v3292_v60 = vrot.slane %v10966_v54, %v10376_v53 }
 0x2e5   : > { %v2489_v15 = vpop.permute.xlu0 %2488  ;;  %v3960_v44 = vsel %vm3932_vm14, %v3954_v37, %v3959_v19  ;;  %v2620_v7 = vsel %vm2556_vm3, %v2491_v34, %v2555_v40  ;;  %v2618_v17 = vsel %vm2556_vm3, %v2487_v16, %v2553_v50  ;;  %v3431_v37 = vsel %vm3327_vm6, %v3284_v63, %v3430_v8  ;;  %3855 = vmatprep.subr.mxu1 %v12876_v42 }
 0x2e6   : > { %v2554_v33 = vrot.slane %v2489_v15, 2  ;;  %v3415_v51 = vsel %vm3335_vm10, %v3248_v5, %v3414_v43  ;;  %v3421_v52 = vsel %vm3335_vm10, %v3252_v21, %v3420_v41  ;;  %4119 = vmatmul.mubr.f32.gmra.mxu0 %v3960_v44  ;;  %v2748_v56 = vmax.f32 %v12938_v55, %v2620_v7  ;;  %3856 = vmatpush2.msra.mxu1 %v3519_v18 }
 0x2e7   : > { %v2746_v22 = vmax.f32 %v12939_v29, %v2618_v17  ;;  %3480 = vst [vmem:[#allocation3 + $0x90] sm:$0xfe] %v3415_v51  ;;  %3481 = vst.msk [vmem:[#allocation3 + $0x98] sm:$0xfe] %vm3461_vm11, %v3421_v52  ;;  %v3300_v47 = vrot.slane %v2745_v38, %v10376_v53  ;;  %v3423_v61 = vsel %vm3325_vm4, %v3272_v28, %v10942_v35  ;;  %3857 = vmatprep.subr.mxu1 %v12876_v42 }
 0x2e8   : > { %v2619_v49 = vsel %vm2556_vm3, %v2489_v15, %v2554_v33  ;;  %v3320_v24 = vrot.slane %v2748_v56, %v12914_v57  ;;  %v3324_v63 = vrot.slane %v2748_v56, %v10376_v53  ;;  %v3280_v30 = vrot.slane %v10899_v9, %v12914_v57  ;;  %3858 = vmatpush2.msra.mxu1 %v3518_v11  ;;  %v4267_v11 = vld [vmem:[#allocation9 + $0x168] sm:$0xff] }
 0x2e9   : > { %v3308_v8 = vrot.slane %v2746_v22, %v10376_v53  ;;  %v2747_v31 = vmax.f32 %v12940_v20, %v2619_v49  ;;  %v3288_v26 = vrot.slane %v10966_v54, %v12914_v57  ;;  %v3432_v28 = vsel %vm3329_vm7, %v3292_v60, %v3431_v37  ;;  %4326 = vmatprep.subr.mxu1 %v4269_v36  ;;  %v4189_v37 = vld [vmem:[#allocation2] sm:$0xff]  ;;  %v4263_v36 = vld [vmem:[#allocation9 + $0x148] sm:$0xff]  ;;  %v3491_v20 = vld [vmem:[#allocation3 + $0x38] sm:$0xff] }
 0x2ea   : > { %3484 = vst [vmem:[#allocation3 + $0xb0] sm:$0x1] %v3320_v24  ;;  %3485 = vst.msk [vmem:[#allocation3 + $0xb8] sm:$0x1] %vm3466_vm12, %v3324_v63  ;;  %v3424_v35 = vsel %vm3327_vm6, %v3280_v30, %v3423_v61  ;;  %v3296_v62 = vrot.slane %v2745_v38, %v12914_v57  ;;  %v3433_v10 = vsel %vm3331_vm8, %v3300_v47, %v3432_v28  ;;  %v4268_v47 = vld [vmem:[#allocation9 + $0x170] sm:$0xff]  ;;  %v3486_v49 = vld [vmem:[#allocation3] sm:$0xff] }
 0x2eb   : > { %v3316_v9 = vrot.slane %v2747_v31, %v10376_v53  ;;  %v3304_v16 = vrot.slane %v2746_v22, %v12914_v57  ;;  %v3434_v14 = vsel %vm3333_vm9, %v3308_v8, %v3433_v10  ;;  %v3312_v54 = vrot.slane %v2747_v31, %v12914_v57  ;;  %v3487_v22 = vld [vmem:[#allocation3 + $0x8] sm:$0xff]  ;;  %v4266_v61 = vld [vmem:[#allocation9 + $0x160] sm:$0xff]  ;;  %v8404_v24 = vld [vmem:[#allocation3 + $0x18] sm:$0xff] }
 0x2ec   : > { %v3425_v45 = vsel %vm3329_vm7, %v3288_v26, %v3424_v35  ;;  %v4265_v63 = vld [vmem:[#allocation9 + $0x158] sm:$0xff]  ;;  %v4264_v8 = vld [vmem:[#allocation9 + $0x150] sm:$0xff]  ;;  %v4190_v30 = vld [vmem:[#allocation2 + $0x8] sm:$0xff] }
 0x2ed   : > { %v3435_v59 = vsel %vm3335_vm10, %v3316_v9, %v3434_v14  ;;  %v3426_v48 = vsel %vm3331_vm8, %v3296_v62, %v3425_v45  ;;  %v4262_v31 = vld [vmem:[#allocation9 + $0x140] sm:$0xff]  ;;  %v4261_v26 = vld [vmem:[#allocation9 + $0x138] sm:$0xff]  ;;  %v4260_v28 = vld [vmem:[#allocation9 + $0x130] sm:$0xff] }
 0x2ee   : > { %3483 = vst.msk [vmem:[#allocation3 + $0xa8] sm:$0xff] %vm2556_vm3, %v3435_v59  ;;  %v3427_v34 = vsel %vm3333_vm9, %v3304_v16, %v3426_v48  ;;  %v3546_v13 = vld [vmem:[#allocation3 + $0x98] sm:$0xfe]  ;;  %v3545_v2 = vld [vmem:[#allocation3 + $0x90] sm:$0xfe]  ;;  %v4259_v62 = vld [vmem:[#allocation9 + $0x128] sm:$0xff] }
 0x2ef   : > { %v11035_v43 = vsel %vm3335_vm10, %v3312_v54, %v3427_v34  ;;  %v3913_v0 = vld [vmem:[#allocation3 + $0x98] sm:$0xfc]  ;;  %v3607_v12 = vrot.slane %v3546_v13, 1  ;;  %v3912_v27 = vld [vmem:[#allocation3 + $0x90] sm:$0xfc]  ;;  %v3604_v41 = vrot.slane %v3545_v2, 1 }
 0x2f0   : > { %v3966_v4 = vrot.slane %v3913_v0, 2  ;;  %v3605_v6 = vrot.slane %v11035_v43, 1  ;;  %v3964_v39 = vrot.slane %v11035_v43, 2  ;;  %v3963_v5 = vrot.slane %v3912_v27, 2  ;;  %v3490_v35 = vld [vmem:[#allocation3 + $0x30] sm:$0xff]  ;;  %v4257_v9 = vld [vmem:[#allocation9 + $0x118] sm:$0xff] }
 0x2f1   : > { %v3548_v1 = vld [vmem:[#allocation3 + $0xb8] sm:$0x1]  ;;  %v3547_v50 = vld [vmem:[#allocation3 + $0xb0] sm:$0x1]  ;;  %v4255_v14 = vld [vmem:[#allocation9 + $0x108] sm:$0xff] }
 0x2f2   : > { %v3915_v38 = vld [vmem:[#allocation3 + $0xb8] sm:$0x3]  ;;  %v3914_v15 = vld [vmem:[#allocation3 + $0xb0] sm:$0x3]  ;;  %v3612_v60 = vrot.slane %v3548_v1, 1  ;;  %v3606_v7 = vsel %vm3573_vm13, %v3604_v41, %v3605_v6  ;;  %v3965_v17 = vsel %vm3932_vm14, %v3963_v5, %v3964_v39  ;;  %v3610_v18 = vrot.slane %v3547_v50, 1 }
 0x2f3   : > { %v3971_v44 = vrot.slane %v3915_v38, 2  ;;  %v3969_v51 = vrot.slane %v3914_v15, 2  ;;  %v4191_v10 = vld [vmem:[#allocation2 + $0x10] sm:$0xff]  ;;  %v4192_v54 = vld [vmem:[#allocation2 + $0x18] sm:$0xff]  ;;  %v3495_v59 = vld [vmem:[#allocation3 + $0x68] sm:$0xff] }
 0x2f4   : > { %v3611_v56 = vsel %vm3573_vm13, %v3605_v6, %v3610_v18  ;;  %v4256_v16 = vld [vmem:[#allocation9 + $0x110] sm:$0xff]  ;;  %v4254_v45 = vld [vmem:[#allocation9 + $0x100] sm:$0xff]  ;;  %v4251_v13 = vld [vmem:[#allocation9 + $0xe8] sm:$0xff] }
 0x2f5   : > { %v11038_v19 = vld [vmem:[#allocation3 + $0xa8] sm:$0xff]  ;;  %v3970_v29 = vsel %vm3932_vm14, %v3964_v39, %v3969_v51  ;;  %v4252_v48 = vld [vmem:[#allocation9 + $0xf0] sm:$0xff]  ;;  %v3494_v34 = vld [vmem:[#allocation3 + $0x60] sm:$0xff] }
 0x2f6   : > { %v3608_v46 = vrot.slane %v11038_v19, 1  ;;  %v3967_v40 = vrot.slane %v11038_v19, 2  ;;  %v4193_v0 = vld [vmem:[#allocation2 + $0x28] sm:$0xff]  ;;  %v4249_v2 = vld [vmem:[#allocation9 + $0xd8] sm:$0xff]  ;;  %v4194_v6 = vld [vmem:[#allocation2 + $0x30] sm:$0xff] }
 0x2f7   : > { %v3499_v27 = vld [vmem:[#allocation3 + $0x98] sm:$0xff]  ;;  %v4246_v39 = vld [vmem:[#allocation9 + $0xc0] sm:$0xff]  ;;  %v3498_v1 = vld [vmem:[#allocation3 + $0x90] sm:$0xff] }
 0x2f8   : > { %v3609_v21 = vsel %vm3573_vm13, %v3607_v12, %v3608_v46  ;;  %v3968_v33 = vsel %vm3932_vm14, %v3966_v4, %v3967_v40  ;;  %v3613_v52 = vsel %vm3573_vm13, %v3608_v46, %v3612_v60  ;;  %v3972_v55 = vsel %vm3932_vm14, %v3967_v40, %v3971_v44  ;;  %v4248_v12 = vld [vmem:[#allocation9 + $0xd0] sm:$0xff]  ;;  %v4247_v4 = vld [vmem:[#allocation9 + $0xc8] sm:$0xff]  ;;  %v4195_v38 = vld [vmem:[#allocation2 + $0x38] sm:$0xff] }
 0x2f9   : > { %8074 = vmatprep.mubr.msk.f32.mxu1 %vm2556_vm3, %v3609_v21  ;;  %8090 = vmatprep.mubr.msk.f32.mxu0 %vm2556_vm3, %v3968_v33  ;;  %v4229_v46 = vld [vmem:[#allocation2 + $0x1] sm:$0xff]  ;;  %v4727_v40 = vld [vmem:[#allocation9 + $0x230] sm:$0xff]  ;;  %v4724_v5 = vld [vmem:[#allocation9 + $0x218] sm:$0xff] }
 0x2fa   : > { %3765 = vmatmul.mubr.f32.gmra.mxu1 %v3606_v7  ;;  %4124 = vmatmul.mubr.f32.gmra.mxu0 %v3965_v17  ;;  %v4726_v50 = vld [vmem:[#allocation9 + $0x228] sm:$0xff]  ;;  %v4197_v15 = vld [vmem:[#allocation2 + $0x50] sm:$0xff]  ;;  %v4198_v33 = vld [vmem:[#allocation2 + $0x58] sm:$0xff] }
 0x2fb   : > { %8075 = vmatprep.mubr.msk.f32.mxu1 %vm2556_vm3, %v3613_v52  ;;  %8091 = vmatprep.mubr.msk.f32.mxu0 %vm2556_vm3, %v3972_v55  ;;  %v4230_v41 = vld [vmem:[#allocation2 + $0x9] sm:$0xff]  ;;  %v4721_v60 = vld [vmem:[#allocation9 + $0x200] sm:$0xff]  ;;  %v4231_v44 = vld [vmem:[#allocation2 + $0x11] sm:$0xff] }
 0x2fc   : > { %v4722_v21 = vld [vmem:[#allocation9 + $0x208] sm:$0xff]  ;;  %v4720_v7 = vld [vmem:[#allocation9 + $0x1f8] sm:$0xff]  ;;  %v4719_v17 = vld [vmem:[#allocation9 + $0x1f0] sm:$0xff] }
 0x2fd   : > { %v4718_v18 = vld [vmem:[#allocation9 + $0x1e8] sm:$0xff]  ;;  %v4199_v51 = vld [vmem:[#allocation2 + $0x60] sm:$0xff] }
 0x2fe   : > { %3770 = vmatmul.mubr.f32.gmra.mxu1 %v3611_v56  ;;  %4129 = vmatmul.mubr.f32.gmra.mxu0 %v3970_v29  ;;  %v4717_v52 = vld [vmem:[#allocation9 + $0x1e0] sm:$0xff]  ;;  %v4716_v56 = vld [vmem:[#allocation9 + $0x1d8] sm:$0xff]  ;;  %v4715_v29 = vld [vmem:[#allocation9 + $0x1d0] sm:$0xff] }
 0x2ff   : > { %8076 = vmatprep.mubr.msk.f32.mxu1 %vm2556_vm3, %v3487_v22  ;;  %4591 = vmatprep.mubr.f32.mxu0 %v12876_v42  ;;  %v4232_v55 = vld [vmem:[#allocation2 + $0x19] sm:$0xff]  ;;  %v4714_v22 = vld [vmem:[#allocation9 + $0x1c8] sm:$0xff] }
 0x302   : > { %3860 = vmatmul.mubr.f32.vlgmr.msra.gmra.mxu1 %v3486_v49  ;;  %8109 = vmatmul.mubr.msk.f32.vlgmr.msra.gmra.mxu0 %vm615_vm1, %v4189_v37  ;;  %v4200_v37 = vld [vmem:[#allocation2 + $0x68] sm:$0xff] }
 0x303   : > { %8077 = vmatprep.mubr.msk.f32.mxu1 %vm2556_vm3, %v8404_v24  ;;  %4327 = vmatpush1.msra.mxu1 %v4268_v47  ;;  %v4713_v47 = vld [vmem:[#allocation9 + $0x1c0] sm:$0xff]  ;;  %v4233_v49 = vld [vmem:[#allocation2 + $0x29] sm:$0xff]  ;;  %v4201_v24 = vld [vmem:[#allocation2 + $0x78] sm:$0xff] }
 0x304   : > { %4328 = vmatprep.subr.mxu1 %v4267_v11  ;;  %4597 = vmatprep.mubr.f32.mxu0 %v12876_v42  ;;  %v4712_v11 = vld [vmem:[#allocation9 + $0x1b8] sm:$0xff] }
 0x305   : > { %4329 = vmatpush1.msra.mxu1 %v4266_v61  ;;  %v4711_v61 = vld [vmem:[#allocation9 + $0x1b0] sm:$0xff] }
 0x306   : > { %3865 = vmatmul.mubr.f32.gmra.mxu1 %v10502_v25  ;;  %4330 = vmatprep.subr.mxu1 %v4265_v63  ;;  %v4258_v25 = vld [vmem:[#allocation9 + $0x120] sm:$0xff]  ;;  %v4710_v63 = vld [vmem:[#allocation9 + $0x1a8] sm:$0xff] }
 0x307   : > { %8078 = vmatprep.mubr.msk.f32.mxu1 %vm2556_vm3, %v3491_v20  ;;  %4331 = vmatpush1.msra.mxu1 %v4264_v8  ;;  %v4709_v8 = vld [vmem:[#allocation9 + $0x1a0] sm:$0xff]  ;;  %v4707_v20 = vld [vmem:[#allocation9 + $0x190] sm:$0xff] }
 0x308   : > { %4332 = vmatprep.subr.mxu1 %v4263_v36  ;;  %8110 = vmatmul.mubr.msk.f32.gmra.mxu0 %vm615_vm1, %v4190_v30  ;;  %v4234_v36 = vld [vmem:[#allocation2 + $0x31] sm:$0xff] }
 0x309   : > { %4333 = vmatpush1.msra.mxu1 %v4262_v31  ;;  %4603 = vmatprep.mubr.f32.mxu0 %v12876_v42  ;;  %v4708_v30 = vld [vmem:[#allocation9 + $0x198] sm:$0xff]  ;;  %v4202_v31 = vld [vmem:[#allocation2 + $0x80] sm:$0xff] }
 0x30a   : > { %3870 = vmatmul.mubr.f32.gmra.mxu1 %v3490_v35  ;;  %4334 = vmatprep.subr.mxu1 %v4261_v26  ;;  %v4706_v26 = vld [vmem:[#allocation9 + $0x188] sm:$0xff]  ;;  %v4235_v35 = vld [vmem:[#allocation2 + $0x39] sm:$0xff] }
 0x30b   : > { %8079 = vmatprep.mubr.msk.f32.mxu1 %vm2556_vm3, %v10726_v32  ;;  %4335 = vmatpush1.msra.mxu1 %v4260_v28  ;;  %v4253_v32 = vld [vmem:[#allocation9 + $0xf8] sm:$0xff]  ;;  %v4705_v28 = vld [vmem:[#allocation9 + $0x180] sm:$0xff] }
 0x30c   : > { %4336 = vmatprep.subr.mxu1 %v4259_v62  ;;  %8111 = vmatmul.mubr.msk.f32.gmra.mxu0 %vm615_vm1, %v4191_v10  ;;  %v4203_v62 = vld [vmem:[#allocation2 + $0x88] sm:$0xff] }
 0x30d   : > { %4337 = vmatpush1.msra.mxu1 %v4258_v25  ;;  %4609 = vmatprep.mubr.f32.mxu0 %v12876_v42  ;;  %v4236_v10 = vld [vmem:[#allocation2 + $0x41] sm:$0xff]  ;;  %v4204_v25 = vld [vmem:[#allocation2 + $0x90] sm:$0xff] }
 0x30e   : > { %3875 = vmatmul.mubr.f32.gmra.mxu1 %v10679_v3  ;;  %4338 = vmatprep.subr.mxu1 %v4257_v9  ;;  %v4250_v3 = vld [vmem:[#allocation9 + $0xe0] sm:$0xff]  ;;  %v4237_v9 = vld [vmem:[#allocation2 + $0x51] sm:$0xff] }
 0x30f   : > { %8080 = vmatprep.mubr.msk.f32.mxu1 %vm2556_vm3, %v3495_v59  ;;  %4339 = vmatpush1.msra.mxu1 %v4256_v16  ;;  %v4238_v16 = vld [vmem:[#allocation2 + $0x59] sm:$0xff] }
 0x310   : > { %4340 = vmatprep.subr.mxu1 %v4255_v14  ;;  %8112 = vmatmul.mubr.msk.f32.gmra.mxu0 %vm615_vm1, %v4192_v54  ;;  %v4239_v14 = vld [vmem:[#allocation2 + $0x61] sm:$0xff]  ;;  %v4240_v54 = vld [vmem:[#allocation2 + $0x69] sm:$0xff]  ;;  %v4241_v59 = vld [vmem:[#allocation2 + $0x79] sm:$0xff] }
 0x311   : > { %4341 = vmatpush1.msra.mxu1 %v4254_v45  ;;  %4615 = vmatprep.mubr.f32.mxu0 %v12876_v42  ;;  %v4242_v45 = vld [vmem:[#allocation2 + $0x81] sm:$0xff] }
 0x312   : > { %3880 = vmatmul.mubr.f32.gmra.mxu1 %v3494_v34  ;;  %4342 = vmatprep.subr.mxu1 %v4253_v32  ;;  %v4243_v32 = vld [vmem:[#allocation2 + $0x89] sm:$0xff] }
 0x313   : > { %8081 = vmatprep.mubr.msk.f32.mxu1 %vm2556_vm3, %v10895_v23  ;;  %4343 = vmatpush1.msra.mxu1 %v4252_v48  ;;  %v4728_v23 = vld [vmem:[#allocation9 + $0x238] sm:$0xff] }
 0x314   : > { %4344 = vmatprep.subr.mxu1 %v4251_v13  ;;  %8113 = vmatmul.mubr.msk.f32.gmra.mxu0 %vm615_vm1, %v4193_v0  ;;  %v4244_v48 = vld [vmem:[#allocation2 + $0x91] sm:$0xff]  ;;  %v4688_v0 = vld [vmem:[#allocation2 + $0x2] sm:$0xff] }
 0x315   : > { %4345 = vmatpush1.msra.mxu1 %v4250_v3  ;;  %4621 = vmatprep.mubr.f32.mxu0 %v12876_v42 }
 0x316   : > { %3885 = vmatmul.mubr.f32.gmra.mxu1 %v10873_v58  ;;  %4346 = vmatprep.subr.mxu1 %v4249_v2  ;;  %v4196_v58 = vld [vmem:[#allocation2 + $0x40] sm:$0xff] }
 0x317   : > { %8082 = vmatprep.mubr.msk.f32.mxu1 %vm2556_vm3, %v3499_v27  ;;  %4347 = vmatpush1.msra.mxu1 %v4248_v12 }
 0x318   : > { %4348 = vmatprep.subr.mxu1 %v4247_v4  ;;  %8114 = vmatmul.mubr.msk.f32.gmra.mxu0 %vm615_vm1, %v4194_v6  ;;  %v4689_v6 = vld [vmem:[#allocation2 + $0xa] sm:$0xff] }
 0x319   : > { %4349 = vmatpush1.msra.mxu1 %v4246_v39  ;;  %4627 = vmatprep.mubr.f32.mxu0 %v12876_v42 }
 0x31a   : > { %3890 = vmatmul.mubr.f32.gmra.mxu1 %v3498_v1  ;;  %4785 = vmatprep.subr.mxu1 %v4728_v23  ;;  %v4690_v23 = vld [vmem:[#allocation2 + $0x12] sm:$0xff]  ;;  %v4691_v1 = vld [vmem:[#allocation2 + $0x1a] sm:$0xff] }
 0x31b   : > { %8083 = vmatprep.mubr.msk.f32.mxu1 %vm2556_vm3, %v11038_v19  ;;  %v4725_v19 = vld [vmem:[#allocation9 + $0x220] sm:$0xff] }
 0x31c   : > { %8115 = vmatmul.mubr.msk.f32.gmra.mxu0 %vm615_vm1, %v4195_v38  ;;  %v4692_v38 = vld [vmem:[#allocation2 + $0x2a] sm:$0xff] }
 0x31d   : > { %4633 = vmatprep.mubr.f32.mxu0 %v12876_v42 }
 0x31e   : > { %3895 = vmatmul.mubr.f32.gmra.mxu1 %v11035_v43  ;;  %v4723_v43 = vld [vmem:[#allocation9 + $0x210] sm:$0xff] }
 0x31f   : > { %4382 = vmatprep.mubr.f32.mxu1 %v12876_v42 }
 0x320   : > { %8116 = vmatmul.mubr.msk.f32.gmra.mxu0 %vm615_vm1, %v4196_v58  ;;  %v4693_v58 = vld [vmem:[#allocation2 + $0x32] sm:$0xff] }
 0x321   : > { %4639 = vmatprep.mubr.f32.mxu0 %v12876_v42 }
 0x322   : > { %8093 = vmatmul.mubr.msk.f32.vlgmr.msra.gmra.mxu1 %vm615_vm1, %v4229_v46  ;;  %v4694_v46 = vld [vmem:[#allocation2 + $0x3a] sm:$0xff] }
 0x323   : > { %4786 = vmatpush1.msra.mxu1 %v4727_v40  ;;  %4388 = vmatprep.mubr.f32.mxu1 %v12876_v42  ;;  %v4695_v40 = vld [vmem:[#allocation2 + $0x42] sm:$0xff] }
 0x324   : > { %4787 = vmatprep.subr.mxu1 %v4726_v50  ;;  %8117 = vmatmul.mubr.msk.f32.gmra.mxu0 %vm615_vm1, %v4197_v15  ;;  %v4696_v50 = vld [vmem:[#allocation2 + $0x52] sm:$0xff] }
 0x325   : > { %4788 = vmatpush1.msra.mxu1 %v4725_v19  ;;  %4645 = vmatprep.mubr.f32.mxu0 %v12876_v42 }
 0x326   : > { %8094 = vmatmul.mubr.msk.f32.gmra.mxu1 %vm615_vm1, %v4230_v41  ;;  %4789 = vmatprep.subr.mxu1 %v4724_v5  ;;  %v4697_v5 = vld [vmem:[#allocation2 + $0x5a] sm:$0xff] }
 0x327   : > { %4394 = vmatprep.mubr.f32.mxu1 %v12876_v42  ;;  %4790 = vmatpush1.msra.mxu1 %v4723_v43 }
 0x328   : > { %4791 = vmatprep.subr.mxu1 %v4722_v21  ;;  %8118 = vmatmul.mubr.msk.f32.gmra.mxu0 %vm615_vm1, %v4198_v33 }
 0x329   : > { %4792 = vmatpush1.msra.mxu1 %v4721_v60  ;;  %4651 = vmatprep.mubr.f32.mxu0 %v12876_v42 }
 0x32a   : > { %8095 = vmatmul.mubr.msk.f32.gmra.mxu1 %vm615_vm1, %v4231_v44  ;;  %4793 = vmatprep.subr.mxu1 %v4720_v7  ;;  %v4698_v44 = vld [vmem:[#allocation2 + $0x62] sm:$0xff] }
 0x32b   : > { %4400 = vmatprep.mubr.f32.mxu1 %v12876_v42  ;;  %4794 = vmatpush1.msra.mxu1 %v4719_v17  ;;  %v4699_v17 = vld [vmem:[#allocation2 + $0x6a] sm:$0xff] }
 0x32c   : > { %4795 = vmatprep.subr.mxu1 %v4718_v18  ;;  %8119 = vmatmul.mubr.msk.f32.gmra.mxu0 %vm615_vm1, %v4199_v51  ;;  %v4700_v18 = vld [vmem:[#allocation2 + $0x7a] sm:$0xff]  ;;  %v4701_v51 = vld [vmem:[#allocation2 + $0x82] sm:$0xff] }
 0x32d   : > { %4796 = vmatpush1.msra.mxu1 %v4717_v52  ;;  %4657 = vmatprep.mubr.f32.mxu0 %v12876_v42  ;;  %v4702_v52 = vld [vmem:[#allocation2 + $0x8a] sm:$0xff] }
 0x32e   : > { %8096 = vmatmul.mubr.msk.f32.gmra.mxu1 %vm615_vm1, %v4232_v55  ;;  %4797 = vmatprep.subr.mxu1 %v4716_v56  ;;  %v4703_v55 = vld [vmem:[#allocation2 + $0x92] sm:$0xff] }
 0x32f   : > { %4406 = vmatprep.mubr.f32.mxu1 %v12876_v42  ;;  %4798 = vmatpush1.msra.mxu1 %v4715_v29 }
 0x330   : > { %4799 = vmatprep.subr.mxu1 %v4714_v22  ;;  %8120 = vmatmul.mubr.msk.f32.gmra.mxu0 %vm615_vm1, %v4200_v37 }
 0x331   : > { %4800 = vmatpush1.msra.mxu1 %v4713_v47  ;;  %4663 = vmatprep.mubr.f32.mxu0 %v12876_v42 }
 0x332   : > { %8097 = vmatmul.mubr.msk.f32.gmra.mxu1 %vm615_vm1, %v4233_v49  ;;  %4801 = vmatprep.subr.mxu1 %v4712_v11 }
 0x333   : > { %4412 = vmatprep.mubr.f32.mxu1 %v12876_v42  ;;  %4802 = vmatpush1.msra.mxu1 %v4711_v61 }
 0x334   : > { %8121 = vmatmul.mubr.msk.f32.gmra.mxu0 %vm615_vm1, %v4201_v24  ;;  %4803 = vmatprep.subr.mxu1 %v4710_v63 }
 0x335   : > { %4804 = vmatpush1.msra.mxu1 %v4709_v8  ;;  %4669 = vmatprep.mubr.f32.mxu0 %v12876_v42 }
 0x336   : > { %8098 = vmatmul.mubr.msk.f32.gmra.mxu1 %vm615_vm1, %v4234_v36  ;;  %4805 = vmatprep.subr.mxu1 %v4708_v30 }
 0x337   : > { %4418 = vmatprep.mubr.f32.mxu1 %v12876_v42  ;;  %4806 = vmatpush1.msra.mxu1 %v4707_v20 }
 0x338   : > { %8122 = vmatmul.mubr.msk.f32.gmra.mxu0 %vm615_vm1, %v4202_v31  ;;  %4807 = vmatprep.subr.mxu1 %v4706_v26 }
 0x339   : > { %4675 = vmatprep.mubr.f32.mxu0 %v12876_v42  ;;  %4808 = vmatpush1.msra.mxu1 %v4705_v28 }
 0x33a   : > { %8099 = vmatmul.mubr.msk.f32.gmra.mxu1 %vm615_vm1, %v4235_v35  ;;  %7403 = vmatprep.subr.mxu1 %v12876_v42 }
 0x33b   : > { %4424 = vmatprep.mubr.f32.mxu1 %v12876_v42 }
 0x33c   : > { %8123 = vmatmul.mubr.msk.f32.gmra.mxu0 %vm615_vm1, %v4203_v62 }
 0x33d   : > { %4681 = vmatprep.mubr.f32.mxu0 %v12876_v42 }
 0x33e   : > { %8100 = vmatmul.mubr.msk.f32.gmra.mxu1 %vm615_vm1, %v4236_v10 }
 0x33f   : > { %4430 = vmatprep.mubr.f32.mxu1 %v12876_v42 }
 0x340   : > { %8124 = vmatmul.mubr.msk.f32.gmra.mxu0 %vm615_vm1, %v4204_v25 }
 0x342   : > { %8101 = vmatmul.mubr.msk.f32.gmra.mxu1 %vm615_vm1, %v4237_v9 }
 0x343   : > { %4436 = vmatprep.mubr.f32.mxu1 %v12876_v42 }
 0x346   : > { %8102 = vmatmul.mubr.msk.f32.gmra.mxu1 %vm615_vm1, %v4238_v16 }
 0x347   : > { %4442 = vmatprep.mubr.f32.mxu1 %v12876_v42 }
 0x34a   : > { %8103 = vmatmul.mubr.msk.f32.gmra.mxu1 %vm615_vm1, %v4239_v14 }
 0x34b   : > { %4448 = vmatprep.mubr.f32.mxu1 %v12876_v42 }
 0x34e   : > { %8104 = vmatmul.mubr.msk.f32.gmra.mxu1 %vm615_vm1, %v4240_v54 }
 0x34f   : > { %4454 = vmatprep.mubr.f32.mxu1 %v12876_v42 }
 0x352   : > { %8105 = vmatmul.mubr.msk.f32.gmra.mxu1 %vm615_vm1, %v4241_v59 }
 0x353   : > { %4460 = vmatprep.mubr.f32.mxu1 %v12876_v42 }
 0x356   : > { %8106 = vmatmul.mubr.msk.f32.gmra.mxu1 %vm615_vm1, %v4242_v45 }
 0x357   : > { %4466 = vmatprep.mubr.f32.mxu1 %v12876_v42 }
 0x35a   : > { %8107 = vmatmul.mubr.msk.f32.gmra.mxu1 %vm615_vm1, %v4243_v32 }
 0x35b   : > { %4472 = vmatprep.mubr.f32.mxu1 %v12876_v42 }
 0x35e   : > { %8108 = vmatmul.mubr.msk.f32.gmra.mxu1 %vm615_vm1, %v4244_v48  ;;  %v8092_v48 = vld [vmem:[#allocation18] ss:$0 sm:$0xff] }
 0x35f   : > { %v11135_v34 = vpop.f32.mrf.mxu1  ;;  %v11137_v13 = vpop.f32.mrf.mxu0  ;;  %4841 = vmatprep.mubr.f32.mxu1 %v12876_v42 }
 0x360   : > { %12941 = vst [vmem:[#allocation29_spill] sm:$0xff] %v11135_v34  ;;  %12942 = vst [vmem:[#allocation30_spill] sm:$0xff] %v11137_v13  ;;  %v12958_v34 = vld [vmem:[#allocation32_spill] sm:$0xff] }
 0x361   : > { %v3738_v3 = vpop.f32.mrf.mxu1  ;;  %v4097_v2 = vpop.f32.mrf.mxu0 }
 0x362   : > { %8125 = vmatmul.mubr.msk.f32.vlgmr.msra.gmra.mxu1 %vm615_vm1, %v4688_v0 }
 0x363   : > { %4847 = vmatprep.mubr.f32.mxu1 %v12876_v42 }
 0x364   : > { %v11141_v12 = vpop.f32.mrf.mxu1  ;;  %v11143_v4 = vpop.f32.mrf.mxu0 }
 0x365   : > { %12943 = vst [vmem:[#allocation31_spill] sm:$0xff] %v11141_v12  ;;  %12944 = vst [vmem:[#allocation33_spill] sm:$0xff] %v11143_v4 }
 0x366   : > { %v3743_v27 = vpop.f32.mrf.mxu1  ;;  %v4102_v39 = vpop.f32.mrf.mxu0  ;;  %8126 = vmatmul.mubr.msk.f32.gmra.mxu1 %vm615_vm1, %v4689_v6 }
 0x367   : > { %4853 = vmatprep.mubr.f32.mxu1 %v12876_v42 }
 0x36a   : > { %8127 = vmatmul.mubr.msk.f32.gmra.mxu1 %vm615_vm1, %v4690_v23 }
 0x36b   : > { %4859 = vmatprep.mubr.f32.mxu1 %v12876_v42 }
 0x36e   : > { %8128 = vmatmul.mubr.msk.f32.gmra.mxu1 %vm615_vm1, %v4691_v1 }
 0x36f   : > { %4865 = vmatprep.mubr.f32.mxu1 %v12876_v42 }
 0x372   : > { %8129 = vmatmul.mubr.msk.f32.gmra.mxu1 %vm615_vm1, %v4692_v38 }
 0x373   : > { %4871 = vmatprep.mubr.f32.mxu1 %v12876_v42 }
 0x376   : > { %8130 = vmatmul.mubr.msk.f32.gmra.mxu1 %vm615_vm1, %v4693_v58 }
 0x377   : > { %4877 = vmatprep.mubr.f32.mxu1 %v12876_v42 }
 0x37a   : > { %8131 = vmatmul.mubr.msk.f32.gmra.mxu1 %vm615_vm1, %v4694_v46 }
 0x37b   : > { %4883 = vmatprep.mubr.f32.mxu1 %v12876_v42 }
 0x37e   : > { %8132 = vmatmul.mubr.msk.f32.gmra.mxu1 %vm615_vm1, %v4695_v40 }
 0x37f   : > { %4889 = vmatprep.mubr.f32.mxu1 %v12876_v42 }
 0x382   : > { %v11160_v15 = vpop.f32.mrf.mxu1  ;;  %8133 = vmatmul.mubr.msk.f32.gmra.mxu1 %vm615_vm1, %v4696_v50 }
 0x383   : > { %12945 = vst [vmem:[#allocation34_spill] sm:$0xff] %v11160_v15  ;;  %v11162_v19 = vpop.f32.mrf.mxu0  ;;  %4895 = vmatprep.mubr.f32.mxu1 %v12876_v42 }
 0x384   : > { %12946 = vst [vmem:[#allocation36_spill] sm:$0xff] %v11162_v19  ;;  %v3748_v41 = vpop.f32.mrf.mxu1  ;;  %v4970_v19 = vld [vmem:[%s12752_s3] sm:$0x3] }
 0x385   : > { %v4107_v43 = vpop.f32.mrf.mxu0  ;;  %v11309_v13 = vrot.slane %v4970_v19, %v12914_v57 }
 0x386   : > { %v11166_v21 = vpop.f32.mrf.mxu1  ;;  %8134 = vmatmul.mubr.msk.f32.gmra.mxu1 %vm615_vm1, %v4697_v5 }
 0x387   : > { %12947 = vst [vmem:[#allocation37_spill] sm:$0xff] %v11166_v21  ;;  %v11168_v33 = vpop.f32.mrf.mxu0  ;;  %4901 = vmatprep.mubr.f32.mxu1 %v12876_v42  ;;  %v7370_v21 = vld [vmem:[#allocation11 + $0x260] sm:$0xff] }
 0x388   : > { %12948 = vst [vmem:[#allocation40_spill] sm:$0xff] %v11168_v33  ;;  %v3753_v60 = vpop.f32.mrf.mxu1 }
 0x389   : > { %v4112_v7 = vpop.f32.mrf.mxu0 }
 0x38a   : > { %8135 = vmatmul.mubr.msk.f32.gmra.mxu1 %vm615_vm1, %v4698_v44 }
 0x38b   : > { %4907 = vmatprep.mubr.f32.mxu1 %v12876_v42 }
 0x38e   : > { %8136 = vmatmul.mubr.msk.f32.gmra.mxu1 %vm615_vm1, %v4699_v17 }
 0x38f   : > { %4913 = vmatprep.mubr.f32.mxu1 %v12876_v42 }
 0x392   : > { %8137 = vmatmul.mubr.msk.f32.gmra.mxu1 %vm615_vm1, %v4700_v18 }
 0x393   : > { %4919 = vmatprep.mubr.f32.mxu1 %v12876_v42 }
 0x396   : > { %8138 = vmatmul.mubr.msk.f32.gmra.mxu1 %vm615_vm1, %v4701_v51 }
 0x397   : > { %4925 = vmatprep.mubr.f32.mxu1 %v12876_v42 }
 0x39a   : > { %8139 = vmatmul.mubr.msk.f32.gmra.mxu1 %vm615_vm1, %v4702_v52 }
 0x39b   : > { %4931 = vmatprep.mubr.f32.mxu1 %v12876_v42 }
 0x39e   : > { %8140 = vmatmul.mubr.msk.f32.gmra.mxu1 %vm615_vm1, %v4703_v55  ;;  %v3756_v56 = vpop.f32.mrf.mxu1 }
 0x3a0   : > { %v3758_v29 = vpop.f32.mrf.mxu1 }
 0x3a2   : > { %v4115_v22 = vpop.f32.mrf.mxu0 }
 0x3a4   : > { %v4117_v37 = vpop.f32.mrf.mxu0  ;;  %v3761_v47 = vpop.f32.mrf.mxu1 }
 0x3a6   : > { %v4120_v49 = vpop.f32.mrf.mxu0  ;;  %v3763_v11 = vpop.f32.mrf.mxu1 }
 0x3a8   : > { %v4122_v61 = vpop.f32.mrf.mxu0 }
 0x3ba   : > { %v3766_v24 = vpop.f32.mrf.mxu1  ;;  %v4125_v63 = vpop.f32.mrf.mxu0 }
 0x3bc   : > { %v3768_v8 = vpop.f32.mrf.mxu1  ;;  %v4127_v36 = vpop.f32.mrf.mxu0 }
 0x3be   : > { %v3771_v30 = vpop.f32.mrf.mxu1  ;;  %v4130_v20 = vpop.f32.mrf.mxu0 }
 0x3c0   : > { %v3773_v31 = vpop.f32.mrf.mxu1  ;;  %v4132_v26 = vpop.f32.mrf.mxu0 }
 0x3c2   : > { %v11183_v28 = vpop.f32.mrf.mxu1  ;;  %v11195_v46 = vpop.f32.mrf.mxu0 }
 0x3c3   : > { %12949 = vst [vmem:[#allocation39_spill] sm:$0xff] %v11183_v28 }
 0x3c4   : > { %v3863_v35 = vpop.f32.mrf.mxu1  ;;  %v11199_v60 = vpop.f32.mrf.mxu0 }
 0x3c6   : > { %v11185_v62 = vpop.f32.mrf.mxu1 }
 0x3c7   : > { %12950 = vst [vmem:[#allocation42_spill] sm:$0xff] %v11185_v62  ;;  %v7368_v62 = vld [vmem:[#allocation11 + $0x250] sm:$0xff] }
 0x3c8   : > { %v3868_v10 = vpop.f32.mrf.mxu1  ;;  %v11207_v18 = vpop.f32.mrf.mxu0 }
 0x3ca   : > { %v11187_v25 = vpop.f32.mrf.mxu1  ;;  %v11213_v55 = vpop.f32.mrf.mxu0 }
 0x3cb   : > { %12951 = vst [vmem:[#allocation41_spill] sm:$0xff] %v11187_v25 }
 0x3cc   : > { %v3873_v9 = vpop.f32.mrf.mxu1 }
 0x3ce   : > { %v11189_v16 = vpop.f32.mrf.mxu1 }
 0x3cf   : > { %12952 = vst [vmem:[#allocation44_spill] sm:$0xff] %v11189_v16  ;;  %v7012_v16 = vld [vmem:[#allocation11 + $0x168] sm:$0xff] }
 0x3d0   : > { %v3878_v14 = vpop.f32.mrf.mxu1 }
 0x3d2   : > { %v3881_v54 = vpop.f32.mrf.mxu1 }
 0x3d3   : > { %v3882_v59 = vadd.f32 %v3881_v54, %v3756_v56 }
 0x3d4   : > { %v3883_v45 = vpop.f32.mrf.mxu1 }
 0x3d5   : > { %v4138_v32 = vadd.f32 %v4115_v22, %v3882_v59  ;;  %v11219_v22 = vpop.f32.mrf.mxu0 }
 0x3d6   : > { %v3886_v0 = vpop.f32.mrf.mxu1 }
 0x3d7   : > { %v11191_v3 = vadd.f32 %v8092_v48, %v4138_v32  ;;  %v3887_v2 = vadd.f32 %v3886_v0, %v3761_v47 }
 0x3d8   : > { %v3888_v6 = vpop.f32.mrf.mxu1 }
 0x3d9   : > { %12953 = vst [vmem:[#allocation43_spill] sm:$0xff] %v11191_v3  ;;  %v4139_v27 = vadd.f32 %v4120_v49, %v3887_v2  ;;  %v11225_v49 = vpop.f32.mrf.mxu0 }
 0x3da   : > { %v3891_v39 = vpop.f32.mrf.mxu1 }
 0x3db   : > { %v11193_v23 = vadd.f32 %v8092_v48, %v4139_v27  ;;  %v3892_v1 = vadd.f32 %v3891_v39, %v3766_v24  ;;  %v11231_v24 = vpop.f32.mrf.mxu0 }
 0x3dc   : > { %v3893_v38 = vpop.f32.mrf.mxu1 }
 0x3dd   : > { %12954 = vst [vmem:[#allocation45_spill] sm:$0xff] %v11193_v23  ;;  %v4140_v58 = vadd.f32 %v4125_v63, %v3892_v1  ;;  %v11237_v36 = vpop.f32.mrf.mxu0  ;;  %v7371_v23 = vld [vmem:[#allocation11 + $0x268] sm:$0xff] }
 0x3de   : > { %v3896_v40 = vpop.f32.mrf.mxu1  ;;  %7404 = vmatpush1.msra.mxu1 %v7371_v23  ;;  %v7011_v23 = vld [vmem:[#allocation11 + $0x160] sm:$0xff] }
 0x3df   : > { %v11197_v50 = vadd.f32 %v8092_v48, %v4140_v58  ;;  %v3897_v41 = vadd.f32 %v3896_v40, %v3771_v30  ;;  %v11243_v31 = vpop.f32.mrf.mxu0  ;;  %7405 = vmatprep.subr.mxu1 %v12876_v42 }
 0x3e0   : > { %v3898_v5 = vpop.f32.mrf.mxu1  ;;  %7406 = vmatpush1.msra.mxu1 %v7370_v21  ;;  %v7010_v21 = vld [vmem:[#allocation11 + $0x158] sm:$0xff] }
 0x3e1   : > { %12955 = vst [vmem:[#allocation46_spill] sm:$0xff] %v11197_v50  ;;  %v4141_v43 = vadd.f32 %v4130_v20, %v3897_v41  ;;  %v11249_v10 = vpop.f32.mrf.mxu0  ;;  %v7013_v50 = vld [vmem:[#allocation11 + $0x170] sm:$0xff]  ;;  %7407 = vmatprep.subr.mxu1 %v12876_v42 }
 0x3e2   : > { %v11201_v44 = vpop.f32.mrf.mxu1  ;;  %7046 = vmatpush1.msra.mxu0 %v7013_v50  ;;  %v7369_v50 = vld [vmem:[#allocation11 + $0x258] sm:$0xff] }
 0x3e3   : > { %v11203_v7 = vadd.f32 %v8092_v48, %v4141_v43  ;;  %v11255_v54 = vpop.f32.mrf.mxu0  ;;  %7047 = vmatprep.subr.mxu0 %v12876_v42  ;;  %v4594_v15 = vadd.f32 %v11195_v46, %v11201_v44  ;;  %7408 = vmatpush1.msra.mxu1 %v7369_v50  ;;  %v12959_v46 = vsub.s32 1, %v12958_v34  ;;  %v7367_v50 = vld [vmem:[#allocation11 + $0x248] sm:$0xff] }
 0x3e4   : > { %v11205_v17 = vpop.f32.mrf.mxu1  ;;  %7048 = vmatpush1.msra.mxu0 %v7012_v16  ;;  %7409 = vmatprep.subr.mxu1 %v12876_v42 }
 0x3e5   : > { %12956 = vst [vmem:[#allocation48_spill] sm:$0xff] %v11203_v7  ;;  %v11261_v32 = vpop.f32.mrf.mxu0  ;;  %7049 = vmatprep.subr.mxu0 %v12876_v42  ;;  %v4596_v12 = vadd.f32 %v11199_v60, %v11205_v17  ;;  %v11317_v44 = vrot.slane %v4970_v19, %v12959_v46  ;;  %7410 = vmatpush1.msra.mxu1 %v7368_v62 }
 0x3e6   : > { %v11209_v51 = vpop.f32.mrf.mxu1  ;;  %7050 = vmatpush1.msra.mxu0 %v7011_v23  ;;  %7411 = vmatprep.subr.mxu1 %v12876_v42  ;;  %v7009_v23 = vld [vmem:[#allocation11 + $0x150] sm:$0xff] }
 0x3e7   : > { %v11267_v2 = vpop.f32.mrf.mxu0  ;;  %7051 = vmatprep.subr.mxu0 %v12876_v42  ;;  %v4600_v57 = vadd.f32 %v11207_v18, %v11209_v51  ;;  %7412 = vmatpush1.msra.mxu1 %v7367_v50 }
 0x3e8   : > { %v11211_v52 = vpop.f32.mrf.mxu1  ;;  %7052 = vmatpush1.msra.mxu0 %v7010_v21  ;;  %7413 = vmatprep.subr.mxu1 %v12876_v42  ;;  %v7007_v21 = vld [vmem:[#allocation11 + $0x140] sm:$0xff] }
 0x3e9   : > { %v11273_v39 = vpop.f32.mrf.mxu0  ;;  %7053 = vmatprep.subr.mxu0 %v12876_v42  ;;  %v4602_v19 = vadd.f32 %v11213_v55, %v11211_v52 }
 0x3ea   : > { %v11215_v56 = vpop.f32.mrf.mxu1  ;;  %7054 = vmatpush1.msra.mxu0 %v7009_v23 }
 0x3eb   : > { %v11279_v58 = vpop.f32.mrf.mxu0  ;;  %7055 = vmatprep.subr.mxu0 %v12876_v42  ;;  %v4606_v62 = vadd.f32 %v11219_v22, %v11215_v56 }
 0x3ec   : > { %v11217_v29 = vpop.f32.mrf.mxu1 }
 0x3ed   : > { %v11285_v5 = vpop.f32.mrf.mxu0 }
 0x3ee   : > { %v11221_v37 = vpop.f32.mrf.mxu1 }
 0x3ef   : > { %v11291_v3 = vpop.f32.mrf.mxu0 }
 0x3f0   : > { %v11223_v47 = vpop.f32.mrf.mxu1 }
 0x3f1   : > { %v11306_v4 = vpop.f32.mrf.mxu0 }
 0x3f2   : > { %v11227_v11 = vpop.f32.mrf.mxu1 }
 0x3f3   : > { %v11339_v51 = vadd.f32 %v11243_v31, %v11227_v11 }
 0x3f4   : > { %v11229_v61 = vpop.f32.mrf.mxu1 }
 0x3f6   : > { %v11233_v63 = vpop.f32.mrf.mxu1 }
 0x3f8   : > { %v11235_v8 = vpop.f32.mrf.mxu1 }
 0x3fa   : > { %v11239_v30 = vpop.f32.mrf.mxu1 }
 0x3fc   : > { %v11241_v20 = vpop.f32.mrf.mxu1 }
 0x3fe   : > { %v11245_v26 = vpop.f32.mrf.mxu1 }
 0x400   : > { %v11247_v35 = vpop.f32.mrf.mxu1 }
 0x402   : > { %v11251_v9 = vpop.f32.mrf.mxu1 }
 0x404   : > { %v11253_v14 = vpop.f32.mrf.mxu1 }
 0x406   : > { %v11257_v59 = vpop.f32.mrf.mxu1 }
 0x408   : > { %v11259_v45 = vpop.f32.mrf.mxu1 }
 0x40a   : > { %v11263_v48 = vpop.f32.mrf.mxu1 }
 0x40c   : > { %v11265_v0 = vpop.f32.mrf.mxu1 }
 0x40e   : > { %v11269_v6 = vpop.f32.mrf.mxu1 }
 0x410   : > { %v11271_v27 = vpop.f32.mrf.mxu1 }
 0x412   : > { %v11275_v1 = vpop.f32.mrf.mxu1 }
 0x414   : > { %v11277_v38 = vpop.f32.mrf.mxu1 }
 0x416   : > { %v11281_v40 = vpop.f32.mrf.mxu1 }
 0x418   : > { %v11283_v41 = vpop.f32.mrf.mxu1 }
 0x41a   : > { %v11287_v43 = vpop.f32.mrf.mxu1 }
 0x41c   : > { %v11289_v7 = vpop.f32.mrf.mxu1 }
 0x41e   : > { %v11293_v33 = vpop.f32.mrf.mxu1 }
 0x420   : > { %v11300_v25 = vpop.f32.mrf.mxu1 }
 0x421   : > { %12957 = vst [vmem:[#allocation47_spill] sm:$0xff] %v11300_v25  ;;  %v4647_v25 = vpop.f32.mrf.mxu0 }
 0x422   : > { %v4843_v16 = vpop.f32.mrf.mxu1 }
 0x423   : > { %v4938_v28 = vadd.f32 %v4843_v16, %v4594_v15  ;;  %v11341_v55 = vpop.f32.mrf.mxu0 }
 0x424   : > { %v4845_v53 = vpop.f32.mrf.mxu1 }
 0x425   : > { %v4982_v60 = vadd.f32 %v11309_v13, %v4938_v28  ;;  %v4939_v15 = vadd.f32 %v4845_v53, %v4596_v12  ;;  %v4608_v28 = vadd.f32 %v11225_v49, %v11217_v29  ;;  %v4612_v53 = vadd.f32 %v11231_v24, %v11221_v37 }
 0x426   : > { %v4849_v34 = vpop.f32.mrf.mxu1  ;;  %v4614_v12 = vadd.f32 %v11237_v36, %v11223_v47  ;;  %v11346_v29 = vadd.f32 %v11249_v10, %v11229_v61  ;;  %v11350_v37 = vadd.f32 %v11255_v54, %v11233_v63  ;;  %v11354_v47 = vadd.f32 %v11261_v32, %v11235_v8  ;;  %v7008_v32 = vld [vmem:[#allocation11 + $0x148] sm:$0xff] }
 0x427   : > { %v4983_v17 = vadd.f32 %v11317_v44, %v4939_v15  ;;  %v4940_v18 = vadd.f32 %v4849_v34, %v4600_v57  ;;  %v5014_v56 = vmax.f32 %v4982_v60, 0.0  ;;  %v11358_v49 = vadd.f32 %v11267_v2, %v11239_v30  ;;  %v7366_v2 = vld [vmem:[#allocation11 + $0x240] sm:$0xff]  ;;  %7056 = vmatpush1.msra.mxu0 %v7008_v32 }
 0x428   : > { %v4851_v52 = vpop.f32.mrf.mxu1  ;;  %v11362_v24 = vadd.f32 %v11273_v39, %v11241_v20  ;;  %v11367_v63 = vadd.f32 %v11279_v58, %v11245_v26  ;;  %v11371_v8 = vadd.f32 %v11285_v5, %v11247_v35  ;;  %v11373_v20 = vpop.f32.mrf.mxu0  ;;  %v12960_v39 = vld [vmem:[#allocation38_spill] sm:$0xff]  ;;  %7414 = vmatpush1.msra.mxu1 %v7366_v2  ;;  %v7365_v26 = vld [vmem:[#allocation11 + $0x238] sm:$0xff]  ;;  %v11379_v35 = vadd.f32 %v11291_v3, %v11251_v9 }
 0x429   : > { %v5015_v22 = vmax.f32 %v4983_v17, 0.0  ;;  %v4984_v57 = vadd.f32 %v11309_v13, %v4940_v18  ;;  %v4941_v16 = vadd.f32 %v4851_v52, %v4602_v19  ;;  %v11383_v58 = vadd.f32 %v11306_v4, %v11253_v14  ;;  %7057 = vmatprep.subr.mxu0 %v12876_v42  ;;  %7415 = vmatprep.subr.mxu1 %v12876_v42 }
 0x42a   : > { %v4855_v11 = vpop.f32.mrf.mxu1  ;;  %v11389_v34 = vadd.f32 %v4647_v25, %v11257_v59  ;;  %7058 = vmatpush1.msra.mxu0 %v7007_v21  ;;  %7416 = vmatpush1.msra.mxu1 %v7365_v26 }
 0x42b   : > { %v5078_v36 = vcombine.low %v5014_v56, %v5015_v22  ;;  %v5079_v61 = vcombine.high %v5014_v56, %v5015_v22  ;;  %v4985_v31 = vadd.f32 %v11317_v44, %v4941_v16  ;;  %v5016_v10 = vmax.f32 %v4984_v57, 0.0  ;;  %7059 = vmatprep.subr.mxu0 %v12876_v42  ;;  %7417 = vmatprep.subr.mxu1 %v12876_v42 }
 0x42c   : > { %v4942_v30 = vadd.f32 %v4855_v11, %v4606_v62  ;;  %v4857_v54 = vpop.f32.mrf.mxu1 }
 0x42d   : > { %v5086_v46 = vrot.slane %v5078_v36, %v12960_v39  ;;  %v5093_v23 = vrot.slane %v5079_v61, %v12960_v39  ;;  %v5017_v50 = vmax.f32 %v4985_v31, 0.0  ;;  %v4943_v60 = vadd.f32 %v4857_v54, %v4608_v28  ;;  %v11393_v28 = vpop.f32.mrf.mxu0  ;;  %v7006_v36 = vld [vmem:[#allocation11 + $0x138] sm:$0xff]  ;;  %v7364_v61 = vld [vmem:[#allocation11 + $0x230] sm:$0xff] }
 0x42e   : > { %v4986_v5 = vadd.f32 %v11309_v13, %v4942_v30  ;;  %v4861_v15 = vpop.f32.mrf.mxu1  ;;  %7060 = vmatpush1.msra.mxu0 %v7006_v36  ;;  %7418 = vmatpush1.msra.mxu1 %v7364_v61  ;;  %v7005_v54 = vld [vmem:[#allocation11 + $0x130] sm:$0xff] }
 0x42f   : > { %v5097_v19 = vcombine.high %v5016_v10, %v5017_v50  ;;  %v4987_v62 = vadd.f32 %v11317_v44, %v4943_v60  ;;  %v4944_v17 = vadd.f32 %v4861_v15, %v4612_v53  ;;  %v5096_v3 = vcombine.low %v5016_v10, %v5017_v50  ;;  %v11415_v50 = vpop.f32.mrf.mxu0  ;;  %7061 = vmatprep.subr.mxu0 %v12876_v42 }
 0x430   : > { %v4863_v9 = vpop.f32.mrf.mxu1  ;;  %v8143_v18 = vrot.slane %v5093_v23, 9  ;;  %v8141_v4 = vrot.slane %v5086_v46, 9  ;;  %v5094_v14 = vcombine.high %v5086_v46, %v5086_v46  ;;  %v5018_v25 = vmax.f32 %v4986_v5, 0.0  ;;  %7419 = vmatprep.subr.mxu1 %v12876_v42  ;;  %7062 = vmatpush1.msra.mxu0 %v7005_v54 }
 0x431   : > { %v11396_v52 = vrot.slane %v5097_v19, %v12960_v39  ;;  %v5019_v59 = vmax.f32 %v4987_v62, 0.0  ;;  %v4988_v56 = vadd.f32 %v11309_v13, %v4944_v17  ;;  %v4945_v53 = vadd.f32 %v4863_v9, %v4614_v12  ;;  %7063 = vmatprep.subr.mxu0 %v12876_v42 }
 0x432   : > { %v4867_v22 = vpop.f32.mrf.mxu1  ;;  %v11400_v57 = vmax.f32 %v5093_v23, %v8143_v18  ;;  %v11402_v16 = vmax.f32 %v5086_v46, %v8141_v4  ;;  %v8142_v11 = vrot.slane %v5094_v14, 9  ;;  %v11406_v32 = vrot.slane %v5096_v3, %v12960_v39 }
 0x433   : > { %v5114_v31 = vcombine.low %v5018_v25, %v5019_v59  ;;  %v5115_v10 = vcombine.high %v5018_v25, %v5019_v59  ;;  %v4946_v30 = vadd.f32 %v4867_v22, %v11339_v51  ;;  %v5020_v2 = vmax.f32 %v4988_v56, 0.0  ;;  %v7363_v51 = vld [vmem:[#allocation11 + $0x228] sm:$0xff]  ;;  %v7362_v59 = vld [vmem:[#allocation11 + $0x220] sm:$0xff] }
 0x434   : > { %v4989_v12 = vadd.f32 %v11317_v44, %v4945_v53  ;;  %5754 = vrot.lane.b32.xlu1 %v11400_v57, %s8752_s5  ;;  %5750 = vrot.lane.b32.xlu0 %v11402_v16, %s8752_s5  ;;  %v4869_v21 = vpop.f32.mrf.mxu1  ;;  %v5113_v46 = vcombine.high %v11396_v52, %v11396_v52  ;;  %v11420_v15 = vmax.f32 %v5094_v14, %v8142_v11  ;;  %v7004_v25 = vld [vmem:[#allocation11 + $0x128] sm:$0xff] }
 0x435   : > { %v5129_v60 = vrot.slane %v5115_v10, %v12960_v39  ;;  %v4990_v26 = vadd.f32 %v11309_v13, %v4946_v30  ;;  %v4947_v5 = vadd.f32 %v4869_v21, %v11346_v29  ;;  %v11424_v19 = vrot.slane %v5114_v31, %v12960_v39  ;;  %7420 = vmatpush1.msra.mxu1 %v7363_v51  ;;  %v7003_v31 = vld [vmem:[#allocation11 + $0x120] sm:$0xff]  ;;  %v7361_v21 = vld [vmem:[#allocation11 + $0x218] sm:$0xff] }
 0x436   : > { %v5021_v62 = vmax.f32 %v4989_v12, 0.0  ;;  %v4873_v17 = vpop.f32.mrf.mxu1  ;;  %v8148_v3 = vrot.slane %v5113_v46, 9  ;;  %v5095_v9 = vcombine.high %v5093_v23, %v5093_v23  ;;  %v11429_v18 = vadd.f32 %v11341_v55, %v11259_v45  ;;  %7421 = vmatprep.subr.mxu1 %v12876_v42  ;;  %v4661_v55 = vpop.f32.mrf.mxu0  ;;  %7064 = vmatpush1.msra.mxu0 %v7004_v25 }
 0x437   : > { %v4991_v29 = vadd.f32 %v11317_v44, %v4947_v5  ;;  %v4948_v4 = vadd.f32 %v4873_v17, %v11350_v37  ;;  %v8151_v14 = vrot.slane %v5129_v60, 9  ;;  %v5022_v37 = vmax.f32 %v4990_v26, 0.0  ;;  %7422 = vmatpush1.msra.mxu1 %v7362_v59  ;;  %7065 = vmatprep.subr.mxu0 %v12876_v42  ;;  %v7002_v17 = vld [vmem:[#allocation11 + $0x118] sm:$0xff] }
 0x438   : > { %v5132_v56 = vcombine.low %v5020_v2, %v5021_v62  ;;  %v11434_v53 = vcombine.high %v5020_v2, %v5021_v62  ;;  %5752 = vrot.lane.b32.xlu1 %v11420_v15, %s8752_s5  ;;  %v4875_v23 = vpop.f32.mrf.mxu1  ;;  %v11438_v22 = vmax.f32 %v5113_v46, %v8148_v3  ;;  %v8144_v45 = vrot.slane %v5095_v9, 9  ;;  %7423 = vmatprep.subr.mxu1 %v12876_v42 }
 0x439   : > { %v5023_v11 = vmax.f32 %v4991_v29, 0.0  ;;  %v4992_v36 = vadd.f32 %v11309_v13, %v4948_v4  ;;  %v4949_v61 = vadd.f32 %v4875_v23, %v11354_v47  ;;  %v11445_v10 = vadd.f32 %v11373_v20, %v11263_v48  ;;  %7066 = vmatpush1.msra.mxu0 %v7003_v31  ;;  %7424 = vmatpush1.msra.mxu1 %v7361_v21 }
 0x43a   : > { %5764 = vrot.lane.b32.xlu0 %v11438_v22, %s8752_s5  ;;  %v4879_v30 = vpop.f32.mrf.mxu1  ;;  %v11449_v54 = vmax.f32 %v5095_v9, %v8144_v45  ;;  %v8145_v2 = vrot.slane %v11406_v32, 9  ;;  %v5130_v12 = vcombine.high %v11424_v19, %v11424_v19  ;;  %v11464_v26 = vmax.f32 %v5129_v60, %v8151_v14  ;;  %v4665_v9 = vpop.f32.mrf.mxu0  ;;  %7067 = vmatprep.subr.mxu0 %v12876_v42 }
 0x43b   : > { %v11454_v47 = vcombine.low %v5022_v37, %v5023_v11  ;;  %v11456_v46 = vcombine.high %v5022_v37, %v5023_v11  ;;  %v4993_v51 = vadd.f32 %v11317_v44, %v4949_v61  ;;  %v4950_v48 = vadd.f32 %v4879_v30, %v11358_v49  ;;  %v7360_v49 = vld [vmem:[#allocation11 + $0x210] sm:$0xff]  ;;  %7425 = vmatprep.subr.mxu1 %v12876_v42 }
 0x43c   : > { %5756 = vrot.lane.b32.xlu1 %v11449_v54, %s8752_s5  ;;  %v4881_v20 = vpop.f32.mrf.mxu1  ;;  %v8150_v5 = vrot.slane %v5130_v12, 9  ;;  %v5131_v62 = vcombine.high %v5129_v60, %v5129_v60  ;;  %v11468_v3 = vadd.f32 %v11393_v28, %v11265_v0  ;;  %v5024_v29 = vmax.f32 %v4992_v36, 0.0  ;;  %7068 = vmatpush1.msra.mxu0 %v7002_v17  ;;  %v7001_v37 = vld [vmem:[#allocation11 + $0x110] sm:$0xff] }
 0x43d   : > { %v5025_v4 = vmax.f32 %v4993_v51, 0.0  ;;  %v4951_v25 = vadd.f32 %v4881_v20, %v11362_v24  ;;  %v11473_v14 = vrot.slane %v5132_v56, %v12960_v39  ;;  %v4994_v60 = vadd.f32 %v11309_v13, %v4950_v48  ;;  %7426 = vmatpush1.msra.mxu1 %v7360_v49  ;;  %7069 = vmatprep.subr.mxu0 %v12876_v42 }
 0x43e   : > { %5770 = vrot.lane.b32.xlu0 %v11464_v26, %s8752_s5  ;;  %v4885_v59 = vpop.f32.mrf.mxu1  ;;  %v11479_v0 = vmax.f32 %v11406_v32, %v8145_v2  ;;  %v8147_v28 = vrot.slane %v11396_v52, 9  ;;  %v11491_v11 = vadd.f32 %v11415_v50, %v11269_v6  ;;  %v11495_v61 = vmax.f32 %v5130_v12, %v8150_v5  ;;  %v7359_v2 = vld [vmem:[#allocation11 + $0x208] sm:$0xff]  ;;  %v4667_v6 = vpop.f32.mrf.mxu0  ;;  %7427 = vmatprep.subr.mxu1 %v12876_v42 }
 0x43f   : > { %v11483_v24 = vcombine.low %v5024_v29, %v5025_v4  ;;  %v11485_v23 = vcombine.high %v5024_v29, %v5025_v4  ;;  %v4995_v56 = vadd.f32 %v11317_v44, %v4951_v25  ;;  %v4952_v45 = vadd.f32 %v4885_v59, %v11367_v63  ;;  %7070 = vmatpush1.msra.mxu0 %v7001_v37 }
 0x440   : > { %5758 = vrot.lane.b32.xlu1 %v11479_v0, %s8752_s5  ;;  %v4887_v36 = vpop.f32.mrf.mxu1  ;;  %v8152_v31 = vrot.slane %v5131_v62, 9  ;;  %v5112_v30 = vcombine.high %v11406_v32, %v11406_v32  ;;  %v11500_v63 = vadd.f32 %v4661_v55, %v11271_v27  ;;  %v11503_v21 = vadd.f32 %v4665_v9, %v11275_v1  ;;  %v7000_v55 = vld [vmem:[#allocation11 + $0x108] sm:$0xff]  ;;  %7428 = vmatpush1.msra.mxu1 %v7359_v2 }
 0x441   : > { %v5026_v50 = vmax.f32 %v4994_v60, 0.0  ;;  %v5027_v51 = vmax.f32 %v4995_v56, 0.0  ;;  %v4996_v12 = vadd.f32 %v11309_v13, %v4952_v45  ;;  %v4953_v48 = vadd.f32 %v4887_v36, %v11371_v8  ;;  %7071 = vmatprep.subr.mxu0 %v12876_v42  ;;  %v7358_v8 = vld [vmem:[#allocation11 + $0x200] sm:$0xff]  ;;  %7429 = vmatprep.subr.mxu1 %v12876_v42  ;;  %v7357_v36 = vld [vmem:[#allocation11 + $0x1f8] sm:$0xff] }
 0x442   : > { %5768 = vrot.lane.b32.xlu0 %v11495_v61, %s8752_s5  ;;  %v4891_v32 = vpop.f32.mrf.mxu1  ;;  %v11512_v27 = vmax.f32 %v11396_v52, %v8147_v28  ;;  %v8146_v1 = vrot.slane %v5112_v30, 9  ;;  %v8153_v9 = vrot.slane %v11473_v14, 9  ;;  %v5147_v29 = vrot.slane %v11434_v53, %v12960_v39  ;;  %7072 = vmatpush1.msra.mxu0 %v7000_v55  ;;  %v6999_v28 = vld [vmem:[#allocation11 + $0x100] sm:$0xff] }
 0x443   : > { %v11514_v20 = vcombine.low %v5026_v50, %v5027_v51  ;;  %v11516_v5 = vcombine.high %v5026_v50, %v5027_v51  ;;  %v4954_v17 = vadd.f32 %v4891_v32, %v11379_v35  ;;  %v4997_v52 = vadd.f32 %v11317_v44, %v4953_v48  ;;  %v11529_v35 = vpop.f32.mrf.mxu0  ;;  %7430 = vmatpush1.msra.mxu1 %v7358_v8 }
 0x444   : > { %5762 = vrot.lane.b32.xlu1 %v11512_v27, %s8752_s5  ;;  %v4893_v4 = vpop.f32.mrf.mxu1  ;;  %v11526_v25 = vmax.f32 %v5131_v62, %v8152_v31  ;;  %v11533_v49 = vrot.slane %v11454_v47, %v12960_v39  ;;  %v11537_v60 = vrot.slane %v11456_v46, %v12960_v39  ;;  %v5028_v62 = vmax.f32 %v4996_v12, 0.0  ;;  %7073 = vmatprep.subr.mxu0 %v12876_v42 }
 0x445   : > { %v4998_v53 = vadd.f32 %v11309_v13, %v4954_v17  ;;  %v4955_v59 = vadd.f32 %v4893_v4, %v11383_v58  ;;  %v5029_v56 = vmax.f32 %v4997_v52, 0.0  ;;  %v11543_v37 = vmax.f32 %v5112_v30, %v8146_v1  ;;  %7431 = vmatprep.subr.mxu1 %v12876_v42  ;;  %7074 = vmatpush1.msra.mxu0 %v6999_v28  ;;  %v4673_v48 = vpop.f32.mrf.mxu0 }
 0x446   : > { %5772 = vrot.lane.b32.xlu0 %v11526_v25, %s8752_s5  ;;  %v4897_v45 = vpop.f32.mrf.mxu1  ;;  %v8149_v47 = vrot.slane %v11424_v19, 9  ;;  %v11549_v58 = vmax.f32 %v11473_v14, %v8153_v9  ;;  %v8155_v51 = vrot.slane %v5147_v29, 9  ;;  %v5148_v12 = vcombine.high %v11473_v14, %v11473_v14  ;;  %7432 = vmatpush1.msra.mxu1 %v7357_v36  ;;  %v7356_v9 = vld [vmem:[#allocation11 + $0x1f0] sm:$0xff] }
 0x447   : > { %v4999_v46 = vadd.f32 %v11317_v44, %v4955_v59  ;;  %v4956_v31 = vadd.f32 %v4897_v45, %v11389_v34  ;;  %v11553_v2 = vcombine.low %v5028_v62, %v5029_v56  ;;  %v11555_v50 = vcombine.high %v5028_v62, %v5029_v56  ;;  %v6998_v34 = vld [vmem:[#allocation11 + $0xf8] sm:$0xff]  ;;  %7075 = vmatprep.subr.mxu0 %v12876_v42  ;;  %v4677_v36 = vpop.f32.mrf.mxu0 }
 0x448   : > { %5760 = vrot.lane.b32.xlu1 %v11543_v37, %s8752_s5  ;;  %v4899_v30 = vpop.f32.mrf.mxu1  ;;  %v5030_v32 = vmax.f32 %v4998_v53, 0.0  ;;  %v11565_v8 = vadd.f32 %v4667_v6, %v11277_v38  ;;  %v11570_v52 = vmax.f32 %v11424_v19, %v8149_v47  ;;  %v8157_v4 = vrot.slane %v11533_v49, 9  ;;  %7433 = vmatprep.subr.mxu1 %v12876_v42  ;;  %v7028_v38 = vld [vmem:[#allocation11 + $0x1e8] sm:$0xff]  ;;  %v7386_v47 = vld [vmem:[#allocation11 + $0x2e0] sm:$0xff] }
 0x449   : > { %v5031_v1 = vmax.f32 %v4999_v46, 0.0  ;;  %v5000_v55 = vadd.f32 %v11309_v13, %v4956_v31  ;;  %v4957_v17 = vadd.f32 %v4899_v30, %v11429_v18  ;;  %v5167_v53 = vcombine.high %v11537_v60, %v11537_v60  ;;  %7076 = vmatpush1.msra.mxu0 %v6998_v34  ;;  %7434 = vmatpush1.msra.mxu1 %v7356_v9 }
 0x44a   : > { %5774 = vrot.lane.b32.xlu0 %v11549_v58, %s8752_s5  ;;  %v4903_v14 = vpop.f32.mrf.mxu1  ;;  %v11584_v62 = vmax.f32 %v5147_v29, %v8155_v51  ;;  %v8154_v56 = vrot.slane %v5148_v12, 9  ;;  %v5149_v45 = vcombine.high %v5147_v29, %v5147_v29  ;;  %v11588_v46 = vrot.slane %v11483_v24, %v12960_v39  ;;  %7079 = vmatprep.subr.mxu0 %v12876_v42 }
 0x44b   : > { %v11575_v18 = vcombine.low %v5030_v32, %v5031_v1  ;;  %v11577_v59 = vcombine.high %v5030_v32, %v5031_v1  ;;  %v5001_v28 = vadd.f32 %v11317_v44, %v4957_v17  ;;  %v4958_v6 = vadd.f32 %v4903_v14, %v11445_v10  ;;  %7437 = vmatprep.subr.mxu1 %v12876_v42 }
 0x44c   : > { %5766 = vrot.lane.b32.xlu1 %v11570_v52, %s8752_s5  ;;  %v4905_v19 = vpop.f32.mrf.mxu1  ;;  %v5032_v31 = vmax.f32 %v5000_v55, 0.0  ;;  %v11595_v10 = vadd.f32 %v11529_v35, %v11281_v40  ;;  %v11601_v24 = vmax.f32 %v11533_v49, %v8157_v4  ;;  %v8160_v32 = vrot.slane %v5167_v53, 9  ;;  %7080 = vmatpush2.msra.mxu0 %v7028_v38  ;;  %v7385_v35 = vld [vmem:[#allocation11 + $0x2d8] sm:$0xff] }
 0x44d   : > { %v5033_v30 = vmax.f32 %v5001_v28, 0.0  ;;  %v4959_v34 = vadd.f32 %v4905_v19, %v11468_v3  ;;  %v5002_v29 = vadd.f32 %v11309_v13, %v4958_v6  ;;  %v7027_v3 = vld [vmem:[#allocation11 + $0x1e0] sm:$0xff]  ;;  %7438 = vmatpush2.msra.mxu1 %v7386_v47  ;;  %v11610_v9 = vadd.f32 %v4673_v48, %v11283_v41  ;;  %7081 = vmatprep.subr.mxu0 %v12876_v42  ;;  %v7026_v41 = vld [vmem:[#allocation11 + $0x1d8] sm:$0xff] }
 0x44e   : > { %5778 = vrot.lane.b32.xlu0 %v11584_v62, %s8752_s5  ;;  %v4909_v51 = vpop.f32.mrf.mxu1  ;;  %v11613_v14 = vadd.f32 %v4677_v36, %v11287_v43  ;;  %v11617_v28 = vmax.f32 %v5148_v12, %v8154_v56  ;;  %v8156_v38 = vrot.slane %v5149_v45, 9  ;;  %v8161_v47 = vrot.slane %v11588_v46, 9  ;;  %7439 = vmatprep.subr.mxu1 %v12876_v42  ;;  %v7384_v36 = vld [vmem:[#allocation11 + $0x2d0] sm:$0xff] }
 0x44f   : > { %v11603_v1 = vcombine.low %v5032_v31, %v5033_v30  ;;  %v11605_v55 = vcombine.high %v5032_v31, %v5033_v30  ;;  %v5003_v17 = vadd.f32 %v11317_v44, %v4959_v34  ;;  %v4960_v40 = vadd.f32 %v4909_v51, %v11491_v11  ;;  %7082 = vmatpush2.msra.mxu0 %v7027_v3 }
 0x450   : > { %5782 = vrot.lane.b32.xlu1 %v11601_v24, %s8752_s5  ;;  %v4911_v4 = vpop.f32.mrf.mxu1  ;;  %v5034_v6 = vmax.f32 %v5002_v29, 0.0  ;;  %v5183_v43 = vrot.slane %v11485_v23, %v12960_v39  ;;  %v11628_v56 = vmax.f32 %v5167_v53, %v8160_v32  ;;  %7440 = vmatpush2.msra.mxu1 %v7385_v35  ;;  %v11640_v53 = vmax.f32 %v5149_v45, %v8156_v38  ;;  %v7025_v32 = vld [vmem:[#allocation11 + $0x1d0] sm:$0xff]  ;;  %v7383_v45 = vld [vmem:[#allocation11 + $0x2c8] sm:$0xff] }
 0x451   : > { %v5035_v19 = vmax.f32 %v5003_v17, 0.0  ;;  %v5004_v11 = vadd.f32 %v11309_v13, %v4960_v40  ;;  %v4961_v48 = vadd.f32 %v4911_v4, %v11500_v63  ;;  %7083 = vmatprep.subr.mxu0 %v12876_v42  ;;  %7441 = vmatprep.subr.mxu1 %v12876_v42  ;;  %v8159_v29 = vrot.slane %v11537_v60, 9 }
 0x452   : > { %5776 = vrot.lane.b32.xlu0 %v11617_v28, %s8752_s5  ;;  %v4915_v12 = vpop.f32.mrf.mxu1  ;;  %v5166_v51 = vcombine.high %v11533_v49, %v11533_v49  ;;  %7084 = vmatpush2.msra.mxu0 %v7026_v41  ;;  %v11647_v3 = vrot.slane %v11514_v20, %v12960_v39  ;;  %v11652_v35 = vmax.f32 %v11588_v46, %v8161_v47 }
 0x453   : > { %v11630_v31 = vcombine.low %v5034_v6, %v5035_v19  ;;  %v11632_v30 = vcombine.high %v5034_v6, %v5035_v19  ;;  %v4962_v34 = vadd.f32 %v4915_v12, %v11503_v21  ;;  %v5005_v23 = vadd.f32 %v11317_v44, %v4961_v48  ;;  %v4679_v21 = vpop.f32.mrf.mxu0  ;;  %7442 = vmatpush2.msra.mxu1 %v7384_v36  ;;  %v7024_v36 = vld [vmem:[#allocation11 + $0x1c8] sm:$0xff] }
 0x454   : > { %5788 = vrot.lane.b32.xlu1 %v11628_v56, %s8752_s5  ;;  %v4917_v63 = vpop.f32.mrf.mxu1  ;;  %v5036_v4 = vmax.f32 %v5004_v11, 0.0  ;;  %v8163_v6 = vrot.slane %v5183_v43, 9  ;;  %v5185_v19 = vcombine.high %v5183_v43, %v5183_v43  ;;  %7085 = vmatprep.subr.mxu0 %v12876_v42  ;;  %v11659_v20 = vrot.slane %v11516_v5, %v12960_v39 }
 0x455   : > { %v5006_v17 = vadd.f32 %v11309_v13, %v4962_v34  ;;  %v4963_v40 = vadd.f32 %v4917_v63, %v11565_v8  ;;  %v5037_v38 = vmax.f32 %v5005_v23, 0.0  ;;  %7443 = vmatprep.subr.mxu1 %v12876_v42  ;;  %7086 = vmatpush2.msra.mxu0 %v7025_v32  ;;  %v11671_v12 = vmax.f32 %v11537_v60, %v8159_v29  ;;  %v7382_v34 = vld [vmem:[#allocation11 + $0x2c0] sm:$0xff]  ;;  %v4683_v23 = vpop.f32.mrf.mxu0 }
 0x456   : > { %5780 = vrot.lane.b32.xlu0 %v11640_v53, %s8752_s5  ;;  %v4921_v49 = vpop.f32.mrf.mxu1  ;;  %v8158_v5 = vrot.slane %v5166_v51, 9  ;;  %7444 = vmatpush2.msra.mxu1 %v7383_v45  ;;  %v11680_v29 = vmax.f32 %v5183_v43, %v8163_v6  ;;  %v8164_v45 = vrot.slane %v5185_v19, 9 }
 0x457   : > { %v5007_v8 = vadd.f32 %v11317_v44, %v4963_v40  ;;  %v4964_v47 = vadd.f32 %v4921_v49, %v11595_v10  ;;  %v11664_v11 = vcombine.low %v5036_v4, %v5037_v38  ;;  %v11666_v41 = vcombine.high %v5036_v4, %v5037_v38  ;;  %7087 = vmatprep.subr.mxu0 %v12876_v42  ;;  %v7023_v38 = vld [vmem:[#allocation11 + $0x1c0] sm:$0xff] }
 0x458   : > { %5790 = vrot.lane.b32.xlu1 %v11652_v35, %s8752_s5  ;;  %v4923_v48 = vpop.f32.mrf.mxu1  ;;  %v5038_v10 = vmax.f32 %v5006_v17, 0.0  ;;  %7445 = vmatprep.subr.mxu1 %v12876_v42  ;;  %v4680_v4 = vadd.f32 %v4679_v21, %v11289_v7  ;;  %v5184_v17 = vcombine.high %v11588_v46, %v11588_v46  ;;  %v7381_v7 = vld [vmem:[#allocation11 + $0x2b8] sm:$0xff]  ;;  %v11692_v6 = vmax.f32 %v5166_v51, %v8158_v5 }
 0x459   : > { %v5039_v63 = vmax.f32 %v5007_v8, 0.0  ;;  %v5008_v32 = vadd.f32 %v11309_v13, %v4964_v47  ;;  %v4965_v40 = vadd.f32 %v4923_v48, %v11610_v9  ;;  %7088 = vmatpush2.msra.mxu0 %v7024_v36  ;;  %7446 = vmatpush2.msra.mxu1 %v7382_v34  ;;  %v8165_v46 = vrot.slane %v11647_v3, 9  ;;  %v4685_v36 = vpop.f32.mrf.mxu0 }
 0x45a   : > { %5786 = vrot.lane.b32.xlu0 %v11671_v12, %s8752_s5  ;;  %v4927_v60 = vpop.f32.mrf.mxu1  ;;  %v5203_v47 = vcombine.high %v11659_v20, %v11659_v20  ;;  %7089 = vmatprep.subr.mxu0 %v12876_v42  ;;  %v4684_v48 = vadd.f32 %v4683_v23, %v11293_v33  ;;  %v7022_v33 = vld [vmem:[#allocation11 + $0x1b8] sm:$0xff]  ;;  %v7380_v23 = vld [vmem:[#allocation11 + $0x2b0] sm:$0xff] }
 0x45b   : > { %v11684_v49 = vcombine.low %v5038_v10, %v5039_v63  ;;  %v11686_v9 = vcombine.high %v5038_v10, %v5039_v63  ;;  %v5009_v8 = vadd.f32 %v11317_v44, %v4965_v40  ;;  %v4966_v21 = vadd.f32 %v4927_v60, %v11613_v14  ;;  %7447 = vmatprep.subr.mxu1 %v12876_v42 }
 0x45c   : > { %5794 = vrot.lane.b32.xlu1 %v11680_v29, %s8752_s5  ;;  %v4929_v43 = vpop.f32.mrf.mxu1  ;;  %v5040_v34 = vmax.f32 %v5008_v32, 0.0  ;;  %7090 = vmatpush2.msra.mxu0 %v7023_v38  ;;  %v5212_v14 = vrot.slane %v11553_v2, %v12960_v39  ;;  %v11705_v40 = vmax.f32 %v5185_v19, %v8164_v45  ;;  %v8162_v60 = vrot.slane %v5184_v17, 9  ;;  %v12962_v2 = vld [vmem:[#allocation47_spill] sm:$0xff] }
 0x45d   : > { %v5041_v10 = vmax.f32 %v5009_v8, 0.0  ;;  %v4967_v63 = vadd.f32 %v4929_v43, %v4680_v4  ;;  %v5010_v51 = vadd.f32 %v11309_v13, %v4966_v21  ;;  %7448 = vmatpush2.msra.mxu1 %v7381_v7  ;;  %7091 = vmatprep.subr.mxu0 %v12876_v42  ;;  %v4686_v21 = vadd.f32 %v4685_v36, %v12962_v2  ;;  %v7379_v2 = vld [vmem:[#allocation11 + $0x2a8] sm:$0xff] }
 0x45e   : > { %5784 = vrot.lane.b32.xlu0 %v11692_v6, %s8752_s5  ;;  %v4933_v5 = vpop.f32.mrf.mxu1  ;;  %12961 = vst [vmem:[#allocation49_spill] sm:$0xff] %v11705_v40  ;;  %v11717_v45 = vmax.f32 %v11647_v3, %v8165_v46  ;;  %v8168_v7 = vrot.slane %v5203_v47, 9  ;;  %7449 = vmatprep.subr.mxu1 %v12876_v42  ;;  %v11723_v36 = vmax.f32 %v5184_v17, %v8162_v60 }
 0x45f   : > { %v11707_v32 = vcombine.low %v5040_v34, %v5041_v10  ;;  %v11709_v4 = vcombine.high %v5040_v34, %v5041_v10  ;;  %v5011_v38 = vadd.f32 %v11317_v44, %v4967_v63  ;;  %v4968_v8 = vadd.f32 %v4933_v5, %v4684_v48  ;;  %7092 = vmatpush2.msra.mxu0 %v7022_v33  ;;  %v7021_v48 = vld [vmem:[#allocation11 + $0x1b0] sm:$0xff] }
 0x460   : > { %5796 = vrot.lane.b32.xlu1 %v11705_v40, %s8752_s5  ;;  %v4935_v19 = vpop.f32.mrf.mxu1  ;;  %v5042_v43 = vmax.f32 %v5010_v51, 0.0  ;;  %7450 = vmatpush2.msra.mxu1 %v7380_v23  ;;  %v8167_v5 = vrot.slane %v11659_v20, 9  ;;  %v5202_v46 = vcombine.high %v11647_v3, %v11647_v3  ;;  %v5219_v33 = vrot.slane %v11555_v50, %v12960_v39  ;;  %v7020_v3 = vld [vmem:[#allocation11 + $0x1a8] sm:$0xff]  ;;  %v7378_v23 = vld [vmem:[#allocation11 + $0x2a0] sm:$0xff] }
 0x461   : > { %v5043_v34 = vmax.f32 %v5011_v38, 0.0  ;;  %v5012_v10 = vadd.f32 %v11309_v13, %v4968_v8  ;;  %v4969_v63 = vadd.f32 %v4935_v19, %v4686_v21  ;;  %v8169_v13 = vrot.slane %v5212_v14, 9  ;;  %7093 = vmatprep.subr.mxu0 %v12876_v42  ;;  %7451 = vmatprep.subr.mxu1 %v12876_v42 }
 0x462   : > { %5798 = vrot.lane.b32.xlu0 %v11717_v45, %s8752_s5  ;;  %v11739_v60 = vmax.f32 %v5203_v47, %v8168_v7  ;;  %7094 = vmatpush2.msra.mxu0 %v7021_v48  ;;  %v11743_v38 = vrot.slane %v11575_v18, %v12960_v39  ;;  %v11747_v8 = vrot.slane %v11577_v59, %v12960_v39  ;;  %v8166_v21 = vrot.slane %v5202_v46, 9  ;;  %v7019_v18 = vld [vmem:[#allocation11 + $0x1a0] sm:$0xff]  ;;  %v7377_v59 = vld [vmem:[#allocation11 + $0x298] sm:$0xff] }
 0x463   : > { %v11728_v40 = vcombine.low %v5042_v43, %v5043_v34  ;;  %v11730_v51 = vcombine.high %v5042_v43, %v5043_v34  ;;  %v5013_v17 = vadd.f32 %v11317_v44, %v4969_v63  ;;  %7452 = vmatpush2.msra.mxu1 %v7379_v2  ;;  %7095 = vmatprep.subr.mxu0 %v12876_v42  ;;  %v5044_v44 = vmax.f32 %v5012_v10, 0.0  ;;  %v7376_v2 = vld [vmem:[#allocation11 + $0x290] sm:$0xff] }
 0x464   : > { %5792 = vrot.lane.b32.xlu1 %v11723_v36, %s8752_s5  ;;  %v11753_v47 = vmax.f32 %v11659_v20, %v8167_v5  ;;  %7453 = vmatprep.subr.mxu1 %v12876_v42  ;;  %v11756_v19 = vmax.f32 %v5212_v14, %v8169_v13  ;;  %v8171_v34 = vrot.slane %v5219_v33, 9  ;;  %v5220_v10 = vcombine.high %v5212_v14, %v5212_v14  ;;  %v7018_v20 = vld [vmem:[#allocation11 + $0x198] sm:$0xff] }
 0x465   : > { %v5045_v50 = vmax.f32 %v5013_v17, 0.0  ;;  %7096 = vmatpush2.msra.mxu0 %v7020_v3  ;;  %7454 = vmatpush2.msra.mxu1 %v7378_v23  ;;  %v11768_v48 = vmax.f32 %v5202_v46, %v8166_v21  ;;  %v8173_v63 = vrot.slane %v11743_v38, 9  ;;  %v5239_v5 = vcombine.high %v11747_v8, %v11747_v8  ;;  %v7017_v46 = vld [vmem:[#allocation11 + $0x190] sm:$0xff]  ;;  %v7375_v3 = vld [vmem:[#allocation11 + $0x288] sm:$0xff] }
 0x466   : > { %5804 = vrot.lane.b32.xlu0 %v11739_v60, %s8752_s5  ;;  %7097 = vmatprep.subr.mxu0 %v12876_v42  ;;  %v11777_v14 = vmax.f32 %v5219_v33, %v8171_v34  ;;  %v8170_v13 = vrot.slane %v5220_v10, 9  ;;  %v5221_v17 = vcombine.high %v5219_v33, %v5219_v33  ;;  %v5248_v23 = vrot.slane %v11603_v1, %v12960_v39  ;;  %v7016_v21 = vld [vmem:[#allocation11 + $0x188] sm:$0xff]  ;;  %v7374_v33 = vld [vmem:[#allocation11 + $0x280] sm:$0xff] }
 0x467   : > { %v11758_v7 = vcombine.low %v5044_v44, %v5045_v50  ;;  %v11760_v43 = vcombine.high %v5044_v44, %v5045_v50  ;;  %7455 = vmatprep.subr.mxu1 %v12876_v42  ;;  %7098 = vmatpush2.msra.mxu0 %v7019_v18  ;;  %v11785_v44 = vmax.f32 %v11743_v38, %v8173_v63  ;;  %v8176_v50 = vrot.slane %v5239_v5, 9  ;;  %v7015_v63 = vld [vmem:[#allocation11 + $0x180] sm:$0xff] }
 0x468   : > { %5802 = vrot.lane.b32.xlu1 %v11753_v47, %s8752_s5  ;;  %7456 = vmatpush2.msra.mxu1 %v7377_v59  ;;  %v11790_v18 = vmax.f32 %v5220_v10, %v8170_v13  ;;  %v8172_v59 = vrot.slane %v5221_v17, 9  ;;  %v5255_v1 = vrot.slane %v11605_v55, %v12960_v39  ;;  %v8175_v55 = vrot.slane %v11747_v8, 9 }
 0x469   : > { %7099 = vmatprep.subr.mxu0 %v12876_v42  ;;  %7457 = vmatprep.subr.mxu1 %v12876_v42  ;;  %v11798_v34 = vmax.f32 %v5239_v5, %v8176_v50  ;;  %v5238_v13 = vcombine.high %v11743_v38, %v11743_v38  ;;  %v7014_v5 = vld [vmem:[#allocation11 + $0x178] sm:$0xff]  ;;  %v5273_v38 = vrot.slane %v11632_v30, %v12960_v39 }
 0x46a   : > { %5806 = vrot.lane.b32.xlu0 %v11756_v19, %s8752_s5  ;;  %7100 = vmatpush2.msra.mxu0 %v7018_v20  ;;  %v8177_v20 = vrot.slane %v5248_v23, 9  ;;  %v11804_v10 = vmax.f32 %v5221_v17, %v8172_v59  ;;  %v8179_v50 = vrot.slane %v5255_v1, 9  ;;  %v5266_v17 = vrot.slane %v11630_v31, %v12960_v39 }
 0x46b   : > { %7458 = vmatpush2.msra.mxu1 %v7376_v2  ;;  %7101 = vmatprep.subr.mxu0 %v12876_v42  ;;  %v7373_v2 = vld [vmem:[#allocation11 + $0x278] sm:$0xff]  ;;  %v8174_v59 = vrot.slane %v5238_v13, 9  ;;  %v5256_v31 = vcombine.high %v5248_v23, %v5248_v23 }
 0x46c   : > { %5800 = vrot.lane.b32.xlu1 %v11768_v48, %s8752_s5  ;;  %7459 = vmatprep.subr.mxu1 %v12876_v42 }
 0x46d   : > { %7102 = vmatpush2.msra.mxu0 %v7017_v46  ;;  %7460 = vmatpush2.msra.mxu1 %v7375_v3  ;;  %v7372_v46 = vld [vmem:[#allocation11 + $0x270] sm:$0xff]  ;;  %v11811_v3 = vmax.f32 %v5248_v23, %v8177_v20  ;;  %v11827_v20 = vmax.f32 %v5255_v1, %v8179_v50  ;;  %v11831_v30 = vmax.f32 %v5238_v13, %v8174_v59  ;;  %v8183_v50 = vrot.slane %v5273_v38, 9 }
 0x46e   : > { %5810 = vrot.lane.b32.xlu0 %v11777_v14, %s8752_s5  ;;  %7103 = vmatprep.subr.mxu0 %v12876_v42  ;;  %v5274_v59 = vcombine.high %v5266_v17, %v5266_v17 }
 0x46f   : > { %7461 = vmatprep.subr.mxu1 %v12876_v42  ;;  %7104 = vmatpush2.msra.mxu0 %v7016_v21  ;;  %v5257_v21 = vcombine.high %v5255_v1, %v5255_v1 }
 0x470   : > { %5814 = vrot.lane.b32.xlu1 %v11785_v44, %s8752_s5  ;;  %7462 = vmatpush2.msra.mxu1 %v7374_v33  ;;  %v11822_v33 = vmax.f32 %v11747_v8, %v8175_v55  ;;  %v8178_v55 = vrot.slane %v5256_v31, 9 }
 0x471   : > { %7105 = vmatprep.subr.mxu0 %v12876_v42  ;;  %7463 = vmatprep.subr.mxu1 %v12876_v42 }
 0x472   : > { %5808 = vrot.lane.b32.xlu0 %v11790_v18, %s8752_s5  ;;  %7106 = vmatpush2.msra.mxu0 %v7015_v63  ;;  %v8180_v63 = vrot.slane %v5257_v21, 9  ;;  %v11845_v13 = vmax.f32 %v5256_v31, %v8178_v55  ;;  %v11859_v31 = vmax.f32 %v5273_v38, %v8183_v50 }
 0x473   : > { %7464 = vmatpush2.msra.mxu1 %v7373_v2  ;;  %7107 = vmatprep.subr.mxu0 %v12876_v42  ;;  %v8181_v2 = vrot.slane %v5266_v17, 9 }
 0x474   : > { %5820 = vrot.lane.b32.xlu1 %v11798_v34, %s8752_s5  ;;  %7465 = vmatprep.subr.mxu1 %v12876_v42  ;;  %v11835_v8 = vmax.f32 %v5257_v21, %v8180_v63  ;;  %v5291_v21 = vrot.slane %v11666_v41, %v12960_v39  ;;  %12965 = vst [vmem:[#allocation52_spill] sm:$0xff] %v11859_v31 }
 0x475   : > { %7108 = vmatpush2.msra.mxu0 %v7014_v5  ;;  %7466 = vmatpush2.msra.mxu1 %v7372_v46  ;;  %v5275_v5 = vcombine.high %v5273_v38, %v5273_v38  ;;  %v5284_v46 = vrot.slane %v11664_v11, %v12960_v39  ;;  %v11841_v23 = vmax.f32 %v5266_v17, %v8181_v2  ;;  %v8182_v17 = vrot.slane %v5274_v59, 9 }
 0x476   : > { %5812 = vrot.lane.b32.xlu0 %v11804_v10, %s8752_s5  ;;  %7170 = vmatprep.subr.mxu0 %v12876_v42  ;;  %12963 = vst [vmem:[#allocation50_spill] sm:$0xff] %v11835_v8  ;;  %v5302_v2 = vrot.slane %v11684_v49, %v12960_v39 }
 0x477   : > { %v8184_v1 = vrot.slane %v5275_v5, 9  ;;  %v8185_v63 = vrot.slane %v5284_v46, 9  ;;  %v5292_v55 = vcombine.high %v5284_v46, %v5284_v46  ;;  %v11867_v49 = vmax.f32 %v5274_v59, %v8182_v17 }
 0x478   : > { %5822 = vrot.lane.b32.xlu1 %v11811_v3, %s8752_s5 }
 0x479   : > { %v11851_v11 = vmax.f32 %v5275_v5, %v8184_v1  ;;  %v11863_v41 = vmax.f32 %v5284_v46, %v8185_v63  ;;  %v8187_v5 = vrot.slane %v5291_v21, 9  ;;  %12967 = vst [vmem:[#allocation54_spill] sm:$0xff] %v11867_v49  ;;  %v8189_v1 = vrot.slane %v5302_v2, 9 }
 0x47a   : > { %5818 = vrot.lane.b32.xlu0 %v11822_v33, %s8752_s5  ;;  %v8186_v50 = vrot.slane %v5292_v55, 9  ;;  %v5320_v63 = vrot.slane %v11707_v32, %v12960_v39  ;;  %v5327_v46 = vrot.slane %v11709_v4, %v12960_v39 }
 0x47b   : > { %12964 = vst [vmem:[#allocation51_spill] sm:$0xff] %v11851_v11  ;;  %12966 = vst [vmem:[#allocation53_spill] sm:$0xff] %v11863_v41  ;;  %v11871_v38 = vmax.f32 %v5291_v21, %v8187_v5  ;;  %v11879_v59 = vmax.f32 %v5302_v2, %v8189_v1 }
 0x47c   : > { %5826 = vrot.lane.b32.xlu1 %v11827_v20, %s8752_s5  ;;  %v8193_v32 = vrot.slane %v5320_v63, 9 }
 0x47d   : > { %12968 = vst [vmem:[#allocation55_spill] sm:$0xff] %v11871_v38  ;;  %12969 = vst [vmem:[#allocation56_spill] sm:$0xff] %v11879_v59 }
 0x47e   : > { %5816 = vrot.lane.b32.xlu0 %v11831_v30, %s8752_s5 }
 0x480   : > { %5828 = vrot.lane.b32.xlu1 %v11835_v8, %s8752_s5  ;;  %v5309_v8 = vrot.slane %v11686_v9, %v12960_v39 }
 0x482   : > { %5830 = vrot.lane.b32.xlu0 %v11841_v23, %s8752_s5  ;;  %v5311_v9 = vcombine.high %v5309_v8, %v5309_v8  ;;  %v8191_v1 = vrot.slane %v5309_v8, 9 }
 0x484   : > { %5824 = vrot.lane.b32.xlu1 %v11845_v13, %s8752_s5  ;;  %v8192_v17 = vrot.slane %v5311_v9, 9 }
 0x486   : > { %5836 = vrot.lane.b32.xlu0 %v11851_v11, %s8752_s5  ;;  %v5293_v11 = vcombine.high %v5291_v21, %v5291_v21  ;;  %v11887_v21 = vmax.f32 %v5311_v9, %v8192_v17  ;;  %v11899_v9 = vmax.f32 %v5320_v63, %v8193_v32  ;;  %v11903_v17 = vmax.f32 %v5309_v8, %v8191_v1 }
 0x488   : > { %5834 = vrot.lane.b32.xlu1 %v11859_v31, %s8752_s5  ;;  %v8188_v5 = vrot.slane %v5293_v11, 9  ;;  %12971 = vst [vmem:[#allocation32_spill] sm:$0xff] %v11887_v21  ;;  %12973 = vst [vmem:[#allocation47_spill] sm:$0xff] %v11899_v9 }
 0x489   : > { %12974 = vst [vmem:[#allocation59_spill] sm:$0xff] %v11903_v17 }
 0x48a   : > { %5838 = vrot.lane.b32.xlu0 %v11863_v41, %s8752_s5  ;;  %v5329_v41 = vcombine.high %v5327_v46, %v5327_v46  ;;  %v11891_v4 = vmax.f32 %v5293_v11, %v8188_v5 }
 0x48c   : > { %5832 = vrot.lane.b32.xlu1 %v11867_v49, %s8752_s5  ;;  %v11883_v49 = vmax.f32 %v5292_v55, %v8186_v50  ;;  %12972 = vst [vmem:[#allocation38_spill] sm:$0xff] %v11891_v4  ;;  %v5345_v55 = vrot.slane %v11730_v51, %v12960_v39  ;;  %v8196_v50 = vrot.slane %v5329_v41, 9 }
 0x48e   : > { %5842 = vrot.lane.b32.xlu0 %v11871_v38, %s8752_s5  ;;  %12970 = vst [vmem:[#allocation57_spill] sm:$0xff] %v11883_v49  ;;  %v5310_v38 = vcombine.high %v5302_v2, %v5302_v2  ;;  %v11907_v2 = vmax.f32 %v5329_v41, %v8196_v50  ;;  %v5356_v41 = vrot.slane %v11758_v7, %v12960_v39 }
 0x490   : > { %5846 = vrot.lane.b32.xlu1 %v11879_v59, %s8752_s5  ;;  %v5338_v59 = vrot.slane %v11728_v40, %v12960_v39  ;;  %v8190_v11 = vrot.slane %v5310_v38, 9  ;;  %12975 = vst [vmem:[#allocation60_spill] sm:$0xff] %v11907_v2  ;;  %v8199_v40 = vrot.slane %v5345_v55, 9  ;;  %v8201_v7 = vrot.slane %v5356_v41, 9 }
 0x492   : > { %5840 = vrot.lane.b32.xlu0 %v11883_v49, %s8752_s5  ;;  %v5346_v5 = vcombine.high %v5338_v59, %v5338_v59  ;;  %v11911_v51 = vmax.f32 %v5310_v38, %v8190_v11  ;;  %v8197_v32 = vrot.slane %v5338_v59, 9  ;;  %v11915_v8 = vmax.f32 %v5345_v55, %v8199_v40 }
 0x493   : > { %v5363_v38 = vrot.slane %v11760_v43, %v12960_v39  ;;  %v5364_v40 = vcombine.high %v5356_v41, %v5356_v41  ;;  %v8195_v39 = vrot.slane %v5327_v46, 9 }
 0x494   : > { %5852 = vrot.lane.b32.xlu1 %v11887_v21, %s8752_s5  ;;  %12976 = vst [vmem:[#allocation61_spill] sm:$0xff] %v11911_v51  ;;  %v5347_v21 = vcombine.high %v5345_v55, %v5345_v55  ;;  %12977 = vst [vmem:[#allocation62_spill] sm:$0xff] %v11915_v8  ;;  %v8198_v1 = vrot.slane %v5346_v5, 9  ;;  %v11921_v50 = vmax.f32 %v5338_v59, %v8197_v32 }
 0x495   : > { %v5365_v43 = vcombine.high %v5363_v38, %v5363_v38 }
 0x496   : > { %5844 = vrot.lane.b32.xlu0 %v11891_v4, %s8752_s5  ;;  %12978 = vst [vmem:[#allocation63_spill] sm:$0xff] %v11921_v50  ;;  %v11927_v11 = vmax.f32 %v5346_v5, %v8198_v1  ;;  %v11939_v5 = vmax.f32 %v5356_v41, %v8201_v7  ;;  %v8202_v1 = vrot.slane %v5364_v40, 9 }
 0x498   : > { %5854 = vrot.lane.b32.xlu1 %v11899_v9, %s8752_s5  ;;  %v5328_v9 = vcombine.high %v5320_v63, %v5320_v63  ;;  %12979 = vst [vmem:[#allocation64_spill] sm:$0xff] %v11927_v11  ;;  %12982 = vst [vmem:[#allocation67_spill] sm:$0xff] %v11939_v5 }
 0x49a   : > { %5850 = vrot.lane.b32.xlu0 %v11903_v17, %s8752_s5  ;;  %v8194_v55 = vrot.slane %v5328_v9, 9 }
 0x49c   : > { %5860 = vrot.lane.b32.xlu1 %v11907_v2, %s8752_s5  ;;  %v8200_v2 = vrot.slane %v5347_v21, 9  ;;  %v11935_v59 = vmax.f32 %v5328_v9, %v8194_v55  ;;  %v11947_v55 = vmax.f32 %v5364_v40, %v8202_v1 }
 0x49e   : > { %5848 = vrot.lane.b32.xlu0 %v11911_v51, %s8752_s5  ;;  %v11931_v63 = vmax.f32 %v5347_v21, %v8200_v2  ;;  %12981 = vst [vmem:[#allocation66_spill] sm:$0xff] %v11935_v59  ;;  %v11943_v21 = vmax.f32 %v5327_v46, %v8195_v39  ;;  %v8204_v2 = vrot.slane %v5365_v43, 9  ;;  %12984 = vst [vmem:[#allocation69_spill] sm:$0xff] %v11947_v55  ;;  %v8203_v51 = vrot.slane %v5363_v38, 9 }
 0x4a0   : > { %5866 = vrot.lane.b32.xlu1 %v11915_v8, %s8752_s5  ;;  %12980 = vst [vmem:[#allocation65_spill] sm:$0xff] %v11931_v63  ;;  %12983 = vst [vmem:[#allocation68_spill] sm:$0xff] %v11943_v21  ;;  %v11957_v40 = vmax.f32 %v5363_v38, %v8203_v51  ;;  %v12987_v38 = vld [vmem:[#allocation35_spill] sm:$0xff] }
 0x4a2   : > { %5862 = vrot.lane.b32.xlu0 %v11921_v50, %s8752_s5  ;;  %12986 = vst [vmem:[#allocation71_spill] sm:$0xff] %v11957_v40 }
 0x4a4   : > { %5864 = vrot.lane.b32.xlu1 %v11927_v11, %s8752_s5 }
 0x4a6   : > { %v5755_v8 = vpop.permute.xlu1 %5754  ;;  %5868 = vrot.lane.b32.xlu0 %v11931_v63, %s8752_s5  ;;  %v5751_v32 = vpop.permute.xlu0 %5750 }
 0x4a7   : > { %v5878_v63 = vrot.slane %v5751_v32, 2 }
 0x4a8   : > { %5856 = vrot.lane.b32.xlu1 %v11935_v59, %s8752_s5  ;;  %v5880_v59 = vrot.slane %v5755_v8, 2 }
 0x4a9   : > { %v5942_v17 = vsel %vm2556_vm3, %v5751_v32, %v5878_v63 }
 0x4aa   : > { %v5753_v11 = vpop.permute.xlu1 %5752  ;;  %5870 = vrot.lane.b32.xlu0 %v11939_v5, %s8752_s5  ;;  %v11952_v5 = vmax.f32 %v5365_v43, %v8204_v2  ;;  %v6070_v43 = vmax.f32 %v11402_v16, %v5942_v17 }
 0x4ab   : > { %v5879_v50 = vrot.slane %v5753_v11, 2 }
 0x4ac   : > { %v5765_v9 = vpop.permute.xlu0 %5764  ;;  %5858 = vrot.lane.b32.xlu1 %v11943_v21, %s8752_s5  ;;  %12985 = vst [vmem:[#allocation70_spill] sm:$0xff] %v11952_v5 }
 0x4ad   : > { %v5943_v41 = vsel %vm2556_vm3, %v5753_v11, %v5879_v50  ;;  %v5885_v46 = vrot.slane %v5765_v9, 2  ;;  %v5944_v50 = vsel %vm2556_vm3, %v5755_v8, %v5880_v59 }
 0x4ae   : > { %v5757_v7 = vpop.permute.xlu1 %5756  ;;  %5872 = vrot.lane.b32.xlu0 %v11947_v55, %s8752_s5  ;;  %v6071_v1 = vmax.f32 %v11420_v15, %v5943_v41  ;;  %v6072_v51 = vmax.f32 %v11400_v57, %v5944_v50  ;;  %v12988_v15 = vld [vmem:[#allocation58_spill] sm:$0xff] }
 0x4af   : > { %v5881_v39 = vrot.slane %v5757_v7, 2  ;;  %v5949_v2 = vsel %vm2556_vm3, %v5765_v9, %v5885_v46  ;;  %v6201_v9 = vrot.slane %v6070_v43, %v12987_v38 }
 0x4b0   : > { %v5771_v4 = vpop.permute.xlu0 %5770  ;;  %5876 = vrot.lane.b32.xlu1 %v11952_v5, %s8752_s5  ;;  %v6209_v5 = vrot.slane %v6071_v1, %v12987_v38  ;;  %v6213_v41 = vrot.slane %v6071_v1, %v12988_v15  ;;  %v11970_v8 = vmax.f32 %v11438_v22, %v5949_v2  ;;  %v6217_v1 = vrot.slane %v6072_v51, %v12987_v38 }
 0x4b1   : > { %v5888_v11 = vrot.slane %v5771_v4, 2  ;;  %v5945_v63 = vsel %vm2556_vm3, %v5757_v7, %v5881_v39  ;;  %v6205_v7 = vrot.slane %v6070_v43, %v12988_v15 }
 0x4b2   : > { %v5759_v21 = vpop.permute.xlu1 %5758  ;;  %5874 = vrot.lane.b32.xlu0 %v11957_v40, %s8752_s5  ;;  %v6073_v59 = vmax.f32 %v11449_v54, %v5945_v63  ;;  %v6710_v22 = vsel %vm3325_vm4, %v6209_v5, %v6201_v9  ;;  %v6261_v2 = vrot.slane %v11970_v8, %v12988_v15 }
 0x4b3   : > { %v5882_v32 = vrot.slane %v5759_v21, 2  ;;  %v5952_v40 = vsel %vm2556_vm3, %v5771_v4, %v5888_v11  ;;  %v6221_v4 = vrot.slane %v6072_v51, %v12988_v15  ;;  %v6257_v11 = vrot.slane %v11970_v8, %v12987_v38 }
 0x4b4   : > { %v5769_v55 = vpop.permute.xlu0 %5768  ;;  %v11981_v50 = vmax.f32 %v11464_v26, %v5952_v40  ;;  %v6225_v43 = vrot.slane %v6073_v59, %v12987_v38  ;;  %v6229_v63 = vrot.slane %v6073_v59, %v12988_v15  ;;  %v6711_v40 = vsel %vm3327_vm6, %v6217_v1, %v6710_v22 }
 0x4b5   : > { %v5946_v16 = vsel %vm2556_vm3, %v5759_v21, %v5882_v32  ;;  %v5887_v54 = vrot.slane %v5769_v55, 2  ;;  %v6716_v21 = vsel %vm3325_vm4, %v6213_v41, %v6205_v7 }
 0x4b6   : > { %v5763_v17 = vpop.permute.xlu1 %5762  ;;  %v6074_v57 = vmax.f32 %v11479_v0, %v5946_v16  ;;  %v6717_v9 = vsel %vm3327_vm6, %v6221_v4, %v6716_v21  ;;  %v6281_v7 = vrot.slane %v11981_v50, %v12987_v38  ;;  %v6712_v59 = vsel %vm3329_vm7, %v6225_v43, %v6711_v40 }
 0x4b7   : > { %v5884_v46 = vrot.slane %v5763_v17, 2  ;;  %v5951_v8 = vsel %vm2556_vm3, %v5769_v55, %v5887_v54  ;;  %v6718_v22 = vsel %vm3329_vm7, %v6229_v63, %v6717_v9 }
 0x4b8   : > { %v5773_v39 = vpop.permute.xlu0 %5772  ;;  %v6233_v32 = vrot.slane %v6074_v57, %v12987_v38  ;;  %v6237_v51 = vrot.slane %v6074_v57, %v12988_v15  ;;  %v6079_v43 = vmax.f32 %v11495_v61, %v5951_v8 }
 0x4b9   : > { %v5948_v5 = vsel %vm2556_vm3, %v5763_v17, %v5884_v46  ;;  %v5889_v26 = vrot.slane %v5773_v39, 2  ;;  %v6285_v17 = vrot.slane %v11981_v50, %v12988_v15 }
 0x4ba   : > { %v5761_v0 = vpop.permute.xlu1 %5760  ;;  %v6076_v46 = vmax.f32 %v11512_v27, %v5948_v5  ;;  %v6713_v55 = vsel %vm3331_vm8, %v6233_v32, %v6712_v59  ;;  %v6719_v54 = vsel %vm3331_vm8, %v6237_v51, %v6718_v22 }
 0x4bb   : > { %v5883_v41 = vrot.slane %v5761_v0, 2  ;;  %v5953_v4 = vsel %vm2556_vm3, %v5773_v39, %v5889_v26 }
 0x4bc   : > { %v5775_v16 = vpop.permute.xlu0 %5774  ;;  %v6249_v39 = vrot.slane %v6076_v46, %v12987_v38  ;;  %v6081_v26 = vmax.f32 %v11526_v25, %v5953_v4  ;;  %v6273_v25 = vrot.slane %v6079_v43, %v12987_v38 }
 0x4bd   : > { %v5890_v49 = vrot.slane %v5775_v16, 2  ;;  %v5947_v1 = vsel %vm2556_vm3, %v5761_v0, %v5883_v41 }
 0x4be   : > { %v5767_v57 = vpop.permute.xlu1 %5766  ;;  %v6075_v21 = vmax.f32 %v11543_v37, %v5947_v1  ;;  %v6253_v37 = vrot.slane %v6076_v46, %v12988_v15  ;;  %v6293_v22 = vrot.slane %v6081_v26, %v12988_v15 }
 0x4bf   : > { %v5886_v31 = vrot.slane %v5767_v57, 2  ;;  %v5954_v50 = vsel %vm2556_vm3, %v5775_v16, %v5890_v49 }
 0x4c0   : > { %v5779_v40 = vpop.permute.xlu0 %5778  ;;  %v6241_v27 = vrot.slane %v6075_v21, %v12987_v38  ;;  %v6245_v0 = vrot.slane %v6075_v21, %v12988_v15  ;;  %v6082_v41 = vmax.f32 %v11549_v58, %v5954_v50 }
 0x4c1   : > { %v5950_v63 = vsel %vm2556_vm3, %v5767_v57, %v5886_v31  ;;  %v5892_v5 = vrot.slane %v5779_v40, 2  ;;  %v6289_v57 = vrot.slane %v6081_v26, %v12987_v38 }
 0x4c2   : > { %v6078_v32 = vmax.f32 %v11570_v52, %v5950_v63  ;;  %v5783_v51 = vpop.permute.xlu1 %5782  ;;  %v6714_v61 = vsel %vm3333_vm9, %v6241_v27, %v6713_v55  ;;  %v6720_v49 = vsel %vm3333_vm9, %v6245_v0, %v6719_v54  ;;  %v6277_v52 = vrot.slane %v6079_v43, %v12988_v15 }
 0x4c3   : > { %v5894_v16 = vrot.slane %v5783_v51, 2  ;;  %v6715_v9 = vsel %vm3335_vm10, %v6249_v39, %v6714_v61  ;;  %v6721_v31 = vsel %vm3335_vm10, %v6253_v37, %v6720_v49  ;;  %v5956_v1 = vsel %vm2556_vm3, %v5779_v40, %v5892_v5 }
 0x4c4   : > { %v6265_v8 = vrot.slane %v6078_v32, %v12987_v38  ;;  %v6269_v59 = vrot.slane %v6078_v32, %v12988_v15  ;;  %v5777_v46 = vpop.permute.xlu0 %5776  ;;  %6838 = vst [vmem:[#allocation3] sm:$0xfe] %v6715_v9  ;;  %6839 = vst.msk [vmem:[#allocation3 + $0x8] sm:$0xfe] %vm3461_vm11, %v6721_v31  ;;  %v6297_v54 = vrot.slane %v6082_v41, %v12987_v38 }
 0x4c5   : > { %v5891_v58 = vrot.slane %v5777_v46, 2  ;;  %v6301_v50 = vrot.slane %v6082_v41, %v12988_v15  ;;  %v6084_v63 = vmax.f32 %v11584_v62, %v5956_v1  ;;  %v5958_v5 = vsel %vm2556_vm3, %v5783_v51, %v5894_v16 }
 0x4c6   : > { %v6722_v4 = vsel %vm3343_vm5, %v6265_v8, %v6257_v11  ;;  %v6729_v21 = vsel %vm3343_vm5, %v6269_v59, %v6261_v2  ;;  %v5789_v55 = vpop.permute.xlu1 %5788  ;;  %v6086_v51 = vmax.f32 %v11601_v24, %v5958_v5 }
 0x4c7   : > { %v6723_v43 = vsel %vm3325_vm4, %v6273_v25, %v6722_v4  ;;  %v6730_v27 = vsel %vm3325_vm4, %v6277_v52, %v6729_v21  ;;  %v5955_v37 = vsel %vm2556_vm3, %v5777_v46, %v5891_v58  ;;  %v5897_v26 = vrot.slane %v5789_v55, 2 }
 0x4c8   : > { %v6724_v40 = vsel %vm3327_vm6, %v6281_v7, %v6723_v43  ;;  %v6731_v0 = vsel %vm3327_vm6, %v6285_v17, %v6730_v27  ;;  %v5781_v11 = vpop.permute.xlu0 %5780  ;;  %v6083_v32 = vmax.f32 %v11617_v28, %v5955_v37  ;;  %v6313_v28 = vrot.slane %v6084_v63, %v12987_v38 }
 0x4c9   : > { %v6725_v2 = vsel %vm3329_vm7, %v6289_v57, %v6724_v40  ;;  %v6732_v39 = vsel %vm3329_vm7, %v6293_v22, %v6731_v0  ;;  %v5893_v61 = vrot.slane %v5781_v11, 2  ;;  %v5961_v62 = vsel %vm2556_vm3, %v5789_v55, %v5897_v26 }
 0x4ca   : > { %v5791_v49 = vpop.permute.xlu1 %5790  ;;  %v6726_v7 = vsel %vm3331_vm8, %v6297_v54, %v6725_v2  ;;  %v6733_v17 = vsel %vm3331_vm8, %v6301_v50, %v6732_v39  ;;  %v6305_v16 = vrot.slane %v6083_v32, %v12987_v38  ;;  %v6309_v9 = vrot.slane %v6083_v32, %v12988_v15 }
 0x4cb   : > { %v5898_v41 = vrot.slane %v5791_v49, 2  ;;  %v5957_v31 = vsel %vm2556_vm3, %v5781_v11, %v5893_v61  ;;  %v6317_v59 = vrot.slane %v6084_v63, %v12988_v15  ;;  %v12058_v24 = vmax.f32 %v11628_v56, %v5961_v62  ;;  %v12067_v55 = vld [vmem:[#allocation3 + $0x8] sm:$0xfe]  ;;  %v6909_v2 = vld [vmem:[#allocation3] sm:$0xfe] }
 0x4cc   : > { %v5787_v8 = vpop.permute.xlu0 %5786  ;;  %v6085_v46 = vmax.f32 %v11640_v53, %v5957_v31  ;;  %v6727_v52 = vsel %vm3333_vm9, %v6305_v16, %v6726_v7  ;;  %v6734_v1 = vsel %vm3333_vm9, %v6309_v9, %v6733_v17  ;;  %v12076_v40 = vld [vmem:[#allocation3 + $0x8] sm:$0xfc]  ;;  %v6329_v0 = vrot.slane %v6086_v51, %v12987_v38 }
 0x4cd   : > { %v5896_v25 = vrot.slane %v5787_v8, 2  ;;  %v5962_v58 = vsel %vm2556_vm3, %v5791_v49, %v5898_v41  ;;  %v12062_v22 = vsel %vm3335_vm10, %v6313_v28, %v6727_v52  ;;  %v6735_v4 = vsel %vm3335_vm10, %v6317_v59, %v6734_v1  ;;  %v7275_v28 = vld [vmem:[#allocation3] sm:$0xfc] }
 0x4ce   : > { %v5795_v57 = vpop.permute.xlu1 %5794  ;;  %v6321_v21 = vrot.slane %v6085_v46, %v12987_v38  ;;  %v6325_v53 = vrot.slane %v6085_v46, %v12988_v15  ;;  %6840 = vst [vmem:[#allocation3 + $0x10] sm:$0xff] %v12062_v22  ;;  %6841 = vst.msk [vmem:[#allocation3 + $0x18] sm:$0xff] %vm2556_vm3, %v6735_v4  ;;  %v12074_v43 = vmax.f32 %v11652_v35, %v5962_v58  ;;  %v6952_v11 = vrot.slane %v12067_v55, 1  ;;  %v12989_v55 = vld [vmem:[#allocation49_spill] sm:$0xff] }
 0x4cf   : > { %v5960_v56 = vsel %vm2556_vm3, %v5787_v8, %v5896_v25  ;;  %v5900_v54 = vrot.slane %v5795_v57, 2  ;;  %v6333_v63 = vrot.slane %v6086_v51, %v12988_v15  ;;  %v6353_v39 = vrot.slane %v12058_v24, %v12987_v38 }
 0x4d0   : > { %v5785_v50 = vpop.permute.xlu0 %5784  ;;  %6842 = vst [vmem:[#allocation3 + $0x20] sm:$0x1] %v6321_v21  ;;  %6843 = vst.msk [vmem:[#allocation3 + $0x28] sm:$0x1] %vm3466_vm12, %v6325_v53  ;;  %v6088_v37 = vmax.f32 %v11671_v12, %v5960_v56  ;;  %v6357_v32 = vrot.slane %v12058_v24, %v12988_v15  ;;  %v7310_v17 = vrot.slane %v12076_v40, 2  ;;  %v6361_v62 = vrot.slane %v12074_v43, %v12987_v38 }
 0x4d1   : > { %v5895_v27 = vrot.slane %v5785_v50, 2  ;;  %v5964_v26 = vsel %vm2556_vm3, %v5795_v57, %v5900_v54  ;;  %v6949_v51 = vrot.slane %v6909_v2, 1  ;;  %v6950_v12 = vrot.slane %v12062_v22, 1 }
 0x4d2   : > { %v5797_v5 = vpop.permute.xlu1 %5796  ;;  %v12094_v16 = vmax.f32 %v11680_v29, %v5964_v26  ;;  %v6345_v59 = vrot.slane %v6088_v37, %v12987_v38  ;;  %v6349_v46 = vrot.slane %v6088_v37, %v12988_v15  ;;  %v7308_v1 = vrot.slane %v12062_v22, 2 }
 0x4d3   : > { %v5959_v35 = vsel %vm2556_vm3, %v5785_v50, %v5895_v27  ;;  %v5901_v49 = vrot.slane %v5797_v5, 2  ;;  %v7307_v54 = vrot.slane %v7275_v28, 2  ;;  %v6365_v50 = vrot.slane %v12074_v43, %v12988_v15 }
 0x4d4   : > { %v6087_v61 = vmax.f32 %v11692_v6, %v5959_v35  ;;  %v5799_v7 = vpop.permute.xlu0 %5798  ;;  %v6377_v27 = vrot.slane %v12094_v16, %v12987_v38  ;;  %v6381_v40 = vrot.slane %v12094_v16, %v12988_v15  ;;  %v6893_v16 = vld [vmem:[#allocation11 + $0x78] sm:$0xff] }
 0x4d5   : > { %v5902_v41 = vrot.slane %v5799_v7, 2  ;;  %v5965_v6 = vsel %vm2556_vm3, %v5797_v5, %v5901_v49  ;;  %v12101_v52 = vld [vmem:[#allocation3 + $0x18] sm:$0xff]  ;;  %v7309_v43 = vsel %vm3932_vm14, %v7307_v54, %v7308_v1 }
 0x4d6   : > { %v6337_v9 = vrot.slane %v6087_v61, %v12987_v38  ;;  %v6341_v31 = vrot.slane %v6087_v61, %v12988_v15  ;;  %v5793_v8 = vpop.permute.xlu1 %5792  ;;  %v6953_v4 = vrot.slane %v12101_v52, 1  ;;  %v12111_v56 = vmax.f32 %v12989_v55, %v5965_v6 }
 0x4d7   : > { %v5899_v25 = vrot.slane %v5793_v8, 2  ;;  %v5966_v58 = vsel %vm2556_vm3, %v5799_v7, %v5902_v41  ;;  %v6912_v5 = vld [vmem:[#allocation3 + $0x28] sm:$0x1] }
 0x4d8   : > { %v6736_v29 = vsel %vm3325_vm4, %v6337_v9, %v6329_v0  ;;  %v6742_v24 = vsel %vm3325_vm4, %v6341_v31, %v6333_v63  ;;  %v5805_v57 = vpop.permute.xlu0 %5804  ;;  %v6951_v0 = vsel %vm3573_vm13, %v6949_v51, %v6950_v12  ;;  %v12123_v2 = vmax.f32 %v11717_v45, %v5966_v58  ;;  %v7278_v35 = vld [vmem:[#allocation3 + $0x28] sm:$0x3] }
 0x4d9   : > { %v6737_v21 = vsel %vm3327_vm6, %v6345_v59, %v6736_v29  ;;  %v6743_v53 = vsel %vm3327_vm6, %v6349_v46, %v6742_v24  ;;  %v5963_v26 = vsel %vm2556_vm3, %v5793_v8, %v5899_v25  ;;  %v5905_v7 = vrot.slane %v5805_v57, 2 }
 0x4da   : > { %v5803_v63 = vpop.permute.xlu1 %5802  ;;  %v6738_v37 = vsel %vm3329_vm7, %v6353_v39, %v6737_v21  ;;  %v6744_v61 = vsel %vm3329_vm7, %v6357_v32, %v6743_v53  ;;  %v6091_v49 = vmax.f32 %v11723_v36, %v5963_v26  ;;  %v6954_v41 = vsel %vm3573_vm13, %v6952_v11, %v6953_v4  ;;  %v6911_v11 = vld [vmem:[#allocation3 + $0x20] sm:$0x1] }
 0x4db   : > { %v6385_v45 = vrot.slane %v12111_v56, %v12987_v38  ;;  %8205 = vmatprep.mubr.msk.f32.mxu0 %vm2556_vm3, %v6954_v41  ;;  %v7311_v39 = vrot.slane %v12101_v52, 2  ;;  %v5904_v9 = vrot.slane %v5803_v63, 2  ;;  %v6957_v31 = vrot.slane %v6912_v5, 1  ;;  %v7277_v52 = vld [vmem:[#allocation3 + $0x20] sm:$0x3] }
 0x4dc   : > { %v5807_v51 = vpop.permute.xlu0 %5806  ;;  %v6739_v6 = vsel %vm3331_vm8, %v6361_v62, %v6738_v37  ;;  %v6369_v32 = vrot.slane %v6091_v49, %v12987_v38  ;;  %v6373_v36 = vrot.slane %v6091_v49, %v12988_v15  ;;  %7110 = vmatmul.mubr.f32.vlgmr.msra.gmra.mxu0 %v6951_v0  ;;  %v7315_v8 = vrot.slane %v7278_v35, 2  ;;  %v6891_v49 = vld [vmem:[#allocation11 + $0x68] sm:$0xff] }
 0x4dd   : > { %v6745_v59 = vsel %vm3331_vm8, %v6365_v50, %v6744_v61  ;;  %v7312_v46 = vsel %vm3932_vm14, %v7310_v17, %v7311_v39  ;;  %v6958_v25 = vsel %vm3573_vm13, %v6953_v4, %v6957_v31  ;;  %v5906_v29 = vrot.slane %v5807_v51, 2  ;;  %7171 = vmatpush1.msra.mxu0 %v6893_v16 }
 0x4de   : > { %v5801_v28 = vpop.permute.xlu1 %5800  ;;  %v6740_v24 = vsel %vm3333_vm9, %v6369_v32, %v6739_v6  ;;  %v6746_v62 = vsel %vm3333_vm9, %v6373_v36, %v6745_v59  ;;  %v5969_v58 = vsel %vm2556_vm3, %v5805_v57, %v5905_v7  ;;  %8221 = vmatprep.mubr.msk.f32.mxu1 %vm2556_vm3, %v7312_v46  ;;  %v5968_v21 = vsel %vm2556_vm3, %v5803_v63, %v5904_v9 }
 0x4df   : > { %v6393_v55 = vrot.slane %v12123_v2, %v12987_v38  ;;  %v6741_v17 = vsel %vm3335_vm10, %v6377_v27, %v6740_v24  ;;  %v6747_v4 = vsel %vm3335_vm10, %v6381_v40, %v6746_v62  ;;  %7468 = vmatmul.mubr.f32.vlgmr.msra.gmra.mxu1 %v7309_v43  ;;  %8206 = vmatprep.mubr.msk.f32.mxu0 %vm2556_vm3, %v6958_v25  ;;  %v6955_v54 = vrot.slane %v6911_v11, 1  ;;  %v6892_v27 = vld [vmem:[#allocation11 + $0x70] sm:$0xff]  ;;  %v6889_v11 = vld [vmem:[#allocation11 + $0x58] sm:$0xff] }
 0x4e0   : > { %v5811_v53 = vpop.permute.xlu0 %5810  ;;  %v6397_v50 = vrot.slane %v12123_v2, %v12988_v15  ;;  %6844 = vst [vmem:[#allocation3 + $0x30] sm:$0xfe] %v6741_v17  ;;  %6845 = vst.msk [vmem:[#allocation3 + $0x38] sm:$0xfe] %vm3461_vm11, %v6747_v4  ;;  %v7316_v57 = vsel %vm3932_vm14, %v7311_v39, %v7315_v8  ;;  %v7313_v0 = vrot.slane %v7277_v52, 2  ;;  %v5903_v63 = vrot.slane %v5801_v28, 2  ;;  %7172 = vmatprep.subr.mxu0 %v12876_v42 }
 0x4e1   : > { %v6097_v40 = vmax.f32 %v11739_v60, %v5969_v58  ;;  %v6096_v37 = vmax.f32 %v11753_v47, %v5968_v21  ;;  %8222 = vmatprep.mubr.msk.f32.mxu1 %vm2556_vm3, %v7316_v57  ;;  %v5970_v26 = vsel %vm2556_vm3, %v5807_v51, %v5906_v29  ;;  %v6956_v2 = vsel %vm3573_vm13, %v6950_v12, %v6955_v54  ;;  %v6890_v39 = vld [vmem:[#allocation11 + $0x60] sm:$0xff]  ;;  %v6888_v58 = vld [vmem:[#allocation11 + $0x50] sm:$0xff] }
 0x4e2   : > { %v5815_v5 = vpop.permute.xlu1 %5814  ;;  %v6389_v43 = vrot.slane %v12111_v56, %v12988_v15  ;;  %7115 = vmatmul.mubr.f32.gmra.mxu0 %v6956_v2  ;;  %v7314_v35 = vsel %vm3932_vm14, %v7308_v1, %v7313_v0  ;;  %v5967_v60 = vsel %vm2556_vm3, %v5801_v28, %v5903_v63  ;;  %v5908_v61 = vrot.slane %v5811_v53, 2  ;;  %v6887_v63 = vld [vmem:[#allocation11 + $0x48] sm:$0xff] }
 0x4e3   : > { %7473 = vmatmul.mubr.f32.gmra.mxu1 %v7314_v35  ;;  %v6095_v7 = vmax.f32 %v11768_v48, %v5967_v60  ;;  %v5910_v41 = vrot.slane %v5815_v5, 2  ;;  %7173 = vmatpush1.msra.mxu0 %v6892_v27  ;;  %v6748_v12 = vsel %vm3343_vm5, %v6393_v55, %v6385_v45  ;;  %v6098_v16 = vmax.f32 %v11756_v19, %v5970_v26  ;;  %v6886_v35 = vld [vmem:[#allocation11 + $0x40] sm:$0xff] }
 0x4e4   : > { %v5809_v47 = vpop.permute.xlu0 %5808  ;;  %v6755_v56 = vsel %vm3343_vm5, %v6397_v50, %v6389_v43  ;;  %v5972_v22 = vsel %vm2556_vm3, %v5811_v53, %v5908_v61  ;;  %7174 = vmatprep.subr.mxu0 %v12876_v42  ;;  %v6417_v9 = vrot.slane %v6097_v40, %v12987_v38  ;;  %v6409_v31 = vrot.slane %v6096_v37, %v12987_v38 }
 0x4e5   : > { %v5907_v51 = vrot.slane %v5809_v47, 2  ;;  %v6401_v48 = vrot.slane %v6095_v7, %v12987_v38  ;;  %v6405_v6 = vrot.slane %v6095_v7, %v12988_v15  ;;  %7175 = vmatpush1.msra.mxu0 %v6891_v49  ;;  %v6413_v45 = vrot.slane %v6096_v37, %v12988_v15 }
 0x4e6   : > { %v5821_v1 = vpop.permute.xlu1 %5820  ;;  %v6100_v32 = vmax.f32 %v11777_v14, %v5972_v22  ;;  %7176 = vmatprep.subr.mxu0 %v12876_v42  ;;  %v6421_v28 = vrot.slane %v6097_v40, %v12988_v15  ;;  %v5974_v25 = vsel %vm2556_vm3, %v5815_v5, %v5910_v41  ;;  %v6425_v29 = vrot.slane %v6098_v16, %v12987_v38 }
 0x4e7   : > { %v5971_v19 = vsel %vm2556_vm3, %v5809_v47, %v5907_v51  ;;  %v5913_v36 = vrot.slane %v5821_v1, 2  ;;  %v6749_v59 = vsel %vm3325_vm4, %v6401_v48, %v6748_v12  ;;  %v6756_v46 = vsel %vm3325_vm4, %v6405_v6, %v6755_v56  ;;  %7177 = vmatpush1.msra.mxu0 %v6890_v39  ;;  %v6885_v56 = vld [vmem:[#allocation11 + $0x38] sm:$0xff]  ;;  %v6884_v48 = vld [vmem:[#allocation11 + $0x30] sm:$0xff] }
 0x4e8   : > { %v5813_v8 = vpop.permute.xlu0 %5812  ;;  %v6429_v14 = vrot.slane %v6098_v16, %v12988_v15  ;;  %v6750_v52 = vsel %vm3327_vm6, %v6409_v31, %v6749_v59  ;;  %v6757_v24 = vsel %vm3327_vm6, %v6413_v45, %v6756_v46  ;;  %7178 = vmatprep.subr.mxu0 %v12876_v42  ;;  %v6099_v55 = vmax.f32 %v11790_v18, %v5971_v19 }
 0x4e9   : > { %v6751_v21 = vsel %vm3329_vm7, %v6417_v9, %v6750_v52  ;;  %v6758_v53 = vsel %vm3329_vm7, %v6421_v28, %v6757_v24  ;;  %v5977_v17 = vsel %vm2556_vm3, %v5821_v1, %v5913_v36  ;;  %7179 = vmatpush1.msra.mxu0 %v6889_v11  ;;  %v6441_v4 = vrot.slane %v6100_v32, %v12987_v38  ;;  %v12229_v1 = vld [vmem:[#allocation3 + $0x38] sm:$0xfe]  ;;  %v6913_v36 = vld [vmem:[#allocation3 + $0x30] sm:$0xfe] }
 0x4ea   : > { %v5823_v62 = vpop.permute.xlu1 %5822  ;;  %v6445_v54 = vrot.slane %v6100_v32, %v12988_v15  ;;  %v12201_v50 = vmax.f32 %v11785_v44, %v5974_v25  ;;  %v5909_v57 = vrot.slane %v5813_v8, 2  ;;  %7180 = vmatprep.subr.mxu0 %v12876_v42  ;;  %v6433_v5 = vrot.slane %v6099_v55, %v12987_v38  ;;  %v6883_v25 = vld [vmem:[#allocation11 + $0x28] sm:$0xff] }
 0x4eb   : > { %v6437_v27 = vrot.slane %v6099_v55, %v12988_v15  ;;  %v5914_v18 = vrot.slane %v5823_v62, 2  ;;  %7181 = vmatpush1.msra.mxu0 %v6888_v58  ;;  %v6752_v37 = vsel %vm3331_vm8, %v6425_v29, %v6751_v21  ;;  %v6759_v26 = vsel %vm3331_vm8, %v6429_v14, %v6758_v53 }
 0x4ec   : > { %v5819_v0 = vpop.permute.xlu0 %5818  ;;  %v12209_v2 = vmax.f32 %v11798_v34, %v5977_v17  ;;  %v5973_v44 = vsel %vm2556_vm3, %v5813_v8, %v5909_v57  ;;  %7182 = vmatprep.subr.mxu0 %v12876_v42  ;;  %v6753_v60 = vsel %vm3333_vm9, %v6433_v5, %v6752_v37  ;;  %v6461_v6 = vrot.slane %v12201_v50, %v12988_v15 }
 0x4ed   : > { %v5912_v40 = vrot.slane %v5819_v0, 2  ;;  %v6760_v61 = vsel %vm3333_vm9, %v6437_v27, %v6759_v26  ;;  %v6101_v47 = vmax.f32 %v11804_v10, %v5973_v44  ;;  %v5978_v49 = vsel %vm2556_vm3, %v5823_v62, %v5914_v18  ;;  %7183 = vmatpush1.msra.mxu0 %v6887_v63  ;;  %v12256_v62 = vld [vmem:[#allocation3 + $0x30] sm:$0xfc]  ;;  %v6881_v18 = vld [vmem:[#allocation11 + $0x18] sm:$0xff] }
 0x4ee   : > { %v5827_v43 = vpop.permute.xlu1 %5826  ;;  %v12218_v7 = vsel %vm3335_vm10, %v6441_v4, %v6753_v60  ;;  %v6761_v34 = vsel %vm3335_vm10, %v6445_v54, %v6760_v61  ;;  %v12222_v41 = vmax.f32 %v11811_v3, %v5978_v49  ;;  %7184 = vmatprep.subr.mxu0 %v12876_v42  ;;  %v6457_v3 = vrot.slane %v12201_v50, %v12987_v38  ;;  %v6882_v4 = vld [vmem:[#allocation11 + $0x20] sm:$0xff] }
 0x4ef   : > { %v5976_v51 = vsel %vm2556_vm3, %v5819_v0, %v5912_v40  ;;  %6847 = vst.msk [vmem:[#allocation3 + $0x48] sm:$0xff] %vm2556_vm3, %v6761_v34  ;;  %v6449_v10 = vrot.slane %v6101_v47, %v12987_v38  ;;  %v6453_v16 = vrot.slane %v6101_v47, %v12988_v15  ;;  %v5916_v22 = vrot.slane %v5827_v43, 2  ;;  %7185 = vmatpush1.msra.mxu0 %v6886_v35  ;;  %v6880_v47 = vld [vmem:[#allocation11 + $0x10] sm:$0xff] }
 0x4f0   : > { %v5817_v12 = vpop.permute.xlu0 %5816  ;;  %v6104_v39 = vmax.f32 %v11822_v33, %v5976_v51  ;;  %7186 = vmatprep.subr.mxu0 %v12876_v42  ;;  %v6481_v45 = vrot.slane %v12209_v2, %v12987_v38  ;;  %v6485_v32 = vrot.slane %v12209_v2, %v12988_v15  ;;  %v12243_v33 = vld [vmem:[#allocation3 + $0x38] sm:$0xfc]  ;;  %v6489_v8 = vrot.slane %v12222_v41, %v12987_v38 }
 0x4f1   : > { %v5911_v9 = vrot.slane %v5817_v12, 2  ;;  %6848 = vst [vmem:[#allocation3 + $0x50] sm:$0x1] %v6449_v10  ;;  %6849 = vst.msk [vmem:[#allocation3 + $0x58] sm:$0x1] %vm3466_vm12, %v6453_v16  ;;  %v5980_v19 = vsel %vm2556_vm3, %v5827_v43, %v5916_v22  ;;  %7187 = vmatpush1.msra.mxu0 %v6885_v56  ;;  %v6962_v46 = vrot.slane %v12229_v1, 1  ;;  %v6493_v29 = vrot.slane %v12222_v41, %v12988_v15 }
 0x4f2   : > { %v5829_v31 = vpop.permute.xlu1 %5828  ;;  %7188 = vmatprep.subr.mxu0 %v12876_v42  ;;  %v12253_v14 = vmax.f32 %v11827_v20, %v5980_v19  ;;  %v6473_v58 = vrot.slane %v6104_v39, %v12987_v38  ;;  %v6477_v21 = vrot.slane %v6104_v39, %v12988_v15  ;;  %v7320_v55 = vrot.slane %v12243_v33, 2  ;;  %v12990_v56 = vld [vmem:[#allocation50_spill] sm:$0xff]  ;;  %v12991_v33 = vld [vmem:[#allocation51_spill] sm:$0xff] }
 0x4f3   : > { %v5975_v11 = vsel %vm2556_vm3, %v5817_v12, %v5911_v9  ;;  %v5917_v28 = vrot.slane %v5829_v31, 2  ;;  %7189 = vmatpush1.msra.mxu0 %v6884_v48  ;;  %v6959_v17 = vrot.slane %v6913_v36, 1  ;;  %v6960_v5 = vrot.slane %v12218_v7, 1 }
 0x4f4   : > { %v5831_v59 = vpop.permute.xlu0 %5830  ;;  %v6103_v52 = vmax.f32 %v11831_v30, %v5975_v11  ;;  %7190 = vmatprep.subr.mxu0 %v12876_v42  ;;  %v7317_v27 = vrot.slane %v12256_v62, 2  ;;  %v6505_v40 = vrot.slane %v12253_v14, %v12987_v38  ;;  %v7318_v60 = vrot.slane %v12218_v7, 2 }
 0x4f5   : > { %v5918_v24 = vrot.slane %v5831_v59, 2  ;;  %7191 = vmatpush1.msra.mxu0 %v6883_v25  ;;  %v5981_v57 = vsel %vm2556_vm3, %v5829_v31, %v5917_v28 }
 0x4f6   : > { %v5825_v53 = vpop.permute.xlu1 %5824  ;;  %v6465_v20 = vrot.slane %v6103_v52, %v12987_v38  ;;  %v6469_v54 = vrot.slane %v6103_v52, %v12988_v15  ;;  %7192 = vmatprep.subr.mxu0 %v12876_v42  ;;  %v12281_v35 = vld [vmem:[#allocation3 + $0x48] sm:$0xff]  ;;  %v12289_v10 = vmax.f32 %v12990_v56, %v5981_v57 }
 0x4f7   : > { %v5982_v30 = vsel %vm2556_vm3, %v5831_v59, %v5918_v24  ;;  %v5915_v50 = vrot.slane %v5825_v53, 2  ;;  %7193 = vmatpush1.msra.mxu0 %v6882_v4  ;;  %v12994_v56 = vld [vmem:[#allocation54_spill] sm:$0xff] }
 0x4f8   : > { %v12267_v0 = vmax.f32 %v11841_v23, %v5982_v30  ;;  %v5837_v63 = vpop.permute.xlu0 %5836  ;;  %v6762_v37 = vsel %vm3325_vm4, %v6465_v20, %v6457_v3  ;;  %v6768_v26 = vsel %vm3325_vm4, %v6469_v54, %v6461_v6  ;;  %v6509_v23 = vrot.slane %v12253_v14, %v12988_v15  ;;  %7194 = vmatprep.subr.mxu0 %v12876_v42  ;;  %v6916_v12 = vld [vmem:[#allocation3 + $0x58] sm:$0x1]  ;;  %v6915_v52 = vld [vmem:[#allocation3 + $0x50] sm:$0x1] }
 0x4f9   : > { %v5979_v2 = vsel %vm2556_vm3, %v5825_v53, %v5915_v50  ;;  %v6763_v44 = vsel %vm3327_vm6, %v6473_v58, %v6762_v37  ;;  %v6769_v43 = vsel %vm3327_vm6, %v6477_v21, %v6768_v26  ;;  %v5921_v51 = vrot.slane %v5837_v63, 2  ;;  %7195 = vmatpush1.msra.mxu0 %v6881_v18  ;;  %v7282_v11 = vld [vmem:[#allocation3 + $0x58] sm:$0x3] }
 0x4fa   : > { %v5835_v61 = vpop.permute.xlu1 %5834  ;;  %v6764_v49 = vsel %vm3329_vm7, %v6481_v45, %v6763_v44  ;;  %v6770_v34 = vsel %vm3329_vm7, %v6485_v32, %v6769_v43  ;;  %v6107_v41 = vmax.f32 %v11845_v13, %v5979_v2  ;;  %v6521_v16 = vrot.slane %v12267_v0, %v12987_v38  ;;  %7196 = vmatprep.subr.mxu0 %v12876_v42  ;;  %v6879_v13 = vld [vmem:[#allocation11 + $0x8] sm:$0xff]  ;;  %v12992_v2 = vld [vmem:[#allocation52_spill] sm:$0xff] }
 0x4fb   : > { %v6525_v22 = vrot.slane %v12267_v0, %v12988_v15  ;;  %v6961_v3 = vsel %vm3573_vm13, %v6959_v17, %v6960_v5  ;;  %v6765_v9 = vsel %vm3331_vm8, %v6489_v8, %v6764_v49  ;;  %v6963_v6 = vrot.slane %v12281_v35, 1  ;;  %7197 = vmatpush1.msra.mxu0 %v6880_v47  ;;  %v6878_v17 = vld [vmem:[#allocation11] sm:$0xff]  ;;  %v6908_v47 = vld [vmem:[#allocation11 + $0xf0] sm:$0xff] }
 0x4fc   : > { %v5839_v39 = vpop.permute.xlu0 %5838  ;;  %v6497_v31 = vrot.slane %v6107_v41, %v12987_v38  ;;  %v6501_v48 = vrot.slane %v6107_v41, %v12988_v15  ;;  %v6771_v45 = vsel %vm3331_vm8, %v6493_v29, %v6770_v34  ;;  %v7321_v32 = vrot.slane %v12281_v35, 2  ;;  %7198 = vmatprep.subr.mxu0 %v12876_v42  ;;  %v7281_v29 = vld [vmem:[#allocation3 + $0x50] sm:$0x3]  ;;  %v12993_v44 = vld [vmem:[#allocation53_spill] sm:$0xff] }
 0x4fd   : > { %v5920_v19 = vrot.slane %v5835_v61, 2  ;;  %v6967_v36 = vrot.slane %v6916_v12, 1  ;;  %v5985_v25 = vsel %vm2556_vm3, %v5837_v63, %v5921_v51  ;;  %v7319_v14 = vsel %vm3932_vm14, %v7317_v27, %v7318_v60  ;;  %7199 = vmatpush1.msra.mxu0 %v6879_v13 }
 0x4fe   : > { %v5833_v28 = vpop.permute.xlu1 %5832  ;;  %v6766_v59 = vsel %vm3333_vm9, %v6497_v31, %v6765_v9  ;;  %v6772_v8 = vsel %vm3333_vm9, %v6501_v48, %v6771_v45  ;;  %v6964_v58 = vsel %vm3573_vm13, %v6962_v46, %v6963_v6  ;;  %v7322_v21 = vsel %vm3932_vm14, %v7320_v55, %v7321_v32  ;;  %7200 = vmatprep.subr.mxu0 %v12876_v42  ;;  %v12995_v31 = vld [vmem:[#allocation55_spill] sm:$0xff] }
 0x4ff   : > { %v6767_v24 = vsel %vm3335_vm10, %v6505_v40, %v6766_v59  ;;  %v6773_v62 = vsel %vm3335_vm10, %v6509_v23, %v6772_v8  ;;  %8207 = vmatprep.mubr.msk.f32.mxu0 %vm2556_vm3, %v6964_v58  ;;  %8223 = vmatprep.mubr.msk.f32.mxu1 %vm2556_vm3, %v7322_v21  ;;  %v5984_v4 = vsel %vm2556_vm3, %v5835_v61, %v5920_v19  ;;  %v7325_v46 = vrot.slane %v7282_v11, 2  ;;  %v6906_v19 = vld [vmem:[#allocation11 + $0xe0] sm:$0xff]  ;;  %v6905_v58 = vld [vmem:[#allocation11 + $0xd8] sm:$0xff] }
 0x500   : > { %v5843_v53 = vpop.permute.xlu0 %5842  ;;  %6850 = vst [vmem:[#allocation3 + $0x60] sm:$0xfe] %v6767_v24  ;;  %6851 = vst.msk [vmem:[#allocation3 + $0x68] sm:$0xfe] %vm3461_vm11, %v6773_v62  ;;  %v6968_v1 = vsel %vm3573_vm13, %v6963_v6, %v6967_v36  ;;  %v5922_v20 = vrot.slane %v5839_v39, 2  ;;  %v12327_v54 = vmax.f32 %v12991_v33, %v5985_v25  ;;  %7120 = vmatmul.mubr.f32.gmra.mxu0 %v6961_v3  ;;  %7478 = vmatmul.mubr.f32.gmra.mxu1 %v7319_v14  ;;  %v12996_v14 = vld [vmem:[#allocation56_spill] sm:$0xff] }
 0x501   : > { %v6965_v55 = vrot.slane %v6915_v52, 1  ;;  %v7323_v30 = vrot.slane %v7281_v29, 2  ;;  %v5919_v50 = vrot.slane %v5833_v28, 2  ;;  %8208 = vmatprep.mubr.msk.f32.mxu0 %vm2556_vm3, %v6968_v1  ;;  %v7326_v63 = vsel %vm3932_vm14, %v7321_v32, %v7325_v46  ;;  %7201 = vmatpush1.msra.mxu0 %v6878_v17  ;;  %v12997_v29 = vld [vmem:[#allocation57_spill] sm:$0xff] }
 0x502   : > { %v5847_v57 = vpop.permute.xlu1 %5846  ;;  %v5986_v27 = vsel %vm2556_vm3, %v5839_v39, %v5922_v20  ;;  %v5924_v18 = vrot.slane %v5843_v53, 2  ;;  %v6513_v37 = vrot.slane %v12289_v10, %v12987_v38  ;;  %v6517_v26 = vrot.slane %v12289_v10, %v12988_v15  ;;  %8224 = vmatprep.mubr.msk.f32.mxu1 %vm2556_vm3, %v7326_v63  ;;  %7204 = vmatprep.subr.mxu0 %v12876_v42  ;;  %v6907_v39 = vld [vmem:[#allocation11 + $0xe8] sm:$0xff] }
 0x503   : > { %v5926_v40 = vrot.slane %v5847_v57, 2  ;;  %v6112_v23 = vmax.f32 %v12992_v2, %v5984_v4  ;;  %v6114_v43 = vmax.f32 %v12993_v44, %v5986_v27  ;;  %v6966_v49 = vsel %vm3573_vm13, %v6960_v5, %v6965_v55  ;;  %7205 = vmatpush2.msra.mxu0 %v6908_v47  ;;  %v6904_v55 = vld [vmem:[#allocation11 + $0xd0] sm:$0xff]  ;;  %v6903_v2 = vld [vmem:[#allocation11 + $0xc8] sm:$0xff] }
 0x504   : > { %v5841_v61 = vpop.permute.xlu0 %5840  ;;  %v7324_v34 = vsel %vm3932_vm14, %v7318_v60, %v7323_v30  ;;  %v5983_v41 = vsel %vm2556_vm3, %v5833_v28, %v5919_v50  ;;  %v5988_v51 = vsel %vm2556_vm3, %v5843_v53, %v5924_v18  ;;  %v6774_v12 = vsel %vm3343_vm5, %v6521_v16, %v6513_v37  ;;  %7125 = vmatmul.mubr.f32.gmra.mxu0 %v6966_v49  ;;  %v12999_v49 = vld [vmem:[#allocation32_spill] sm:$0xff] }
 0x505   : > { %v6781_v5 = vsel %vm3343_vm5, %v6525_v22, %v6517_v26  ;;  %7483 = vmatmul.mubr.f32.gmra.mxu1 %v7324_v34  ;;  %v6111_v60 = vmax.f32 %v12994_v56, %v5983_v41  ;;  %v5923_v10 = vrot.slane %v5841_v61, 2  ;;  %v6545_v13 = vrot.slane %v12327_v54, %v12987_v38  ;;  %7206 = vmatprep.subr.mxu0 %v12876_v42 }
 0x506   : > { %v5853_v3 = vpop.permute.xlu1 %5852  ;;  %v6549_v9 = vrot.slane %v12327_v54, %v12988_v15  ;;  %v6116_v16 = vmax.f32 %v12995_v31, %v5988_v51  ;;  %v5990_v48 = vsel %vm2556_vm3, %v5847_v57, %v5926_v40  ;;  %v6537_v0 = vrot.slane %v6112_v23, %v12987_v38  ;;  %7207 = vmatpush2.msra.mxu0 %v6907_v39 }
 0x507   : > { %v6529_v22 = vrot.slane %v6111_v60, %v12987_v38  ;;  %v6533_v6 = vrot.slane %v6111_v60, %v12988_v15  ;;  %v5987_v45 = vsel %vm2556_vm3, %v5841_v61, %v5923_v10  ;;  %v6541_v36 = vrot.slane %v6112_v23, %v12988_v15  ;;  %7208 = vmatprep.subr.mxu0 %v12876_v42  ;;  %v13000_v10 = vld [vmem:[#allocation47_spill] sm:$0xff] }
 0x508   : > { %v5845_v32 = vpop.permute.xlu0 %5844  ;;  %v6553_v11 = vrot.slane %v6114_v43, %v12987_v38  ;;  %v6557_v28 = vrot.slane %v6114_v43, %v12988_v15  ;;  %v5929_v59 = vrot.slane %v5853_v3, 2  ;;  %v12374_v52 = vmax.f32 %v12996_v14, %v5990_v48  ;;  %7209 = vmatpush2.msra.mxu0 %v6906_v19  ;;  %v12998_v43 = vld [vmem:[#allocation38_spill] sm:$0xff]  ;;  %v6901_v48 = vld [vmem:[#allocation11 + $0xb8] sm:$0xff] }
 0x509   : > { %v6775_v8 = vsel %vm3325_vm4, %v6529_v22, %v6774_v12  ;;  %v6782_v25 = vsel %vm3325_vm4, %v6533_v6, %v6781_v5  ;;  %v6115_v24 = vmax.f32 %v12997_v29, %v5987_v45  ;;  %v6569_v17 = vrot.slane %v6116_v16, %v12987_v38  ;;  %7210 = vmatprep.subr.mxu0 %v12876_v42  ;;  %v6902_v5 = vld [vmem:[#allocation11 + $0xc0] sm:$0xff]  ;;  %v12416_v6 = vld [vmem:[#allocation3 + $0x68] sm:$0xfc] }
 0x50a   : > { %v5855_v62 = vpop.permute.xlu1 %5854  ;;  %v6776_v21 = vsel %vm3327_vm6, %v6537_v0, %v6775_v8  ;;  %v6783_v53 = vsel %vm3327_vm6, %v6541_v36, %v6782_v25  ;;  %v5925_v4 = vrot.slane %v5845_v32, 2  ;;  %v6573_v30 = vrot.slane %v6116_v16, %v12988_v15  ;;  %7211 = vmatpush2.msra.mxu0 %v6905_v58  ;;  %v6918_v16 = vld [vmem:[#allocation3 + $0x68] sm:$0xfe]  ;;  %v6917_v45 = vld [vmem:[#allocation3 + $0x60] sm:$0xfe]  ;;  %v13001_v8 = vld [vmem:[#allocation59_spill] sm:$0xff] }
 0x50b   : > { %v6777_v1 = vsel %vm3329_vm7, %v6545_v13, %v6776_v21  ;;  %v6784_v46 = vsel %vm3329_vm7, %v6549_v9, %v6783_v53  ;;  %v6561_v20 = vrot.slane %v6115_v24, %v12987_v38  ;;  %v6565_v33 = vrot.slane %v6115_v24, %v12988_v15  ;;  %7212 = vmatprep.subr.mxu0 %v12876_v42  ;;  %v13002_v14 = vld [vmem:[#allocation60_spill] sm:$0xff]  ;;  %v13003_v24 = vld [vmem:[#allocation61_spill] sm:$0xff] }
 0x50c   : > { %v5851_v54 = vpop.permute.xlu0 %5850  ;;  %v6778_v50 = vsel %vm3331_vm8, %v6553_v11, %v6777_v1  ;;  %v6785_v57 = vsel %vm3331_vm8, %v6557_v28, %v6784_v46  ;;  %v5993_v63 = vsel %vm2556_vm3, %v5853_v3, %v5929_v59  ;;  %v5989_v40 = vsel %vm2556_vm3, %v5845_v32, %v5925_v4  ;;  %7213 = vmatpush2.msra.mxu0 %v6904_v55  ;;  %v6900_v59 = vld [vmem:[#allocation11 + $0xb0] sm:$0xff]  ;;  %v6899_v1 = vld [vmem:[#allocation11 + $0xa8] sm:$0xff] }
 0x50d   : > { %v6779_v27 = vsel %vm3333_vm9, %v6561_v20, %v6778_v50  ;;  %v6786_v18 = vsel %vm3333_vm9, %v6565_v33, %v6785_v57  ;;  %v5930_v37 = vrot.slane %v5855_v62, 2  ;;  %v6117_v61 = vmax.f32 %v12998_v43, %v5989_v40  ;;  %7214 = vmatprep.subr.mxu0 %v12876_v42  ;;  %v7283_v43 = vld [vmem:[#allocation3 + $0x60] sm:$0xfc] }
 0x50e   : > { %v5861_v26 = vpop.permute.xlu1 %5860  ;;  %v12395_v23 = vsel %vm3335_vm10, %v6569_v17, %v6779_v27  ;;  %v6787_v44 = vsel %vm3335_vm10, %v6573_v30, %v6786_v18  ;;  %v5928_v47 = vrot.slane %v5851_v54, 2  ;;  %v12401_v34 = vmax.f32 %v12999_v49, %v5993_v63  ;;  %7215 = vmatpush2.msra.mxu0 %v6903_v2  ;;  %v6898_v18 = vld [vmem:[#allocation11 + $0xa0] sm:$0xff] }
 0x50f   : > { %6853 = vst.msk [vmem:[#allocation3 + $0x78] sm:$0xff] %vm2556_vm3, %v6787_v44  ;;  %v5994_v41 = vsel %vm2556_vm3, %v5855_v62, %v5930_v37  ;;  %v5933_v51 = vrot.slane %v5861_v26, 2  ;;  %v6577_v56 = vrot.slane %v6117_v61, %v12987_v38  ;;  %v6581_v60 = vrot.slane %v6117_v61, %v12988_v15  ;;  %7216 = vmatprep.subr.mxu0 %v12876_v42  ;;  %v13005_v61 = vld [vmem:[#allocation62_spill] sm:$0xff]  ;;  %v13006_v49 = vld [vmem:[#allocation64_spill] sm:$0xff] }
 0x510   : > { %v5849_v12 = vpop.permute.xlu0 %5848  ;;  %v12408_v3 = vmax.f32 %v13000_v10, %v5994_v41  ;;  %v5992_v39 = vsel %vm2556_vm3, %v5851_v54, %v5928_v47  ;;  %v6585_v0 = vrot.slane %v12374_v52, %v12987_v38  ;;  %7217 = vmatpush2.msra.mxu0 %v6902_v5  ;;  %v6589_v32 = vrot.slane %v12374_v52, %v12988_v15 }
 0x511   : > { %v5997_v13 = vsel %vm2556_vm3, %v5861_v26, %v5933_v51  ;;  %v5927_v9 = vrot.slane %v5849_v12, 2  ;;  %6854 = vst [vmem:[#allocation3 + $0x80] sm:$0x1] %v6577_v56  ;;  %6855 = vst.msk [vmem:[#allocation3 + $0x88] sm:$0x1] %vm3466_vm12, %v6581_v60  ;;  %v6609_v19 = vrot.slane %v12401_v34, %v12987_v38  ;;  %v6613_v36 = vrot.slane %v12401_v34, %v12988_v15  ;;  %v13004_v26 = vld [vmem:[#allocation63_spill] sm:$0xff] }
 0x512   : > { %v5867_v31 = vpop.permute.xlu1 %5866  ;;  %7218 = vmatprep.subr.mxu0 %v12876_v42  ;;  %v12427_v25 = vmax.f32 %v13001_v8, %v5992_v39  ;;  %v12430_v29 = vmax.f32 %v13002_v14, %v5997_v13  ;;  %v6972_v62 = vrot.slane %v6918_v16, 1  ;;  %v6617_v58 = vrot.slane %v12408_v3, %v12987_v38 }
 0x513   : > { %v5936_v22 = vrot.slane %v5867_v31, 2  ;;  %v5991_v11 = vsel %vm2556_vm3, %v5849_v12, %v5927_v9  ;;  %7219 = vmatpush2.msra.mxu0 %v6901_v48  ;;  %v7330_v17 = vrot.slane %v12416_v6, 2  ;;  %v6969_v4 = vrot.slane %v6917_v45, 1 }
 0x514   : > { %v5863_v28 = vpop.permute.xlu0 %5862  ;;  %v6119_v52 = vmax.f32 %v13003_v24, %v5991_v11  ;;  %7220 = vmatprep.subr.mxu0 %v12876_v42  ;;  %v6621_v46 = vrot.slane %v12408_v3, %v12988_v15  ;;  %v6970_v27 = vrot.slane %v12395_v23, 1  ;;  %v6601_v40 = vrot.slane %v12427_v25, %v12987_v38  ;;  %v6897_v24 = vld [vmem:[#allocation11 + $0x98] sm:$0xff] }
 0x515   : > { %v5934_v21 = vrot.slane %v5863_v28, 2  ;;  %v6000_v33 = vsel %vm2556_vm3, %v5867_v31, %v5936_v22  ;;  %7221 = vmatpush2.msra.mxu0 %v6900_v59  ;;  %v6641_v37 = vrot.slane %v12430_v29, %v12987_v38  ;;  %v7328_v12 = vrot.slane %v12395_v23, 2 }
 0x516   : > { %v5865_v53 = vpop.permute.xlu1 %5864  ;;  %v6593_v20 = vrot.slane %v6119_v52, %v12987_v38  ;;  %v12441_v55 = vld [vmem:[#allocation3 + $0x78] sm:$0xff]  ;;  %v6597_v30 = vrot.slane %v6119_v52, %v12988_v15  ;;  %7222 = vmatprep.subr.mxu0 %v12876_v42  ;;  %v12455_v47 = vmax.f32 %v13005_v61, %v6000_v33  ;;  %v6971_v31 = vsel %vm3573_vm13, %v6969_v4, %v6970_v27 }
 0x517   : > { %v5935_v54 = vrot.slane %v5865_v53, 2  ;;  %v5998_v50 = vsel %vm2556_vm3, %v5863_v28, %v5934_v21  ;;  %v6973_v63 = vrot.slane %v12441_v55, 1  ;;  %7223 = vmatpush2.msra.mxu0 %v6899_v1  ;;  %v7331_v39 = vrot.slane %v12441_v55, 2  ;;  %v13007_v1 = vld [vmem:[#allocation65_spill] sm:$0xff] }
 0x518   : > { %v5869_v57 = vpop.permute.xlu0 %5868  ;;  %v6126_v2 = vmax.f32 %v13004_v26, %v5998_v50  ;;  %7224 = vmatprep.subr.mxu0 %v12876_v42  ;;  %v6788_v56 = vsel %vm3325_vm4, %v6593_v20, %v6585_v0  ;;  %v6794_v13 = vsel %vm3325_vm4, %v6597_v30, %v6589_v32  ;;  %v7327_v16 = vrot.slane %v7283_v43, 2  ;;  %v6920_v32 = vld [vmem:[#allocation3 + $0x88] sm:$0x1]  ;;  %v6896_v50 = vld [vmem:[#allocation11 + $0x90] sm:$0xff] }
 0x519   : > { %v5999_v44 = vsel %vm2556_vm3, %v5865_v53, %v5935_v54  ;;  %v5937_v51 = vrot.slane %v5869_v57, 2  ;;  %v6974_v10 = vsel %vm3573_vm13, %v6972_v62, %v6973_v63  ;;  %7225 = vmatpush2.msra.mxu0 %v6898_v18  ;;  %v6605_v0 = vrot.slane %v12427_v25, %v12988_v15  ;;  %v7286_v25 = vld [vmem:[#allocation3 + $0x88] sm:$0x3]  ;;  %v6919_v53 = vld [vmem:[#allocation3 + $0x80] sm:$0x1] }
 0x51a   : > { %v12458_v41 = vmax.f32 %v13006_v49, %v5999_v44  ;;  %v5857_v5 = vpop.permute.xlu1 %5856  ;;  %v6649_v60 = vrot.slane %v6126_v2, %v12987_v38  ;;  %v6653_v9 = vrot.slane %v6126_v2, %v12988_v15  ;;  %8209 = vmatprep.mubr.msk.f32.mxu0 %vm2556_vm3, %v6974_v10  ;;  %v7332_v45 = vsel %vm3932_vm14, %v7330_v17, %v7331_v39  ;;  %v7285_v17 = vld [vmem:[#allocation3 + $0x80] sm:$0x3] }
 0x51b   : > { %v6001_v6 = vsel %vm2556_vm3, %v5869_v57, %v5937_v51  ;;  %7130 = vmatmul.mubr.f32.gmra.mxu0 %v6971_v31  ;;  %v6645_v11 = vrot.slane %v12430_v29, %v12988_v15  ;;  %v6789_v28 = vsel %vm3327_vm6, %v6601_v40, %v6788_v56  ;;  %8225 = vmatprep.mubr.msk.f32.mxu1 %vm2556_vm3, %v7332_v45  ;;  %v5931_v33 = vrot.slane %v5857_v5, 2  ;;  %v6894_v31 = vld [vmem:[#allocation11 + $0x80] sm:$0xff] }
 0x51c   : > { %v5871_v48 = vpop.permute.xlu0 %5870  ;;  %v6657_v22 = vrot.slane %v12458_v41, %v12987_v38  ;;  %v6800_v59 = vsel %vm3343_vm5, %v6649_v60, %v6641_v37  ;;  %v7329_v8 = vsel %vm3932_vm14, %v7327_v16, %v7328_v12  ;;  %v6795_v52 = vsel %vm3327_vm6, %v6605_v0, %v6794_v13  ;;  %7226 = vmatprep.subr.mxu0 %v12876_v42 }
 0x51d   : > { %v6665_v62 = vrot.slane %v12455_v47, %v12987_v38  ;;  %v6669_v29 = vrot.slane %v12455_v47, %v12988_v15  ;;  %v6661_v21 = vrot.slane %v12458_v41, %v12988_v15  ;;  %7488 = vmatmul.mubr.f32.gmra.mxu1 %v7329_v8  ;;  %v6807_v4 = vsel %vm3343_vm5, %v6653_v9, %v6645_v11  ;;  %v13008_v41 = vld [vmem:[#allocation66_spill] sm:$0xff] }
 0x51e   : > { %v5859_v14 = vpop.permute.xlu1 %5858  ;;  %v12495_v20 = vmax.f32 %v13007_v1, %v6001_v6  ;;  %v6977_v54 = vrot.slane %v6920_v32, 1  ;;  %v6801_v57 = vsel %vm3325_vm4, %v6657_v22, %v6800_v59  ;;  %v6790_v18 = vsel %vm3329_vm7, %v6609_v19, %v6789_v28  ;;  %7227 = vmatpush2.msra.mxu0 %v6897_v24  ;;  %v13010_v32 = vld [vmem:[#allocation67_spill] sm:$0xff] }
 0x51f   : > { %v7335_v40 = vrot.slane %v7286_v25, 2  ;;  %v5938_v37 = vrot.slane %v5871_v48, 2  ;;  %v5995_v26 = vsel %vm2556_vm3, %v5857_v5, %v5931_v33  ;;  %v6975_v44 = vrot.slane %v6919_v53, 1  ;;  %7228 = vmatprep.subr.mxu0 %v12876_v42  ;;  %v6895_v5 = vld [vmem:[#allocation11 + $0x88] sm:$0xff] }
 0x520   : > { %v5873_v30 = vpop.permute.xlu0 %5872  ;;  %v6978_v2 = vsel %vm3573_vm13, %v6973_v63, %v6977_v54  ;;  %v7333_v43 = vrot.slane %v7285_v17, 2  ;;  %v6796_v49 = vsel %vm3329_vm7, %v6613_v36, %v6795_v52  ;;  %v6123_v51 = vmax.f32 %v13008_v41, %v5995_v26  ;;  %7229 = vmatpush2.msra.mxu0 %v6896_v50 }
 0x521   : > { %8210 = vmatprep.mubr.msk.f32.mxu0 %vm2556_vm3, %v6978_v2  ;;  %v7336_v19 = vsel %vm3932_vm14, %v7331_v39, %v7335_v40  ;;  %v5932_v56 = vrot.slane %v5859_v14, 2  ;;  %v6002_v63 = vsel %vm2556_vm3, %v5871_v48, %v5938_v37  ;;  %v6976_v60 = vsel %vm3573_vm13, %v6970_v27, %v6975_v44  ;;  %7230 = vmatprep.subr.mxu0 %v12876_v42  ;;  %v13009_v48 = vld [vmem:[#allocation68_spill] sm:$0xff] }
 0x522   : > { %v5877_v61 = vpop.permute.xlu1 %5876  ;;  %8226 = vmatprep.mubr.msk.f32.mxu1 %vm2556_vm3, %v7336_v19  ;;  %v7334_v34 = vsel %vm3932_vm14, %v7328_v12, %v7333_v43  ;;  %v5939_v36 = vrot.slane %v5873_v30, 2  ;;  %v6625_v10 = vrot.slane %v6123_v51, %v12987_v38  ;;  %v6629_v39 = vrot.slane %v6123_v51, %v12988_v15  ;;  %7135 = vmatmul.mubr.f32.gmra.mxu0 %v6976_v60 }
 0x523   : > { %7493 = vmatmul.mubr.f32.gmra.mxu1 %v7334_v34  ;;  %v5996_v13 = vsel %vm2556_vm3, %v5859_v14, %v5932_v56  ;;  %v5941_v9 = vrot.slane %v5877_v61, 2  ;;  %v6808_v16 = vsel %vm3325_vm4, %v6661_v21, %v6807_v4  ;;  %v6673_v27 = vrot.slane %v12495_v20, %v12987_v38  ;;  %7231 = vmatpush2.msra.mxu0 %v6895_v5  ;;  %v13011_v14 = vld [vmem:[#allocation69_spill] sm:$0xff]  ;;  %v13012_v21 = vld [vmem:[#allocation70_spill] sm:$0xff] }
 0x524   : > { %v6124_v12 = vmax.f32 %v13009_v48, %v5996_v13  ;;  %v6003_v0 = vsel %vm2556_vm3, %v5873_v30, %v5939_v36  ;;  %v5875_v22 = vpop.permute.xlu0 %5874  ;;  %v6677_v6 = vrot.slane %v12495_v20, %v12988_v15  ;;  %v6791_v45 = vsel %vm3331_vm8, %v6617_v58, %v6790_v18  ;;  %7232 = vmatprep.subr.mxu0 %v12876_v42  ;;  %v13013_v30 = vld [vmem:[#allocation71_spill] sm:$0xff] }
 0x525   : > { %v6130_v11 = vmax.f32 %v13010_v32, %v6002_v63  ;;  %v6005_v28 = vsel %vm2556_vm3, %v5877_v61, %v5941_v9  ;;  %v6797_v59 = vsel %vm3331_vm8, %v6621_v46, %v6796_v49  ;;  %v6131_v24 = vmax.f32 %v13011_v14, %v6003_v0  ;;  %7233 = vmatpush2.msra.mxu0 %v6894_v31  ;;  %v6862_v14 = vld [vmem:[#allocation3] sm:$0xff] }
 0x526   : > { %v6633_v8 = vrot.slane %v6124_v12, %v12987_v38  ;;  %v6637_v25 = vrot.slane %v6124_v12, %v12988_v15  ;;  %v6792_v58 = vsel %vm3333_vm9, %v6625_v10, %v6791_v45  ;;  %v6798_v52 = vsel %vm3333_vm9, %v6629_v39, %v6797_v59 }
 0x527   : > { %v6133_v53 = vmax.f32 %v13012_v21, %v6005_v28  ;;  %v5940_v17 = vrot.slane %v5875_v22, 2  ;;  %v6802_v42 = vsel %vm3327_vm6, %v6665_v62, %v6801_v57  ;;  %v6809_v3 = vsel %vm3327_vm6, %v6669_v29, %v6808_v16  ;;  %v6866_v21 = vld [vmem:[#allocation3 + $0x30] sm:$0xff] }
 0x528   : > { %v6793_v46 = vsel %vm3335_vm10, %v6633_v8, %v6792_v58  ;;  %v6799_v4 = vsel %vm3335_vm10, %v6637_v25, %v6798_v52  ;;  %v6681_v1 = vrot.slane %v6130_v11, %v12987_v38  ;;  %v6685_v20 = vrot.slane %v6130_v11, %v12988_v15  ;;  %v6863_v25 = vld [vmem:[#allocation3 + $0x8] sm:$0xff]  ;;  %v8406_v58 = vld [vmem:[#allocation3 + $0x10] sm:$0xff]  ;;  %v6867_v52 = vld [vmem:[#allocation3 + $0x38] sm:$0xff] }
 0x529   : > { %6856 = vst [vmem:[#allocation3 + $0x90] sm:$0xfe] %v6793_v46  ;;  %6857 = vst.msk [vmem:[#allocation3 + $0x98] sm:$0xfe] %vm3461_vm11, %v6799_v4  ;;  %v6705_v33 = vrot.slane %v6133_v53, %v12987_v38  ;;  %v6709_v62 = vrot.slane %v6133_v53, %v12988_v15  ;;  %v6689_v54 = vrot.slane %v6131_v24, %v12987_v38  ;;  %v6871_v53 = vld [vmem:[#allocation3 + $0x68] sm:$0xff] }
 0x52a   : > { %v6693_v47 = vrot.slane %v6131_v24, %v12988_v15  ;;  %v6004_v29 = vsel %vm2556_vm3, %v5875_v22, %v5940_v17  ;;  %v6803_v57 = vsel %vm3329_vm7, %v6673_v27, %v6802_v42  ;;  %v6810_v18 = vsel %vm3329_vm7, %v6677_v6, %v6809_v3  ;;  %v8405_v24 = vld [vmem:[#allocation3 + $0x18] sm:$0xff]  ;;  %v6870_v17 = vld [vmem:[#allocation3 + $0x60] sm:$0xff] }
 0x52b   : > { %6860 = vst [vmem:[#allocation3 + $0xb0] sm:$0x1] %v6705_v33  ;;  %6861 = vst.msk [vmem:[#allocation3 + $0xb8] sm:$0x1] %vm3466_vm12, %v6709_v62  ;;  %v6132_v50 = vmax.f32 %v13013_v30, %v6004_v29  ;;  %v6804_v40 = vsel %vm3331_vm8, %v6681_v1, %v6803_v57  ;;  %v6811_v37 = vsel %vm3331_vm8, %v6685_v20, %v6810_v18 }
 0x52c   : > { %v6805_v44 = vsel %vm3333_vm9, %v6689_v54, %v6804_v40  ;;  %v6812_v43 = vsel %vm3333_vm9, %v6693_v47, %v6811_v37 }
 0x52d   : > { %v6697_v26 = vrot.slane %v6132_v50, %v12987_v38  ;;  %v6701_v2 = vrot.slane %v6132_v50, %v12988_v15 }
 0x52f   : > { %v12578_v61 = vsel %vm3335_vm10, %v6697_v26, %v6805_v44  ;;  %v6813_v49 = vsel %vm3335_vm10, %v6701_v2, %v6812_v43 }
 0x530   : > { %6859 = vst.msk [vmem:[#allocation3 + $0xa8] sm:$0xff] %vm2556_vm3, %v6813_v49  ;;  %v6922_v41 = vld [vmem:[#allocation3 + $0x98] sm:$0xfe]  ;;  %v6921_v19 = vld [vmem:[#allocation3 + $0x90] sm:$0xfe]  ;;  %v6980_v31 = vrot.slane %v12578_v61, 1 }
 0x531   : > { %v7288_v51 = vld [vmem:[#allocation3 + $0x98] sm:$0xfc]  ;;  %v7287_v56 = vld [vmem:[#allocation3 + $0x90] sm:$0xfc]  ;;  %v6982_v5 = vrot.slane %v6922_v41, 1  ;;  %v6979_v38 = vrot.slane %v6921_v19, 1 }
 0x532   : > { %v7340_v63 = vrot.slane %v7288_v51, 2  ;;  %v7337_v15 = vrot.slane %v7287_v56, 2  ;;  %v6924_v34 = vld [vmem:[#allocation3 + $0xb8] sm:$0x1]  ;;  %v6923_v13 = vld [vmem:[#allocation3 + $0xb0] sm:$0x1] }
 0x533   : > { %v7290_v36 = vld [vmem:[#allocation3 + $0xb8] sm:$0x3]  ;;  %v7289_v9 = vld [vmem:[#allocation3 + $0xb0] sm:$0x3]  ;;  %v7338_v16 = vrot.slane %v12578_v61, 2  ;;  %v6987_v12 = vrot.slane %v6924_v34, 1  ;;  %v6981_v22 = vsel %vm3573_vm13, %v6979_v38, %v6980_v31 }
 0x534   : > { %v7345_v0 = vrot.slane %v7290_v36, 2  ;;  %v6985_v45 = vrot.slane %v6923_v13, 1  ;;  %v7343_v32 = vrot.slane %v7289_v9, 2  ;;  %v6875_v42 = vld [vmem:[#allocation3 + $0x98] sm:$0xff]  ;;  %v6874_v3 = vld [vmem:[#allocation3 + $0x90] sm:$0xff] }
 0x535   : > { %v7339_v6 = vsel %vm3932_vm14, %v7337_v15, %v7338_v16  ;;  %v13015_v15 = vld [vmem:[#allocation39_spill] sm:$0xff] }
 0x536   : > { %v6986_v59 = vsel %vm3573_vm13, %v6980_v31, %v6985_v45  ;;  %v7344_v8 = vsel %vm3932_vm14, %v7338_v16, %v7343_v32  ;;  %v13016_v36 = vld [vmem:[#allocation31_spill] sm:$0xff] }
 0x537   : > { %v6877_v60 = vld [vmem:[#allocation3 + $0xa8] sm:$0xff] }
 0x538   : > { %v6983_v10 = vrot.slane %v6877_v60, 1  ;;  %v7341_v39 = vrot.slane %v6877_v60, 2 }
 0x53a   : > { %v6984_v27 = vsel %vm3573_vm13, %v6982_v5, %v6983_v10  ;;  %v7342_v48 = vsel %vm3932_vm14, %v7340_v63, %v7341_v39  ;;  %v6988_v11 = vsel %vm3573_vm13, %v6983_v10, %v6987_v12  ;;  %v7346_v28 = vsel %vm3932_vm14, %v7341_v39, %v7345_v0  ;;  %v13017_v10 = vld [vmem:[#allocation42_spill] sm:$0xff]  ;;  %v13019_v12 = vld [vmem:[#allocation33_spill] sm:$0xff] }
 0x53b   : > { %8211 = vmatprep.mubr.msk.f32.mxu0 %vm2556_vm3, %v6984_v27  ;;  %8227 = vmatprep.mubr.msk.f32.mxu1 %vm2556_vm3, %v7342_v48  ;;  %v3867_v39 = vadd.f32 %v13017_v10, %v13016_v36  ;;  %v13018_v27 = vld [vmem:[#allocation30_spill] sm:$0xff] }
 0x53c   : > { %7140 = vmatmul.mubr.f32.gmra.mxu0 %v6981_v22  ;;  %7498 = vmatmul.mubr.f32.gmra.mxu1 %v7339_v6  ;;  %v8229_v22 = vld [vmem:[#allocation12] ss:$0 sm:$0xff] }
 0x53d   : > { %8212 = vmatprep.mubr.msk.f32.mxu0 %vm2556_vm3, %v6988_v11  ;;  %8228 = vmatprep.mubr.msk.f32.mxu1 %vm2556_vm3, %v7346_v28  ;;  %v4135_v0 = vadd.f32 %v13019_v12, %v3867_v39  ;;  %v13026_v39 = vld [vmem:[#allocation43_spill] sm:$0xff] }
 0x540   : > { %7145 = vmatmul.mubr.f32.gmra.mxu0 %v6986_v59  ;;  %7503 = vmatmul.mubr.f32.gmra.mxu1 %v7344_v8  ;;  %v8407_v59 = vld [vmem:[#allocation18] ss:$0 sm:$0xff] }
 0x541   : > { %8213 = vmatprep.mubr.msk.f32.mxu0 %vm2556_vm3, %v6863_v25  ;;  %v4150_v25 = vadd.f32 %v8407_v59, %v4135_v0 }
 0x544   : > { %7235 = vmatmul.mubr.f32.vlgmr.msra.gmra.mxu0 %v6862_v14 }
 0x545   : > { %8214 = vmatprep.mubr.msk.f32.mxu0 %vm2556_vm3, %v8405_v24  ;;  %v13020_v24 = vld [vmem:[#allocation34_spill] sm:$0xff] }
 0x548   : > { %7240 = vmatmul.mubr.f32.gmra.mxu0 %v8406_v58  ;;  %v13021_v58 = vld [vmem:[#allocation41_spill] sm:$0xff] }
 0x549   : > { %8215 = vmatprep.mubr.msk.f32.mxu0 %vm2556_vm3, %v6867_v52  ;;  %v3872_v52 = vadd.f32 %v13021_v58, %v13020_v24 }
 0x54c   : > { %7245 = vmatmul.mubr.f32.gmra.mxu0 %v6866_v21  ;;  %v13022_v21 = vld [vmem:[#allocation37_spill] sm:$0xff] }
 0x54d   : > { %8216 = vmatprep.mubr.msk.f32.mxu0 %vm2556_vm3, %v12281_v35 }
 0x550   : > { %7250 = vmatmul.mubr.f32.gmra.mxu0 %v12218_v7 }
 0x551   : > { %8217 = vmatprep.mubr.msk.f32.mxu0 %vm2556_vm3, %v6871_v53  ;;  %v13023_v53 = vld [vmem:[#allocation44_spill] sm:$0xff] }
 0x554   : > { %7255 = vmatmul.mubr.f32.gmra.mxu0 %v6870_v17  ;;  %v3877_v17 = vadd.f32 %v13023_v53, %v13022_v21 }
 0x555   : > { %8218 = vmatprep.mubr.msk.f32.mxu0 %vm2556_vm3, %v12441_v55 }
 0x558   : > { %7260 = vmatmul.mubr.f32.gmra.mxu0 %v12395_v23 }
 0x559   : > { %8219 = vmatprep.mubr.msk.f32.mxu0 %vm2556_vm3, %v6875_v42 }
 0x55c   : > { %7265 = vmatmul.mubr.f32.gmra.mxu0 %v6874_v3 }
 0x55d   : > { %8220 = vmatprep.mubr.msk.f32.mxu0 %vm2556_vm3, %v6877_v60  ;;  %v13014_v60 = vld [vmem:[#allocation29_spill] sm:$0xff] }
 0x55e   : > { %v3862_v34 = vadd.f32 %v13015_v15, %v13014_v60 }
 0x560   : > { %7270 = vmatmul.mubr.f32.gmra.mxu0 %v12578_v61  ;;  %v4134_v48 = vadd.f32 %v13018_v27, %v3862_v34  ;;  %v13027_v27 = vld [vmem:[#allocation45_spill] sm:$0xff] }
 0x562   : > { %v4149_v8 = vadd.f32 %v8407_v59, %v4134_v48 }
 0x59c   : > { %v7111_v7 = vpop.f32.mrf.mxu0 }
 0x59e   : > { %v7113_v35 = vpop.f32.mrf.mxu0 }
 0x59f   : > { %v7469_v46 = vpop.f32.mrf.mxu1 }
 0x5a1   : > { %v7471_v4 = vpop.f32.mrf.mxu1 }
 0x5a2   : > { %v7116_v1 = vpop.f32.mrf.mxu0 }
 0x5a3   : > { %v7474_v20 = vpop.f32.mrf.mxu1 }
 0x5a4   : > { %v7118_v33 = vpop.f32.mrf.mxu0 }
 0x5a5   : > { %v7476_v62 = vpop.f32.mrf.mxu1  ;;  %v13024_v33 = vld [vmem:[#allocation36_spill] sm:$0xff] }
 0x5a6   : > { %v4136_v62 = vadd.f32 %v13024_v33, %v3872_v52 }
 0x5c0   : > { %v7121_v55 = vpop.f32.mrf.mxu0  ;;  %v7479_v54 = vpop.f32.mrf.mxu1 }
 0x5c2   : > { %v7123_v23 = vpop.f32.mrf.mxu0  ;;  %v7481_v47 = vpop.f32.mrf.mxu1 }
 0x5c4   : > { %v7126_v29 = vpop.f32.mrf.mxu0 }
 0x5c5   : > { %v7484_v30 = vpop.f32.mrf.mxu1 }
 0x5c6   : > { %v7128_v50 = vpop.f32.mrf.mxu0 }
 0x5c7   : > { %v7486_v57 = vpop.f32.mrf.mxu1 }
 0x5db   : > { %v7131_v18 = vpop.f32.mrf.mxu0 }
 0x5dd   : > { %v7489_v40 = vpop.f32.mrf.mxu1  ;;  %v7133_v37 = vpop.f32.mrf.mxu0 }
 0x5df   : > { %v7491_v26 = vpop.f32.mrf.mxu1 }
 0x5e2   : > { %v7136_v2 = vpop.f32.mrf.mxu0 }
 0x5e3   : > { %v7494_v44 = vpop.f32.mrf.mxu1 }
 0x5e4   : > { %v7138_v43 = vpop.f32.mrf.mxu0 }
 0x5e5   : > { %v7496_v61 = vpop.f32.mrf.mxu1 }
 0x5e6   : > { %v4151_v61 = vadd.f32 %v8407_v59, %v4136_v62 }
 0x5fc   : > { %v7141_v49 = vpop.f32.mrf.mxu0  ;;  %v12609_v41 = vpop.f32.mrf.mxu1 }
 0x5fe   : > { %v7143_v51 = vpop.f32.mrf.mxu0  ;;  %v7501_v19 = vpop.f32.mrf.mxu1 }
 0x600   : > { %v12611_v56 = vpop.f32.mrf.mxu0  ;;  %v12613_v5 = vpop.f32.mrf.mxu1 }
 0x602   : > { %v7148_v63 = vpop.f32.mrf.mxu0  ;;  %v7506_v38 = vpop.f32.mrf.mxu1 }
 0x604   : > { %v7236_v13 = vpop.f32.mrf.mxu0 }
 0x605   : > { %v7237_v9 = vadd.f32 %v7236_v13, %v7111_v7 }
 0x606   : > { %v7238_v31 = vpop.f32.mrf.mxu0 }
 0x607   : > { %v7508_v16 = vadd.f32 %v7469_v46, %v7237_v9 }
 0x608   : > { %v7241_v6 = vpop.f32.mrf.mxu0 }
 0x609   : > { %v7242_v45 = vadd.f32 %v7241_v6, %v7116_v1  ;;  %v7523_v11 = vadd.f32 %v8229_v22, %v7508_v16 }
 0x60a   : > { %v7243_v32 = vpop.f32.mrf.mxu0 }
 0x60b   : > { %v7509_v28 = vadd.f32 %v7474_v20, %v7242_v45  ;;  %v7531_v46 = vadd.f32 %v7523_v11, %v4149_v8  ;;  %v13025_v20 = vld [vmem:[#allocation40_spill] sm:$0xff]  ;;  %v13028_v45 = vld [vmem:[#allocation46_spill] sm:$0xff] }
 0x60c   : > { %v7246_v14 = vpop.f32.mrf.mxu0  ;;  %v4137_v23 = vadd.f32 %v13025_v20, %v3877_v17 }
 0x60d   : > { %v7524_v42 = vadd.f32 %v8229_v22, %v7509_v28  ;;  %v7247_v3 = vadd.f32 %v7246_v14, %v7121_v55  ;;  %v13029_v28 = vld [vmem:[#allocation48_spill] sm:$0xff] }
 0x60e   : > { %v7248_v7 = vpop.f32.mrf.mxu0  ;;  %v4152_v51 = vadd.f32 %v8407_v59, %v4137_v23 }
 0x60f   : > { %v7510_v35 = vadd.f32 %v7479_v54, %v7247_v3  ;;  %v7532_v4 = vadd.f32 %v7524_v42, %v4150_v25 }
 0x610   : > { %v7251_v1 = vpop.f32.mrf.mxu0 }
 0x611   : > { %v7252_v47 = vadd.f32 %v7251_v1, %v7126_v29  ;;  %v7539_v50 = vadd.f32 %v7532_v4, %v7531_v46  ;;  %v7525_v37 = vadd.f32 %v8229_v22, %v7510_v35 }
 0x612   : > { %v7253_v57 = vpop.f32.mrf.mxu0 }
 0x613   : > { %v7511_v26 = vadd.f32 %v7484_v30, %v7252_v47  ;;  %7540 = vadd.xlane.f32.xlu0 %v7539_v50  ;;  %v12627_v38 = vadd.f32 %v7525_v37, %v4151_v61 }
 0x614   : > { %v7256_v43 = vpop.f32.mrf.mxu0 }
 0x615   : > { %v7526_v19 = vadd.f32 %v8229_v22, %v7511_v26  ;;  %v7257_v55 = vadd.f32 %v7256_v43, %v7131_v18 }
 0x616   : > { %v7258_v63 = vpop.f32.mrf.mxu0 }
 0x617   : > { %v7512_v54 = vadd.f32 %v7489_v40, %v7257_v55  ;;  %v12629_v60 = vadd.f32 %v7526_v19, %v4152_v51 }
 0x618   : > { %v7261_v15 = vpop.f32.mrf.mxu0 }
 0x619   : > { %v7527_v34 = vadd.f32 %v8229_v22, %v7512_v54  ;;  %v7262_v36 = vadd.f32 %v7261_v15, %v7136_v2  ;;  %v7584_v29 = vadd.f32 %v12629_v60, %v12627_v38 }
 0x61a   : > { %v7263_v10 = vpop.f32.mrf.mxu0 }
 0x61b   : > { %v7513_v30 = vadd.f32 %v7494_v44, %v7262_v36  ;;  %7585 = vadd.xlane.f32.xlu0 %v7584_v29  ;;  %v12634_v13 = vadd.f32 %v7527_v34, %v13026_v39  ;;  %v12657_v10 = vld [vmem:[%s12759_s10] sm:$0xff] }
 0x61c   : > { %v7266_v9 = vpop.f32.mrf.mxu0 }
 0x61d   : > { %v7528_v18 = vadd.f32 %v8229_v22, %v7513_v30  ;;  %v7267_v31 = vadd.f32 %v7266_v9, %v7141_v49  ;;  %v12662_v30 = vld [vmem:[%s12759_s10 + $0x8] sm:$0xff]  ;;  %v12664_v9 = vld [vmem:[#allocation20] sm:$0xff] }
 0x61e   : > { %v7268_v40 = vpop.f32.mrf.mxu0 }
 0x61f   : > { %v7514_v16 = vadd.f32 %v12609_v41, %v7267_v31  ;;  %v12638_v48 = vadd.f32 %v7528_v18, %v13027_v27 }
 0x620   : > { %v7271_v12 = vpop.f32.mrf.mxu0 }
 0x621   : > { %v7529_v2 = vadd.f32 %v8229_v22, %v7514_v16  ;;  %v7272_v0 = vadd.f32 %v7271_v12, %v12611_v56 }
 0x622   : > { %v7273_v6 = vpop.f32.mrf.mxu0 }
 0x623   : > { %v7515_v44 = vadd.f32 %v12613_v5, %v7272_v0  ;;  %v12643_v32 = vadd.f32 %v7529_v2, %v13028_v45 }
 0x625   : > { %v7530_v11 = vadd.f32 %v8229_v22, %v7515_v44  ;;  %v7629_v22 = vadd.f32 %v12638_v48, %v12634_v13 }
 0x627   : > { %v12646_v59 = vadd.f32 %v7530_v11, %v13029_v28 }
 0x629   : > { %v7674_v3 = vadd.f32 %v12646_v59, %v12643_v32 }
 0x69c   : > { %v7541_v49 = vpop.xlane.xlu0 %7540 }
 0x69d   : > { %v7542_v8 = vrot.slane %v7541_v49, 4 }
 0x69f   : > { %v7543_v41 = vadd.f32 %v7542_v8, %v7541_v49 }
 0x6a1   : > { %v7544_v25 = vrot.slane %v7543_v41, 2 }
 0x6a3   : > { %v7545_v14 = vadd.f32 %v7544_v25, %v7543_v41 }
 0x6a4   : > { %v7586_v7 = vpop.xlane.xlu0 %7585 }
 0x6a5   : > { %v7546_v24 = vrot.slane %v7545_v14, 1  ;;  %v7587_v35 = vrot.slane %v7586_v7, 4 }
 0x6a7   : > { %v7547_v58 = vadd.f32 %v7546_v24, %v7545_v14  ;;  %v7588_v1 = vadd.f32 %v7587_v35, %v7586_v7 }
 0x6a9   : > { %8243 = vpush %v7547_v58  ;;  %v7589_v33 = vrot.slane %v7588_v1, 2 }
 0x6da   : > { %s8244_s14 = spop %8243 }
 0x6db   : > { %v7549_v56 = vstv %s8244_s14 }
 0x6dc   : > { %v7551_v52 = vmul.f32 0.00048828125, %v7549_v56 }
 0x6de   : > { %v7552_v21 = vsub.f32 %v7531_v46, %v7551_v52  ;;  %v7553_v5 = vsub.f32 %v7532_v4, %v7551_v52  ;;  %v7590_v4 = vadd.f32 %v7589_v33, %v7588_v1 }
 0x6e0   : > { %v7554_v53 = vmul.f32 %v7552_v21, %v7552_v21  ;;  %v7555_v17 = vmul.f32 %v7553_v5, %v7553_v5  ;;  %v7591_v50 = vrot.slane %v7590_v4, 1 }
 0x6e2   : > { %v7556_v42 = vadd.f32 %v7555_v17, %v7554_v53  ;;  %v7592_v26 = vadd.f32 %v7591_v50, %v7590_v4 }
 0x6e4   : > { %7557 = vadd.xlane.f32.xlu1 %v7556_v42 }
 0x6e8   : > { %7630 = vadd.xlane.f32.xlu1 %v7629_v22 }
 0x6ec   : > { %7675 = vadd.xlane.f32.xlu1 %v7674_v3 }
 0x76d   : > { %v7558_v62 = vpop.xlane.xlu1 %7557 }
 0x76e   : > { %v7559_v20 = vrot.slane %v7558_v62, 4 }
 0x770   : > { %v7560_v46 = vadd.f32 %v7559_v20, %v7558_v62 }
 0x771   : > { %v7631_v2 = vpop.xlane.xlu1 %7630 }
 0x772   : > { %v7561_v23 = vrot.slane %v7560_v46, 2  ;;  %v7632_v0 = vrot.slane %v7631_v2, 4 }
 0x774   : > { %v7562_v47 = vadd.f32 %v7561_v23, %v7560_v46  ;;  %v7633_v6 = vadd.f32 %v7632_v0, %v7631_v2 }
 0x776   : > { %v7563_v57 = vrot.slane %v7562_v47, 1  ;;  %v7634_v44 = vrot.slane %v7633_v6, 2 }
 0x778   : > { %v7564_v37 = vadd.f32 %v7563_v57, %v7562_v47  ;;  %v7635_v49 = vadd.f32 %v7634_v44, %v7633_v6 }
 0x77a   : > { %8245 = vpush %v7564_v37  ;;  %v7636_v25 = vrot.slane %v7635_v49, 1 }
 0x77b   : > { %8247 = vpush %v7592_v26 }
 0x77c   : > { %v7637_v58 = vadd.f32 %v7636_v25, %v7635_v49 }
 0x7ab   : > { %s8246_s28 = spop %8245 }
 0x7ac   : > { %v7566_v43 = vstv %s8246_s28  ;;  %s8248_s4 = spop %8247 }
 0x7ad   : > { %v7567_v61 = vmul.f32 0.00048828125, %v7566_v43  ;;  %v7594_v51 = vstv %s8248_s4  ;;  %s12702_s4 = scalar_lea.hbm %s12761_s12, %s8242_s13 }
 0x7ae   : > { %v7595_v19 = vmul.f32 0.00048828125, %v7594_v51 }
 0x7af   : > { %v7568_v55 = vadd.f32 1e-05, %v7567_v61 }
 0x7b0   : > { %v7596_v63 = vsub.f32 %v12627_v38, %v7595_v19  ;;  %v7597_v54 = vsub.f32 %v12629_v60, %v7595_v19  ;;  %v12666_v60 = vld [vmem:[#allocation20 + $0x8] sm:$0xff] }
 0x7b1   : > { %8396 = vrsqrt.f32 %v7568_v55 }
 0x7b2   : > { %v7598_v15 = vmul.f32 %v7596_v63, %v7596_v63  ;;  %v7599_v34 = vmul.f32 %v7597_v54, %v7597_v54 }
 0x7b4   : > { %v7600_v36 = vadd.f32 %v7599_v34, %v7598_v15 }
 0x7b6   : > { %7601 = vadd.xlane.f32.xlu0 %v7600_v36 }
 0x7be   : > { %v8397_v29 = vpop.eup %8396 }
 0x7bf   : > { %v7570_v39 = vmul.f32 %v8397_v29, %v7552_v21  ;;  %v7571_v38 = vmul.f32 %v8397_v29, %v7553_v5 }
 0x7c1   : > { %v7574_v18 = vmul.f32 %v12657_v10, %v7570_v39  ;;  %v7575_v31 = vmul.f32 %v12662_v30, %v7571_v38 }
 0x7c3   : > { %v7578_v40 = vadd.f32 %v12664_v9, %v7574_v18  ;;  %v7579_v16 = vadd.f32 %v12666_v60, %v7575_v31 }
 0x7c5   : > { %v7580_v27 = vmax.f32 %v7578_v40, 0.0  ;;  %v7581_v12 = vmax.f32 %v7579_v16, 0.0 }
 0x7c7   : > { %7582 = vst [vmem:[%s12673_s22] sm:$0xff] %v7580_v27  ;;  %7583 = vst [vmem:[%s12673_s22 + $0x8] sm:$0xff] %v7581_v12 }
 0x83f   : > { %v7602_v45 = vpop.xlane.xlu0 %7601 }
 0x840   : > { %v7603_v11 = vrot.slane %v7602_v45, 4 }
 0x842   : > { %v7604_v28 = vadd.f32 %v7603_v11, %v7602_v45 }
 0x844   : > { %v7605_v8 = vrot.slane %v7604_v28, 2 }
 0x846   : > { %v7606_v41 = vadd.f32 %v7605_v8, %v7604_v28 }
 0x848   : > { %v7607_v14 = vrot.slane %v7606_v41, 1 }
 0x84a   : > { %v7608_v24 = vadd.f32 %v7607_v14, %v7606_v41 }
 0x84c   : > { %8249 = vpush %v7608_v24 }
 0x84d   : > { %8251 = vpush %v7637_v58 }
 0x87d   : > { %s8250_s6 = spop %8249 }
 0x87e   : > { %v7610_v56 = vstv %s8250_s6  ;;  %s8252_s19 = spop %8251 }
 0x87f   : > { %v7611_v52 = vmul.f32 0.00048828125, %v7610_v56  ;;  %v7639_v21 = vstv %s8252_s19 }
 0x880   : > { %v7640_v5 = vmul.f32 0.00048828125, %v7639_v21 }
 0x881   : > { %v7612_v53 = vadd.f32 1e-05, %v7611_v52 }
 0x882   : > { %v7641_v17 = vsub.f32 %v12634_v13, %v7640_v5  ;;  %v7642_v42 = vsub.f32 %v12638_v48, %v7640_v5  ;;  %v7676_v48 = vpop.xlane.xlu1 %7675 }
 0x883   : > { %8398 = vrsqrt.f32 %v7612_v53  ;;  %v7677_v47 = vrot.slane %v7676_v48, 4 }
 0x884   : > { %v7643_v22 = vmul.f32 %v7641_v17, %v7641_v17  ;;  %v7644_v3 = vmul.f32 %v7642_v42, %v7642_v42 }
 0x885   : > { %v7678_v50 = vadd.f32 %v7677_v47, %v7676_v48 }
 0x886   : > { %v7645_v7 = vadd.f32 %v7644_v3, %v7643_v22 }
 0x887   : > { %v7679_v57 = vrot.slane %v7678_v50, 2 }
 0x888   : > { %7646 = vadd.xlane.f32.xlu0 %v7645_v7 }
 0x889   : > { %v7680_v61 = vadd.f32 %v7679_v57, %v7678_v50 }
 0x88b   : > { %v7681_v55 = vrot.slane %v7680_v61, 1 }
 0x88d   : > { %v7682_v15 = vadd.f32 %v7681_v55, %v7680_v61 }
 0x890   : > { %v8399_v35 = vpop.eup %8398 }
 0x891   : > { %v7614_v1 = vmul.f32 %v8399_v35, %v7596_v63  ;;  %v7615_v33 = vmul.f32 %v8399_v35, %v7597_v54 }
 0x893   : > { %v7618_v62 = vmul.f32 %v7614_v1, %v12657_v10  ;;  %v7619_v20 = vmul.f32 %v7615_v33, %v12662_v30 }
 0x895   : > { %v7622_v46 = vadd.f32 %v7618_v62, %v12664_v9  ;;  %v7623_v13 = vadd.f32 %v7619_v20, %v12666_v60 }
 0x897   : > { %v7624_v4 = vmax.f32 %v7622_v46, 0.0  ;;  %v7625_v23 = vmax.f32 %v7623_v13, 0.0 }
 0x899   : > { %8230 = vst [vmem:[%s12673_s22 + $0x10] sm:$0xff] %v7624_v4  ;;  %8231 = vst [vmem:[%s12673_s22 + $0x18] sm:$0xff] %v7625_v23 }
 0x911   : > { %v7647_v37 = vpop.xlane.xlu0 %7646 }
 0x912   : > { %v7648_v26 = vrot.slane %v7647_v37, 4 }
 0x914   : > { %v7649_v43 = vadd.f32 %v7648_v26, %v7647_v37 }
 0x916   : > { %v7650_v51 = vrot.slane %v7649_v43, 2 }
 0x918   : > { %v7651_v19 = vadd.f32 %v7650_v51, %v7649_v43 }
 0x91a   : > { %v7652_v63 = vrot.slane %v7651_v19, 1 }
 0x91c   : > { %v7653_v54 = vadd.f32 %v7652_v63, %v7651_v19 }
 0x91e   : > { %8253 = vpush %v7653_v54 }
 0x91f   : > { %8255 = vpush %v7682_v15 }
 0x94f   : > { %s8254_s7 = spop %8253 }
 0x950   : > { %v7655_v34 = vstv %s8254_s7  ;;  %s8256_s2 = spop %8255 }
 0x951   : > { %v7656_v36 = vmul.f32 0.00048828125, %v7655_v34  ;;  %v7684_v29 = vstv %s8256_s2 }
 0x952   : > { %v7685_v39 = vmul.f32 0.00048828125, %v7684_v29 }
 0x953   : > { %v7657_v38 = vadd.f32 1e-05, %v7656_v36 }
 0x954   : > { %v7686_v18 = vsub.f32 %v12643_v32, %v7685_v39  ;;  %v7687_v31 = vsub.f32 %v12646_v59, %v7685_v39 }
 0x955   : > { %8400 = vrsqrt.f32 %v7657_v38 }
 0x956   : > { %v7688_v40 = vmul.f32 %v7686_v18, %v7686_v18  ;;  %v7689_v16 = vmul.f32 %v7687_v31, %v7687_v31 }
 0x958   : > { %v7690_v27 = vadd.f32 %v7689_v16, %v7688_v40 }
 0x95a   : > { %7691 = vadd.xlane.f32.xlu0 %v7690_v27 }
 0x962   : > { %v8401_v12 = vpop.eup %8400 }
 0x963   : > { %v7659_v2 = vmul.f32 %v8401_v12, %v7641_v17  ;;  %v7660_v0 = vmul.f32 %v8401_v12, %v7642_v42 }
 0x965   : > { %v7663_v6 = vmul.f32 %v7659_v2, %v12657_v10  ;;  %v7664_v44 = vmul.f32 %v7660_v0, %v12662_v30 }
 0x967   : > { %v7667_v45 = vadd.f32 %v7663_v6, %v12664_v9  ;;  %v7668_v32 = vadd.f32 %v7664_v44, %v12666_v60 }
 0x969   : > { %v7669_v11 = vmax.f32 %v7667_v45, 0.0  ;;  %v7670_v28 = vmax.f32 %v7668_v32, 0.0 }
 0x96b   : > { %8232 = vst [vmem:[%s12673_s22 + $0x20] sm:$0xff] %v7669_v11  ;;  %8233 = vst [vmem:[%s12673_s22 + $0x28] sm:$0xff] %v7670_v28 }
 0x9e3   : > { %v7692_v59 = vpop.xlane.xlu0 %7691 }
 0x9e4   : > { %v7693_v49 = vrot.slane %v7692_v59, 4 }
 0x9e6   : > { %v7694_v8 = vadd.f32 %v7693_v49, %v7692_v59 }
 0x9e8   : > { %v7695_v41 = vrot.slane %v7694_v8, 2 }
 0x9ea   : > { %v7696_v25 = vadd.f32 %v7695_v41, %v7694_v8 }
 0x9ec   : > { %v7697_v14 = vrot.slane %v7696_v25, 1 }
 0x9ee   : > { %v7698_v24 = vadd.f32 %v7697_v14, %v7696_v25 }
 0x9f0   : > { %8257 = vpush %v7698_v24 }
 0xa21   : > { %s8258_s5 = spop %8257 }
 0xa22   : > { %v7700_v58 = vstv %s8258_s5 }
 0xa23   : > { %v7701_v56 = vmul.f32 0.00048828125, %v7700_v58 }
 0xa25   : > { %v7702_v52 = vadd.f32 1e-05, %v7701_v56 }
 0xa27   : > { %8402 = vrsqrt.f32 %v7702_v52 }
 0xa34   : > { %v8403_v21 = vpop.eup %8402 }
 0xa35   : > { %v7704_v5 = vmul.f32 %v8403_v21, %v7686_v18  ;;  %v7705_v53 = vmul.f32 %v8403_v21, %v7687_v31 }
 0xa37   : > { %v7708_v17 = vmul.f32 %v7704_v5, %v12657_v10  ;;  %v7709_v42 = vmul.f32 %v7705_v53, %v12662_v30 }
 0xa39   : > { %v7712_v22 = vadd.f32 %v7708_v17, %v12664_v9  ;;  %v7713_v3 = vadd.f32 %v7709_v42, %v12666_v60 }
 0xa3b   : > { %v7714_v7 = vmax.f32 %v7712_v22, 0.0  ;;  %v7715_v10 = vmax.f32 %v7713_v3, 0.0 }
 0xa3d   : > { %8234 = vst [vmem:[%s12673_s22 + $0x30] sm:$0xff] %v7714_v7  ;;  %8235 = vst [vmem:[%s12673_s22 + $0x38] sm:$0xff] %v7715_v10 }
 0xa3e   : > { %8665 = shalt.err (!%p8662_p5)
}
 0xa3f   : > { %s8666_s15 = scalar_lea.hbm %s12702_s4, 1024  ;;  %s8670_s19 = scalar_lea.hbm %s12761_s12, 2048 }
 0xa40   : > { %p8667_p9 = scmp.ne.s32.totalorder %s12702_s4, %s8666_s15  ;;  %p8671_p1 = scmp.lt.s32.totalorder %s12702_s4, %s12761_s12 }
 0xa41   : > { %p8672_p3 = scmp.lt.s32.totalorder %s8670_s19, %s8666_s15 }
 0xa42   : > { %p8668_p11 = pnand %p8667_p9, %p13030_p0 }
 0xa43   : > { %p8673_p4 = por %p8672_p3, %p8671_p1 }
 0xa44   : > { %p8669_p12 = pneg %p8668_p11 }
 0xa46   : > { %p8674_p13 = pnand %p8673_p4, %p8669_p12 }
 0xa48   : > { %8677 = shalt.err (!%p8674_p13)
}
 0xa49   : > { %s8754_s5 = smov 128   ;;  %s8755_s13 = smov 8  }
 0xa4a   : > { %8293 = dma.vmem_to_hbm [thread:$0]  (%p13030_p0), %s12704_s17, 1024, %s12702_s4, %s7720_s29, %s8754_s5, %s8754_s5, %s8755_s13  }
 0xa4b PF: > { %s7748_s14 = sand.u32 1, %s8722_s24   ;;  %p13031_p8 = scmp.ne.s32.totalorder %s12852_s16, 0 }
 0xa4c   : > { %p13032_p10 = scmp.ge.s32.totalorder %s8734_s27, 2  ;;  %s7749_s28 = scalar_lea.sflag [#allocation8], %s7748_s14 }
 0xa4e   : > { %p8325_p7 = pnand %p13032_p10, %p13031_p8 }
 0xa50   : > { %p8326_p6 = pneg %p8325_p7 }
 0xa52   : > { %8717 = dma.done.wait (%p8326_p6), %s7749_s28, 1024  }
 0xa53   : > { %8719 = vsyncadd (%p8326_p6), %s7749_s28, 4294966272  ;;  %p33_p2 = scmp.ge.s32.totalorder %s8949_s18, 4   ;;  %s13033_s24 = smov %s8726_s25 }
 0xa54   : > { %s13034_s25 = smov %s8730_s26  ;;  %s13035_s26 = smov %s8960_s20 }
 0xa55   : > { %s13036_s27 = smov %s8949_s18  ;;  %35 = sbr.rel (!%p33_p2) target bundleno = 21 (0x15), region = 165 }
 0xa5a   :  { %7754 = vsyncpa [#allocation7], 1 }
 0xa5b   :  { %7756 = vsyncpa [#allocation7 + $0x1], 1 }
 0xa5c   :  { %7757 = vsyncpa [#allocation10], 1 }
 0xa5d   :  { %7758 = vsyncpa [#allocation13], 1 }
 0xa5e   :  { %7759 = vsyncpa [#allocation16], 1 }
 0xa5f   :  { %7760 = vsyncpa [#allocation19], 1 }
 0xa60   :  { %7761 = vsyncpa [#allocation8], 1 }
 0xa61   :  { %7763 = vsyncpa [#allocation8 + $0x1], 1 }

</bundles_post_ra>
